<compile_context>
chip_gen: v7x
topology: tpu7x:2x2x1
jax: 0.10.0
libtpu: 0.0.40
codegen_flags: <defaults>
</compile_context>

<pallas_src>
import functools

import numpy as np
import jax
import jax.numpy as jnp
from jax import lax
from jax.experimental import pallas as pl
from jax.experimental.pallas import tpu as pltpu


def _intercam_kernel(x_ref, proxy_ref, pids_ref, cids_ref, tgt_ref, cam_ref,
                     out_ref, *, inv_temp, num_hards, n_samples, matmul_dtype):
    # x_ref  : (TILE_B, D)  activations tile, natural layout
    # proxy  : (N, D)       proxy bank (matmul_dtype), grid-invariant
    # pids   : (N, 1) int32, cids: (N, 1) int32, grid-invariant
    # tgt    : (1, TILE_B) int32, cam: (1, TILE_B) int32 (padding cols = -1)
    # out    : (1, TILE_B)  per-row loss (lane-dense)

    # --- F.normalize(x, dim=1) (eps=1e-12) and 1/temp folded into one scale -
    x = x_ref[...].astype(jnp.float32)                          # (TB, D)
    sq = jnp.sum(x * x, axis=1, keepdims=True)                  # (TB, 1)
    # rsqrt(max(sq, 1e-24)) == 1 / max(||x||, 1e-12); lands on the EUP slot.
    scale = lax.rsqrt(jnp.maximum(sq, 1e-24)) * inv_temp
    xs = (x * scale).astype(matmul_dtype)                       # (TB, D)

    # --- sims = proxy @ xs^T -> (N, TILE_B): batch rows on the lane axis ----
    # dot_general contracts D on both operands (transpose-free q@k^T form);
    # MXU operands may be bf16, accumulation is f32.
    sims = lax.dot_general(proxy_ref[...], xs,
                           dimension_numbers=(((1,), (1,)), ((), ())),
                           preferred_element_type=jnp.float32)  # (N, TB)

    t = tgt_ref[...]                                            # (1, TB)
    c = cam_ref[...]
    pids = pids_ref[...]                                        # (N, 1)
    cids = cids_ref[...]
    pos_mask = jnp.logical_and(pids == t, cids != c)            # (N, TB)
    neg_mask = pids != t                                        # (N, TB)

    # Positive statistics (one reduction pass each over the (N, TB) tile).
    n_pos = jnp.sum(jnp.where(pos_mask, 1.0, 0.0), axis=0, keepdims=True)
    pos_sum = jnp.sum(jnp.where(pos_mask, sims, 0.0), axis=0, keepdims=True)
    # Positives' share of the softmax denominator in online (m, s) form;
    # exp(where(..., -inf)) keeps unselected entries exactly 0 without risk.
    m_pos = jnp.max(jnp.where(pos_mask, sims, -jnp.inf), axis=0, keepdims=True)
    s_pos = jnp.sum(jnp.exp(jnp.where(pos_mask, sims - m_pos, -jnp.inf)),
                    axis=0, keepdims=True)

    # Hard-negative ranking key == sims + -9999999*(1 - neg_mask), same
    # additive f32 mask as the PyTorch forward (precision-fragile only in the
    # corner case where fewer than num_hards negatives exist).
    key = jnp.where(neg_mask, sims, sims - 9999999.0)
    iota = lax.broadcasted_iota(jnp.int32, sims.shape, 0)       # proxy index

    # Iterative top-K (K = num_hards): each step picks one entry per row
    # (min index among equal maxima == stable-sort tie-break), folds its sims
    # value into the online logsumexp, and knocks it out of `key`.
    # Carry = mutated key (N, TB) + two (1, TB) slabs; sims/iota close over.
    def pick_one(_, carry):
        key, run_m, run_s = carry
        m = jnp.max(key, axis=0, keepdims=True)                 # (1, TB)
        hit = key == m
        idx = jnp.min(jnp.where(hit, iota, n_samples), axis=0, keepdims=True)
        pick = iota == idx                                      # 1-hot per col
        v = jnp.sum(jnp.where(pick, sims, 0.0), axis=0, keepdims=True)
        new_m = jnp.maximum(run_m, v)
        run_s = run_s * jnp.exp(run_m - new_m) + jnp.exp(v - new_m)
        key = jnp.where(pick, -jnp.inf, key)
        return key, new_m, run_s

    # Full unroll keeps LLO scheduling visibility; after the live-set
    # reduction (~3 full tensors) we are near the 64-vreg edge — sweep
    # unroll in {True, 2, False} against the bundle dump on hardware.
    _, run_m, run_s = lax.fori_loop(0, num_hards, pick_one,
                                    (key, m_pos, s_pos), unroll=True)

    lse = run_m + jnp.log(run_s)                                # (1, TB)
    pos_mean = pos_sum / jnp.maximum(n_pos, 1.0)

    # -(targets_i * logsoftmax(sims_i)).sum() == lse - mean(positive sims);
    # rows with no positives (incl. padding columns) contribute 0.
    out_ref[...] = jnp.where(n_pos > 0.0, lse - pos_mean, 0.0)


def inter_cam_proxy_loss(inputs, targets, cams, proxy, pids, cids,
                         *, num_hards=8, temp=0.07, tile_b=128,
                         matmul_dtype=jnp.bfloat16):
    """Mean InterCamProxy loss over the batch.

    Preconditions: pids >= 0 and cids >= 0 (padding columns use -1 sentinels).
    """
    B, D = inputs.shape
    N = proxy.shape[0]
    # torch.sort(...)[:num_hards] truncates at N entries; mirror that.
    num_hards = min(int(num_hards), N)

    assert tile_b % 128 == 0, "tile_b must be a multiple of the 128-lane width"
    TILE_B = tile_b
    B_pad = ((B + TILE_B - 1) // TILE_B) * TILE_B
    num_tiles = B_pad // TILE_B
    # TODO(synk): with a single B-tile on v7x one TensorCore idles; splitting
    # the N axis across cores with a partial-lse carry would recover it.

    # Natural (B, D) layout: only a row-pad when B isn't a tile multiple,
    # never a transpose pass over the activations.
    if B_pad != B:
        x_in = jnp.zeros((B_pad, D), inputs.dtype).at[:B, :].set(inputs)
    else:
        x_in = inputs
    # Padding columns get targets/cams = -1 so they never match any proxy.
    tgt = jnp.full((1, B_pad), -1, jnp.int32).at[0, :B].set(
        targets.astype(jnp.int32))
    cam = jnp.full((1, B_pad), -1, jnp.int32).at[0, :B].set(
        cams.astype(jnp.int32))
    pid_col = pids.reshape(N, 1).astype(jnp.int32)
    cid_col = cids.reshape(N, 1).astype(jnp.int32)
    # bf16 MXU operand by default: halves proxy DMA bytes and VMEM residency;
    # accumulation and all elementwise math stay f32.
    proxy_in = proxy.astype(matmul_dtype)

    kernel = functools.partial(_intercam_kernel, inv_temp=1.0 / temp,
                               num_hards=num_hards, n_samples=N,
                               matmul_dtype=matmul_dtype)

    # VMEM budget: proxy (worst-case double buffered) + 2 x-tile buffers +
    # ~10 live (N, TILE_B) f32 temporaries / spill headroom; floor 32 MiB
    # (raises v5e's 16 MiB scoped default), cap 48 MiB to stay safely under
    # v7x's 64 MiB physical VMEM.
    est = (2 * N * D * jnp.dtype(matmul_dtype).itemsize
           + 2 * TILE_B * D * jnp.dtype(inputs.dtype).itemsize
           + 10 * N * TILE_B * 4
           + 4 * (2 * N + 6 * TILE_B))
    vmem_limit = int(min(48 * 2**20, max(32 * 2**20, est)))

    def run(single_buffer_invariants):
        inv_kw = ({"pipeline_mode": pl.Buffered(1)}
                  if single_buffer_invariants else {})
        grid_spec = pltpu.PrefetchScalarGridSpec(
            num_scalar_prefetch=0,
            grid=(num_tiles,),
            in_specs=[
                pl.BlockSpec((TILE_B, D), lambda bt: (bt, 0)),        # x tile
                pl.BlockSpec((N, D), lambda bt: (0, 0), **inv_kw),    # proxy
                pl.BlockSpec((N, 1), lambda bt: (0, 0), **inv_kw),    # pids
                pl.BlockSpec((N, 1), lambda bt: (0, 0), **inv_kw),    # cids
                pl.BlockSpec((1, TILE_B), lambda bt: (0, bt)),        # targets
                pl.BlockSpec((1, TILE_B), lambda bt: (0, bt)),        # cams
            ],
            out_specs=pl.BlockSpec((1, TILE_B), lambda bt: (0, bt)),
        )
        return pl.pallas_call(
            kernel,
            out_shape=jax.ShapeDtypeStruct((1, B_pad), jnp.float32),
            grid_spec=grid_spec,
            compiler_params=pltpu.CompilerParams(
                # independent per-tile outputs -> B-tile axis shards across
                # TensorCores on multi-core chips (v7x).
                dimension_semantics=("parallel",),
                vmem_limit_bytes=vmem_limit),
        )(x_in, proxy_in, pid_col, cid_col, tgt, cam)

    try:
        # Grid-invariant operands single-buffered (constant index_map: the
        # second pipeline buffer buys nothing and doubles VMEM residency).
        per_row = run(True)
    except Exception:
        # Installed jax doesn't support pipeline_mode on this path: fall back
        # to default (double) buffering; semantics are identical.
        per_row = run(False)

    return jnp.sum(per_row[0, :B]) / B


def reference_loss(inputs, targets, cams, proxy, pids, cids, num_hards, temp):
    """Pure numpy (f64) transcription of the PyTorch forward (verification)."""
    x = np.asarray(inputs, dtype=np.float64)
    proxy = np.asarray(proxy, dtype=np.float64)
    targets = np.asarray(targets)
    cams = np.asarray(cams)
    pids = np.asarray(pids)
    cids = np.asarray(cids)
    B = x.shape[0]
    xn = x / np.maximum(np.linalg.norm(x, axis=1, keepdims=True), 1e-12)
    sims = xn @ proxy.T / temp
    loss = 0.0
    for i in range(B):
        pos_mask = (targets[i] == pids) & (cams[i] != cids)
        neg_mask = (targets[i] != pids).astype(np.float64)
        pos_idx = np.nonzero(pos_mask)[0]
        if len(pos_idx) == 0:
            continue
        key = sims[i] + (-9999999.0) * (1.0 - neg_mask)
        hard_idx = np.argsort(-key, kind="stable")[:num_hards]
        s = sims[i][np.concatenate([pos_idx, hard_idx])]
        t = np.zeros(len(s))
        t[:len(pos_idx)] = 1.0 / len(pos_idx)
        mx = s.max()
        logsm = s - mx - np.log(np.sum(np.exp(s - mx)))
        loss += -(t * logsm).sum()
    return loss / B


if __name__ == "__main__":
    # Small synthetic config consistent with the module:
    #   num_features D=32, num_samples N=128, num_hards=8, temp=0.07, batch B=8
    B, D, N = 8, 32, 128
    num_hards, temp = 8, 0.07

    key = jax.random.PRNGKey(0)
    k1, k2, k3, k4, k5, k6 = jax.random.split(key, 6)
    inputs = jax.random.normal(k1, (B, D), dtype=jnp.float32)
    # Deterministic synthetic buffers (registered as zeros in __init__; filled
    # here so the loss path is exercised — this is NOT a checkpoint load).
    proxy = jax.random.normal(k2, (N, D), dtype=jnp.float32)
    proxy = proxy / jnp.linalg.norm(proxy, axis=1, keepdims=True)
    pids = jax.random.randint(k3, (N,), 0, 4, dtype=jnp.int32)
    cids = jax.random.randint(k4, (N,), 0, 3, dtype=jnp.int32)
    targets = jax.random.randint(k5, (B,), 0, 4, dtype=jnp.int32)
    cams = jax.random.randint(k6, (B,), 0, 3, dtype=jnp.int32)

    ref = reference_loss(np.array(inputs), np.array(targets), np.array(cams),
                         np.array(proxy), np.array(pids), np.array(cids),
                         num_hards, temp)

    # f32 MXU path: tight parity with the f64 reference.
    loss_f32 = inter_cam_proxy_loss(inputs, targets, cams, proxy, pids, cids,
                                    num_hards=num_hards, temp=temp,
                                    matmul_dtype=jnp.float32)
    loss_f32 = float(jax.block_until_ready(loss_f32))
    assert np.allclose(loss_f32, ref, rtol=1e-3, atol=2e-3), (loss_f32, ref)

    # Default bf16-MXU-operand path (f32 accumulation): looser tolerance.
    loss_bf16 = inter_cam_proxy_loss(inputs, targets, cams, proxy, pids, cids,
                                     num_hards=num_hards, temp=temp)
    loss_bf16 = float(jax.block_until_ready(loss_bf16))
    assert np.allclose(loss_bf16, ref, rtol=5e-2, atol=5e-2), (loss_bf16, ref)

    print("KERNEL_OK")
</pallas_src>

<mosaic_0001>
module attributes {stable_mosaic.version = 11 : i64} {
  func.func @_intercam_kernel(%arg0: i32, %arg1: memref<128x32xf32, #tpu.memory_space<vmem>>, %arg2: memref<128x32xf32, #tpu.memory_space<vmem>>, %arg3: memref<128x1xi32, #tpu.memory_space<vmem>>, %arg4: memref<128x1xi32, #tpu.memory_space<vmem>>, %arg5: memref<1x128xi32, #tpu.memory_space<vmem>>, %arg6: memref<1x128xi32, #tpu.memory_space<vmem>>, %arg7: memref<1x128xf32, #tpu.memory_space<vmem>>) attributes {dimension_semantics = [#tpu.dimension_semantics<parallel>], iteration_bounds = array<i64: 1>, scalar_prefetch = 0 : i64, scratch_operands = 0 : i64, tpu.core_type = #tpu.core_type<tc>, window_params = [{transform_indices = @transform_0, window_bounds = array<i64: 128, 32>}, {pipeline_mode = #tpu.pipeline_mode<synchronous>, transform_indices = @transform_1, window_bounds = array<i64: 128, 32>}, {pipeline_mode = #tpu.pipeline_mode<synchronous>, transform_indices = @transform_2, window_bounds = array<i64: 128, 1>}, {pipeline_mode = #tpu.pipeline_mode<synchronous>, transform_indices = @transform_3, window_bounds = array<i64: 128, 1>}, {transform_indices = @transform_4, window_bounds = array<i64: 1, 128>}, {transform_indices = @transform_5, window_bounds = array<i64: 1, 128>}, {transform_indices = @transform_6, window_bounds = array<i64: 1, 128>}]} {
    %c0 = arith.constant 0 : index
    %c0_0 = arith.constant 0 : index
    %0 = vector.load %arg1[%c0, %c0_0] : memref<128x32xf32, #tpu.memory_space<vmem>>, vector<128x32xf32>
    %1 = arith.mulf %0, %0 : vector<128x32xf32>
    %cst = arith.constant dense<0.000000e+00> : vector<128xf32>
    %2 = vector.multi_reduction <add>, %1, %cst [1] : vector<128x32xf32> to vector<128xf32>
    %3 = vector.shape_cast %2 : vector<128xf32> to vector<128x1xf32>
    %cst_1 = arith.constant 1.000000e-24 : f32
    %4 = vector.broadcast %cst_1 : f32 to vector<128x1xf32>
    %5 = arith.maximumf %3, %4 : vector<128x1xf32>
    %6 = math.rsqrt %5 : vector<128x1xf32>
    %cst_2 = arith.constant 14.2857141 : f32
    %7 = vector.broadcast %cst_2 : f32 to vector<128x1xf32>
    %8 = arith.mulf %6, %7 : vector<128x1xf32>
    %9 = vector.broadcast %8 : vector<128x1xf32> to vector<128x32xf32>
    %10 = arith.mulf %0, %9 : vector<128x32xf32>
    %c0_3 = arith.constant 0 : index
    %c0_4 = arith.constant 0 : index
    %11 = vector.load %arg2[%c0_3, %c0_4] : memref<128x32xf32, #tpu.memory_space<vmem>>, vector<128x32xf32>
    %cst_5 = arith.constant dense<0.000000e+00> : vector<128x128xf32>
    %12 = tpu.matmul %11, %10, %cst_5 {dimension_numbers = #tpu.dot_dimension_numbers<[1], [1], [0], [0], [0, 0, 1, 0], [], []>} : vector<128x32xf32>, vector<128x32xf32>, vector<128x128xf32> -> vector<128x128xf32>
    %c0_6 = arith.constant 0 : index
    %c0_7 = arith.constant 0 : index
    %13 = vector.load %arg5[%c0_6, %c0_7] : memref<1x128xi32, #tpu.memory_space<vmem>>, vector<1x128xi32>
    %c0_8 = arith.constant 0 : index
    %c0_9 = arith.constant 0 : index
    %14 = vector.load %arg6[%c0_8, %c0_9] : memref<1x128xi32, #tpu.memory_space<vmem>>, vector<1x128xi32>
    %c0_10 = arith.constant 0 : index
    %c0_11 = arith.constant 0 : index
    %15 = vector.load %arg3[%c0_10, %c0_11] : memref<128x1xi32, #tpu.memory_space<vmem>>, vector<128x1xi32>
    %c0_12 = arith.constant 0 : index
    %c0_13 = arith.constant 0 : index
    %16 = vector.load %arg4[%c0_12, %c0_13] : memref<128x1xi32, #tpu.memory_space<vmem>>, vector<128x1xi32>
    %17 = vector.broadcast %15 : vector<128x1xi32> to vector<128x128xi32>
    %18 = vector.broadcast %13 : vector<1x128xi32> to vector<128x128xi32>
    %19 = arith.cmpi eq, %17, %18 : vector<128x128xi32>
    %20 = vector.broadcast %16 : vector<128x1xi32> to vector<128x128xi32>
    %21 = vector.broadcast %14 : vector<1x128xi32> to vector<128x128xi32>
    %22 = arith.cmpi ne, %20, %21 : vector<128x128xi32>
    %23 = arith.andi %19, %22 : vector<128x128xi1>
    %24 = vector.broadcast %15 : vector<128x1xi32> to vector<128x128xi32>
    %25 = vector.broadcast %13 : vector<1x128xi32> to vector<128x128xi32>
    %26 = arith.cmpi ne, %24, %25 : vector<128x128xi32>
    %cst_14 = arith.constant 1.000000e+00 : f32
    %cst_15 = arith.constant 0.000000e+00 : f32
    %27 = vector.broadcast %cst_14 : f32 to vector<128x128xf32>
    %28 = vector.broadcast %cst_15 : f32 to vector<128x128xf32>
    %29 = arith.select %23, %27, %28 : vector<128x128xi1>, vector<128x128xf32>
    %cst_16 = arith.constant dense<0.000000e+00> : vector<128xf32>
    %30 = vector.multi_reduction <add>, %29, %cst_16 [0] : vector<128x128xf32> to vector<128xf32>
    %31 = vector.shape_cast %30 : vector<128xf32> to vector<1x128xf32>
    %cst_17 = arith.constant 0.000000e+00 : f32
    %32 = vector.broadcast %cst_17 : f32 to vector<128x128xf32>
    %33 = arith.select %23, %12, %32 : vector<128x128xi1>, vector<128x128xf32>
    %cst_18 = arith.constant dense<0.000000e+00> : vector<128xf32>
    %34 = vector.multi_reduction <add>, %33, %cst_18 [0] : vector<128x128xf32> to vector<128xf32>
    %35 = vector.shape_cast %34 : vector<128xf32> to vector<1x128xf32>
    %cst_19 = arith.constant 0xFF800000 : f32
    %36 = vector.broadcast %cst_19 : f32 to vector<128x128xf32>
    %37 = arith.select %23, %12, %36 : vector<128x128xi1>, vector<128x128xf32>
    %cst_20 = arith.constant dense<0xFF800000> : vector<128xf32>
    %38 = vector.multi_reduction <maximumf>, %37, %cst_20 [0] : vector<128x128xf32> to vector<128xf32>
    %39 = vector.shape_cast %38 : vector<128xf32> to vector<1x128xf32>
    %40 = vector.broadcast %39 : vector<1x128xf32> to vector<128x128xf32>
    %41 = arith.subf %12, %40 : vector<128x128xf32>
    %cst_21 = arith.constant 0xFF800000 : f32
    %42 = vector.broadcast %cst_21 : f32 to vector<128x128xf32>
    %43 = arith.select %23, %41, %42 : vector<128x128xi1>, vector<128x128xf32>
    %44 = math.exp %43 : vector<128x128xf32>
    %cst_22 = arith.constant dense<0.000000e+00> : vector<128xf32>
    %45 = vector.multi_reduction <add>, %44, %cst_22 [0] : vector<128x128xf32> to vector<128xf32>
    %46 = vector.shape_cast %45 : vector<128xf32> to vector<1x128xf32>
    %cst_23 = arith.constant 0x4B18967F : f32
    %47 = vector.broadcast %cst_23 : f32 to vector<128x128xf32>
    %48 = arith.subf %12, %47 : vector<128x128xf32>
    %49 = arith.select %26, %12, %48 : vector<128x128xi1>, vector<128x128xf32>
    %50 = tpu.iota {dimensions = array<i32: 0>} : vector<128x128xi32>
    %c0_i32 = arith.constant 0 : i32
    %cst_24 = arith.constant dense<0xFF800000> : vector<128xf32>
    %51 = vector.multi_reduction <maximumf>, %49, %cst_24 [0] : vector<128x128xf32> to vector<128xf32>
    %52 = vector.shape_cast %51 : vector<128xf32> to vector<1x128xf32>
    %53 = vector.broadcast %52 : vector<1x128xf32> to vector<128x128xf32>
    %54 = arith.cmpf oeq, %49, %53 : vector<128x128xf32>
    %c128_i32 = arith.constant 128 : i32
    %55 = vector.broadcast %c128_i32 : i32 to vector<128x128xi32>
    %56 = arith.select %54, %50, %55 : vector<128x128xi1>, vector<128x128xi32>
    %cst_25 = arith.constant dense<2147483647> : vector<128xi32>
    %57 = vector.multi_reduction <minsi>, %56, %cst_25 [0] : vector<128x128xi32> to vector<128xi32>
    %58 = vector.shape_cast %57 : vector<128xi32> to vector<1x128xi32>
    %59 = vector.broadcast %58 : vector<1x128xi32> to vector<128x128xi32>
    %60 = arith.cmpi eq, %50, %59 : vector<128x128xi32>
    %cst_26 = arith.constant 0.000000e+00 : f32
    %61 = vector.broadcast %cst_26 : f32 to vector<128x128xf32>
    %62 = arith.select %60, %12, %61 : vector<128x128xi1>, vector<128x128xf32>
    %cst_27 = arith.constant dense<0.000000e+00> : vector<128xf32>
    %63 = vector.multi_reduction <add>, %62, %cst_27 [0] : vector<128x128xf32> to vector<128xf32>
    %64 = vector.shape_cast %63 : vector<128xf32> to vector<1x128xf32>
    %65 = arith.maximumf %39, %64 : vector<1x128xf32>
    %66 = arith.subf %39, %65 : vector<1x128xf32>
    %67 = math.exp %66 : vector<1x128xf32>
    %68 = arith.mulf %46, %67 : vector<1x128xf32>
    %69 = arith.subf %64, %65 : vector<1x128xf32>
    %70 = math.exp %69 : vector<1x128xf32>
    %71 = arith.addf %68, %70 : vector<1x128xf32>
    %cst_28 = arith.constant 0xFF800000 : f32
    %72 = vector.broadcast %cst_28 : f32 to vector<128x128xf32>
    %73 = arith.select %60, %72, %49 : vector<128x128xi1>, vector<128x128xf32>
    %c1_i32 = arith.constant 1 : i32
    %cst_29 = arith.constant dense<0xFF800000> : vector<128xf32>
    %74 = vector.multi_reduction <maximumf>, %73, %cst_29 [0] : vector<128x128xf32> to vector<128xf32>
    %75 = vector.shape_cast %74 : vector<128xf32> to vector<1x128xf32>
    %76 = vector.broadcast %75 : vector<1x128xf32> to vector<128x128xf32>
    %77 = arith.cmpf oeq, %73, %76 : vector<128x128xf32>
    %c128_i32_30 = arith.constant 128 : i32
    %78 = vector.broadcast %c128_i32_30 : i32 to vector<128x128xi32>
    %79 = arith.select %77, %50, %78 : vector<128x128xi1>, vector<128x128xi32>
    %cst_31 = arith.constant dense<2147483647> : vector<128xi32>
    %80 = vector.multi_reduction <minsi>, %79, %cst_31 [0] : vector<128x128xi32> to vector<128xi32>
    %81 = vector.shape_cast %80 : vector<128xi32> to vector<1x128xi32>
    %82 = vector.broadcast %81 : vector<1x128xi32> to vector<128x128xi32>
    %83 = arith.cmpi eq, %50, %82 : vector<128x128xi32>
    %cst_32 = arith.constant 0.000000e+00 : f32
    %84 = vector.broadcast %cst_32 : f32 to vector<128x128xf32>
    %85 = arith.select %83, %12, %84 : vector<128x128xi1>, vector<128x128xf32>
    %cst_33 = arith.constant dense<0.000000e+00> : vector<128xf32>
    %86 = vector.multi_reduction <add>, %85, %cst_33 [0] : vector<128x128xf32> to vector<128xf32>
    %87 = vector.shape_cast %86 : vector<128xf32> to vector<1x128xf32>
    %88 = arith.maximumf %65, %87 : vector<1x128xf32>
    %89 = arith.subf %65, %88 : vector<1x128xf32>
    %90 = math.exp %89 : vector<1x128xf32>
    %91 = arith.mulf %71, %90 : vector<1x128xf32>
    %92 = arith.subf %87, %88 : vector<1x128xf32>
    %93 = math.exp %92 : vector<1x128xf32>
    %94 = arith.addf %91, %93 : vector<1x128xf32>
    %cst_34 = arith.constant 0xFF800000 : f32
    %95 = vector.broadcast %cst_34 : f32 to vector<128x128xf32>
    %96 = arith.select %83, %95, %73 : vector<128x128xi1>, vector<128x128xf32>
    %c2_i32 = arith.constant 2 : i32
    %cst_35 = arith.constant dense<0xFF800000> : vector<128xf32>
    %97 = vector.multi_reduction <maximumf>, %96, %cst_35 [0] : vector<128x128xf32> to vector<128xf32>
    %98 = vector.shape_cast %97 : vector<128xf32> to vector<1x128xf32>
    %99 = vector.broadcast %98 : vector<1x128xf32> to vector<128x128xf32>
    %100 = arith.cmpf oeq, %96, %99 : vector<128x128xf32>
    %c128_i32_36 = arith.constant 128 : i32
    %101 = vector.broadcast %c128_i32_36 : i32 to vector<128x128xi32>
    %102 = arith.select %100, %50, %101 : vector<128x128xi1>, vector<128x128xi32>
    %cst_37 = arith.constant dense<2147483647> : vector<128xi32>
    %103 = vector.multi_reduction <minsi>, %102, %cst_37 [0] : vector<128x128xi32> to vector<128xi32>
    %104 = vector.shape_cast %103 : vector<128xi32> to vector<1x128xi32>
    %105 = vector.broadcast %104 : vector<1x128xi32> to vector<128x128xi32>
    %106 = arith.cmpi eq, %50, %105 : vector<128x128xi32>
    %cst_38 = arith.constant 0.000000e+00 : f32
    %107 = vector.broadcast %cst_38 : f32 to vector<128x128xf32>
    %108 = arith.select %106, %12, %107 : vector<128x128xi1>, vector<128x128xf32>
    %cst_39 = arith.constant dense<0.000000e+00> : vector<128xf32>
    %109 = vector.multi_reduction <add>, %108, %cst_39 [0] : vector<128x128xf32> to vector<128xf32>
    %110 = vector.shape_cast %109 : vector<128xf32> to vector<1x128xf32>
    %111 = arith.maximumf %88, %110 : vector<1x128xf32>
    %112 = arith.subf %88, %111 : vector<1x128xf32>
    %113 = math.exp %112 : vector<1x128xf32>
    %114 = arith.mulf %94, %113 : vector<1x128xf32>
    %115 = arith.subf %110, %111 : vector<1x128xf32>
    %116 = math.exp %115 : vector<1x128xf32>
    %117 = arith.addf %114, %116 : vector<1x128xf32>
    %cst_40 = arith.constant 0xFF800000 : f32
    %118 = vector.broadcast %cst_40 : f32 to vector<128x128xf32>
    %119 = arith.select %106, %118, %96 : vector<128x128xi1>, vector<128x128xf32>
    %c3_i32 = arith.constant 3 : i32
    %cst_41 = arith.constant dense<0xFF800000> : vector<128xf32>
    %120 = vector.multi_reduction <maximumf>, %119, %cst_41 [0] : vector<128x128xf32> to vector<128xf32>
    %121 = vector.shape_cast %120 : vector<128xf32> to vector<1x128xf32>
    %122 = vector.broadcast %121 : vector<1x128xf32> to vector<128x128xf32>
    %123 = arith.cmpf oeq, %119, %122 : vector<128x128xf32>
    %c128_i32_42 = arith.constant 128 : i32
    %124 = vector.broadcast %c128_i32_42 : i32 to vector<128x128xi32>
    %125 = arith.select %123, %50, %124 : vector<128x128xi1>, vector<128x128xi32>
    %cst_43 = arith.constant dense<2147483647> : vector<128xi32>
    %126 = vector.multi_reduction <minsi>, %125, %cst_43 [0] : vector<128x128xi32> to vector<128xi32>
    %127 = vector.shape_cast %126 : vector<128xi32> to vector<1x128xi32>
    %128 = vector.broadcast %127 : vector<1x128xi32> to vector<128x128xi32>
    %129 = arith.cmpi eq, %50, %128 : vector<128x128xi32>
    %cst_44 = arith.constant 0.000000e+00 : f32
    %130 = vector.broadcast %cst_44 : f32 to vector<128x128xf32>
    %131 = arith.select %129, %12, %130 : vector<128x128xi1>, vector<128x128xf32>
    %cst_45 = arith.constant dense<0.000000e+00> : vector<128xf32>
    %132 = vector.multi_reduction <add>, %131, %cst_45 [0] : vector<128x128xf32> to vector<128xf32>
    %133 = vector.shape_cast %132 : vector<128xf32> to vector<1x128xf32>
    %134 = arith.maximumf %111, %133 : vector<1x128xf32>
    %135 = arith.subf %111, %134 : vector<1x128xf32>
    %136 = math.exp %135 : vector<1x128xf32>
    %137 = arith.mulf %117, %136 : vector<1x128xf32>
    %138 = arith.subf %133, %134 : vector<1x128xf32>
    %139 = math.exp %138 : vector<1x128xf32>
    %140 = arith.addf %137, %139 : vector<1x128xf32>
    %cst_46 = arith.constant 0xFF800000 : f32
    %141 = vector.broadcast %cst_46 : f32 to vector<128x128xf32>
    %142 = arith.select %129, %141, %119 : vector<128x128xi1>, vector<128x128xf32>
    %c4_i32 = arith.constant 4 : i32
    %cst_47 = arith.constant dense<0xFF800000> : vector<128xf32>
    %143 = vector.multi_reduction <maximumf>, %142, %cst_47 [0] : vector<128x128xf32> to vector<128xf32>
    %144 = vector.shape_cast %143 : vector<128xf32> to vector<1x128xf32>
    %145 = vector.broadcast %144 : vector<1x128xf32> to vector<128x128xf32>
    %146 = arith.cmpf oeq, %142, %145 : vector<128x128xf32>
    %c128_i32_48 = arith.constant 128 : i32
    %147 = vector.broadcast %c128_i32_48 : i32 to vector<128x128xi32>
    %148 = arith.select %146, %50, %147 : vector<128x128xi1>, vector<128x128xi32>
    %cst_49 = arith.constant dense<2147483647> : vector<128xi32>
    %149 = vector.multi_reduction <minsi>, %148, %cst_49 [0] : vector<128x128xi32> to vector<128xi32>
    %150 = vector.shape_cast %149 : vector<128xi32> to vector<1x128xi32>
    %151 = vector.broadcast %150 : vector<1x128xi32> to vector<128x128xi32>
    %152 = arith.cmpi eq, %50, %151 : vector<128x128xi32>
    %cst_50 = arith.constant 0.000000e+00 : f32
    %153 = vector.broadcast %cst_50 : f32 to vector<128x128xf32>
    %154 = arith.select %152, %12, %153 : vector<128x128xi1>, vector<128x128xf32>
    %cst_51 = arith.constant dense<0.000000e+00> : vector<128xf32>
    %155 = vector.multi_reduction <add>, %154, %cst_51 [0] : vector<128x128xf32> to vector<128xf32>
    %156 = vector.shape_cast %155 : vector<128xf32> to vector<1x128xf32>
    %157 = arith.maximumf %134, %156 : vector<1x128xf32>
    %158 = arith.subf %134, %157 : vector<1x128xf32>
    %159 = math.exp %158 : vector<1x128xf32>
    %160 = arith.mulf %140, %159 : vector<1x128xf32>
    %161 = arith.subf %156, %157 : vector<1x128xf32>
    %162 = math.exp %161 : vector<1x128xf32>
    %163 = arith.addf %160, %162 : vector<1x128xf32>
    %cst_52 = arith.constant 0xFF800000 : f32
    %164 = vector.broadcast %cst_52 : f32 to vector<128x128xf32>
    %165 = arith.select %152, %164, %142 : vector<128x128xi1>, vector<128x128xf32>
    %c5_i32 = arith.constant 5 : i32
    %cst_53 = arith.constant dense<0xFF800000> : vector<128xf32>
    %166 = vector.multi_reduction <maximumf>, %165, %cst_53 [0] : vector<128x128xf32> to vector<128xf32>
    %167 = vector.shape_cast %166 : vector<128xf32> to vector<1x128xf32>
    %168 = vector.broadcast %167 : vector<1x128xf32> to vector<128x128xf32>
    %169 = arith.cmpf oeq, %165, %168 : vector<128x128xf32>
    %c128_i32_54 = arith.constant 128 : i32
    %170 = vector.broadcast %c128_i32_54 : i32 to vector<128x128xi32>
    %171 = arith.select %169, %50, %170 : vector<128x128xi1>, vector<128x128xi32>
    %cst_55 = arith.constant dense<2147483647> : vector<128xi32>
    %172 = vector.multi_reduction <minsi>, %171, %cst_55 [0] : vector<128x128xi32> to vector<128xi32>
    %173 = vector.shape_cast %172 : vector<128xi32> to vector<1x128xi32>
    %174 = vector.broadcast %173 : vector<1x128xi32> to vector<128x128xi32>
    %175 = arith.cmpi eq, %50, %174 : vector<128x128xi32>
    %cst_56 = arith.constant 0.000000e+00 : f32
    %176 = vector.broadcast %cst_56 : f32 to vector<128x128xf32>
    %177 = arith.select %175, %12, %176 : vector<128x128xi1>, vector<128x128xf32>
    %cst_57 = arith.constant dense<0.000000e+00> : vector<128xf32>
    %178 = vector.multi_reduction <add>, %177, %cst_57 [0] : vector<128x128xf32> to vector<128xf32>
    %179 = vector.shape_cast %178 : vector<128xf32> to vector<1x128xf32>
    %180 = arith.maximumf %157, %179 : vector<1x128xf32>
    %181 = arith.subf %157, %180 : vector<1x128xf32>
    %182 = math.exp %181 : vector<1x128xf32>
    %183 = arith.mulf %163, %182 : vector<1x128xf32>
    %184 = arith.subf %179, %180 : vector<1x128xf32>
    %185 = math.exp %184 : vector<1x128xf32>
    %186 = arith.addf %183, %185 : vector<1x128xf32>
    %cst_58 = arith.constant 0xFF800000 : f32
    %187 = vector.broadcast %cst_58 : f32 to vector<128x128xf32>
    %188 = arith.select %175, %187, %165 : vector<128x128xi1>, vector<128x128xf32>
    %c6_i32 = arith.constant 6 : i32
    %cst_59 = arith.constant dense<0xFF800000> : vector<128xf32>
    %189 = vector.multi_reduction <maximumf>, %188, %cst_59 [0] : vector<128x128xf32> to vector<128xf32>
    %190 = vector.shape_cast %189 : vector<128xf32> to vector<1x128xf32>
    %191 = vector.broadcast %190 : vector<1x128xf32> to vector<128x128xf32>
    %192 = arith.cmpf oeq, %188, %191 : vector<128x128xf32>
    %c128_i32_60 = arith.constant 128 : i32
    %193 = vector.broadcast %c128_i32_60 : i32 to vector<128x128xi32>
    %194 = arith.select %192, %50, %193 : vector<128x128xi1>, vector<128x128xi32>
    %cst_61 = arith.constant dense<2147483647> : vector<128xi32>
    %195 = vector.multi_reduction <minsi>, %194, %cst_61 [0] : vector<128x128xi32> to vector<128xi32>
    %196 = vector.shape_cast %195 : vector<128xi32> to vector<1x128xi32>
    %197 = vector.broadcast %196 : vector<1x128xi32> to vector<128x128xi32>
    %198 = arith.cmpi eq, %50, %197 : vector<128x128xi32>
    %cst_62 = arith.constant 0.000000e+00 : f32
    %199 = vector.broadcast %cst_62 : f32 to vector<128x128xf32>
    %200 = arith.select %198, %12, %199 : vector<128x128xi1>, vector<128x128xf32>
    %cst_63 = arith.constant dense<0.000000e+00> : vector<128xf32>
    %201 = vector.multi_reduction <add>, %200, %cst_63 [0] : vector<128x128xf32> to vector<128xf32>
    %202 = vector.shape_cast %201 : vector<128xf32> to vector<1x128xf32>
    %203 = arith.maximumf %180, %202 : vector<1x128xf32>
    %204 = arith.subf %180, %203 : vector<1x128xf32>
    %205 = math.exp %204 : vector<1x128xf32>
    %206 = arith.mulf %186, %205 : vector<1x128xf32>
    %207 = arith.subf %202, %203 : vector<1x128xf32>
    %208 = math.exp %207 : vector<1x128xf32>
    %209 = arith.addf %206, %208 : vector<1x128xf32>
    %cst_64 = arith.constant 0xFF800000 : f32
    %210 = vector.broadcast %cst_64 : f32 to vector<128x128xf32>
    %211 = arith.select %198, %210, %188 : vector<128x128xi1>, vector<128x128xf32>
    %c7_i32 = arith.constant 7 : i32
    %cst_65 = arith.constant dense<0xFF800000> : vector<128xf32>
    %212 = vector.multi_reduction <maximumf>, %211, %cst_65 [0] : vector<128x128xf32> to vector<128xf32>
    %213 = vector.shape_cast %212 : vector<128xf32> to vector<1x128xf32>
    %214 = vector.broadcast %213 : vector<1x128xf32> to vector<128x128xf32>
    %215 = arith.cmpf oeq, %211, %214 : vector<128x128xf32>
    %c128_i32_66 = arith.constant 128 : i32
    %216 = vector.broadcast %c128_i32_66 : i32 to vector<128x128xi32>
    %217 = arith.select %215, %50, %216 : vector<128x128xi1>, vector<128x128xi32>
    %cst_67 = arith.constant dense<2147483647> : vector<128xi32>
    %218 = vector.multi_reduction <minsi>, %217, %cst_67 [0] : vector<128x128xi32> to vector<128xi32>
    %219 = vector.shape_cast %218 : vector<128xi32> to vector<1x128xi32>
    %220 = vector.broadcast %219 : vector<1x128xi32> to vector<128x128xi32>
    %221 = arith.cmpi eq, %50, %220 : vector<128x128xi32>
    %cst_68 = arith.constant 0.000000e+00 : f32
    %222 = vector.broadcast %cst_68 : f32 to vector<128x128xf32>
    %223 = arith.select %221, %12, %222 : vector<128x128xi1>, vector<128x128xf32>
    %cst_69 = arith.constant dense<0.000000e+00> : vector<128xf32>
    %224 = vector.multi_reduction <add>, %223, %cst_69 [0] : vector<128x128xf32> to vector<128xf32>
    %225 = vector.shape_cast %224 : vector<128xf32> to vector<1x128xf32>
    %226 = arith.maximumf %203, %225 : vector<1x128xf32>
    %227 = arith.subf %203, %226 : vector<1x128xf32>
    %228 = math.exp %227 : vector<1x128xf32>
    %229 = arith.mulf %209, %228 : vector<1x128xf32>
    %230 = arith.subf %225, %226 : vector<1x128xf32>
    %231 = math.exp %230 : vector<1x128xf32>
    %232 = arith.addf %229, %231 : vector<1x128xf32>
    %cst_70 = arith.constant 0xFF800000 : f32
    %233 = vector.broadcast %cst_70 : f32 to vector<128x128xf32>
    %234 = arith.select %221, %233, %211 : vector<128x128xi1>, vector<128x128xf32>
    %235 = math.log %232 : vector<1x128xf32>
    %236 = arith.addf %226, %235 : vector<1x128xf32>
    %cst_71 = arith.constant 1.000000e+00 : f32
    %237 = vector.broadcast %cst_71 : f32 to vector<1x128xf32>
    %238 = arith.maximumf %31, %237 : vector<1x128xf32>
    %239 = arith.divf %35, %238 : vector<1x128xf32>
    %cst_72 = arith.constant 0.000000e+00 : f32
    %240 = vector.broadcast %cst_72 : f32 to vector<1x128xf32>
    %241 = arith.cmpf ogt, %31, %240 : vector<1x128xf32>
    %242 = arith.subf %236, %239 : vector<1x128xf32>
    %cst_73 = arith.constant 0.000000e+00 : f32
    %243 = vector.broadcast %cst_73 : f32 to vector<1x128xf32>
    %244 = arith.select %241, %242, %243 : vector<1x128xi1>, vector<1x128xf32>
    %c0_74 = arith.constant 0 : index
    %c0_75 = arith.constant 0 : index
    %245 = vector.load %arg7[%c0_74, %c0_75] : memref<1x128xf32, #tpu.memory_space<vmem>>, vector<1x128xf32>
    tpu.vector_store %arg7[%c0_74, %c0_75], %244 {strides = array<i32>} : memref<1x128xf32, #tpu.memory_space<vmem>>, vector<1x128xf32>,
    return
  }
  func.func @transform_0(%arg0: i32) -> (i32, i32) {
    %c0_i32 = arith.constant 0 : i32
    %c0_i32_0 = arith.constant 0 : i32
    return %arg0, %c0_i32 : i32, i32
  }
  func.func @transform_1(%arg0: i32) -> (i32, i32) {
    %c0_i32 = arith.constant 0 : i32
    %c0_i32_0 = arith.constant 0 : i32
    %c0_i32_1 = arith.constant 0 : i32
    return %c0_i32, %c0_i32_0 : i32, i32
  }
  func.func @transform_2(%arg0: i32) -> (i32, i32) {
    %c0_i32 = arith.constant 0 : i32
    %c0_i32_0 = arith.constant 0 : i32
    %c0_i32_1 = arith.constant 0 : i32
    return %c0_i32, %c0_i32_0 : i32, i32
  }
  func.func @transform_3(%arg0: i32) -> (i32, i32) {
    %c0_i32 = arith.constant 0 : i32
    %c0_i32_0 = arith.constant 0 : i32
    %c0_i32_1 = arith.constant 0 : i32
    return %c0_i32, %c0_i32_0 : i32, i32
  }
  func.func @transform_4(%arg0: i32) -> (i32, i32) {
    %c0_i32 = arith.constant 0 : i32
    %c0_i32_0 = arith.constant 0 : i32
    return %c0_i32, %arg0 : i32, i32
  }
  func.func @transform_5(%arg0: i32) -> (i32, i32) {
    %c0_i32 = arith.constant 0 : i32
    %c0_i32_0 = arith.constant 0 : i32
    return %c0_i32, %arg0 : i32, i32
  }
  func.func @transform_6(%arg0: i32) -> (i32, i32) {
    %c0_i32 = arith.constant 0 : i32
    %c0_i32_0 = arith.constant 0 : i32
    return %c0_i32, %arg0 : i32, i32
  }
}

module attributes {stable_mosaic.version = 11 : i64} {
  func.func @_intercam_kernel(%arg0: i32, %arg1: memref<128x32xf32, #tpu.memory_space<vmem>>, %arg2: memref<128x32xf32, #tpu.memory_space<vmem>>, %arg3: memref<128x1xi32, #tpu.memory_space<vmem>>, %arg4: memref<128x1xi32, #tpu.memory_space<vmem>>, %arg5: memref<1x128xi32, #tpu.memory_space<vmem>>, %arg6: memref<1x128xi32, #tpu.memory_space<vmem>>, %arg7: memref<1x128xf32, #tpu.memory_space<vmem>>) attributes {dimension_semantics = [#tpu.dimension_semantics<parallel>], iteration_bounds = array<i64: 1>, scalar_prefetch = 0 : i64, scratch_operands = 0 : i64, tpu.core_type = #tpu.core_type<tc>, window_params = [{transform_indices = @transform_0, window_bounds = array<i64: 128, 32>}, {pipeline_mode = #tpu.pipeline_mode<synchronous>, transform_indices = @transform_1, window_bounds = array<i64: 128, 32>}, {pipeline_mode = #tpu.pipeline_mode<synchronous>, transform_indices = @transform_2, window_bounds = array<i64: 128, 1>}, {pipeline_mode = #tpu.pipeline_mode<synchronous>, transform_indices = @transform_3, window_bounds = array<i64: 128, 1>}, {transform_indices = @transform_4, window_bounds = array<i64: 1, 128>}, {transform_indices = @transform_5, window_bounds = array<i64: 1, 128>}, {transform_indices = @transform_6, window_bounds = array<i64: 1, 128>}]} {
    %c0 = arith.constant 0 : index
    %c0_0 = arith.constant 0 : index
    %0 = vector.load %arg1[%c0, %c0_0] : memref<128x32xf32, #tpu.memory_space<vmem>>, vector<128x32xf32>
    %1 = arith.mulf %0, %0 : vector<128x32xf32>
    %cst = arith.constant dense<0.000000e+00> : vector<128xf32>
    %2 = vector.multi_reduction <add>, %1, %cst [1] : vector<128x32xf32> to vector<128xf32>
    %3 = vector.shape_cast %2 : vector<128xf32> to vector<128x1xf32>
    %cst_1 = arith.constant 1.000000e-24 : f32
    %4 = vector.broadcast %cst_1 : f32 to vector<128x1xf32>
    %5 = arith.maximumf %3, %4 : vector<128x1xf32>
    %6 = math.rsqrt %5 : vector<128x1xf32>
    %cst_2 = arith.constant 14.2857141 : f32
    %7 = vector.broadcast %cst_2 : f32 to vector<128x1xf32>
    %8 = arith.mulf %6, %7 : vector<128x1xf32>
    %9 = vector.broadcast %8 : vector<128x1xf32> to vector<128x32xf32>
    %10 = arith.mulf %0, %9 : vector<128x32xf32>
    %c0_3 = arith.constant 0 : index
    %c0_4 = arith.constant 0 : index
    %11 = vector.load %arg2[%c0_3, %c0_4] : memref<128x32xf32, #tpu.memory_space<vmem>>, vector<128x32xf32>
    %cst_5 = arith.constant dense<0.000000e+00> : vector<128x128xf32>
    %12 = tpu.matmul %11, %10, %cst_5 {dimension_numbers = #tpu.dot_dimension_numbers<[1], [1], [0], [0], [0, 0, 1, 0], [], []>} : vector<128x32xf32>, vector<128x32xf32>, vector<128x128xf32> -> vector<128x128xf32>
    %c0_6 = arith.constant 0 : index
    %c0_7 = arith.constant 0 : index
    %13 = vector.load %arg5[%c0_6, %c0_7] : memref<1x128xi32, #tpu.memory_space<vmem>>, vector<1x128xi32>
    %c0_8 = arith.constant 0 : index
    %c0_9 = arith.constant 0 : index
    %14 = vector.load %arg6[%c0_8, %c0_9] : memref<1x128xi32, #tpu.memory_space<vmem>>, vector<1x128xi32>
    %c0_10 = arith.constant 0 : index
    %c0_11 = arith.constant 0 : index
    %15 = vector.load %arg3[%c0_10, %c0_11] : memref<128x1xi32, #tpu.memory_space<vmem>>, vector<128x1xi32>
    %c0_12 = arith.constant 0 : index
    %c0_13 = arith.constant 0 : index
    %16 = vector.load %arg4[%c0_12, %c0_13] : memref<128x1xi32, #tpu.memory_space<vmem>>, vector<128x1xi32>
    %17 = vector.broadcast %15 : vector<128x1xi32> to vector<128x128xi32>
    %18 = vector.broadcast %13 : vector<1x128xi32> to vector<128x128xi32>
    %19 = arith.cmpi eq, %17, %18 : vector<128x128xi32>
    %20 = vector.broadcast %16 : vector<128x1xi32> to vector<128x128xi32>
    %21 = vector.broadcast %14 : vector<1x128xi32> to vector<128x128xi32>
    %22 = arith.cmpi ne, %20, %21 : vector<128x128xi32>
    %23 = arith.andi %19, %22 : vector<128x128xi1>
    %24 = vector.broadcast %15 : vector<128x1xi32> to vector<128x128xi32>
    %25 = vector.broadcast %13 : vector<1x128xi32> to vector<128x128xi32>
    %26 = arith.cmpi ne, %24, %25 : vector<128x128xi32>
    %cst_14 = arith.constant 1.000000e+00 : f32
    %cst_15 = arith.constant 0.000000e+00 : f32
    %27 = vector.broadcast %cst_14 : f32 to vector<128x128xf32>
    %28 = vector.broadcast %cst_15 : f32 to vector<128x128xf32>
    %29 = arith.select %23, %27, %28 : vector<128x128xi1>, vector<128x128xf32>
    %cst_16 = arith.constant dense<0.000000e+00> : vector<128xf32>
    %30 = vector.multi_reduction <add>, %29, %cst_16 [0] : vector<128x128xf32> to vector<128xf32>
    %31 = vector.shape_cast %30 : vector<128xf32> to vector<1x128xf32>
    %cst_17 = arith.constant 0.000000e+00 : f32
    %32 = vector.broadcast %cst_17 : f32 to vector<128x128xf32>
    %33 = arith.select %23, %12, %32 : vector<128x128xi1>, vector<128x128xf32>
    %cst_18 = arith.constant dense<0.000000e+00> : vector<128xf32>
    %34 = vector.multi_reduction <add>, %33, %cst_18 [0] : vector<128x128xf32> to vector<128xf32>
    %35 = vector.shape_cast %34 : vector<128xf32> to vector<1x128xf32>
    %cst_19 = arith.constant 0xFF800000 : f32
    %36 = vector.broadcast %cst_19 : f32 to vector<128x128xf32>
    %37 = arith.select %23, %12, %36 : vector<128x128xi1>, vector<128x128xf32>
    %cst_20 = arith.constant dense<0xFF800000> : vector<128xf32>
    %38 = vector.multi_reduction <maximumf>, %37, %cst_20 [0] : vector<128x128xf32> to vector<128xf32>
    %39 = vector.shape_cast %38 : vector<128xf32> to vector<1x128xf32>
    %40 = vector.broadcast %39 : vector<1x128xf32> to vector<128x128xf32>
    %41 = arith.subf %12, %40 : vector<128x128xf32>
    %cst_21 = arith.constant 0xFF800000 : f32
    %42 = vector.broadcast %cst_21 : f32 to vector<128x128xf32>
    %43 = arith.select %23, %41, %42 : vector<128x128xi1>, vector<128x128xf32>
    %44 = math.exp %43 : vector<128x128xf32>
    %cst_22 = arith.constant dense<0.000000e+00> : vector<128xf32>
    %45 = vector.multi_reduction <add>, %44, %cst_22 [0] : vector<128x128xf32> to vector<128xf32>
    %46 = vector.shape_cast %45 : vector<128xf32> to vector<1x128xf32>
    %cst_23 = arith.constant 0x4B18967F : f32
    %47 = vector.broadcast %cst_23 : f32 to vector<128x128xf32>
    %48 = arith.subf %12, %47 : vector<128x128xf32>
    %49 = arith.select %26, %12, %48 : vector<128x128xi1>, vector<128x128xf32>
    %50 = tpu.iota {dimensions = array<i32: 0>} : vector<128x128xi32>
    %c0_i32 = arith.constant 0 : i32
    %cst_24 = arith.constant dense<0xFF800000> : vector<128xf32>
    %51 = vector.multi_reduction <maximumf>, %49, %cst_24 [0] : vector<128x128xf32> to vector<128xf32>
    %52 = vector.shape_cast %51 : vector<128xf32> to vector<1x128xf32>
    %53 = vector.broadcast %52 : vector<1x128xf32> to vector<128x128xf32>
    %54 = arith.cmpf oeq, %49, %53 : vector<128x128xf32>
    %c128_i32 = arith.constant 128 : i32
    %55 = vector.broadcast %c128_i32 : i32 to vector<128x128xi32>
    %56 = arith.select %54, %50, %55 : vector<128x128xi1>, vector<128x128xi32>
    %cst_25 = arith.constant dense<2147483647> : vector<128xi32>
    %57 = vector.multi_reduction <minsi>, %56, %cst_25 [0] : vector<128x128xi32> to vector<128xi32>
    %58 = vector.shape_cast %57 : vector<128xi32> to vector<1x128xi32>
    %59 = vector.broadcast %58 : vector<1x128xi32> to vector<128x128xi32>
    %60 = arith.cmpi eq, %50, %59 : vector<128x128xi32>
    %cst_26 = arith.constant 0.000000e+00 : f32
    %61 = vector.broadcast %cst_26 : f32 to vector<128x128xf32>
    %62 = arith.select %60, %12, %61 : vector<128x128xi1>, vector<128x128xf32>
    %cst_27 = arith.constant dense<0.000000e+00> : vector<128xf32>
    %63 = vector.multi_reduction <add>, %62, %cst_27 [0] : vector<128x128xf32> to vector<128xf32>
    %64 = vector.shape_cast %63 : vector<128xf32> to vector<1x128xf32>
    %65 = arith.maximumf %39, %64 : vector<1x128xf32>
    %66 = arith.subf %39, %65 : vector<1x128xf32>
    %67 = math.exp %66 : vector<1x128xf32>
    %68 = arith.mulf %46, %67 : vector<1x128xf32>
    %69 = arith.subf %64, %65 : vector<1x128xf32>
    %70 = math.exp %69 : vector<1x128xf32>
    %71 = arith.addf %68, %70 : vector<1x128xf32>
    %cst_28 = arith.constant 0xFF800000 : f32
    %72 = vector.broadcast %cst_28 : f32 to vector<128x128xf32>
    %73 = arith.select %60, %72, %49 : vector<128x128xi1>, vector<128x128xf32>
    %c1_i32 = arith.constant 1 : i32
    %cst_29 = arith.constant dense<0xFF800000> : vector<128xf32>
    %74 = vector.multi_reduction <maximumf>, %73, %cst_29 [0] : vector<128x128xf32> to vector<128xf32>
    %75 = vector.shape_cast %74 : vector<128xf32> to vector<1x128xf32>
    %76 = vector.broadcast %75 : vector<1x128xf32> to vector<128x128xf32>
    %77 = arith.cmpf oeq, %73, %76 : vector<128x128xf32>
    %c128_i32_30 = arith.constant 128 : i32
    %78 = vector.broadcast %c128_i32_30 : i32 to vector<128x128xi32>
    %79 = arith.select %77, %50, %78 : vector<128x128xi1>, vector<128x128xi32>
    %cst_31 = arith.constant dense<2147483647> : vector<128xi32>
    %80 = vector.multi_reduction <minsi>, %79, %cst_31 [0] : vector<128x128xi32> to vector<128xi32>
    %81 = vector.shape_cast %80 : vector<128xi32> to vector<1x128xi32>
    %82 = vector.broadcast %81 : vector<1x128xi32> to vector<128x128xi32>
    %83 = arith.cmpi eq, %50, %82 : vector<128x128xi32>
    %cst_32 = arith.constant 0.000000e+00 : f32
    %84 = vector.broadcast %cst_32 : f32 to vector<128x128xf32>
    %85 = arith.select %83, %12, %84 : vector<128x128xi1>, vector<128x128xf32>
    %cst_33 = arith.constant dense<0.000000e+00> : vector<128xf32>
    %86 = vector.multi_reduction <add>, %85, %cst_33 [0] : vector<128x128xf32> to vector<128xf32>
    %87 = vector.shape_cast %86 : vector<128xf32> to vector<1x128xf32>
    %88 = arith.maximumf %65, %87 : vector<1x128xf32>
    %89 = arith.subf %65, %88 : vector<1x128xf32>
    %90 = math.exp %89 : vector<1x128xf32>
    %91 = arith.mulf %71, %90 : vector<1x128xf32>
    %92 = arith.subf %87, %88 : vector<1x128xf32>
    %93 = math.exp %92 : vector<1x128xf32>
    %94 = arith.addf %91, %93 : vector<1x128xf32>
    %cst_34 = arith.constant 0xFF800000 : f32
    %95 = vector.broadcast %cst_34 : f32 to vector<128x128xf32>
    %96 = arith.select %83, %95, %73 : vector<128x128xi1>, vector<128x128xf32>
    %c2_i32 = arith.constant 2 : i32
    %cst_35 = arith.constant dense<0xFF800000> : vector<128xf32>
    %97 = vector.multi_reduction <maximumf>, %96, %cst_35 [0] : vector<128x128xf32> to vector<128xf32>
    %98 = vector.shape_cast %97 : vector<128xf32> to vector<1x128xf32>
    %99 = vector.broadcast %98 : vector<1x128xf32> to vector<128x128xf32>
    %100 = arith.cmpf oeq, %96, %99 : vector<128x128xf32>
    %c128_i32_36 = arith.constant 128 : i32
    %101 = vector.broadcast %c128_i32_36 : i32 to vector<128x128xi32>
    %102 = arith.select %100, %50, %101 : vector<128x128xi1>, vector<128x128xi32>
    %cst_37 = arith.constant dense<2147483647> : vector<128xi32>
    %103 = vector.multi_reduction <minsi>, %102, %cst_37 [0] : vector<128x128xi32> to vector<128xi32>
    %104 = vector.shape_cast %103 : vector<128xi32> to vector<1x128xi32>
    %105 = vector.broadcast %104 : vector<1x128xi32> to vector<128x128xi32>
    %106 = arith.cmpi eq, %50, %105 : vector<128x128xi32>
    %cst_38 = arith.constant 0.000000e+00 : f32
    %107 = vector.broadcast %cst_38 : f32 to vector<128x128xf32>
    %108 = arith.select %106, %12, %107 : vector<128x128xi1>, vector<128x128xf32>
    %cst_39 = arith.constant dense<0.000000e+00> : vector<128xf32>
    %109 = vector.multi_reduction <add>, %108, %cst_39 [0] : vector<128x128xf32> to vector<128xf32>
    %110 = vector.shape_cast %109 : vector<128xf32> to vector<1x128xf32>
    %111 = arith.maximumf %88, %110 : vector<1x128xf32>
    %112 = arith.subf %88, %111 : vector<1x128xf32>
    %113 = math.exp %112 : vector<1x128xf32>
    %114 = arith.mulf %94, %113 : vector<1x128xf32>
    %115 = arith.subf %110, %111 : vector<1x128xf32>
    %116 = math.exp %115 : vector<1x128xf32>
    %117 = arith.addf %114, %116 : vector<1x128xf32>
    %cst_40 = arith.constant 0xFF800000 : f32
    %118 = vector.broadcast %cst_40 : f32 to vector<128x128xf32>
    %119 = arith.select %106, %118, %96 : vector<128x128xi1>, vector<128x128xf32>
    %c3_i32 = arith.constant 3 : i32
    %cst_41 = arith.constant dense<0xFF800000> : vector<128xf32>
    %120 = vector.multi_reduction <maximumf>, %119, %cst_41 [0] : vector<128x128xf32> to vector<128xf32>
    %121 = vector.shape_cast %120 : vector<128xf32> to vector<1x128xf32>
    %122 = vector.broadcast %121 : vector<1x128xf32> to vector<128x128xf32>
    %123 = arith.cmpf oeq, %119, %122 : vector<128x128xf32>
    %c128_i32_42 = arith.constant 128 : i32
    %124 = vector.broadcast %c128_i32_42 : i32 to vector<128x128xi32>
    %125 = arith.select %123, %50, %124 : vector<128x128xi1>, vector<128x128xi32>
    %cst_43 = arith.constant dense<2147483647> : vector<128xi32>
    %126 = vector.multi_reduction <minsi>, %125, %cst_43 [0] : vector<128x128xi32> to vector<128xi32>
    %127 = vector.shape_cast %126 : vector<128xi32> to vector<1x128xi32>
    %128 = vector.broadcast %127 : vector<1x128xi32> to vector<128x128xi32>
    %129 = arith.cmpi eq, %50, %128 : vector<128x128xi32>
    %cst_44 = arith.constant 0.000000e+00 : f32
    %130 = vector.broadcast %cst_44 : f32 to vector<128x128xf32>
    %131 = arith.select %129, %12, %130 : vector<128x128xi1>, vector<128x128xf32>
    %cst_45 = arith.constant dense<0.000000e+00> : vector<128xf32>
    %132 = vector.multi_reduction <add>, %131, %cst_45 [0] : vector<128x128xf32> to vector<128xf32>
    %133 = vector.shape_cast %132 : vector<128xf32> to vector<1x128xf32>
    %134 = arith.maximumf %111, %133 : vector<1x128xf32>
    %135 = arith.subf %111, %134 : vector<1x128xf32>
    %136 = math.exp %135 : vector<1x128xf32>
    %137 = arith.mulf %117, %136 : vector<1x128xf32>
    %138 = arith.subf %133, %134 : vector<1x128xf32>
    %139 = math.exp %138 : vector<1x128xf32>
    %140 = arith.addf %137, %139 : vector<1x128xf32>
    %cst_46 = arith.constant 0xFF800000 : f32
    %141 = vector.broadcast %cst_46 : f32 to vector<128x128xf32>
    %142 = arith.select %129, %141, %119 : vector<128x128xi1>, vector<128x128xf32>
    %c4_i32 = arith.constant 4 : i32
    %cst_47 = arith.constant dense<0xFF800000> : vector<128xf32>
    %143 = vector.multi_reduction <maximumf>, %142, %cst_47 [0] : vector<128x128xf32> to vector<128xf32>
    %144 = vector.shape_cast %143 : vector<128xf32> to vector<1x128xf32>
    %145 = vector.broadcast %144 : vector<1x128xf32> to vector<128x128xf32>
    %146 = arith.cmpf oeq, %142, %145 : vector<128x128xf32>
    %c128_i32_48 = arith.constant 128 : i32
    %147 = vector.broadcast %c128_i32_48 : i32 to vector<128x128xi32>
    %148 = arith.select %146, %50, %147 : vector<128x128xi1>, vector<128x128xi32>
    %cst_49 = arith.constant dense<2147483647> : vector<128xi32>
    %149 = vector.multi_reduction <minsi>, %148, %cst_49 [0] : vector<128x128xi32> to vector<128xi32>
    %150 = vector.shape_cast %149 : vector<128xi32> to vector<1x128xi32>
    %151 = vector.broadcast %150 : vector<1x128xi32> to vector<128x128xi32>
    %152 = arith.cmpi eq, %50, %151 : vector<128x128xi32>
    %cst_50 = arith.constant 0.000000e+00 : f32
    %153 = vector.broadcast %cst_50 : f32 to vector<128x128xf32>
    %154 = arith.select %152, %12, %153 : vector<128x128xi1>, vector<128x128xf32>
    %cst_51 = arith.constant dense<0.000000e+00> : vector<128xf32>
    %155 = vector.multi_reduction <add>, %154, %cst_51 [0] : vector<128x128xf32> to vector<128xf32>
    %156 = vector.shape_cast %155 : vector<128xf32> to vector<1x128xf32>
    %157 = arith.maximumf %134, %156 : vector<1x128xf32>
    %158 = arith.subf %134, %157 : vector<1x128xf32>
    %159 = math.exp %158 : vector<1x128xf32>
    %160 = arith.mulf %140, %159 : vector<1x128xf32>
    %161 = arith.subf %156, %157 : vector<1x128xf32>
    %162 = math.exp %161 : vector<1x128xf32>
    %163 = arith.addf %160, %162 : vector<1x128xf32>
    %cst_52 = arith.constant 0xFF800000 : f32
    %164 = vector.broadcast %cst_52 : f32 to vector<128x128xf32>
    %165 = arith.select %152, %164, %142 : vector<128x128xi1>, vector<128x128xf32>
    %c5_i32 = arith.constant 5 : i32
    %cst_53 = arith.constant dense<0xFF800000> : vector<128xf32>
    %166 = vector.multi_reduction <maximumf>, %165, %cst_53 [0] : vector<128x128xf32> to vector<128xf32>
    %167 = vector.shape_cast %166 : vector<128xf32> to vector<1x128xf32>
    %168 = vector.broadcast %167 : vector<1x128xf32> to vector<128x128xf32>
    %169 = arith.cmpf oeq, %165, %168 : vector<128x128xf32>
    %c128_i32_54 = arith.constant 128 : i32
    %170 = vector.broadcast %c128_i32_54 : i32 to vector<128x128xi32>
    %171 = arith.select %169, %50, %170 : vector<128x128xi1>, vector<128x128xi32>
    %cst_55 = arith.constant dense<2147483647> : vector<128xi32>
    %172 = vector.multi_reduction <minsi>, %171, %cst_55 [0] : vector<128x128xi32> to vector<128xi32>
    %173 = vector.shape_cast %172 : vector<128xi32> to vector<1x128xi32>
    %174 = vector.broadcast %173 : vector<1x128xi32> to vector<128x128xi32>
    %175 = arith.cmpi eq, %50, %174 : vector<128x128xi32>
    %cst_56 = arith.constant 0.000000e+00 : f32
    %176 = vector.broadcast %cst_56 : f32 to vector<128x128xf32>
    %177 = arith.select %175, %12, %176 : vector<128x128xi1>, vector<128x128xf32>
    %cst_57 = arith.constant dense<0.000000e+00> : vector<128xf32>
    %178 = vector.multi_reduction <add>, %177, %cst_57 [0] : vector<128x128xf32> to vector<128xf32>
    %179 = vector.shape_cast %178 : vector<128xf32> to vector<1x128xf32>
    %180 = arith.maximumf %157, %179 : vector<1x128xf32>
    %181 = arith.subf %157, %180 : vector<1x128xf32>
    %182 = math.exp %181 : vector<1x128xf32>
    %183 = arith.mulf %163, %182 : vector<1x128xf32>
    %184 = arith.subf %179, %180 : vector<1x128xf32>
    %185 = math.exp %184 : vector<1x128xf32>
    %186 = arith.addf %183, %185 : vector<1x128xf32>
    %cst_58 = arith.constant 0xFF800000 : f32
    %187 = vector.broadcast %cst_58 : f32 to vector<128x128xf32>
    %188 = arith.select %175, %187, %165 : vector<128x128xi1>, vector<128x128xf32>
    %c6_i32 = arith.constant 6 : i32
    %cst_59 = arith.constant dense<0xFF800000> : vector<128xf32>
    %189 = vector.multi_reduction <maximumf>, %188, %cst_59 [0] : vector<128x128xf32> to vector<128xf32>
    %190 = vector.shape_cast %189 : vector<128xf32> to vector<1x128xf32>
    %191 = vector.broadcast %190 : vector<1x128xf32> to vector<128x128xf32>
    %192 = arith.cmpf oeq, %188, %191 : vector<128x128xf32>
    %c128_i32_60 = arith.constant 128 : i32
    %193 = vector.broadcast %c128_i32_60 : i32 to vector<128x128xi32>
    %194 = arith.select %192, %50, %193 : vector<128x128xi1>, vector<128x128xi32>
    %cst_61 = arith.constant dense<2147483647> : vector<128xi32>
    %195 = vector.multi_reduction <minsi>, %194, %cst_61 [0] : vector<128x128xi32> to vector<128xi32>
    %196 = vector.shape_cast %195 : vector<128xi32> to vector<1x128xi32>
    %197 = vector.broadcast %196 : vector<1x128xi32> to vector<128x128xi32>
    %198 = arith.cmpi eq, %50, %197 : vector<128x128xi32>
    %cst_62 = arith.constant 0.000000e+00 : f32
    %199 = vector.broadcast %cst_62 : f32 to vector<128x128xf32>
    %200 = arith.select %198, %12, %199 : vector<128x128xi1>, vector<128x128xf32>
    %cst_63 = arith.constant dense<0.000000e+00> : vector<128xf32>
    %201 = vector.multi_reduction <add>, %200, %cst_63 [0] : vector<128x128xf32> to vector<128xf32>
    %202 = vector.shape_cast %201 : vector<128xf32> to vector<1x128xf32>
    %203 = arith.maximumf %180, %202 : vector<1x128xf32>
    %204 = arith.subf %180, %203 : vector<1x128xf32>
    %205 = math.exp %204 : vector<1x128xf32>
    %206 = arith.mulf %186, %205 : vector<1x128xf32>
    %207 = arith.subf %202, %203 : vector<1x128xf32>
    %208 = math.exp %207 : vector<1x128xf32>
    %209 = arith.addf %206, %208 : vector<1x128xf32>
    %cst_64 = arith.constant 0xFF800000 : f32
    %210 = vector.broadcast %cst_64 : f32 to vector<128x128xf32>
    %211 = arith.select %198, %210, %188 : vector<128x128xi1>, vector<128x128xf32>
    %c7_i32 = arith.constant 7 : i32
    %cst_65 = arith.constant dense<0xFF800000> : vector<128xf32>
    %212 = vector.multi_reduction <maximumf>, %211, %cst_65 [0] : vector<128x128xf32> to vector<128xf32>
    %213 = vector.shape_cast %212 : vector<128xf32> to vector<1x128xf32>
    %214 = vector.broadcast %213 : vector<1x128xf32> to vector<128x128xf32>
    %215 = arith.cmpf oeq, %211, %214 : vector<128x128xf32>
    %c128_i32_66 = arith.constant 128 : i32
    %216 = vector.broadcast %c128_i32_66 : i32 to vector<128x128xi32>
    %217 = arith.select %215, %50, %216 : vector<128x128xi1>, vector<128x128xi32>
    %cst_67 = arith.constant dense<2147483647> : vector<128xi32>
    %218 = vector.multi_reduction <minsi>, %217, %cst_67 [0] : vector<128x128xi32> to vector<128xi32>
    %219 = vector.shape_cast %218 : vector<128xi32> to vector<1x128xi32>
    %220 = vector.broadcast %219 : vector<1x128xi32> to vector<128x128xi32>
    %221 = arith.cmpi eq, %50, %220 : vector<128x128xi32>
    %cst_68 = arith.constant 0.000000e+00 : f32
    %222 = vector.broadcast %cst_68 : f32 to vector<128x128xf32>
    %223 = arith.select %221, %12, %222 : vector<128x128xi1>, vector<128x128xf32>
    %cst_69 = arith.constant dense<0.000000e+00> : vector<128xf32>
    %224 = vector.multi_reduction <add>, %223, %cst_69 [0] : vector<128x128xf32> to vector<128xf32>
    %225 = vector.shape_cast %224 : vector<128xf32> to vector<1x128xf32>
    %226 = arith.maximumf %203, %225 : vector<1x128xf32>
    %227 = arith.subf %203, %226 : vector<1x128xf32>
    %228 = math.exp %227 : vector<1x128xf32>
    %229 = arith.mulf %209, %228 : vector<1x128xf32>
    %230 = arith.subf %225, %226 : vector<1x128xf32>
    %231 = math.exp %230 : vector<1x128xf32>
    %232 = arith.addf %229, %231 : vector<1x128xf32>
    %cst_70 = arith.constant 0xFF800000 : f32
    %233 = vector.broadcast %cst_70 : f32 to vector<128x128xf32>
    %234 = arith.select %221, %233, %211 : vector<128x128xi1>, vector<128x128xf32>
    %235 = math.log %232 : vector<1x128xf32>
    %236 = arith.addf %226, %235 : vector<1x128xf32>
    %cst_71 = arith.constant 1.000000e+00 : f32
    %237 = vector.broadcast %cst_71 : f32 to vector<1x128xf32>
    %238 = arith.maximumf %31, %237 : vector<1x128xf32>
    %239 = arith.divf %35, %238 : vector<1x128xf32>
    %cst_72 = arith.constant 0.000000e+00 : f32
    %240 = vector.broadcast %cst_72 : f32 to vector<1x128xf32>
    %241 = arith.cmpf ogt, %31, %240 : vector<1x128xf32>
    %242 = arith.subf %236, %239 : vector<1x128xf32>
    %cst_73 = arith.constant 0.000000e+00 : f32
    %243 = vector.broadcast %cst_73 : f32 to vector<1x128xf32>
    %244 = arith.select %241, %242, %243 : vector<1x128xi1>, vector<1x128xf32>
    %c0_74 = arith.constant 0 : index
    %c0_75 = arith.constant 0 : index
    %245 = vector.load %arg7[%c0_74, %c0_75] : memref<1x128xf32, #tpu.memory_space<vmem>>, vector<1x128xf32>
    tpu.vector_store %arg7[%c0_74, %c0_75], %244 {strides = array<i32>} : memref<1x128xf32, #tpu.memory_space<vmem>>, vector<1x128xf32>,
    return
  }
  func.func @transform_0(%arg0: i32) -> (i32, i32) {
    %c0_i32 = arith.constant 0 : i32
    %c0_i32_0 = arith.constant 0 : i32
    return %arg0, %c0_i32 : i32, i32
  }
  func.func @transform_1(%arg0: i32) -> (i32, i32) {
    %c0_i32 = arith.constant 0 : i32
    %c0_i32_0 = arith.constant 0 : i32
    %c0_i32_1 = arith.constant 0 : i32
    return %c0_i32, %c0_i32_0 : i32, i32
  }
  func.func @transform_2(%arg0: i32) -> (i32, i32) {
    %c0_i32 = arith.constant 0 : i32
    %c0_i32_0 = arith.constant 0 : i32
    %c0_i32_1 = arith.constant 0 : i32
    return %c0_i32, %c0_i32_0 : i32, i32
  }
  func.func @transform_3(%arg0: i32) -> (i32, i32) {
    %c0_i32 = arith.constant 0 : i32
    %c0_i32_0 = arith.constant 0 : i32
    %c0_i32_1 = arith.constant 0 : i32
    return %c0_i32, %c0_i32_0 : i32, i32
  }
  func.func @transform_4(%arg0: i32) -> (i32, i32) {
    %c0_i32 = arith.constant 0 : i32
    %c0_i32_0 = arith.constant 0 : i32
    return %c0_i32, %arg0 : i32, i32
  }
  func.func @transform_5(%arg0: i32) -> (i32, i32) {
    %c0_i32 = arith.constant 0 : i32
    %c0_i32_0 = arith.constant 0 : i32
    return %c0_i32, %arg0 : i32, i32
  }
  func.func @transform_6(%arg0: i32) -> (i32, i32) {
    %c0_i32 = arith.constant 0 : i32
    %c0_i32_0 = arith.constant 0 : i32
    return %c0_i32, %arg0 : i32, i32
  }
}

</mosaic_0001>

<bundles_post_ra>
// kernel: tpu_custom_call.1
= control target key start
LH: loop header
LB: loop body
LE: loop exit
PB: predicated region body
PF: predicated region fallthrough
CT: control target
= control target key end

     0   :  { %vm56_vm0 = vcmask 261120   ;;  %s5678_s0 = inlined_call_operand.vmem [shape: f32[128,32], index: 0, kind: input, shape index: {}]   ;;  %s5679_s1 = inlined_call_operand.vmem [shape: f32[128,32], index: 1, kind: input, shape index: {}]   ;;  %s5680_s2 = inlined_call_operand.vmem [shape: s32[128,1], index: 2, kind: input, shape index: {}]   ;;  %s5681_s3 = inlined_call_operand.vmem [shape: s32[128,1], index: 3, kind: input, shape index: {}]   ;;  %s5682_s4 = inlined_call_operand.vmem [shape: s32[1,128], index: 4, kind: input, shape index: {}]   ;;  %s5683_s5 = inlined_call_operand.vmem [shape: s32[1,128], index: 5, kind: input, shape index: {}]   ;;  %s5684_s6 = inlined_call_operand.hbm [shape: f32[1,128], index: 6, kind: output, shape index: {}]  }
   0x1   :  { %v2613_v0 = vld [vmem:[%s5678_s0] sm:$0xff]  ;;  %v2618_v1 = vld [vmem:[%s5678_s0 + $0x10] sm:$0xff]  ;;  %v2623_v2 = vld [vmem:[%s5678_s0 + $0x8] sm:$0xff] }
   0x2   :  { %v40_v3 = vmul.f32 %v2613_v0, %v2613_v0  ;;  %v42_v4 = vmul.f32 %v2618_v1, %v2618_v1  ;;  %v41_v5 = vmul.f32 %v2623_v2, %v2623_v2  ;;  %v2634_v6 = vld [vmem:[%s5678_s0 + $0x18] sm:$0xff]  ;;  %v2641_v8 = vld [vmem:[%s5678_s0 + $0x28] sm:$0xff]  ;;  %v2646_v9 = vld [vmem:[%s5678_s0 + $0x20] sm:$0xff] }
   0x3   :  { %v43_v7 = vmul.f32 %v2634_v6, %v2634_v6  ;;  %v45_v14 = vmul.f32 %v2641_v8, %v2641_v8  ;;  %v44_v15 = vmul.f32 %v2646_v9, %v2646_v9 }
   0x4   :  { %v57_v10 = vsel %vm56_vm0, %v40_v3, 0.0  ;;  %v63_v11 = vsel %vm56_vm0, %v42_v4, 0.0  ;;  %v60_v12 = vsel %vm56_vm0, %v41_v5, 0.0 }
   0x5   :  { %58 = vadd.xlane.f32.xlu0 %v57_v10  ;;  %64 = vadd.xlane.f32.xlu1 %v63_v11  ;;  %v66_v13 = vsel %vm56_vm0, %v43_v7, 0.0 }
   0x6   :  { %11 = vsyncpa [#allocation3], 0  ;;  %v2659_v16 = vld [vmem:[%s5678_s0 + $0x38] sm:$0xff]  ;;  %v2664_v17 = vld [vmem:[%s5678_s0 + $0x30] sm:$0xff]  ;;  %v72_v18 = vsel %vm56_vm0, %v45_v14, 0.0  ;;  %v69_v19 = vsel %vm56_vm0, %v44_v15, 0.0 }
   0x7   :  { %v47_v20 = vmul.f32 %v2659_v16, %v2659_v16  ;;  %v46_v21 = vmul.f32 %v2664_v17, %v2664_v17  ;;  %v2675_v22 = vld [vmem:[%s5678_s0 + $0x48] sm:$0xff]  ;;  %v2680_v23 = vld [vmem:[%s5678_s0 + $0x40] sm:$0xff]  ;;  %v2691_v28 = vld [vmem:[%s5678_s0 + $0x58] sm:$0xff]  ;;  %v2572_v49 = vmov 0  }
   0x8   :  { %v49_v26 = vmul.f32 %v2675_v22, %v2675_v22  ;;  %v48_v27 = vmul.f32 %v2680_v23, %v2680_v23  ;;  %v2696_v29 = vld [vmem:[%s5678_s0 + $0x50] sm:$0xff]  ;;  %v51_v32 = vmul.f32 %v2691_v28, %v2691_v28  ;;  %v2707_v34 = vld [vmem:[%s5678_s0 + $0x68] sm:$0xff]  ;;  %v2712_v35 = vld [vmem:[%s5678_s0 + $0x60] sm:$0xff]  ;;  %2447 = vset.pattern.permute.xlu1 %v2572_v49  ;;  %2446 = vset.pattern.permute.xlu0 %v2572_v49 }
   0x9   :  { %61 = vadd.xlane.f32.xlu0 %v60_v12  ;;  %67 = vadd.xlane.f32.xlu1 %v66_v13  ;;  %v78_v24 = vsel %vm56_vm0, %v47_v20, 0.0  ;;  %v75_v25 = vsel %vm56_vm0, %v46_v21, 0.0  ;;  %v50_v33 = vmul.f32 %v2696_v29, %v2696_v29  ;;  %v53_v38 = vmul.f32 %v2707_v34, %v2707_v34  ;;  %v2723_v40 = vld [vmem:[%s5678_s0 + $0x78] sm:$0xff]  ;;  %v2728_v41 = vld [vmem:[%s5678_s0 + $0x70] sm:$0xff]  ;;  %v429_v48 = vld [vmem:[%s5680_s2 + $0x8] sm:$0xff] }
   0xa   :  { %v84_v30 = vsel %vm56_vm0, %v49_v26, 0.0  ;;  %v81_v31 = vsel %vm56_vm0, %v48_v27, 0.0  ;;  %v90_v36 = vsel %vm56_vm0, %v51_v32, 0.0  ;;  %v52_v39 = vmul.f32 %v2712_v35, %v2712_v35  ;;  %v430_v50 = vld [vmem:[%s5680_s2 + $0x10] sm:$0xff]  ;;  %v431_v51 = vld [vmem:[%s5680_s2 + $0x18] sm:$0xff]  ;;  %v432_v52 = vld [vmem:[%s5680_s2 + $0x20] sm:$0xff] }
   0xb   :  { %v87_v37 = vsel %vm56_vm0, %v50_v33, 0.0  ;;  %v96_v42 = vsel %vm56_vm0, %v53_v38, 0.0  ;;  %v55_v44 = vmul.f32 %v2723_v40, %v2723_v40  ;;  %v54_v45 = vmul.f32 %v2728_v41, %v2728_v41  ;;  %v169_v53 = vld [vmem:[%s5679_s1] sm:$0xff]  ;;  %v433_v55 = vld [vmem:[%s5680_s2 + $0x28] sm:$0xff]  ;;  %v434_v56 = vld [vmem:[%s5680_s2 + $0x30] sm:$0xff] }
   0xc   :  { %v93_v43 = vsel %vm56_vm0, %v52_v39, 0.0  ;;  %v177_v54 = vld [vmem:[%s5679_s1 + $0x40] sm:$0xff]  ;;  %2355 = vmatprep.mubr.msk.f32.mxu0 %vm56_vm0, %v169_v53  ;;  %v435_v57 = vld [vmem:[%s5680_s2 + $0x38] sm:$0xff]  ;;  %v437_v60 = vld [vmem:[%s5680_s2 + $0x48] sm:$0xff] }
   0xd   :  { %73 = vadd.xlane.f32.xlu1 %v72_v18  ;;  %70 = vadd.xlane.f32.xlu0 %v69_v19  ;;  %v102_v46 = vsel %vm56_vm0, %v55_v44, 0.0  ;;  %v99_v47 = vsel %vm56_vm0, %v54_v45, 0.0  ;;  %v428_v58 = vld [vmem:[%s5680_s2] sm:$0xff]  ;;  %v438_v61 = vld [vmem:[%s5680_s2 + $0x50] sm:$0xff]  ;;  %v439_v62 = vld [vmem:[%s5680_s2 + $0x58] sm:$0xff] }
   0xe   :  { %2367 = vmatprep.mubr.msk.f32.mxu1 %vm56_vm0, %v177_v54  ;;  %v436_v59 = vld [vmem:[%s5680_s2 + $0x40] sm:$0xff]  ;;  %v441_v3 = vld [vmem:[%s5680_s2 + $0x68] sm:$0xff]  ;;  %v442_v4 = vld [vmem:[%s5680_s2 + $0x70] sm:$0xff] }
   0xf   :  { %v440_v63 = vld [vmem:[%s5680_s2 + $0x60] sm:$0xff]  ;;  %v443_v5 = vld [vmem:[%s5680_s2 + $0x78] sm:$0xff]  ;;  %v445_v10 = vld [vmem:[%s5681_s3 + $0x8] sm:$0xff] }
  0x10   :  { %v444_v7 = vld [vmem:[%s5681_s3] sm:$0xff]  ;;  %v446_v11 = vld [vmem:[%s5681_s3 + $0x10] sm:$0xff]  ;;  %v447_v12 = vld [vmem:[%s5681_s3 + $0x18] sm:$0xff] }
  0x11   :  { %79 = vadd.xlane.f32.xlu1 %v78_v24  ;;  %76 = vadd.xlane.f32.xlu0 %v75_v25  ;;  %v448_v13 = vld [vmem:[%s5681_s3 + $0x20] sm:$0xff]  ;;  %v449_v14 = vld [vmem:[%s5681_s3 + $0x28] sm:$0xff]  ;;  %v450_v15 = vld [vmem:[%s5681_s3 + $0x30] sm:$0xff] }
  0x12   :  { %v451_v18 = vld [vmem:[%s5681_s3 + $0x38] sm:$0xff]  ;;  %v452_v19 = vld [vmem:[%s5681_s3 + $0x40] sm:$0xff]  ;;  %v453_v26 = vld [vmem:[%s5681_s3 + $0x48] sm:$0xff] }
  0x13   :  { %v454_v27 = vld [vmem:[%s5681_s3 + $0x50] sm:$0xff]  ;;  %v457_v44 = vld [vmem:[%s5681_s3 + $0x68] sm:$0xff]  ;;  %vm2848_vm1 = vmpackc.low %vm56_vm0, %vm56_vm0 }
  0x14   :  { %v458_v45 = vld [vmem:[%s5681_s3 + $0x70] sm:$0xff] }
  0x15   :  { %85 = vadd.xlane.f32.xlu1 %v84_v30  ;;  %82 = vadd.xlane.f32.xlu0 %v81_v31 }
  0x19   :  { %91 = vadd.xlane.f32.xlu1 %v90_v36  ;;  %88 = vadd.xlane.f32.xlu0 %v87_v37  ;;  %v455_v36 = vld [vmem:[%s5681_s3 + $0x58] sm:$0xff]  ;;  %v456_v37 = vld [vmem:[%s5681_s3 + $0x60] sm:$0xff] }
  0x1d   :  { %97 = vadd.xlane.f32.xlu1 %v96_v42  ;;  %94 = vadd.xlane.f32.xlu0 %v93_v43 }
  0x21   :  { %103 = vadd.xlane.f32.xlu1 %v102_v46  ;;  %100 = vadd.xlane.f32.xlu0 %v99_v47 }
  0x32   :  { %464 = vperm.xlu1 %2447, %v429_v48  }
  0x36   :  { %467 = vperm.xlu1 %2447, %v430_v50  }
  0x37   :  { %461 = vperm.xlu0 %2446, %v428_v58  }
  0x3a   :  { %470 = vperm.xlu1 %2447, %v431_v51  }
  0x3b   :  { %488 = vperm.xlu0 %2446, %v437_v60  }
  0x3e   :  { %473 = vperm.xlu1 %2447, %v432_v52   ;;  %v459_v52 = vld [vmem:[%s5681_s3 + $0x78] sm:$0xff] }
  0x3f   :  { %494 = vperm.xlu0 %2446, %v439_v62  }
  0x42   :  { %476 = vperm.xlu1 %2447, %v433_v55  }
  0x43   :  { %500 = vperm.xlu0 %2446, %v441_v3  }
  0x46   :  { %479 = vperm.xlu1 %2447, %v434_v56  }
  0x47   :  { %506 = vperm.xlu0 %2446, %v443_v5  }
  0x4a   :  { %482 = vperm.xlu1 %2447, %v435_v57  }
  0x4b   :  { %532 = vperm.xlu0 %2446, %v445_v10  }
  0x4e   :  { %485 = vperm.xlu1 %2447, %v436_v59  }
  0x4f   :  { %538 = vperm.xlu0 %2446, %v447_v12  }
  0x52   :  { %491 = vperm.xlu1 %2447, %v438_v61  }
  0x53   :  { %544 = vperm.xlu0 %2446, %v449_v14  }
  0x56   :  { %497 = vperm.xlu1 %2447, %v440_v63  }
  0x57   :  { %550 = vperm.xlu0 %2446, %v451_v18  }
  0x5a   :  { %503 = vperm.xlu1 %2447, %v442_v4  }
  0x5b   :  { %556 = vperm.xlu0 %2446, %v453_v26  }
  0x5e   :  { %529 = vperm.xlu1 %2447, %v444_v7   ;;  %v171_v7 = vld [vmem:[%s5679_s1 + $0x10] sm:$0xff] }
  0x5f   :  { %562 = vperm.xlu0 %2446, %v455_v36  }
  0x62   :  { %535 = vperm.xlu1 %2447, %v446_v11  }
  0x63   :  { %568 = vperm.xlu0 %2446, %v457_v44  }
  0x66   :  { %541 = vperm.xlu1 %2447, %v448_v13  }
  0x67   :  { %574 = vperm.xlu0 %2446, %v459_v52  }
  0x6a   :  { %547 = vperm.xlu1 %2447, %v450_v15  }
  0x6e   :  { %553 = vperm.xlu1 %2447, %v452_v19  }
  0x72   :  { %559 = vperm.xlu1 %2447, %v454_v27  }
  0x76   :  { %565 = vperm.xlu1 %2447, %v456_v37  }
  0x7a   :  { %571 = vperm.xlu1 %2447, %v458_v45  }
  0x92   :  { %v59_v20 = vpop.xlane.xlu0 %58  ;;  %v65_v21 = vpop.xlane.xlu1 %64 }
  0x93   :  { %v105_v24 = vmax.f32 %v59_v20, 1e-24  ;;  %v107_v25 = vmax.f32 %v65_v21, 1e-24 }
  0x95   :  { %2448 = vrsqrt.f32 %v105_v24 }
  0x96   :  { %2450 = vrsqrt.f32 %v107_v25  ;;  %v62_v30 = vpop.xlane.xlu0 %61  ;;  %v68_v31 = vpop.xlane.xlu1 %67 }
  0x97   :  { %v106_v32 = vmax.f32 %v62_v30, 1e-24  ;;  %v108_v33 = vmax.f32 %v68_v31, 1e-24 }
  0x99   :  { %2452 = vrsqrt.f32 %v106_v32 }
  0x9a   :  { %2454 = vrsqrt.f32 %v108_v33  ;;  %v74_v38 = vpop.xlane.xlu1 %73  ;;  %v71_v39 = vpop.xlane.xlu0 %70 }
  0x9b   :  { %v110_v42 = vmax.f32 %v74_v38, 1e-24  ;;  %v109_v43 = vmax.f32 %v71_v39, 1e-24 }
  0x9d   :  { %2456 = vrsqrt.f32 %v110_v42 }
  0x9e   :  { %2458 = vrsqrt.f32 %v109_v43  ;;  %v80_v46 = vpop.xlane.xlu1 %79  ;;  %v77_v47 = vpop.xlane.xlu0 %76 }
  0x9f   :  { %v2449_v48 = vpop.eup %2448  ;;  %v112_v49 = vmax.f32 %v80_v46, 1e-24  ;;  %v111_v50 = vmax.f32 %v77_v47, 1e-24 }
  0xa0   :  { %v2451_v51 = vpop.eup %2450  ;;  %v137_v54 = vmul.f32 14.285714, %v2449_v48 }
  0xa1   :  { %v139_v53 = vmul.f32 14.285714, %v2451_v51  ;;  %2460 = vrsqrt.f32 %v112_v49 }
  0xa2   :  { %2462 = vrsqrt.f32 %v111_v50  ;;  %v86_v56 = vpop.xlane.xlu1 %85  ;;  %v83_v59 = vpop.xlane.xlu0 %82  ;;  %v153_v62 = vmul.f32 %v137_v54, %v2613_v0 }
  0xa3   :  { %v2453_v55 = vpop.eup %2452  ;;  %v155_v60 = vmul.f32 %v139_v53, %v2618_v1  ;;  %v114_v3 = vmax.f32 %v86_v56, 1e-24  ;;  %v113_v10 = vmax.f32 %v83_v59, 1e-24 }
  0xa4   :  { %v2455_v57 = vpop.eup %2454  ;;  %v138_v58 = vmul.f32 14.285714, %v2453_v55 }
  0xa5   :  { %v140_v61 = vmul.f32 14.285714, %v2455_v57  ;;  %2464 = vrsqrt.f32 %v114_v3 }
  0xa6   :  { %v154_v63 = vmul.f32 %v138_v58, %v2623_v2  ;;  %2466 = vrsqrt.f32 %v113_v10  ;;  %v92_v0 = vpop.xlane.xlu1 %91  ;;  %v89_v18 = vpop.xlane.xlu0 %88 }
  0xa7   :  { %v2457_v4 = vpop.eup %2456  ;;  %v156_v5 = vmul.f32 %v140_v61, %v2634_v6  ;;  %v116_v20 = vmax.f32 %v92_v0, 1e-24  ;;  %v115_v21 = vmax.f32 %v89_v18, 1e-24  ;;  %v2909_v61 = vld [vmem:[%s5682_s4] ss:$0 sm:$0xff] }
  0xa8   :  { %v2459_v11 = vpop.eup %2458  ;;  %v142_v12 = vmul.f32 14.285714, %v2457_v4  ;;  %v2379_v13 = vpack.c.bf16 %v154_v63, %v153_v62  ;;  %v170_v4 = vld [vmem:[%s5679_s1 + $0x8] sm:$0xff]  ;;  %v181_v0 = vld [vmem:[%s5679_s1 + $0x60] sm:$0xff]  ;;  %v175_v18 = vld [vmem:[%s5679_s1 + $0x30] sm:$0xff] }
  0xa9   :  { %v141_v1 = vmul.f32 14.285714, %v2459_v11  ;;  %v2385_v14 = vpack.c.bf16 %v156_v5, %v155_v60  ;;  %2468 = vrsqrt.f32 %v116_v20  ;;  %v178_v5 = vld [vmem:[%s5679_s1 + $0x48] sm:$0xff]  ;;  %v179_v11 = vld [vmem:[%s5679_s1 + $0x50] sm:$0xff] }
  0xaa   :  { %2381 = vmatprep.subr.msk.bf16.mxu0 %vm2848_vm1, %v2379_v13  ;;  %2427 = vmatprep.subr.msk.bf16.mxu1 %vm2848_vm1, %v2379_v13  ;;  %v158_v6 = vmul.f32 %v142_v12, %v2641_v8  ;;  %2470 = vrsqrt.f32 %v115_v21  ;;  %v98_v8 = vpop.xlane.xlu1 %97  ;;  %v95_v31 = vpop.xlane.xlu0 %94  ;;  %v172_v12 = vld [vmem:[%s5679_s1 + $0x18] sm:$0xff] }
  0xab   :  { %2384 = vmatpush3.bf16.xpose.msk.msra.mxu0 %vm2848_vm1, %v2379_v13  ;;  %2435 = vmatpush3.bf16.xpose.msk.msra.mxu1 %vm2848_vm1, %v2379_v13  ;;  %v2461_v2 = vpop.eup %2460  ;;  %v157_v15 = vmul.f32 %v141_v1, %v2646_v9  ;;  %v118_v33 = vmax.f32 %v98_v8, 1e-24  ;;  %v117_v36 = vmax.f32 %v95_v31, 1e-24  ;;  %v180_v13 = vld [vmem:[%s5679_s1 + $0x58] sm:$0xff] }
  0xac   :  { %2387 = vmatprep.subr.msk.bf16.mxu0 %vm2848_vm1, %v2385_v14  ;;  %2428 = vmatprep.subr.msk.bf16.mxu1 %vm2848_vm1, %v2385_v14  ;;  %v2463_v19 = vpop.eup %2462  ;;  %v144_v24 = vmul.f32 14.285714, %v2461_v2  ;;  %v174_v2 = vld [vmem:[%s5679_s1 + $0x28] sm:$0xff]  ;;  %v176_v21 = vld [vmem:[%s5679_s1 + $0x38] sm:$0xff] }
  0xad   :  { %v143_v25 = vmul.f32 14.285714, %v2463_v19  ;;  %v2391_v26 = vpack.c.bf16 %v158_v6, %v157_v15  ;;  %2472 = vrsqrt.f32 %v118_v33  ;;  %v182_v6 = vld [vmem:[%s5679_s1 + $0x68] sm:$0xff]  ;;  %v183_v19 = vld [vmem:[%s5679_s1 + $0x70] sm:$0xff] }
  0xae   :  { %v160_v27 = vmul.f32 %v144_v24, %v2659_v16  ;;  %2474 = vrsqrt.f32 %v117_v36  ;;  %v104_v16 = vpop.xlane.xlu1 %103  ;;  %v101_v44 = vpop.xlane.xlu0 %100  ;;  %v184_v24 = vld [vmem:[%s5679_s1 + $0x78] sm:$0xff] }
  0xaf   :  { %v2465_v9 = vpop.eup %2464  ;;  %v159_v30 = vmul.f32 %v143_v25, %v2664_v17  ;;  %v120_v46 = vmax.f32 %v104_v16, 1e-24  ;;  %v119_v47 = vmax.f32 %v101_v44, 1e-24 }
  0xb0   :  { %v2467_v32 = vpop.eup %2466  ;;  %v146_v37 = vmul.f32 14.285714, %v2465_v9 }
  0xb1   :  { %v145_v38 = vmul.f32 14.285714, %v2467_v32  ;;  %v2397_v39 = vpack.c.bf16 %v160_v27, %v159_v30  ;;  %2476 = vrsqrt.f32 %v120_v46 }
  0xb2   :  { %v162_v42 = vmul.f32 %v146_v37, %v2675_v22  ;;  %2478 = vrsqrt.f32 %v119_v47  ;;  %v2921_v62 = vpop.permute.xlu1 %464  ;;  %v3064_v47 = vld [vmem:[%s5683_s5] ss:$0 sm:$0xff]  ;;  %s2574_s5 = smov [#allocation2]  }
  0xb3   :  { %2390 = vmatpush3.bf16.xpose.msk.msra.mxu0 %vm2848_vm1, %v2385_v14  ;;  %2436 = vmatpush3.bf16.xpose.msk.msra.mxu1 %vm2848_vm1, %v2385_v14  ;;  %v2469_v17 = vpop.eup %2468  ;;  %v161_v43 = vmul.f32 %v145_v38, %v2680_v23  ;;  %vm513_vm2 = vcmp.eq.s32.totalorder %v2921_v62, %v2909_v61  ;;  %v173_v14 = vld [vmem:[%s5679_s1 + $0x20] sm:$0xff]  ;;  %s2233_s22 = sshll.u32 %s2574_s5, 4  ;;  %s2234_s22 = int_to_ptr.vmem [resolvable:$true] %s2233_s22 }
  0xb4   :  { %2393 = vmatprep.subr.msk.bf16.mxu0 %vm2848_vm1, %v2391_v26  ;;  %2429 = vmatprep.subr.msk.bf16.mxu1 %vm2848_vm1, %v2391_v26  ;;  %v2471_v45 = vpop.eup %2470  ;;  %v148_v48 = vmul.f32 14.285714, %v2469_v17  ;;  %s2548_s2 = scalar_lea.vmem %s2234_s22, 16  ;;  %s2552_s23 = scalar_lea.vmem %s2234_s22, 32 }
  0xb5   :  { %v147_v49 = vmul.f32 14.285714, %v2471_v45  ;;  %v2403_v50 = vpack.c.bf16 %v162_v42, %v161_v43  ;;  %p2549_p0 = scmp.ne.s32.totalorder %s2234_s22, %s2548_s2  ;;  %p2553_p1 = scmp.lt.s32.totalorder %s2234_s22, %s2234_s22 }
  0xb6   :  { %v164_v23 = vmul.f32 %v148_v48, %v2691_v28  ;;  %v3007_v20 = vpop.permute.xlu0 %461  ;;  %p2554_p2 = scmp.lt.s32.totalorder %s2552_s23, %s2548_s2 }
  0xb7   :  { %v2473_v22 = vpop.eup %2472  ;;  %v163_v51 = vmul.f32 %v147_v49, %v2696_v29  ;;  %vm512_vm9 = vcmp.eq.s32.totalorder %v3007_v20, %v2909_v61 }
  0xb8   :  { %v2475_v52 = vpop.eup %2474  ;;  %v150_v53 = vmul.f32 14.285714, %v2473_v22  ;;  %p2555_p3 = por %p2554_p2, %p2553_p1 }
  0xb9   :  { %v149_v54 = vmul.f32 14.285714, %v2475_v52  ;;  %v2409_v55 = vpack.c.bf16 %v164_v23, %v163_v51  ;;  %v5875_v51 = vmov 0 }
  0xba   :  { %v166_v28 = vmul.f32 %v150_v53, %v2707_v34  ;;  %v5878_v53 = vmov 0  ;;  %p2556_p4 = pnand %p2555_p3, %p2549_p0 }
  0xbb   :  { %2396 = vmatpush3.bf16.xpose.msk.msra.mxu0 %vm2848_vm1, %v2391_v26  ;;  %2437 = vmatpush3.bf16.xpose.msk.msra.mxu1 %vm2848_vm1, %v2391_v26  ;;  %v2477_v56 = vpop.eup %2476  ;;  %v165_v29 = vmul.f32 %v149_v54, %v2712_v35  ;;  %v3025_v26 = vpop.permute.xlu0 %488 }
  0xbc   :  { %2399 = vmatprep.subr.msk.bf16.mxu0 %vm2848_vm1, %v2397_v39  ;;  %2430 = vmatprep.subr.msk.bf16.mxu1 %vm2848_vm1, %v2397_v39  ;;  %v2479_v57 = vpop.eup %2478  ;;  %v152_v58 = vmul.f32 14.285714, %v2477_v56  ;;  %vm521_vm11 = vcmp.eq.s32.totalorder %v3025_v26, %v2909_v61 }
  0xbd   :  { %v151_v59 = vmul.f32 14.285714, %v2479_v57  ;;  %v2415_v60 = vpack.c.bf16 %v166_v28, %v165_v29  ;;  %v5883_v29 = vmov 0 }
  0xbe   :  { %v168_v34 = vmul.f32 %v152_v58, %v2723_v40  ;;  %v2929_v40 = vpop.permute.xlu1 %467  ;;  %v5886_v58 = vmov 0 }
  0xbf   :  { %v167_v35 = vmul.f32 %v151_v59, %v2728_v41  ;;  %vm514_vm3 = vcmp.eq.s32.totalorder %v2929_v40, %v2909_v61  ;;  %v3033_v9 = vpop.permute.xlu0 %494 }
  0xc1   :  { %v2421_v63 = vpack.c.bf16 %v168_v34, %v167_v35 }
  0xc2   :  { %v2937_v41 = vpop.permute.xlu1 %470 }
  0xc3   :  { %2402 = vmatpush3.bf16.xpose.msk.msra.mxu0 %vm2848_vm1, %v2397_v39  ;;  %2438 = vmatpush3.bf16.xpose.msk.msra.mxu1 %vm2848_vm1, %v2397_v39  ;;  %vm515_vm4 = vcmp.eq.s32.totalorder %v2937_v41, %v2909_v61  ;;  %v3041_v30 = vpop.permute.xlu0 %500 }
  0xc4   :  { %2405 = vmatprep.subr.msk.bf16.mxu0 %vm2848_vm1, %v2403_v50  ;;  %2431 = vmatprep.subr.msk.bf16.mxu1 %vm2848_vm1, %v2403_v50 }
  0xc6   :  { %v2945_v3 = vpop.permute.xlu1 %473 }
  0xc7   :  { %vm516_vm5 = vcmp.eq.s32.totalorder %v2945_v3, %v2909_v61  ;;  %v3049_v32 = vpop.permute.xlu0 %506 }
  0xca   :  { %v2955_v10 = vpop.permute.xlu1 %476 }
  0xcb   :  { %2408 = vmatpush3.bf16.xpose.msk.msra.mxu0 %vm2848_vm1, %v2403_v50  ;;  %2439 = vmatpush3.bf16.xpose.msk.msra.mxu1 %vm2848_vm1, %v2403_v50  ;;  %v533_v33 = vpop.permute.xlu0 %532  ;;  %v5870_v50 = vmov 0 }
  0xcc   :  { %2411 = vmatprep.subr.msk.bf16.mxu0 %vm2848_vm1, %v2409_v55  ;;  %2432 = vmatprep.subr.msk.bf16.mxu1 %vm2848_vm1, %v2409_v55 }
  0xce   :  { %v2975_v1 = vpop.permute.xlu1 %479 }
  0xcf   :  { %v539_v37 = vpop.permute.xlu0 %538 }
  0xd0   :  { %vm583_vm13 = vcmp.ne.s32.totalorder %v539_v37, %v3064_v47 }
  0xd2   :  { %v2995_v15 = vpop.permute.xlu1 %482 }
  0xd3   :  { %2414 = vmatpush3.bf16.xpose.msk.msra.mxu0 %vm2848_vm1, %v2409_v55  ;;  %2440 = vmatpush3.bf16.xpose.msk.msra.mxu1 %vm2848_vm1, %v2409_v55  ;;  %v3053_v39 = vpop.permute.xlu0 %544 }
  0xd4   :  { %2417 = vmatprep.subr.msk.bf16.mxu0 %vm2848_vm1, %v2415_v60  ;;  %2433 = vmatprep.subr.msk.bf16.mxu1 %vm2848_vm1, %v2415_v60 }
  0xd6   :  { %v3019_v25 = vpop.permute.xlu1 %485 }
  0xd7   :  { %vm520_vm10 = vcmp.eq.s32.totalorder %v3019_v25, %v2909_v61  ;;  %v3055_v17 = vpop.permute.xlu0 %550 }
  0xda   :  { %v3029_v8 = vpop.permute.xlu1 %491 }
  0xdb   :  { %2420 = vmatpush3.bf16.xpose.msk.msra.mxu0 %vm2848_vm1, %v2415_v60  ;;  %2441 = vmatpush3.bf16.xpose.msk.msra.mxu1 %vm2848_vm1, %v2415_v60  ;;  %v557_v43 = vpop.permute.xlu0 %556 }
  0xdc   :  { %2423 = vmatprep.subr.msk.bf16.mxu0 %vm2848_vm1, %v2421_v63  ;;  %2434 = vmatprep.subr.msk.bf16.mxu1 %vm2848_vm1, %v2421_v63  ;;  %vm589_vm7 = vcmp.ne.s32.totalorder %v557_v43, %v3064_v47 }
  0xde   :  { %v3037_v27 = vpop.permute.xlu1 %497 }
  0xdf   :  { %v563_v45 = vpop.permute.xlu0 %562 }
  0xe2   :  { %v3045_v31 = vpop.permute.xlu1 %503 }
  0xe3   :  { %2426 = vmatpush3.bf16.xpose.msk.msra.mxu0 %vm2848_vm1, %v2421_v63  ;;  %2442 = vmatpush3.bf16.xpose.msk.msra.mxu1 %vm2848_vm1, %v2421_v63  ;;  %v3066_v48 = vpop.permute.xlu0 %568  ;;  %vm581_vm1 = vcmp.ne.s32.totalorder %v533_v33, %v3064_v47  ;;  %v5891_v63 = vmov 0 }
  0xe4   :  { %vm593_vm8 = vcmp.ne.s32.totalorder %v3066_v48, %v3064_v47 }
  0xe6   :  { %v530_v36 = vpop.permute.xlu1 %529 }
  0xe7   :  { %v3108_v52 = vpop.permute.xlu0 %574 }
  0xea   :  { %2356 = vmatmul.mubr.msk.f32.vlgmr.msra.gmra.mrb[0].mxu0 %vm56_vm0, %v170_v4  ;;  %2368 = vmatmul.mubr.msk.f32.vlgmr.msra.gmra.mrb[0].mxu1 %vm56_vm0, %v178_v5  ;;  %v536_v38 = vpop.permute.xlu1 %535 }
  0xeb   :  { %2358 = vmatprep.mubr.msk.f32.mxu0 %vm56_vm0, %v171_v7  ;;  %2370 = vmatprep.mubr.msk.f32.mxu1 %vm56_vm0, %v179_v11  ;;  %vm582_vm14 = vcmp.ne.s32.totalorder %v536_v38, %v3064_v47 }
  0xec   :  { %vm3117_vm12 = vmand %vm514_vm3, %vm582_vm14  ;;  %vm5929_vm3 = vcmp.ne.s32.totalorder %v3033_v9, %v2909_v61 }
  0xed   :  { %v5879_v53 = vsel %vm3117_vm12, 4294967295, %v5878_v53  ;;  %vm3138_vm14 = vmand %vm515_vm4, %vm583_vm13 }
  0xee   :  { %2359 = vmatmul.mubr.msk.f32.gmra.mrb[2].mxu0 %vm56_vm0, %v172_v12  ;;  %2371 = vmatmul.mubr.msk.f32.gmra.mrb[2].mxu1 %vm56_vm0, %v180_v13  ;;  %v542_v16 = vpop.permute.xlu1 %541  ;;  %5880 = vst [vmem:[#allocation9_spill] sm:$0xff] %v5879_v53  ;;  %v5884_v29 = vsel %vm3138_vm14, 4294967295, %v5883_v29  ;;  %vm3156_vm4 = vmand %vm521_vm11, %vm589_vm7  ;;  %v5896_v13 = vmov 0  ;;  %vm5899_vm11 = vcmp.ne.s32.totalorder %v2921_v62, %v2909_v61 }
  0xef   :  { %2361 = vmatprep.mubr.msk.f32.mxu0 %vm56_vm0, %v173_v14  ;;  %2373 = vmatprep.mubr.msk.f32.mxu1 %vm56_vm0, %v181_v0  ;;  %5885 = vst [vmem:[#allocation12_spill] sm:$0xff] %v5884_v29  ;;  %v5887_v58 = vsel %vm3156_vm4, 4294967295, %v5886_v58 }
  0xf0   :  { %5888 = vst [vmem:[#allocation13_spill] sm:$0xff] %v5887_v58 }
  0xf2   :  { %2362 = vmatmul.mubr.msk.f32.gmra.mrb[4].mxu0 %vm56_vm0, %v174_v2  ;;  %2374 = vmatmul.mubr.msk.f32.gmra.mrb[4].mxu1 %vm56_vm0, %v182_v6  ;;  %v3057_v42 = vpop.permute.xlu1 %547 }
  0xf3   :  { %2364 = vmatprep.mubr.msk.f32.mxu0 %vm56_vm0, %v175_v18  ;;  %2376 = vmatprep.mubr.msk.f32.mxu1 %vm56_vm0, %v183_v19  ;;  %v5904_v19 = vmov 0 }
  0xf6   :  { %2365 = vmatmul.mubr.msk.f32.gmra.mrb[6].mxu0 %vm56_vm0, %v176_v21  ;;  %2377 = vmatmul.mubr.msk.f32.gmra.mrb[6].mxu1 %vm56_vm0, %v184_v24  ;;  %v554_v44 = vpop.permute.xlu1 %553  ;;  %vm580_vm0 = vcmp.ne.s32.totalorder %v530_v36, %v3064_v47 }
  0xf7   :  { %vm3084_vm6 = vmand %vm512_vm9, %vm580_vm0  ;;  %vm584_vm0 = vcmp.ne.s32.totalorder %v542_v16, %v3064_v47 }
  0xf8   :  { %v5871_v50 = vsel %vm3084_vm6, 4294967295, %v5870_v50  ;;  %vm3102_vm9 = vmand %vm513_vm2, %vm581_vm1  ;;  %vm588_vm1 = vcmp.ne.s32.totalorder %v554_v44, %v3064_v47  ;;  %vm591_vm2 = vcmp.ne.s32.totalorder %v563_v45, %v3064_v47 }
  0xf9   :  { %5872 = vst [vmem:[#allocation5_spill] sm:$0xff] %v5871_v50  ;;  %v5876_v51 = vsel %vm3102_vm9, 4294967295, %v5875_v51  ;;  %vm3177_vm7 = vmand %vm516_vm5, %vm584_vm0  ;;  %vm5901_vm5 = vcmp.ne.s32.totalorder %v3025_v26, %v2909_v61 }
  0xfa   :  { %v3059_v46 = vpop.permute.xlu1 %559  ;;  %5877 = vst [vmem:[#allocation8_spill] sm:$0xff] %v5876_v51  ;;  %v5892_v63 = vsel %vm3177_vm7, 4294967295, %v5891_v63  ;;  %vm3201_vm0 = vmand %vm520_vm10, %vm588_vm1  ;;  %vm5903_vm10 = vcmp.eq.s32.totalorder %v3033_v9, %v2909_v61 }
  0xfb   :  { %5893 = vst [vmem:[#allocation16_spill] sm:$0xff] %v5892_v63  ;;  %v5897_v13 = vsel %vm3201_vm0, 4294967295, %v5896_v13  ;;  %vm3226_vm1 = vmand %vm5903_vm10, %vm591_vm2  ;;  %vm5910_vm10 = vcmp.eq.s32.totalorder %v2955_v10, %v2909_v61  ;;  %vm5916_vm2 = vcmp.ne.s32.totalorder %v2937_v41, %v2909_v61  ;;  %v5922_v41 = vmov 0 }
  0xfc   :  { %5898 = vst [vmem:[#allocation19_spill] sm:$0xff] %v5897_v13  ;;  %v5905_v19 = vsel %vm3226_vm1, 4294967295, %v5904_v19 }
  0xfd   :  { %5906 = vst [vmem:[#allocation22_spill] sm:$0xff] %v5905_v19 }
  0xfe   :  { %v3073_v49 = vpop.permute.xlu1 %565 }
 0x102   :  { %v3205_v14 = vpop.permute.xlu1 %571 }
 0x1bd   :  { %v3089_v22 = vpop.f32.mrb[0].mxu0  ;;  %v3091_v23 = vpop.f32.mrb[0].mxu1 }
 0x1be   :  { %5873 = vst [vmem:[#allocation6_spill] sm:$0xff] %v3089_v22  ;;  %5874 = vst [vmem:[#allocation7_spill] sm:$0xff] %v3091_v23  ;;  %v2276_v54 = vadd.f32 -9999999.0, %v3089_v22  ;;  %v2284_v55 = vadd.f32 -9999999.0, %v3091_v23 }
 0x1bf   :  { %v3127_v56 = vpop.f32.mrb[1].mxu0  ;;  %v3129_v28 = vpop.f32.mrb[1].mxu1  ;;  %v703_v59 = vsel %vm3102_vm9, %v3089_v22, -inf  ;;  %v711_v4 = vsel %vm3156_vm4, %v3091_v23, -inf  ;;  %v674_v13 = vsel %vm3156_vm4, %v3091_v23, 0.0 }
 0x1c0   :  { %5881 = vst [vmem:[#allocation10_spill] sm:$0xff] %v3127_v56  ;;  %5882 = vst [vmem:[#allocation11_spill] sm:$0xff] %v3129_v28  ;;  %v2275_v57 = vadd.f32 -9999999.0, %v3127_v56  ;;  %v2283_v60 = vadd.f32 -9999999.0, %v3129_v28  ;;  %v3211_v0 = vsel %vm5899_vm11, %v3089_v22, %v2276_v54  ;;  %v3217_v2 = vsel %vm5901_vm5, %v3091_v23, %v2284_v55 }
 0x1c1   :  { %v3168_v34 = vpop.f32.mrb[2].mxu0  ;;  %v3170_v35 = vpop.f32.mrb[2].mxu1  ;;  %5900 = vst [vmem:[#allocation20_spill] sm:$0xff] %v3211_v0  ;;  %5902 = vst [vmem:[#allocation21_spill] sm:$0xff] %v3217_v2  ;;  %v702_v62 = vsel %vm3084_vm6, %v3127_v56, -inf  ;;  %vm5907_vm11 = vcmp.ne.s32.totalorder %v3007_v20, %v2909_v61  ;;  %v710_v24 = vsel %vm3201_vm0, %v3129_v28, -inf  ;;  %vm5909_vm5 = vcmp.ne.s32.totalorder %v3053_v39, %v3064_v47 }
 0x1c2   :  { %5889 = vst [vmem:[#allocation14_spill] sm:$0xff] %v3168_v34  ;;  %5890 = vst [vmem:[#allocation15_spill] sm:$0xff] %v3170_v35  ;;  %v2278_v5 = vadd.f32 -9999999.0, %v3168_v34  ;;  %v3187_v7 = vpop.f32.mrb[3].mxu0  ;;  %v3189_v11 = vpop.f32.mrb[3].mxu1  ;;  %v3237_v21 = vsel %vm5907_vm11, %v3127_v56, %v2275_v57  ;;  %vm5914_vm11 = vcmp.ne.s32.totalorder %v3019_v25, %v2909_v61 }
 0x1c3   :  { %5894 = vst [vmem:[#allocation17_spill] sm:$0xff] %v3187_v7  ;;  %5895 = vst [vmem:[#allocation18_spill] sm:$0xff] %v3189_v11  ;;  %v2286_v6 = vadd.f32 -9999999.0, %v3170_v35  ;;  %v2277_v18 = vadd.f32 -9999999.0, %v3187_v7  ;;  %v3261_v33 = vsel %vm5914_vm11, %v3129_v28, %v2283_v60 }
 0x1c4   :  { %5908 = vst [vmem:[#allocation23_spill] sm:$0xff] %v3237_v21  ;;  %v705_v26 = vsel %vm3138_vm14, %v3168_v34, -inf  ;;  %vm3253_vm15 = vmand %vm5910_vm10, %vm5909_vm5  ;;  %v5911_v20 = vmov 0  ;;  %v3267_v36 = vsel %vm5916_vm2, %v3168_v34, %v2278_v5  ;;  %v713_v37 = vsel %vm3226_vm1, %v3170_v35, -inf }
 0x1c5   :  { %v5912_v20 = vsel %vm3253_vm15, 4294967295, %v5911_v20  ;;  %5915 = vst [vmem:[#allocation25_spill] sm:$0xff] %v3261_v33  ;;  %5917 = vst [vmem:[#allocation26_spill] sm:$0xff] %v3267_v36  ;;  %v3273_v38 = vadd.f32 -9999999.0, %v3189_v11  ;;  %v3275_v39 = vpop.f32.mrb[4].mxu0  ;;  %vm5920_vm5 = vcmp.ne.s32.totalorder %v3059_v46, %v3064_v47  ;;  %vm5921_vm10 = vcmp.eq.s32.totalorder %v3029_v8, %v2909_v61 }
 0x1c6   :  { %5913 = vst [vmem:[#allocation24_spill] sm:$0xff] %v5912_v20  ;;  %5918 = vst [vmem:[#allocation27_spill] sm:$0xff] %v3275_v39  ;;  %v3277_v16 = vpop.f32.mrb[4].mxu1  ;;  %v707_v25 = vsel %vm3253_vm15, %v3275_v39, -inf  ;;  %v2280_v43 = vadd.f32 -9999999.0, %v3275_v39  ;;  %vm5925_vm2 = vcmp.eq.s32.totalorder %v3041_v30, %v2909_v61  ;;  %v3317_v54 = vsel %vm5929_vm3, %v3170_v35, %v2286_v6 }
 0x1c7   :  { %5919 = vst [vmem:[#allocation28_spill] sm:$0xff] %v3277_v16  ;;  %vm3285_vm11 = vmand %vm5921_vm10, %vm5920_vm5  ;;  %v2288_v44 = vadd.f32 -9999999.0, %v3277_v16  ;;  %v704_v45 = vsel %vm3117_vm12, %v3187_v7, -inf  ;;  %v5926_v46 = vmov 0  ;;  %v719_v55 = vmax.f32 %v703_v59, %v707_v25  ;;  %v3319_v57 = vpop.f32.mrb[5].mxu0 }
 0x1c8   :  { %v5923_v41 = vsel %vm3285_vm11, 4294967295, %v5922_v41  ;;  %vm3309_vm13 = vmand %vm5925_vm2, %vm593_vm8  ;;  %5930 = vst [vmem:[#allocation31_spill] sm:$0xff] %v3317_v54  ;;  %v3321_v60 = vpop.f32.mrb[5].mxu1  ;;  %vm5933_vm10 = vcmp.ne.s32.totalorder %v2929_v40, %v2909_v61  ;;  %v712_v5 = vsel %vm3285_vm11, %v3189_v11, -inf  ;;  %vm5935_vm8 = vcmp.ne.s32.totalorder %v2955_v10, %v2909_v61  ;;  %v6055_v51 = vld [vmem:[#allocation20_spill] sm:$0xff] }
 0x1c9   :  { %5924 = vst [vmem:[#allocation29_spill] sm:$0xff] %v5923_v41  ;;  %v5927_v46 = vsel %vm3309_vm13, 4294967295, %v5926_v46  ;;  %5931 = vst [vmem:[#allocation32_spill] sm:$0xff] %v3319_v57  ;;  %v3327_v48 = vsel %vm5933_vm10, %v3187_v7, %v2277_v18  ;;  %v3336_v9 = vsel %vm5935_vm8, %v3275_v39, %v2280_v43  ;;  %v715_v59 = vsel %vm3309_vm13, %v3277_v16, -inf }
 0x1ca   :  { %5928 = vst [vmem:[#allocation30_spill] sm:$0xff] %v5927_v46  ;;  %5932 = vst [vmem:[#allocation33_spill] sm:$0xff] %v3321_v60  ;;  %v706_v40 = vsel %vm3177_vm7, %v3319_v57, -inf  ;;  %v2279_v6 = vadd.f32 -9999999.0, %v3319_v57  ;;  %vm5937_vm2 = vcmp.ne.s32.totalorder %v3055_v17, %v3064_v47  ;;  %vm5938_vm10 = vcmp.eq.s32.totalorder %v2995_v15, %v2909_v61  ;;  %v3365_v46 = vpop.f32.mrb[6].mxu0 }
 0x1cb   :  { %5934 = vst [vmem:[#allocation34_spill] sm:$0xff] %v3327_v48  ;;  %5936 = vst [vmem:[#allocation35_spill] sm:$0xff] %v3336_v9  ;;  %v5939_v10 = vmov 0  ;;  %v874_v18 = vmax.f32 %v3211_v0, %v3336_v9  ;;  %v723_v25 = vmax.f32 %v719_v55, %v711_v4  ;;  %vm5942_vm5 = vcmp.ne.s32.totalorder %v3041_v30, %v2909_v61  ;;  %v3367_v17 = vpop.f32.mrb[6].mxu1 }
 0x1cc   :  { %vm3353_vm8 = vmand %vm5938_vm10, %vm5937_vm2  ;;  %v3363_v43 = vsel %vm5942_vm5, %v3277_v16, %v2288_v44  ;;  %v718_v12 = vmax.f32 %v702_v62, %v706_v40  ;;  %5944 = vst [vmem:[#allocation38_spill] sm:$0xff] %v3365_v46  ;;  %vm5946_vm2 = vcmp.ne.s32.totalorder %v2945_v3, %v2909_v61  ;;  %v2287_v35 = vadd.f32 -9999999.0, %v3321_v60  ;;  %v3380_v44 = vpop.f32.mrb[7].mxu0  ;;  %v3395_v16 = vpop.f32.mrb[7].mxu1 }
 0x1cd   :  { %v5940_v10 = vsel %vm3353_vm8, 4294967295, %v5939_v10  ;;  %5943 = vst [vmem:[#allocation37_spill] sm:$0xff] %v3363_v43  ;;  %5945 = vst [vmem:[#allocation39_spill] sm:$0xff] %v3367_v17  ;;  %v3373_v19 = vsel %vm5946_vm2, %v3319_v57, %v2279_v6  ;;  %v709_v4 = vsel %vm3353_vm8, %v3365_v46, -inf  ;;  %v2282_v30 = vadd.f32 -9999999.0, %v3365_v46 }
 0x1ce   :  { %5941 = vst [vmem:[#allocation36_spill] sm:$0xff] %v5940_v10  ;;  %5947 = vst [vmem:[#allocation40_spill] sm:$0xff] %v3373_v19  ;;  %vm5949_vm5 = vcmp.ne.s32.totalorder %v3073_v49, %v3064_v47  ;;  %vm5950_vm10 = vcmp.eq.s32.totalorder %v3037_v27, %v2909_v61  ;;  %v5951_v3 = vmov 0  ;;  %v727_v62 = vmax.f32 %v723_v25, %v715_v59 }
 0x1cf   :  { %5948 = vst [vmem:[#allocation41_spill] sm:$0xff] %v3380_v44  ;;  %vm3388_vm3 = vmand %vm5950_vm10, %vm5949_vm5  ;;  %v878_v55 = vmax.f32 %v874_v18, %v3217_v2  ;;  %v873_v40 = vmax.f32 %v3237_v21, %v3373_v19  ;;  %v722_v6 = vmax.f32 %v718_v12, %v710_v24  ;;  %vm5955_vm2 = vcmp.ne.s32.totalorder %v3057_v42, %v3064_v47 }
 0x1d0   :  { %v5952_v3 = vsel %vm3388_vm3, 4294967295, %v5951_v3  ;;  %5954 = vst [vmem:[#allocation43_spill] sm:$0xff] %v3395_v16  ;;  %vm5956_vm13 = vcmp.eq.s32.totalorder %v2975_v1, %v2909_v61  ;;  %v5957_v49 = vmov 0  ;;  %v714_v59 = vsel %vm3388_vm3, %v3321_v60, -inf }
 0x1d1   :  { %5953 = vst [vmem:[#allocation42_spill] sm:$0xff] %v5952_v3  ;;  %vm3403_vm1 = vmand %vm5956_vm13, %vm5955_vm2  ;;  %v721_v18 = vmax.f32 %v705_v26, %v709_v4  ;;  %vm5960_vm5 = vcmp.ne.s32.totalorder %v2995_v15, %v2909_v61  ;;  %v2290_v42 = vadd.f32 -9999999.0, %v3367_v17  ;;  %vm5962_vm10 = vcmp.ne.s32.totalorder %v3108_v52, %v3064_v47 }
 0x1d2   :  { %v5958_v49 = vsel %vm3403_vm1, 4294967295, %v5957_v49  ;;  %v3414_v12 = vsel %vm5960_vm5, %v3365_v46, %v2282_v30  ;;  %vm5963_vm13 = vcmp.eq.s32.totalorder %v3049_v32, %v2909_v61  ;;  %v5964_v24 = vmov 0 }
 0x1d3   :  { %5959 = vst [vmem:[#allocation44_spill] sm:$0xff] %v5958_v49  ;;  %5961 = vst [vmem:[#allocation45_spill] sm:$0xff] %v3414_v12  ;;  %v882_v26 = vmax.f32 %v878_v55, %v3363_v43  ;;  %v726_v25 = vmax.f32 %v722_v6, %v714_v59  ;;  %v877_v4 = vmax.f32 %v873_v40, %v3261_v33  ;;  %v708_v30 = vsel %vm3403_vm1, %v3380_v44, -inf }
 0x1d4   :  { %vm3423_vm2 = vmand %vm5963_vm13, %vm5962_vm10  ;;  %v876_v15 = vmax.f32 %v3267_v36, %v3414_v12  ;;  %vm5967_vm5 = vcmp.ne.s32.totalorder %v3037_v27, %v2909_v61  ;;  %v2281_v3 = vadd.f32 -9999999.0, %v3380_v44  ;;  %v720_v6 = vmax.f32 %v704_v45, %v708_v30  ;;  %v6003_v49 = vld [vmem:[#allocation37_spill] sm:$0xff] }
 0x1d5   :  { %v5965_v24 = vsel %vm3423_vm2, 4294967295, %v5964_v24  ;;  %v3435_v52 = vsel %vm5967_vm5, %v3321_v60, %v2287_v35  ;;  %v717_v55 = vsel %vm3423_vm2, %v3367_v17, -inf  ;;  %v725_v59 = vmax.f32 %v721_v18, %v713_v37 }
 0x1d6   :  { %5966 = vst [vmem:[#allocation46_spill] sm:$0xff] %v5965_v24  ;;  %5968 = vst [vmem:[#allocation47_spill] sm:$0xff] %v3435_v52  ;;  %v881_v40 = vmax.f32 %v877_v4, %v3435_v52  ;;  %v730_v43 = vmax.f32 %v726_v25, %v727_v62  ;;  %vm5969_vm10 = vcmp.ne.s32.totalorder %v2975_v1, %v2909_v61  ;;  %v2289_v35 = vadd.f32 -9999999.0, %v3395_v16 }
 0x1d7   :  { %v3449_v27 = vsel %vm5969_vm10, %v3380_v44, %v2281_v3  ;;  %vm5971_vm13 = vcmp.ne.s32.totalorder %v3049_v32, %v2909_v61  ;;  %v880_v24 = vmax.f32 %v876_v15, %v3317_v54  ;;  %vm5972_vm5 = vcmp.ne.s32.totalorder %v3205_v14, %v3064_v47 }
 0x1d8   :  { %5970 = vst [vmem:[#allocation48_spill] sm:$0xff] %v3449_v27  ;;  %v3456_v60 = vsel %vm5971_vm13, %v3367_v17, %v2290_v42  ;;  %vm5973_vm2 = vcmp.eq.s32.totalorder %v3045_v31, %v2909_v61  ;;  %v5974_v1 = vmov 0  ;;  %v885_v37 = vmax.f32 %v881_v40, %v882_v26  ;;  %v6001_v58 = vld [vmem:[#allocation42_spill] sm:$0xff] }
 0x1d9   :  { %vm3465_vm3 = vmand %vm5973_vm2, %vm5972_vm5  ;;  %v875_v45 = vmax.f32 %v3327_v48, %v3449_v27  ;;  %v724_v3 = vmax.f32 %v720_v6, %v712_v5  ;;  %v729_v32 = vmax.f32 %v725_v59, %v717_v55  ;;  %vm5977_vm10 = vcmp.ne.s32.totalorder %v3029_v8, %v2909_v61 }
 0x1da   :  { %v5975_v1 = vsel %vm3465_vm3, 4294967295, %v5974_v1  ;;  %v716_v62 = vsel %vm3465_vm3, %v3395_v16, -inf  ;;  %v3479_v47 = vsel %vm5977_vm10, %v3189_v11, %v3273_v38  ;;  %v884_v14 = vmax.f32 %v880_v24, %v3456_v60 }
 0x1db   :  { %5976 = vst [vmem:[#allocation49_spill] sm:$0xff] %v5975_v1  ;;  %5978 = vst [vmem:[#allocation50_spill] sm:$0xff] %v3479_v47  ;;  %v665_v18 = vsel %vm3084_vm6, %v3127_v56, 0.0  ;;  %vm626_vm2 = vcmp.ne.s32.totalorder %v3045_v31, %v2909_v61  ;;  %v728_v5 = vmax.f32 %v724_v3, %v716_v62  ;;  %v879_v42 = vmax.f32 %v875_v45, %v3479_v47 }
 0x1dc   :  { %v3489_v26 = vsel %vm626_vm2, %v3395_v16, %v2289_v35  ;;  %v667_v8 = vsel %vm3117_vm12, %v3187_v7, 0.0  ;;  %v5980_v25 = vsel %vm3102_vm9, %v3089_v22, 0.0  ;;  %v856_v15 = vlaneseq }
 0x1dd   :  { %5979 = vst [vmem:[#allocation51_spill] sm:$0xff] %v3489_v26  ;;  %v731_v38 = vmax.f32 %v728_v5, %v729_v32  ;;  %v883_v24 = vmax.f32 %v879_v42, %v3489_v26  ;;  %v681_v4 = vadd.f32 %v5980_v25, %v665_v18  ;;  %v668_v55 = vsel %vm3138_vm14, %v3168_v34, 0.0 }
 0x1de   :  { %v669_v40 = vsel %vm3177_vm7, %v3319_v57, 0.0  ;;  %v3505_v45 = vshrl.u32 %v856_v15, 7 }
 0x1df   :  { %v732_v61 = vmax.f32 %v730_v43, %v731_v38  ;;  %v886_v31 = vmax.f32 %v883_v24, %v884_v14  ;;  %v682_v30 = vadd.f32 %v681_v4, %v667_v8  ;;  %v670_v43 = vsel %vm3253_vm15, %v3275_v39, 0.0 }
 0x1e0   :  { %5981 = vst [vmem:[#allocation52_spill] sm:$0xff] %v3505_v45  ;;  %v671_v14 = vsel %vm3403_vm1, %v3380_v44, 0.0  ;;  %v3514_v8 = vadd.s32 8, %v3505_v45  ;;  %v3520_v38 = vadd.s32 24, %v3505_v45  ;;  %v3523_v25 = vadd.s32 32, %v3505_v45 }
 0x1e1   :  { %v733_v6 = vrot.slane %v732_v61, 4  ;;  %v887_v59 = vmax.f32 %v885_v37, %v886_v31  ;;  %v683_v35 = vadd.f32 %v682_v30, %v668_v55  ;;  %v3517_v37 = vadd.s32 16, %v3505_v45 }
 0x1e2   :  { %5982 = vst [vmem:[#allocation53_spill] sm:$0xff] %v3514_v8  ;;  %5984 = vst [vmem:[#allocation55_spill] sm:$0xff] %v3520_v38  ;;  %v3529_v31 = vadd.s32 48, %v3505_v45  ;;  %v3532_v30 = vadd.s32 56, %v3505_v45  ;;  %v672_v55 = vsel %vm3353_vm8, %v3365_v46, 0.0 }
 0x1e3   :  { %v734_v3 = vmax.f32 %v732_v61, %v733_v6  ;;  %v888_v32 = vrot.slane %v887_v59, 4  ;;  %v684_v62 = vadd.f32 %v683_v35, %v669_v40  ;;  %5983 = vst [vmem:[#allocation54_spill] sm:$0xff] %v3517_v37  ;;  %5985 = vst [vmem:[#allocation56_spill] sm:$0xff] %v3523_v25  ;;  %v3526_v61 = vadd.s32 40, %v3505_v45 }
 0x1e4   :  { %5987 = vst [vmem:[#allocation58_spill] sm:$0xff] %v3529_v31  ;;  %5988 = vst [vmem:[#allocation59_spill] sm:$0xff] %v3532_v30  ;;  %v3538_v6 = vadd.s32 64, %v3505_v45 }
 0x1e5   :  { %v735_v18 = vrot.slane %v734_v3, 2  ;;  %v889_v5 = vmax.f32 %v887_v59, %v888_v32  ;;  %v685_v42 = vadd.f32 %v684_v62, %v670_v43  ;;  %5986 = vst [vmem:[#allocation57_spill] sm:$0xff] %v3526_v61  ;;  %v3544_v32 = vadd.s32 80, %v3505_v45 }
 0x1e6   :  { %5989 = vst [vmem:[#allocation60_spill] sm:$0xff] %v3538_v6  ;;  %v3547_v62 = vadd.s32 88, %v3505_v45  ;;  %v673_v43 = vsel %vm3201_vm0, %v3129_v28, 0.0  ;;  %vm6002_vm0 = vnez %v6001_v58 }
 0x1e7   :  { %v736_v24 = vmax.f32 %v734_v3, %v735_v18  ;;  %v890_v4 = vrot.slane %v889_v5, 2  ;;  %v686_v15 = vadd.f32 %v685_v42, %v671_v14  ;;  %v3541_v3 = vadd.s32 72, %v3505_v45  ;;  %5991 = vst [vmem:[#allocation62_spill] sm:$0xff] %v3544_v32 }
 0x1e8   :  { %5992 = vst [vmem:[#allocation63_spill] sm:$0xff] %v3547_v62  ;;  %v3555_v18 = vadd.s32 96, %v3505_v45 }
 0x1e9   :  { %v737_v40 = vrot.slane %v736_v24, 1  ;;  %v891_v59 = vmax.f32 %v889_v5, %v890_v4  ;;  %v687_v35 = vadd.f32 %v686_v15, %v672_v55  ;;  %5990 = vst [vmem:[#allocation61_spill] sm:$0xff] %v3541_v3  ;;  %v3558_v4 = vadd.s32 104, %v3505_v45 }
 0x1ea   :  { %5993 = vst [vmem:[#allocation64_spill] sm:$0xff] %v3555_v18  ;;  %v3561_v15 = vadd.s32 112, %v3505_v45  ;;  %v3564_v55 = vadd.s32 120, %v3505_v45 }
 0x1eb   :  { %v3552_v14 = vmax.f32 %v736_v24, %v737_v40  ;;  %v892_v5 = vrot.slane %v891_v59, 1  ;;  %v688_v42 = vadd.f32 %v687_v35, %v673_v43  ;;  %5994 = vst [vmem:[#allocation65_spill] sm:$0xff] %v3558_v4  ;;  %v6000_v24 = vld [vmem:[#allocation33_spill] sm:$0xff] }
 0x1ec   :  { %5995 = vst [vmem:[#allocation66_spill] sm:$0xff] %v3561_v15  ;;  %5996 = vst [vmem:[#allocation67_spill] sm:$0xff] %v3564_v55  ;;  %v677_v20 = vsel %vm6002_vm0, %v6000_v24, 0.0 }
 0x1ed   :  { %v893_v40 = vmax.f32 %v891_v59, %v892_v5  ;;  %v3571_v10 = vadd.f32 %v688_v42, %v674_v13  ;;  %v675_v13 = vsel %vm3285_vm11, %v3189_v11, 0.0  ;;  %v5997_v59 = vld [vmem:[#allocation15_spill] sm:$0xff]  ;;  %v5998_v5 = vld [vmem:[#allocation22_spill] sm:$0xff] }
 0x1ee   :  { %vm5999_vm8 = vnez %v5998_v5 }
 0x1ef   :  { %v676_v42 = vsel %vm5999_vm8, %v5997_v59, 0.0  ;;  %vm903_vm1 = vcmp.eq.f32.partialorder %v3217_v2, %v893_v40  ;;  %vm907_vm8 = vcmp.eq.f32.partialorder %v6003_v49, %v893_v40  ;;  %vm6004_vm10 = vcmp.eq.f32.partialorder %v3237_v21, %v893_v40 }
 0x1f0   :  { %v910_v43 = vsel %vm6004_vm10, %v3505_v45, 128  ;;  %vm6005_vm11 = vcmp.eq.f32.partialorder %v3211_v0, %v893_v40  ;;  %vm6006_vm4 = vcmp.eq.f32.partialorder %v3327_v48, %v893_v40  ;;  %vm6007_vm2 = vcmp.eq.f32.partialorder %v3267_v36, %v893_v40 }
 0x1f1   :  { %v911_v35 = vsel %vm6005_vm11, %v3514_v8, 128  ;;  %v912_v5 = vsel %vm6006_vm4, %v3517_v37, 128  ;;  %v913_v58 = vsel %vm6007_vm2, %v3520_v38, 128  ;;  %vm6008_vm13 = vcmp.eq.f32.partialorder %v3373_v19, %v893_v40 }
 0x1f2   :  { %v914_v41 = vsel %vm6008_vm13, %v3523_v25, 128  ;;  %vm6009_vm5 = vcmp.eq.f32.partialorder %v3336_v9, %v893_v40  ;;  %vm6010_vm10 = vcmp.eq.f32.partialorder %v3449_v27, %v893_v40  ;;  %vm6011_vm11 = vcmp.eq.f32.partialorder %v3414_v12, %v893_v40 }
 0x1f3   :  { %v915_v21 = vsel %vm6009_vm5, %v3526_v61, 128  ;;  %v916_v0 = vsel %vm6010_vm10, %v3529_v31, 128  ;;  %v917_v48 = vsel %vm6011_vm11, %v3532_v30, 128  ;;  %vm6012_vm4 = vcmp.eq.f32.partialorder %v3261_v33, %v893_v40 }
 0x1f4   :  { %v918_v36 = vsel %vm6012_vm4, %v3538_v6, 128  ;;  %v919_v19 = vsel %vm903_vm1, %v3541_v3, 128  ;;  %vm6013_vm13 = vcmp.eq.f32.partialorder %v3479_v47, %v893_v40  ;;  %vm6014_vm5 = vcmp.eq.f32.partialorder %v3317_v54, %v893_v40 }
 0x1f5   :  { %v920_v9 = vsel %vm6013_vm13, %v3544_v32, 128  ;;  %v921_v27 = vsel %vm6014_vm5, %v3547_v62, 128  ;;  %vm6015_vm2 = vcmp.eq.f32.partialorder %v3435_v52, %v893_v40  ;;  %v923_v33 = vsel %vm907_vm8, %v3558_v4, 128 }
 0x1f6   :  { %v922_v12 = vsel %vm6015_vm2, %v3555_v18, 128  ;;  %vm6016_vm10 = vcmp.eq.f32.partialorder %v3489_v26, %v893_v40  ;;  %vm6017_vm1 = vcmp.eq.f32.partialorder %v3456_v60, %v893_v40  ;;  %vm926_vm11 = vcmp.lt.s32.totalorder %v910_v43, %v914_v41 }
 0x1f7   :  { %v924_v2 = vsel %vm6016_vm10, %v3561_v15, 128  ;;  %v925_v47 = vsel %vm6017_vm1, %v3564_v55, 128  ;;  %v927_v32 = vsel %vm926_vm11, %v910_v43, %v914_v41  ;;  %vm928_vm4 = vcmp.lt.s32.totalorder %v911_v35, %v915_v21 }
 0x1f8   :  { %vm930_vm13 = vcmp.lt.s32.totalorder %v912_v5, %v916_v0  ;;  %vm932_vm5 = vcmp.lt.s32.totalorder %v913_v58, %v917_v48  ;;  %v929_v54 = vsel %vm928_vm4, %v911_v35, %v915_v21  ;;  %vm934_vm2 = vcmp.lt.s32.totalorder %v927_v32, %v918_v36 }
 0x1f9   :  { %v931_v52 = vsel %vm930_vm13, %v912_v5, %v916_v0  ;;  %v933_v18 = vsel %vm932_vm5, %v913_v58, %v917_v48  ;;  %v935_v62 = vsel %vm934_vm2, %v927_v32, %v918_v36  ;;  %vm936_vm0 = vcmp.lt.s32.totalorder %v929_v54, %v919_v19 }
 0x1fa   :  { %vm938_vm8 = vcmp.lt.s32.totalorder %v931_v52, %v920_v9  ;;  %vm940_vm15 = vcmp.lt.s32.totalorder %v933_v18, %v921_v27  ;;  %v937_v49 = vsel %vm936_vm0, %v929_v54, %v919_v19  ;;  %vm942_vm10 = vcmp.lt.s32.totalorder %v935_v62, %v922_v12 }
 0x1fb   :  { %v939_v26 = vsel %vm938_vm8, %v931_v52, %v920_v9  ;;  %v941_v15 = vsel %vm940_vm15, %v933_v18, %v921_v27  ;;  %v943_v4 = vsel %vm942_vm10, %v935_v62, %v922_v12  ;;  %vm944_vm7 = vcmp.lt.s32.totalorder %v937_v49, %v923_v33  ;;  %v6031_v62 = vld [vmem:[#allocation24_spill] sm:$0xff] }
 0x1fc   :  { %vm946_vm1 = vcmp.lt.s32.totalorder %v939_v26, %v924_v2  ;;  %vm948_vm14 = vcmp.lt.s32.totalorder %v941_v15, %v925_v47  ;;  %v945_v41 = vsel %vm944_vm7, %v937_v49, %v923_v33  ;;  %v690_v21 = vadd.f32 %v3571_v10, %v675_v13 }
 0x1fd   :  { %v947_v40 = vsel %vm946_vm1, %v939_v26, %v924_v2  ;;  %v949_v43 = vsel %vm948_vm14, %v941_v15, %v925_v47  ;;  %vm950_vm11 = vcmp.lt.s32.totalorder %v943_v4, %v945_v41  ;;  %v744_v58 = vsub.f32 %v3275_v39, %v3552_v14  ;;  %v6018_v47 = vld [vmem:[#allocation28_spill] sm:$0xff]  ;;  %v6019_v26 = vld [vmem:[#allocation30_spill] sm:$0xff] }
 0x1fe   :  { %vm952_vm4 = vcmp.lt.s32.totalorder %v947_v40, %v949_v43  ;;  %v745_v0 = vsub.f32 %v3380_v44, %v3552_v14  ;;  %v951_v19 = vsel %vm950_vm11, %v943_v4, %v945_v41  ;;  %v691_v54 = vadd.f32 %v690_v21, %v676_v42 }
 0x1ff   :  { %v953_v36 = vsel %vm952_vm4, %v947_v40, %v949_v43  ;;  %vm6020_vm14 = vnez %v6019_v26  ;;  %v6021_v15 = vsub.f32 %v3127_v56, %v3552_v14  ;;  %v6022_v42 = vsub.f32 %v3089_v22, %v3552_v14  ;;  %v6138_v26 = vld [vmem:[#allocation64_spill] sm:$0xff] }
 0x200   :  { %vm954_vm15 = vcmp.lt.s32.totalorder %v951_v19, %v953_v36  ;;  %v692_v49 = vadd.f32 %v691_v54, %v677_v20  ;;  %v678_v32 = vsel %vm6020_vm14, %v6018_v47, 0.0  ;;  %v679_v20 = vsel %vm3465_vm3, %v3395_v16, 0.0 }
 0x201   :  { %v955_v10 = vsel %vm954_vm15, %v951_v19, %v953_v36  ;;  %v755_v35 = vsel %vm3084_vm6, %v6021_v15, -inf  ;;  %v756_v41 = vsel %vm3102_vm9, %v6022_v42, -inf  ;;  %v6023_v40 = vsub.f32 %v3187_v7, %v3552_v14  ;;  %v6024_v19 = vld [vmem:[#allocation46_spill] sm:$0xff] }
 0x202   :  { %v956_v27 = vrot.slane %v955_v10, 4  ;;  %v693_v4 = vadd.f32 %v692_v49, %v678_v32  ;;  %vm6025_vm0 = vnez %v6024_v19  ;;  %v6026_v54 = vsub.f32 %v3168_v34, %v3552_v14 }
 0x203   :  { %v757_v43 = vsel %vm3117_vm12, %v6023_v40, -inf  ;;  %v680_v36 = vsel %vm6025_vm0, %v3367_v17, 0.0  ;;  %vm6027_vm13 = vnez %v5884_v29  ;;  %v773_v32 = vmul.f32 1.442695, %v756_v41  ;;  %v6053_v29 = vld [vmem:[#allocation23_spill] sm:$0xff] }
 0x204   :  { %vm957_vm7 = vcmp.lt.s32.totalorder %v955_v10, %v956_v27  ;;  %v694_v5 = vadd.f32 %v693_v4, %v679_v20  ;;  %v775_v4 = vmul.f32 1.442695, %v757_v43  ;;  %v6029_v40 = vsub.f32 %v3319_v57, %v3552_v14 }
 0x205   :  { %v958_v13 = vsel %vm957_vm7, %v955_v10, %v956_v27  ;;  %v758_v10 = vsel %vm6027_vm13, %v6026_v54, -inf  ;;  %v771_v27 = vmul.f32 1.442695, %v755_v35  ;;  %vm6030_vm2 = vnez %v5892_v63 }
 0x206   :  { %v959_v21 = vrot.slane %v958_v13, 2  ;;  %v3706_v49 = vadd.f32 %v694_v5, %v680_v36  ;;  %v777_v15 = vmul.f32 1.442695, %v758_v10  ;;  %v759_v18 = vsel %vm6030_vm2, %v6029_v40, -inf  ;;  %v6033_v5 = vld [vmem:[#allocation44_spill] sm:$0xff] }
 0x207   :  { %vm6032_vm8 = vnez %v6031_v62  ;;  %2480 = vpow2.f32 %v771_v27  ;;  %vm6034_vm1 = vnez %v6033_v5  ;;  %v3721_v41 = vmul.f32 1.442695, %v759_v18  ;;  %v6038_v18 = vld [vmem:[#allocation65_spill] sm:$0xff] }
 0x208   :  { %6028 = vst [vmem:[#allocation68_spill] sm:$0xff] %v3706_v49  ;;  %vm960_vm5 = vcmp.lt.s32.totalorder %v958_v13, %v959_v21  ;;  %v760_v52 = vsel %vm6032_vm8, %v744_v58, -inf  ;;  %2482 = vpow2.f32 %v773_v32  ;;  %v3717_v35 = vsel %vm6034_vm1, %v745_v0, -inf  ;;  %v6035_v58 = vld [vmem:[#allocation62_spill] sm:$0xff]  ;;  %v6036_v0 = vld [vmem:[#allocation63_spill] sm:$0xff] }
 0x209   :  { %v961_v20 = vsel %vm960_vm5, %v958_v13, %v959_v21  ;;  %2484 = vpow2.f32 %v775_v4  ;;  %v3723_v43 = vmul.f32 1.442695, %v760_v52  ;;  %v6037_v52 = vld [vmem:[#allocation64_spill] sm:$0xff]  ;;  %v6039_v21 = vld [vmem:[#allocation66_spill] sm:$0xff] }
 0x20a   :  { %v962_v42 = vrot.slane %v961_v20, 1  ;;  %2486 = vpow2.f32 %v777_v15 }
 0x20b   :  { %2488 = vpow2.f32 %v3721_v41 }
 0x20c   :  { %vm963_vm10 = vcmp.lt.s32.totalorder %v961_v20, %v962_v42  ;;  %2490 = vpow2.f32 %v3723_v43  ;;  %v6103_v43 = vsub.f32 %v3395_v16, %v3552_v14 }
 0x20d   :  { %v3719_v13 = vsel %vm963_vm10, %v961_v20, %v962_v42 }
 0x20e   :  { %vm975_vm7 = vcmp.eq.s32.totalorder %v6035_v58, %v3719_v13  ;;  %vm977_vm10 = vcmp.eq.s32.totalorder %v6037_v52, %v3719_v13  ;;  %vm6040_vm15 = vcmp.eq.s32.totalorder %v3505_v45, %v3719_v13  ;;  %vm6041_vm5 = vcmp.eq.s32.totalorder %v3514_v8, %v3719_v13  ;;  %v6097_v52 = vld [vmem:[#allocation36_spill] sm:$0xff] }
 0x20f   :  { %v981_v36 = vsel %vm6040_vm15, %v3127_v56, 0.0  ;;  %v982_v54 = vsel %vm6041_vm5, %v3089_v22, 0.0  ;;  %vm6042_vm1 = vcmp.eq.s32.totalorder %v3517_v37, %v3719_v13  ;;  %vm6043_vm11 = vcmp.eq.s32.totalorder %v3520_v38, %v3719_v13  ;;  %v6069_v22 = vld [vmem:[#allocation48_spill] sm:$0xff]  ;;  %v6072_v56 = vld [vmem:[#allocation45_spill] sm:$0xff] }
 0x210   :  { %v983_v10 = vsel %vm6042_vm1, %v3187_v7, 0.0  ;;  %v984_v27 = vsel %vm6043_vm11, %v3168_v34, 0.0  ;;  %vm6044_vm4 = vcmp.eq.s32.totalorder %v3523_v25, %v3719_v13  ;;  %vm6045_vm15 = vcmp.eq.s32.totalorder %v3526_v61, %v3719_v13  ;;  %v6063_v34 = vld [vmem:[#allocation40_spill] sm:$0xff]  ;;  %v6066_v7 = vld [vmem:[#allocation35_spill] sm:$0xff] }
 0x211   :  { %v985_v32 = vsel %vm6044_vm4, %v3319_v57, 0.0  ;;  %v986_v4 = vsel %vm6045_vm15, %v3275_v39, 0.0  ;;  %vm6046_vm5 = vcmp.eq.s32.totalorder %v3529_v31, %v3719_v13  ;;  %vm6047_vm1 = vcmp.eq.s32.totalorder %v3532_v30, %v3719_v13  ;;  %v2481_v42 = vpop.eup %2480 }
 0x212   :  { %v987_v20 = vsel %vm6046_vm5, %v3380_v44, 0.0  ;;  %v988_v15 = vsel %vm6047_vm1, %v3365_v46, 0.0  ;;  %vm6048_vm11 = vcmp.eq.s32.totalorder %v3538_v6, %v3719_v13  ;;  %vm6049_vm4 = vcmp.eq.s32.totalorder %v3541_v3, %v3719_v13  ;;  %v2483_v2 = vpop.eup %2482  ;;  %v6057_v44 = vld [vmem:[#allocation34_spill] sm:$0xff] }
 0x213   :  { %v989_v40 = vsel %vm6048_vm11, %v3129_v28, 0.0  ;;  %v3797_v12 = vsel %vm6049_vm4, %v3091_v23, 0.0  ;;  %v3803_v9 = vsel %vm975_vm7, %v3189_v11, 0.0  ;;  %vm6050_vm15 = vcmp.eq.s32.totalorder %v6036_v0, %v3719_v13  ;;  %v2485_v63 = vpop.eup %2484 }
 0x214   :  { %v3809_v33 = vsel %vm6050_vm15, %v5997_v59, 0.0  ;;  %v3815_v48 = vsel %vm977_vm10, %v6000_v24, 0.0  ;;  %vm6051_vm5 = vcmp.eq.s32.totalorder %v6038_v18, %v3719_v13  ;;  %vm6052_vm1 = vcmp.eq.s32.totalorder %v6039_v21, %v3719_v13 }
 0x215   :  { %v3821_v49 = vsel %vm6051_vm5, %v6018_v47, 0.0  ;;  %v3827_v5 = vsel %vm6052_vm1, %v3395_v16, 0.0  ;;  %v997_v62 = vadd.f32 %v982_v54, %v981_v36  ;;  %vm6054_vm11 = vcmp.eq.s32.totalorder %v3505_v45, %v3719_v13  ;;  %v6060_v36 = vld [vmem:[#allocation26_spill] sm:$0xff] }
 0x216   :  { %v3833_v53 = vsel %vm6054_vm11, -inf, %v6053_v29  ;;  %vm6056_vm4 = vcmp.eq.s32.totalorder %v3514_v8, %v3719_v13  ;;  %vm6058_vm15 = vcmp.eq.s32.totalorder %v3517_v37, %v3719_v13  ;;  %vm6061_vm5 = vcmp.eq.s32.totalorder %v3520_v38, %v3719_v13  ;;  %v2487_v29 = vpop.eup %2486 }
 0x217   :  { %v3839_v50 = vsel %vm6056_vm4, -inf, %v6055_v51  ;;  %v3845_v39 = vsel %vm6058_vm15, -inf, %v6057_v44  ;;  %v3851_v54 = vsel %vm6061_vm5, -inf, %v6060_v36  ;;  %v998_v57 = vadd.f32 %v997_v62, %v983_v10 }
 0x218   :  { %6059 = vst [vmem:[#allocation23_spill] sm:$0xff] %v3845_v39  ;;  %6062 = vst [vmem:[#allocation20_spill] sm:$0xff] %v3851_v54  ;;  %vm6064_vm1 = vcmp.eq.s32.totalorder %v3523_v25, %v3719_v13  ;;  %vm6067_vm11 = vcmp.eq.s32.totalorder %v3526_v61, %v3719_v13  ;;  %vm6070_vm4 = vcmp.eq.s32.totalorder %v3529_v31, %v3719_v13 }
 0x219   :  { %v3857_v51 = vsel %vm6064_vm1, -inf, %v6063_v34  ;;  %v3863_v44 = vsel %vm6067_vm11, -inf, %v6066_v7  ;;  %v3869_v36 = vsel %vm6070_vm4, -inf, %v6069_v22  ;;  %vm6073_vm15 = vcmp.eq.s32.totalorder %v3532_v30, %v3719_v13  ;;  %v6075_v34 = vld [vmem:[#allocation25_spill] sm:$0xff]  ;;  %v6081_v22 = vld [vmem:[#allocation50_spill] sm:$0xff]  ;;  %v6083_v30 = vld [vmem:[#allocation31_spill] sm:$0xff] }
 0x21a   :  { %6065 = vst [vmem:[#allocation34_spill] sm:$0xff] %v3857_v51  ;;  %6068 = vst [vmem:[#allocation26_spill] sm:$0xff] %v3863_v44  ;;  %v3875_v62 = vsel %vm6073_vm15, -inf, %v6072_v56  ;;  %vm6076_vm5 = vcmp.eq.s32.totalorder %v3538_v6, %v3719_v13  ;;  %v6078_v7 = vld [vmem:[#allocation21_spill] sm:$0xff]  ;;  %vm6079_vm1 = vcmp.eq.s32.totalorder %v3541_v3, %v3719_v13  ;;  %v3893_v31 = vsel %vm975_vm7, -inf, %v6081_v22  ;;  %v6091_v22 = vld [vmem:[#allocation51_spill] sm:$0xff] }
 0x21b   :  { %6071 = vst [vmem:[#allocation40_spill] sm:$0xff] %v3869_v36  ;;  %6074 = vst [vmem:[#allocation35_spill] sm:$0xff] %v3875_v62  ;;  %v3881_v10 = vsel %vm6076_vm5, -inf, %v6075_v34  ;;  %v3887_v61 = vsel %vm6079_vm1, -inf, %v6078_v7  ;;  %v999_v56 = vadd.f32 %v998_v57, %v984_v27  ;;  %vm6084_vm11 = vcmp.eq.s32.totalorder %v6036_v0, %v3719_v13  ;;  %v6086_v34 = vld [vmem:[#allocation47_spill] sm:$0xff]  ;;  %v6088_v7 = vld [vmem:[#allocation37_spill] sm:$0xff] }
 0x21c   :  { %6077 = vst [vmem:[#allocation48_spill] sm:$0xff] %v3881_v10  ;;  %6080 = vst [vmem:[#allocation45_spill] sm:$0xff] %v3887_v61  ;;  %v3899_v6 = vsel %vm6084_vm11, -inf, %v6083_v30  ;;  %v3905_v3 = vsel %vm977_vm10, -inf, %v6086_v34  ;;  %vm6089_vm4 = vcmp.eq.s32.totalorder %v6038_v18, %v3719_v13  ;;  %vm6092_vm7 = vcmp.eq.s32.totalorder %v6039_v21, %v3719_v13 }
 0x21d   :  { %6082 = vst [vmem:[#allocation25_spill] sm:$0xff] %v3893_v31  ;;  %6085 = vst [vmem:[#allocation21_spill] sm:$0xff] %v3899_v6  ;;  %v3911_v58 = vsel %vm6089_vm4, -inf, %v6088_v7  ;;  %v3917_v57 = vsel %vm6092_vm7, -inf, %v6091_v22  ;;  %vm6094_vm15 = vcmp.eq.s32.totalorder %v3564_v55, %v3719_v13  ;;  %v1043_v27 = vmax.f32 %v3833_v53, %v3857_v51 }
 0x21e   :  { %6087 = vst [vmem:[#allocation50_spill] sm:$0xff] %v3905_v3  ;;  %6090 = vst [vmem:[#allocation31_spill] sm:$0xff] %v3911_v58  ;;  %v3923_v30 = vsel %vm6094_vm15, -inf, %v3456_v60  ;;  %v1044_v34 = vmax.f32 %v3839_v50, %v3863_v44  ;;  %v1000_v7 = vadd.f32 %v999_v56, %v985_v32  ;;  %v1045_v18 = vmax.f32 %v3845_v39, %v3869_v36 }
 0x21f   :  { %6093 = vst [vmem:[#allocation47_spill] sm:$0xff] %v3917_v57  ;;  %6095 = vst [vmem:[#allocation37_spill] sm:$0xff] %v3923_v30  ;;  %v1046_v22 = vmax.f32 %v3851_v54, %v3875_v62  ;;  %v6096_v21 = vsub.f32 %v3365_v46, %v3552_v14  ;;  %vm6098_vm10 = vnez %v6097_v52  ;;  %v1047_v0 = vmax.f32 %v1043_v27, %v3881_v10  ;;  %v6100_v46 = vld [vmem:[#allocation19_spill] sm:$0xff] }
 0x220   :  { %v1048_v25 = vmax.f32 %v1044_v34, %v3887_v61  ;;  %v783_v32 = vmul.f32 1.442695, %v3717_v35  ;;  %v1001_v56 = vadd.f32 %v1000_v7, %v986_v4  ;;  %v1049_v38 = vmax.f32 %v1045_v18, %v3893_v31  ;;  %vm6102_vm1 = vmmov %vm6094_vm15 }
 0x221   :  { %v762_v60 = vsel %vm6098_vm10, %v6096_v21, -inf  ;;  %v1050_v37 = vmax.f32 %v1046_v22, %v3899_v6  ;;  %v6099_v8 = vsub.f32 %v3129_v28, %v3552_v14  ;;  %vm6101_vm5 = vnez %v6100_v46 }
 0x222   :  { %v1051_v21 = vmax.f32 %v1047_v0, %v3905_v3  ;;  %v1052_v27 = vmax.f32 %v1048_v25, %v3911_v58  ;;  %v785_v41 = vmul.f32 1.442695, %v762_v60  ;;  %v1002_v34 = vadd.f32 %v1001_v56, %v987_v20  ;;  %v6108_v56 = vld [vmem:[#allocation29_spill] sm:$0xff] }
 0x223   :  { %v763_v52 = vsel %vm6101_vm5, %v6099_v8, -inf  ;;  %v1053_v35 = vmax.f32 %v1049_v38, %v3917_v57  ;;  %v1054_v18 = vmax.f32 %v1050_v37, %v3923_v30  ;;  %2492 = vpow2.f32 %v783_v32 }
 0x224   :  { %v1055_v4 = vmax.f32 %v1051_v21, %v1052_v27  ;;  %v787_v7 = vmul.f32 1.442695, %v763_v52  ;;  %v803_v22 = vadd.f32 %v2483_v2, %v2481_v42  ;;  %v1003_v28 = vadd.f32 %v1002_v34, %v988_v15  ;;  %v6105_v15 = vld [vmem:[#allocation13_spill] sm:$0xff] }
 0x225   :  { %v1056_v45 = vmax.f32 %v1053_v35, %v1054_v18  ;;  %v3958_v8 = vsel %vm6102_vm1, %v3367_v17, 0.0  ;;  %2494 = vpow2.f32 %v785_v41  ;;  %v769_v37 = vsel %vm3465_vm3, %v6103_v43, -inf  ;;  %v6114_v35 = vld [vmem:[#allocation42_spill] sm:$0xff] }
 0x226   :  { %v804_v25 = vadd.f32 %v2485_v63, %v803_v22  ;;  %v1004_v38 = vadd.f32 %v1003_v28, %v989_v40  ;;  %2496 = vpow2.f32 %v787_v7  ;;  %v6104_v13 = vsub.f32 %v3091_v23, %v3552_v14  ;;  %v2489_v63 = vpop.eup %2488 }
 0x227   :  { %v1057_v0 = vmax.f32 %v1055_v4, %v1056_v45  ;;  %vm6106_vm11 = vnez %v6105_v15  ;;  %v799_v60 = vmul.f32 1.442695, %v769_v37  ;;  %v6107_v32 = vsub.f32 %v3189_v11, %v3552_v14  ;;  %v2491_v41 = vpop.eup %2490  ;;  %v6141_v15 = vld [vmem:[#allocation66_spill] sm:$0xff] }
 0x228   :  { %v805_v2 = vadd.f32 %v2487_v29, %v804_v25  ;;  %v1005_v52 = vadd.f32 %v1004_v38, %v3797_v12  ;;  %v764_v42 = vsel %vm6106_vm11, %v6104_v13, -inf  ;;  %vm6109_vm4 = vnez %v6108_v56  ;;  %v6111_v29 = vld [vmem:[#allocation22_spill] sm:$0xff] }
 0x229   :  { %v1058_v20 = vrot.slane %v1057_v0, 4  ;;  %v765_v28 = vsel %vm6109_vm4, %v6107_v32, -inf  ;;  %v6110_v12 = vsub.f32 %v5997_v59, %v3552_v14  ;;  %vm6112_vm7 = vnez %v6111_v29  ;;  %v6140_v29 = vld [vmem:[#allocation65_spill] sm:$0xff] }
 0x22a   :  { %v1006_v45 = vadd.f32 %v1005_v52, %v3803_v9  ;;  %v806_v27 = vadd.f32 %v2489_v63, %v805_v2  ;;  %v6113_v34 = vsub.f32 %v6000_v24, %v3552_v14  ;;  %vm6115_vm15 = vnez %v6114_v35 }
 0x22b   :  { %v1059_v40 = vmax.f32 %v1057_v0, %v1058_v20  ;;  %v766_v21 = vsel %vm6112_vm7, %v6110_v12, -inf  ;;  %v6116_v4 = vsub.f32 %v6018_v47, %v3552_v14  ;;  %v789_v7 = vmul.f32 1.442695, %v764_v42 }
 0x22c   :  { %v767_v18 = vsel %vm6115_vm15, %v6113_v34, -inf  ;;  %v1007_v22 = vadd.f32 %v1006_v45, %v3809_v33  ;;  %v791_v43 = vmul.f32 1.442695, %v765_v28  ;;  %v807_v37 = vadd.f32 %v2491_v41, %v806_v27  ;;  %v6120_v34 = vld [vmem:[#allocation53_spill] sm:$0xff] }
 0x22d   :  { %v768_v9 = vsel %vm6020_vm14, %v6116_v4, -inf  ;;  %v1060_v25 = vrot.slane %v1059_v40, 2  ;;  %v2493_v38 = vpop.eup %2492  ;;  %2498 = vpow2.f32 %v799_v60  ;;  %v793_v0 = vmul.f32 1.442695, %v766_v21  ;;  %v6122_v4 = vld [vmem:[#allocation54_spill] sm:$0xff] }
 0x22e   :  { %v1008_v2 = vadd.f32 %v1007_v22, %v3815_v48  ;;  %v795_v20 = vmul.f32 1.442695, %v767_v18  ;;  %v808_v13 = vadd.f32 %v2493_v38, %v807_v37  ;;  %v6117_v32 = vsub.f32 %v3367_v17, %v3552_v14  ;;  %v6127_v38 = vld [vmem:[#allocation57_spill] sm:$0xff] }
 0x22f   :  { %v1061_v52 = vmax.f32 %v1059_v40, %v1060_v25  ;;  %v2495_v63 = vpop.eup %2494  ;;  %2500 = vpow2.f32 %v789_v7  ;;  %v797_v33 = vmul.f32 1.442695, %v768_v9  ;;  %v6123_v7 = vld [vmem:[#allocation55_spill] sm:$0xff] }
 0x230   :  { %v770_v42 = vsel %vm6025_vm0, %v6117_v32, -inf  ;;  %v1009_v28 = vadd.f32 %v1008_v2, %v3821_v49  ;;  %2502 = vpow2.f32 %v791_v43  ;;  %v809_v60 = vadd.f32 %v2495_v63, %v808_v13  ;;  %v2497_v12 = vpop.eup %2496  ;;  %v6125_v43 = vld [vmem:[#allocation56_spill] sm:$0xff]  ;;  %v6129_v2 = vld [vmem:[#allocation58_spill] sm:$0xff] }
 0x231   :  { %v1062_v45 = vrot.slane %v1061_v52, 1  ;;  %2504 = vpow2.f32 %v793_v0  ;;  %v4005_v27 = vmul.f32 1.442695, %v770_v42  ;;  %v6133_v32 = vld [vmem:[#allocation60_spill] sm:$0xff] }
 0x232   :  { %v4001_v48 = vadd.f32 %v1009_v28, %v3827_v5  ;;  %2506 = vpow2.f32 %v795_v20  ;;  %v4003_v21 = vadd.f32 %v2497_v12, %v809_v60  ;;  %v6118_v5 = vld [vmem:[#allocation52_spill] sm:$0xff]  ;;  %v6131_v20 = vld [vmem:[#allocation59_spill] sm:$0xff] }
 0x233   :  { %v1063_v40 = vmax.f32 %v1061_v52, %v1062_v45  ;;  %2508 = vpow2.f32 %v797_v33  ;;  %v6134_v33 = vld [vmem:[#allocation61_spill] sm:$0xff]  ;;  %v6136_v45 = vld [vmem:[#allocation62_spill] sm:$0xff]  ;;  %v6137_v12 = vld [vmem:[#allocation63_spill] sm:$0xff] }
 0x234   :  { %2510 = vpow2.f32 %v4005_v27 }
 0x235   :  { %vm1066_vm3 = vcmp.eq.f32.partialorder %v3845_v39, %v1063_v40  ;;  %vm1072_vm5 = vcmp.eq.f32.partialorder %v3881_v10, %v1063_v40  ;;  %vm1074_vm1 = vcmp.eq.f32.partialorder %v3893_v31, %v1063_v40  ;;  %vm1075_vm0 = vcmp.eq.f32.partialorder %v3899_v6, %v1063_v40 }
 0x236   :  { %vm1077_vm15 = vcmp.eq.f32.partialorder %v3911_v58, %v1063_v40  ;;  %vm1078_vm7 = vcmp.eq.f32.partialorder %v3917_v57, %v1063_v40  ;;  %vm6119_vm11 = vcmp.eq.f32.partialorder %v3833_v53, %v1063_v40  ;;  %vm6121_vm10 = vcmp.eq.f32.partialorder %v3839_v50, %v1063_v40 }
 0x237   :  { %v4019_v49 = vpop.eup %2498  ;;  %v1080_v41 = vsel %vm6119_vm11, %v6118_v5, 128  ;;  %v1081_v18 = vsel %vm6121_vm10, %v6120_v34, 128  ;;  %v1082_v9 = vsel %vm1066_vm3, %v6122_v4, 128  ;;  %vm6124_vm14 = vcmp.eq.f32.partialorder %v3851_v54, %v1063_v40 }
 0x238   :  { %v1083_v22 = vsel %vm6124_vm14, %v6123_v7, 128  ;;  %vm6126_vm4 = vcmp.eq.f32.partialorder %v3857_v51, %v1063_v40  ;;  %vm6128_vm11 = vcmp.eq.f32.partialorder %v3863_v44, %v1063_v40  ;;  %vm6130_vm10 = vcmp.eq.f32.partialorder %v3869_v36, %v1063_v40 }
 0x239   :  { %v2501_v25 = vpop.eup %2500  ;;  %v1084_v37 = vsel %vm6126_vm4, %v6125_v43, 128  ;;  %v1085_v0 = vsel %vm6128_vm11, %v6127_v38, 128  ;;  %v1086_v52 = vsel %vm6130_vm10, %v6129_v2, 128  ;;  %vm6132_vm3 = vcmp.eq.f32.partialorder %v3875_v62, %v1063_v40 }
 0x23a   :  { %v1087_v13 = vsel %vm6132_vm3, %v6131_v20, 128  ;;  %v2503_v63 = vpop.eup %2502  ;;  %v1088_v42 = vsel %vm1072_vm5, %v6133_v32, 128  ;;  %vm6135_vm14 = vcmp.eq.f32.partialorder %v3887_v61, %v1063_v40  ;;  %v1090_v60 = vsel %vm1074_vm1, %v6136_v45, 128 }
 0x23b   :  { %v1089_v28 = vsel %vm6135_vm14, %v6134_v33, 128  ;;  %v1091_v19 = vsel %vm1075_vm0, %v6137_v12, 128  ;;  %v2505_v1 = vpop.eup %2504  ;;  %vm6139_vm4 = vcmp.eq.f32.partialorder %v3905_v3, %v1063_v40  ;;  %v1093_v56 = vsel %vm1077_vm15, %v6140_v29, 128 }
 0x23c   :  { %v1092_v35 = vsel %vm6139_vm4, %v6138_v26, 128  ;;  %v1094_v46 = vsel %vm1078_vm7, %v6141_v15, 128  ;;  %vm6142_vm5 = vcmp.eq.f32.partialorder %v3923_v30, %v1063_v40  ;;  %v2507_v61 = vpop.eup %2506  ;;  %vm1096_vm1 = vcmp.lt.s32.totalorder %v1080_v41, %v1084_v37 }
 0x23d   :  { %v1095_v31 = vsel %vm6142_vm5, %v3564_v55, 128  ;;  %vm1098_vm0 = vcmp.lt.s32.totalorder %v1081_v18, %v1085_v0  ;;  %vm1100_vm11 = vcmp.lt.s32.totalorder %v1082_v9, %v1086_v52  ;;  %vm1102_vm10 = vcmp.lt.s32.totalorder %v1083_v22, %v1087_v13  ;;  %v2509_v6 = vpop.eup %2508 }
 0x23e   :  { %v1097_v3 = vsel %vm1096_vm1, %v1080_v41, %v1084_v37  ;;  %v1099_v10 = vsel %vm1098_vm0, %v1081_v18, %v1085_v0  ;;  %v1101_v62 = vsel %vm1100_vm11, %v1082_v9, %v1086_v52  ;;  %v1103_v36 = vsel %vm1102_vm10, %v1083_v22, %v1087_v13  ;;  %v6146_v0 = vld [vmem:[#allocation17_spill] sm:$0xff]  ;;  %v6147_v13 = vld [vmem:[#allocation14_spill] sm:$0xff] }
 0x23f   :  { %vm1104_vm3 = vcmp.lt.s32.totalorder %v1097_v3, %v1088_v42  ;;  %vm1106_vm15 = vcmp.lt.s32.totalorder %v1099_v10, %v1089_v28  ;;  %vm1108_vm14 = vcmp.lt.s32.totalorder %v1101_v62, %v1090_v60  ;;  %vm1110_vm4 = vcmp.lt.s32.totalorder %v1103_v36, %v1091_v19 }
 0x240   :  { %v1105_v57 = vsel %vm1104_vm3, %v1097_v3, %v1088_v42  ;;  %v1107_v58 = vsel %vm1106_vm15, %v1099_v10, %v1089_v28  ;;  %v1109_v44 = vsel %vm1108_vm14, %v1101_v62, %v1090_v60  ;;  %v1111_v51 = vsel %vm1110_vm4, %v1103_v36, %v1091_v19  ;;  %v6148_v42 = vld [vmem:[#allocation32_spill] sm:$0xff]  ;;  %v6149_v60 = vld [vmem:[#allocation27_spill] sm:$0xff] }
 0x241   :  { %vm1112_vm7 = vcmp.lt.s32.totalorder %v1105_v57, %v1092_v35  ;;  %vm1114_vm5 = vcmp.lt.s32.totalorder %v1107_v58, %v1093_v56  ;;  %vm1116_vm8 = vcmp.lt.s32.totalorder %v1109_v44, %v1094_v46  ;;  %vm1118_vm2 = vcmp.lt.s32.totalorder %v1111_v51, %v1095_v31 }
 0x242   :  { %v1113_v40 = vsel %vm1112_vm7, %v1105_v57, %v1092_v35  ;;  %v1115_v30 = vsel %vm1114_vm5, %v1107_v58, %v1093_v56  ;;  %v1117_v54 = vsel %vm1116_vm8, %v1109_v44, %v1094_v46  ;;  %v1119_v39 = vsel %vm1118_vm2, %v1111_v51, %v1095_v31 }
 0x243   :  { %vm1120_vm1 = vcmp.lt.s32.totalorder %v1113_v40, %v1115_v30  ;;  %vm1122_vm0 = vcmp.lt.s32.totalorder %v1117_v54, %v1119_v39  ;;  %v811_v41 = vadd.f32 %v2501_v25, %v4003_v21  ;;  %v1011_v18 = vadd.f32 %v4001_v48, %v3958_v8  ;;  %v6145_v25 = vld [vmem:[#allocation6_spill] sm:$0xff] }
 0x244   :  { %v1121_v9 = vsel %vm1120_vm1, %v1113_v40, %v1115_v30  ;;  %v1123_v3 = vsel %vm1122_vm0, %v1117_v54, %v1119_v39  ;;  %v2511_v54 = vpop.eup %2510 }
 0x245   :  { %vm1124_vm11 = vcmp.lt.s32.totalorder %v1121_v9, %v1123_v3  ;;  %v812_v19 = vadd.f32 %v2503_v63, %v811_v41  ;;  %v1012_v36 = vrot.slane %v1011_v18, 4  ;;  %v6151_v41 = vld [vmem:[#allocation41_spill] sm:$0xff] }
 0x246   :  { %v1125_v62 = vsel %vm1124_vm11, %v1121_v9, %v1123_v3  ;;  %v6153_v9 = vld [vmem:[#allocation38_spill] sm:$0xff] }
 0x247   :  { %v1126_v10 = vrot.slane %v1125_v62, 4  ;;  %v813_v57 = vadd.f32 %v2505_v1, %v812_v19  ;;  %v1013_v58 = vadd.f32 %v1012_v36, %v1011_v18  ;;  %v6155_v19 = vld [vmem:[#allocation11_spill] sm:$0xff] }
 0x249   :  { %vm1127_vm8 = vcmp.lt.s32.totalorder %v1125_v62, %v1126_v10  ;;  %v814_v46 = vadd.f32 %v2507_v61, %v813_v57  ;;  %v1014_v31 = vrot.slane %v1013_v58, 2 }
 0x24a   :  { %v1128_v51 = vsel %vm1127_vm8, %v1125_v62, %v1126_v10 }
 0x24b   :  { %v1129_v44 = vrot.slane %v1128_v51, 2  ;;  %v815_v56 = vadd.f32 %v2509_v6, %v814_v46  ;;  %v1015_v35 = vadd.f32 %v1014_v31, %v1013_v58  ;;  %v6144_v6 = vld [vmem:[#allocation10_spill] sm:$0xff] }
 0x24d   :  { %vm1130_vm2 = vcmp.lt.s32.totalorder %v1128_v51, %v1129_v44  ;;  %v816_v30 = vadd.f32 %v4019_v49, %v815_v56  ;;  %v1016_v39 = vrot.slane %v1015_v35, 1 }
 0x24e   :  { %v1131_v8 = vsel %vm1130_vm2, %v1128_v51, %v1129_v44 }
 0x24f   :  { %v1132_v48 = vrot.slane %v1131_v8, 1  ;;  %v817_v21 = vadd.f32 %v2511_v54, %v816_v30  ;;  %v1017_v27 = vadd.f32 %v1016_v39, %v1015_v35 }
 0x251   :  { %vm1133_vm10 = vcmp.lt.s32.totalorder %v1131_v8, %v1132_v48  ;;  %v4079_v1 = vmax.f32 %v3552_v14, %v1017_v27  ;;  %v818_v61 = vrot.slane %v817_v21, 4 }
 0x252   :  { %v4081_v22 = vsel %vm1133_vm10, %v1131_v8, %v1132_v48 }
 0x253   :  { %6143 = vst [vmem:[#allocation51_spill] sm:$0xff] %v4079_v1  ;;  %vm5831_vm3 = vcmp.eq.s32.totalorder %v6118_v5, %v4081_v22  ;;  %vm5832_vm15 = vcmp.eq.s32.totalorder %v6120_v34, %v4081_v22  ;;  %vm5833_vm14 = vcmp.eq.s32.totalorder %v6122_v4, %v4081_v22  ;;  %vm1138_vm4 = vcmp.eq.s32.totalorder %v6123_v7, %v4081_v22 }
 0x254   :  { %vm1139_vm7 = vcmp.eq.s32.totalorder %v6125_v43, %v4081_v22  ;;  %vm1143_vm11 = vcmp.eq.s32.totalorder %v6133_v32, %v4081_v22  ;;  %vm1144_vm8 = vcmp.eq.s32.totalorder %v6134_v33, %v4081_v22  ;;  %vm1145_vm2 = vcmp.eq.s32.totalorder %v6136_v45, %v4081_v22 }
 0x255   :  { %vm1146_vm10 = vcmp.eq.s32.totalorder %v6137_v12, %v4081_v22  ;;  %vm1147_vm5 = vcmp.eq.s32.totalorder %v6138_v26, %v4081_v22  ;;  %vm1148_vm1 = vcmp.eq.s32.totalorder %v6140_v29, %v4081_v22  ;;  %vm1149_vm0 = vcmp.eq.s32.totalorder %v6141_v15, %v4081_v22 }
 0x256   :  { %v1151_v49 = vsel %vm5831_vm3, %v6144_v6, 0.0  ;;  %v1152_v37 = vsel %vm5832_vm15, %v6145_v25, 0.0  ;;  %v1153_v52 = vsel %vm5833_vm14, %v6146_v0, 0.0  ;;  %v1154_v63 = vsel %vm1138_vm4, %v6147_v13, 0.0 }
 0x257   :  { %v1155_v28 = vsel %vm1139_vm7, %v6148_v42, 0.0  ;;  %vm6150_vm3 = vcmp.eq.s32.totalorder %v6127_v38, %v4081_v22  ;;  %vm6152_vm15 = vcmp.eq.s32.totalorder %v6129_v2, %v4081_v22  ;;  %vm6154_vm14 = vcmp.eq.s32.totalorder %v6131_v20, %v4081_v22 }
 0x258   :  { %v1156_v40 = vsel %vm6150_vm3, %v6149_v60, 0.0  ;;  %v1157_v18 = vsel %vm6152_vm15, %v6151_v41, 0.0  ;;  %v1158_v3 = vsel %vm6154_vm14, %v6153_v9, 0.0  ;;  %v1159_v36 = vsel %vm1143_vm11, %v6155_v19, 0.0 }
 0x259   :  { %v1160_v62 = vsel %vm1144_vm8, %v3091_v23, 0.0  ;;  %v1161_v10 = vsel %vm1145_vm2, %v3189_v11, 0.0  ;;  %v4161_v57 = vsel %vm1146_vm10, %v5997_v59, 0.0  ;;  %v4167_v58 = vsel %vm1147_vm5, %v6000_v24, 0.0 }
 0x25a   :  { %v4173_v46 = vsel %vm1148_vm1, %v6018_v47, 0.0  ;;  %v4179_v31 = vsel %vm1149_vm0, %v3395_v16, 0.0  ;;  %v1167_v51 = vadd.f32 %v1152_v37, %v1151_v49  ;;  %v819_v44 = vadd.f32 %v818_v61, %v817_v21  ;;  %v6160_v61 = vld [vmem:[#allocation20_spill] sm:$0xff]  ;;  %v6170_v16 = vld [vmem:[#allocation25_spill] sm:$0xff] }
 0x25b   :  { %v1019_v56 = vsub.f32 %v3552_v14, %v4079_v1  ;;  %v1023_v35 = vsub.f32 %v1017_v27, %v4079_v1  ;;  %vm1150_vm3 = vcmp.eq.s32.totalorder %v3564_v55, %v4081_v22  ;;  %vm6156_vm15 = vcmp.eq.s32.totalorder %v6118_v5, %v4081_v22  ;;  %v6158_v27 = vld [vmem:[#allocation23_spill] sm:$0xff]  ;;  %v6171_v47 = vld [vmem:[#allocation21_spill] sm:$0xff] }
 0x25c   :  { %v4190_v30 = vsel %vm6156_vm15, -inf, %v3833_v53  ;;  %v1168_v39 = vadd.f32 %v1167_v51, %v1153_v52  ;;  %v820_v54 = vrot.slane %v819_v44, 2  ;;  %v1166_v8 = vsel %vm1150_vm3, %v3367_v17, 0.0  ;;  %v6161_v52 = vld [vmem:[#allocation34_spill] sm:$0xff]  ;;  %v6169_v17 = vld [vmem:[#allocation45_spill] sm:$0xff] }
 0x25d   :  { %vm6157_vm14 = vcmp.eq.s32.totalorder %v6120_v34, %v4081_v22  ;;  %v1020_v48 = vmul.f32 1.442695, %v1019_v56  ;;  %v1024_v21 = vmul.f32 1.442695, %v1023_v35  ;;  %vm6159_vm15 = vcmp.eq.s32.totalorder %v6122_v4, %v4081_v22  ;;  %v6162_v51 = vld [vmem:[#allocation26_spill] sm:$0xff]  ;;  %v6164_v35 = vld [vmem:[#allocation40_spill] sm:$0xff] }
 0x25e   :  { %v4200_v14 = vsel %vm6157_vm14, -inf, %v3839_v50  ;;  %v4206_v53 = vsel %vm6159_vm15, -inf, %v6158_v27  ;;  %v4212_v49 = vsel %vm1138_vm4, -inf, %v6160_v61  ;;  %v1169_v37 = vadd.f32 %v1168_v39, %v1154_v63  ;;  %v6166_v63 = vld [vmem:[#allocation35_spill] sm:$0xff]  ;;  %v6168_v61 = vld [vmem:[#allocation48_spill] sm:$0xff] }
 0x25f   :  { %v4218_v50 = vsel %vm1139_vm7, -inf, %v6161_v52  ;;  %vm6163_vm14 = vcmp.eq.s32.totalorder %v6127_v38, %v4081_v22  ;;  %2512 = vpow2.f32 %v1020_v48  ;;  %vm6165_vm15 = vcmp.eq.s32.totalorder %v6129_v2, %v4081_v22 }
 0x260   :  { %v4224_v56 = vsel %vm6163_vm14, -inf, %v6162_v51  ;;  %v4230_v27 = vsel %vm6165_vm15, -inf, %v6164_v35  ;;  %vm6167_vm4 = vcmp.eq.s32.totalorder %v6131_v20, %v4081_v22  ;;  %v4242_v52 = vsel %vm1143_vm11, -inf, %v6168_v61 }
 0x261   :  { %v4236_v39 = vsel %vm6167_vm4, -inf, %v6166_v63  ;;  %v1170_v51 = vadd.f32 %v1169_v37, %v1155_v28  ;;  %v821_v48 = vadd.f32 %v820_v54, %v819_v44  ;;  %2514 = vpow2.f32 %v1024_v21  ;;  %v6172_v28 = vld [vmem:[#allocation50_spill] sm:$0xff]  ;;  %v6174_v21 = vld [vmem:[#allocation47_spill] sm:$0xff] }
 0x262   :  { %v4248_v35 = vsel %vm1144_vm8, -inf, %v6169_v17  ;;  %v4254_v63 = vsel %vm1145_vm2, -inf, %v6170_v16  ;;  %v4260_v61 = vsel %vm1146_vm10, -inf, %v6171_v47  ;;  %v4266_v44 = vsel %vm1147_vm5, -inf, %v6172_v28  ;;  %v6173_v17 = vld [vmem:[#allocation31_spill] sm:$0xff]  ;;  %v6175_v47 = vld [vmem:[#allocation37_spill] sm:$0xff] }
 0x263   :  { %v4272_v54 = vsel %vm1148_vm1, -inf, %v6173_v17  ;;  %v1171_v16 = vadd.f32 %v1170_v51, %v1156_v40  ;;  %v4278_v37 = vsel %vm1149_vm0, -inf, %v6174_v21  ;;  %v4284_v24 = vsel %vm1150_vm3, -inf, %v6175_v47 }
 0x264   :  { %v1213_v28 = vmax.f32 %v4190_v30, %v4218_v50  ;;  %v1214_v17 = vmax.f32 %v4200_v14, %v4224_v56  ;;  %v1215_v40 = vmax.f32 %v4206_v53, %v4230_v27  ;;  %v1216_v51 = vmax.f32 %v4212_v49, %v4236_v39 }
 0x265   :  { %v1172_v21 = vadd.f32 %v1171_v16, %v1157_v18  ;;  %v822_v59 = vrot.slane %v821_v48, 1 }
 0x266   :  { %v1217_v11 = vmax.f32 %v1213_v28, %v4242_v52  ;;  %v1218_v22 = vmax.f32 %v1214_v17, %v4248_v35  ;;  %v1219_v47 = vmax.f32 %v1215_v40, %v4254_v63  ;;  %v1220_v23 = vmax.f32 %v1216_v51, %v4260_v61 }
 0x267   :  { %v1173_v19 = vadd.f32 %v1172_v21, %v1158_v3  ;;  %v823_v18 = vadd.f32 %v822_v59, %v821_v48 }
 0x268   :  { %v1221_v9 = vmax.f32 %v1217_v11, %v4266_v44  ;;  %v1222_v41 = vmax.f32 %v1218_v22, %v4272_v54  ;;  %v1223_v60 = vmax.f32 %v1219_v47, %v4278_v37  ;;  %v1224_v42 = vmax.f32 %v1220_v23, %v4284_v24 }
 0x269   :  { %v1174_v13 = vadd.f32 %v1173_v19, %v1159_v36  ;;  %v2513_v16 = vpop.eup %2512 }
 0x26a   :  { %v1225_v0 = vmax.f32 %v1221_v9, %v1222_v41  ;;  %v1226_v28 = vmax.f32 %v1223_v60, %v1224_v42  ;;  %v1022_v6 = vmul.f32 %v2513_v16, %v823_v18 }
 0x26b   :  { %v2515_v25 = vpop.eup %2514  ;;  %v1175_v17 = vadd.f32 %v1174_v13, %v1160_v62 }
 0x26c   :  { %v1227_v40 = vmax.f32 %v1225_v0, %v1226_v28  ;;  %v4302_v51 = vadd.f32 %v2515_v25, %v1022_v6 }
 0x26d   :  { %v1176_v1 = vadd.f32 %v1175_v17, %v1161_v10 }
 0x26e   :  { %v1228_v3 = vrot.slane %v1227_v40, 4 }
 0x26f   :  { %v1177_v11 = vadd.f32 %v1176_v1, %v4161_v57 }
 0x270   :  { %v1229_v21 = vmax.f32 %v1227_v40, %v1228_v3 }
 0x271   :  { %v1178_v22 = vadd.f32 %v1177_v11, %v4167_v58 }
 0x272   :  { %v1230_v47 = vrot.slane %v1229_v21, 2 }
 0x273   :  { %v1179_v23 = vadd.f32 %v1178_v22, %v4173_v46 }
 0x274   :  { %v1231_v59 = vmax.f32 %v1229_v21, %v1230_v47 }
 0x275   :  { %v1180_v41 = vadd.f32 %v1179_v23, %v4179_v31  ;;  %v6183_v23 = vld [vmem:[#allocation51_spill] sm:$0xff] }
 0x276   :  { %v1232_v42 = vrot.slane %v1231_v59, 1 }
 0x277   :  { %v1181_v60 = vadd.f32 %v1180_v41, %v1166_v8 }
 0x278   :  { %v1233_v13 = vmax.f32 %v1231_v59, %v1232_v42 }
 0x279   :  { %v1182_v9 = vrot.slane %v1181_v60, 4 }
 0x27a   :  { %vm1234_vm7 = vcmp.eq.f32.partialorder %v4190_v30, %v1233_v13  ;;  %vm1235_vm5 = vcmp.eq.f32.partialorder %v4200_v14, %v1233_v13  ;;  %vm1240_vm2 = vcmp.eq.f32.partialorder %v4230_v27, %v1233_v13  ;;  %vm1241_vm10 = vcmp.eq.f32.partialorder %v4236_v39, %v1233_v13 }
 0x27b   :  { %v1183_v1 = vadd.f32 %v1182_v9, %v1181_v60  ;;  %vm1242_vm3 = vcmp.eq.f32.partialorder %v4242_v52, %v1233_v13  ;;  %vm1243_vm14 = vcmp.eq.f32.partialorder %v4248_v35, %v1233_v13  ;;  %vm1244_vm15 = vcmp.eq.f32.partialorder %v4254_v63, %v1233_v13 }
 0x27c   :  { %vm1246_vm0 = vcmp.eq.f32.partialorder %v4266_v44, %v1233_v13  ;;  %vm1248_vm11 = vcmp.eq.f32.partialorder %v4278_v37, %v1233_v13  ;;  %v1250_v25 = vsel %vm1234_vm7, %v6118_v5, 128  ;;  %v1251_v0 = vsel %vm1235_vm5, %v6120_v34, 128 }
 0x27d   :  { %v1184_v6 = vrot.slane %v1183_v1, 2  ;;  %vm6176_vm4 = vcmp.eq.f32.partialorder %v4206_v53, %v1233_v13  ;;  %vm6177_vm1 = vcmp.eq.f32.partialorder %v4212_v49, %v1233_v13  ;;  %vm6178_vm8 = vcmp.eq.f32.partialorder %v4218_v50, %v1233_v13 }
 0x27e   :  { %v1252_v36 = vsel %vm6176_vm4, %v6122_v4, 128  ;;  %v1253_v62 = vsel %vm6177_vm1, %v6123_v7, 128  ;;  %v1254_v10 = vsel %vm6178_vm8, %v6125_v43, 128  ;;  %vm6179_vm7 = vcmp.eq.f32.partialorder %v4224_v56, %v1233_v13 }
 0x27f   :  { %v1185_v19 = vadd.f32 %v1184_v6, %v1183_v1  ;;  %v1255_v57 = vsel %vm6179_vm7, %v6127_v38, 128  ;;  %v1256_v58 = vsel %vm1240_vm2, %v6129_v2, 128  ;;  %v1257_v46 = vsel %vm1241_vm10, %v6131_v20, 128 }
 0x280   :  { %v1258_v31 = vsel %vm1242_vm3, %v6133_v32, 128  ;;  %v1259_v48 = vsel %vm1243_vm14, %v6134_v33, 128  ;;  %v1260_v18 = vsel %vm1244_vm15, %v6136_v45, 128  ;;  %vm6180_vm5 = vcmp.eq.f32.partialorder %v4260_v61, %v1233_v13 }
 0x281   :  { %v1186_v8 = vrot.slane %v1185_v19, 1  ;;  %v1261_v16 = vsel %vm6180_vm5, %v6137_v12, 128  ;;  %v1262_v28 = vsel %vm1246_vm0, %v6138_v26, 128  ;;  %vm6181_vm1 = vcmp.eq.f32.partialorder %v4272_v54, %v1233_v13 }
 0x282   :  { %v1263_v17 = vsel %vm6181_vm1, %v6140_v29, 128  ;;  %v1264_v40 = vsel %vm1248_vm11, %v6141_v15, 128  ;;  %vm6182_vm8 = vcmp.eq.f32.partialorder %v4284_v24, %v1233_v13  ;;  %vm1266_vm2 = vcmp.lt.s32.totalorder %v1250_v25, %v1254_v10 }
 0x283   :  { %v1265_v3 = vsel %vm6182_vm8, %v3564_v55, 128  ;;  %v1187_v11 = vadd.f32 %v1186_v8, %v1185_v19  ;;  %vm1268_vm10 = vcmp.lt.s32.totalorder %v1251_v0, %v1255_v57  ;;  %vm1270_vm3 = vcmp.lt.s32.totalorder %v1252_v36, %v1256_v58 }
 0x284   :  { %v1267_v21 = vsel %vm1266_vm2, %v1250_v25, %v1254_v10  ;;  %v1269_v22 = vsel %vm1268_vm10, %v1251_v0, %v1255_v57  ;;  %v1271_v47 = vsel %vm1270_vm3, %v1252_v36, %v1256_v58  ;;  %vm1272_vm0 = vcmp.lt.s32.totalorder %v1253_v62, %v1257_v46 }
 0x285   :  { %v4373_v59 = vmax.f32 %v6183_v23, %v1187_v11  ;;  %v1273_v41 = vsel %vm1272_vm0, %v1253_v62, %v1257_v46  ;;  %vm1274_vm14 = vcmp.lt.s32.totalorder %v1267_v21, %v1258_v31  ;;  %vm1276_vm15 = vcmp.lt.s32.totalorder %v1269_v22, %v1259_v48 }
 0x286   :  { %v1275_v42 = vsel %vm1274_vm14, %v1267_v21, %v1258_v31  ;;  %v1277_v60 = vsel %vm1276_vm15, %v1269_v22, %v1259_v48  ;;  %vm1278_vm11 = vcmp.lt.s32.totalorder %v1271_v47, %v1260_v18  ;;  %vm1280_vm4 = vcmp.lt.s32.totalorder %v1273_v41, %v1261_v16  ;;  %v6187_v22 = vld [vmem:[#allocation6_spill] sm:$0xff] }
 0x287   :  { %6184 = vst [vmem:[#allocation52_spill] sm:$0xff] %v4373_v59  ;;  %v1189_v13 = vsub.f32 %v6183_v23, %v4373_v59  ;;  %v1193_v9 = vsub.f32 %v1187_v11, %v4373_v59  ;;  %v1279_v1 = vsel %vm1278_vm11, %v1271_v47, %v1260_v18  ;;  %v1281_v6 = vsel %vm1280_vm4, %v1273_v41, %v1261_v16  ;;  %v6188_v23 = vld [vmem:[#allocation17_spill] sm:$0xff] }
 0x288   :  { %vm1282_vm7 = vcmp.lt.s32.totalorder %v1275_v42, %v1262_v28  ;;  %vm1284_vm5 = vcmp.lt.s32.totalorder %v1277_v60, %v1263_v17  ;;  %vm1286_vm1 = vcmp.lt.s32.totalorder %v1279_v1, %v1264_v40  ;;  %vm1288_vm8 = vcmp.lt.s32.totalorder %v1281_v6, %v1265_v3 }
 0x289   :  { %v1190_v25 = vmul.f32 1.442695, %v1189_v13  ;;  %v1194_v0 = vmul.f32 1.442695, %v1193_v9  ;;  %v1283_v19 = vsel %vm1282_vm7, %v1275_v42, %v1262_v28  ;;  %v1285_v36 = vsel %vm1284_vm5, %v1277_v60, %v1263_v17  ;;  %v6190_v42 = vld [vmem:[#allocation14_spill] sm:$0xff]  ;;  %v6192_v13 = vld [vmem:[#allocation32_spill] sm:$0xff] }
 0x28a   :  { %v1287_v62 = vsel %vm1286_vm1, %v1279_v1, %v1264_v40  ;;  %v1289_v10 = vsel %vm1288_vm8, %v1281_v6, %v1265_v3  ;;  %vm1290_vm2 = vcmp.lt.s32.totalorder %v1283_v19, %v1285_v36  ;;  %v6194_v1 = vld [vmem:[#allocation27_spill] sm:$0xff] }
 0x28b   :  { %2516 = vpow2.f32 %v1190_v25  ;;  %v1291_v57 = vsel %vm1290_vm2, %v1283_v19, %v1285_v36  ;;  %vm1292_vm10 = vcmp.lt.s32.totalorder %v1287_v62, %v1289_v10  ;;  %v6196_v25 = vld [vmem:[#allocation41_spill] sm:$0xff]  ;;  %v6197_v19 = vld [vmem:[#allocation38_spill] sm:$0xff] }
 0x28c   :  { %v1293_v58 = vsel %vm1292_vm10, %v1287_v62, %v1289_v10  ;;  %2518 = vpow2.f32 %v1194_v0  ;;  %v6198_v62 = vld [vmem:[#allocation11_spill] sm:$0xff] }
 0x28d   :  { %vm1294_vm3 = vcmp.lt.s32.totalorder %v1291_v57, %v1293_v58 }
 0x28e   :  { %v1295_v46 = vsel %vm1294_vm3, %v1291_v57, %v1293_v58  ;;  %v6199_v57 = vld [vmem:[#allocation7_spill] sm:$0xff] }
 0x28f   :  { %v1296_v31 = vrot.slane %v1295_v46, 4 }
 0x291   :  { %vm1297_vm0 = vcmp.lt.s32.totalorder %v1295_v46, %v1296_v31 }
 0x292   :  { %v1298_v8 = vsel %vm1297_vm0, %v1295_v46, %v1296_v31  ;;  %v6200_v46 = vld [vmem:[#allocation18_spill] sm:$0xff] }
 0x293   :  { %v1299_v48 = vrot.slane %v1298_v8, 2 }
 0x295   :  { %v2517_v18 = vpop.eup %2516  ;;  %vm1300_vm14 = vcmp.lt.s32.totalorder %v1298_v8, %v1299_v48 }
 0x296   :  { %v1192_v16 = vmul.f32 %v2517_v18, %v4302_v51  ;;  %v1301_v28 = vsel %vm1300_vm14, %v1298_v8, %v1299_v48  ;;  %v2519_v17 = vpop.eup %2518  ;;  %v6186_v51 = vld [vmem:[#allocation10_spill] sm:$0xff]  ;;  %v6202_v8 = vld [vmem:[#allocation15_spill] sm:$0xff]  ;;  %v6203_v18 = vld [vmem:[#allocation33_spill] sm:$0xff] }
 0x297   :  { %v1302_v40 = vrot.slane %v1301_v28, 1 }
 0x298   :  { %v4379_v3 = vadd.f32 %v2519_v17, %v1192_v16 }
 0x299   :  { %vm1303_vm15 = vcmp.lt.s32.totalorder %v1301_v28, %v1302_v40 }
 0x29a   :  { %6185 = vst [vmem:[#allocation53_spill] sm:$0xff] %v4379_v3  ;;  %v1304_v11 = vsel %vm1303_vm15, %v1301_v28, %v1302_v40  ;;  %v6205_v28 = vld [vmem:[#allocation28_spill] sm:$0xff]  ;;  %v6206_v40 = vld [vmem:[#allocation43_spill] sm:$0xff] }
 0x29b   :  { %vm1305_vm11 = vcmp.eq.s32.totalorder %v6118_v5, %v1304_v11  ;;  %vm1306_vm4 = vcmp.eq.s32.totalorder %v6120_v34, %v1304_v11  ;;  %vm1311_vm2 = vcmp.eq.s32.totalorder %v6129_v2, %v1304_v11  ;;  %vm1312_vm10 = vcmp.eq.s32.totalorder %v6131_v20, %v1304_v11 }
 0x29c   :  { %vm1313_vm3 = vcmp.eq.s32.totalorder %v6133_v32, %v1304_v11  ;;  %vm1314_vm0 = vcmp.eq.s32.totalorder %v6134_v33, %v1304_v11  ;;  %vm1316_vm15 = vcmp.eq.s32.totalorder %v6137_v12, %v1304_v11  ;;  %vm1318_vm5 = vcmp.eq.s32.totalorder %v6140_v29, %v1304_v11 }
 0x29d   :  { %v1321_v21 = vsel %vm1305_vm11, %v6186_v51, 0.0  ;;  %v1322_v47 = vsel %vm1306_vm4, %v6187_v22, 0.0  ;;  %vm6189_vm14 = vcmp.eq.s32.totalorder %v6122_v4, %v1304_v11  ;;  %vm6191_vm7 = vcmp.eq.s32.totalorder %v6123_v7, %v1304_v11 }
 0x29e   :  { %v1323_v41 = vsel %vm6189_vm14, %v6188_v23, 0.0  ;;  %v1324_v60 = vsel %vm6191_vm7, %v6190_v42, 0.0  ;;  %vm6193_vm1 = vcmp.eq.s32.totalorder %v6125_v43, %v1304_v11  ;;  %vm6195_vm8 = vcmp.eq.s32.totalorder %v6127_v38, %v1304_v11 }
 0x29f   :  { %v1325_v9 = vsel %vm6193_vm1, %v6192_v13, 0.0  ;;  %v1326_v6 = vsel %vm6195_vm8, %v6194_v1, 0.0  ;;  %v1327_v0 = vsel %vm1311_vm2, %v6196_v25, 0.0  ;;  %v1328_v36 = vsel %vm1312_vm10, %v6197_v19, 0.0 }
 0x2a0   :  { %v1329_v10 = vsel %vm1313_vm3, %v6198_v62, 0.0  ;;  %v1330_v58 = vsel %vm1314_vm0, %v6199_v57, 0.0  ;;  %vm6201_vm7 = vcmp.eq.s32.totalorder %v6136_v45, %v1304_v11  ;;  %v1332_v48 = vsel %vm1316_vm15, %v6202_v8, 0.0  ;;  %v6208_v62 = vld [vmem:[#allocation39_spill] sm:$0xff] }
 0x2a1   :  { %v1331_v31 = vsel %vm6201_vm7, %v6200_v46, 0.0  ;;  %vm6204_vm1 = vcmp.eq.s32.totalorder %v6138_v26, %v1304_v11  ;;  %v1334_v17 = vsel %vm1318_vm5, %v6205_v28, 0.0  ;;  %vm6207_vm8 = vcmp.eq.s32.totalorder %v6141_v15, %v1304_v11 }
 0x2a2   :  { %v1333_v16 = vsel %vm6204_vm1, %v6203_v18, 0.0  ;;  %v1335_v57 = vsel %vm6207_vm8, %v6206_v40, 0.0  ;;  %vm6209_vm14 = vcmp.eq.s32.totalorder %v3564_v55, %v1304_v11  ;;  %v1337_v19 = vadd.f32 %v1322_v47, %v1321_v21 }
 0x2a3   :  { %v1336_v46 = vsel %vm6209_vm14, %v6208_v62, 0.0  ;;  %v4448_v8 = vsel %vm1305_vm11, -inf, %v4190_v30  ;;  %v4453_v18 = vsel %vm1306_vm4, -inf, %v4200_v14  ;;  %vm6210_vm7 = vcmp.eq.s32.totalorder %v6122_v4, %v1304_v11 }
 0x2a4   :  { %v4458_v28 = vsel %vm6210_vm7, -inf, %v4206_v53  ;;  %vm6211_vm1 = vcmp.eq.s32.totalorder %v6123_v7, %v1304_v11  ;;  %vm6212_vm8 = vcmp.eq.s32.totalorder %v6125_v43, %v1304_v11  ;;  %vm6213_vm11 = vcmp.eq.s32.totalorder %v6127_v38, %v1304_v11 }
 0x2a5   :  { %v4463_v62 = vsel %vm6211_vm1, -inf, %v4212_v49  ;;  %v4468_v30 = vsel %vm6212_vm8, -inf, %v4218_v50  ;;  %v4473_v14 = vsel %vm6213_vm11, -inf, %v4224_v56  ;;  %v4478_v53 = vsel %vm1311_vm2, -inf, %v4230_v27 }
 0x2a6   :  { %v1338_v21 = vadd.f32 %v1337_v19, %v1323_v41  ;;  %v4483_v49 = vsel %vm1312_vm10, -inf, %v4236_v39  ;;  %v4488_v50 = vsel %vm1313_vm3, -inf, %v4242_v52  ;;  %v4493_v56 = vsel %vm1314_vm0, -inf, %v4248_v35  ;;  %vm6217_vm3 = vmmov %vm6209_vm14 }
 0x2a7   :  { %vm6214_vm4 = vcmp.eq.s32.totalorder %v6136_v45, %v1304_v11  ;;  %v4503_v39 = vsel %vm1316_vm15, -inf, %v4260_v61  ;;  %vm6215_vm2 = vcmp.eq.s32.totalorder %v6138_v26, %v1304_v11  ;;  %v4513_v35 = vsel %vm1318_vm5, -inf, %v4272_v54 }
 0x2a8   :  { %v4498_v27 = vsel %vm6214_vm4, -inf, %v4254_v63  ;;  %v4508_v52 = vsel %vm6215_vm2, -inf, %v4266_v44  ;;  %v1339_v47 = vadd.f32 %v1338_v21, %v1324_v60  ;;  %vm6216_vm10 = vcmp.eq.s32.totalorder %v6141_v15, %v1304_v11 }
 0x2a9   :  { %v4518_v63 = vsel %vm6216_vm10, -inf, %v4278_v37  ;;  %v4523_v61 = vsel %vm6217_vm3, -inf, %v4284_v24  ;;  %v1383_v44 = vmax.f32 %v4448_v8, %v4468_v30  ;;  %v1384_v41 = vmax.f32 %v4453_v18, %v4473_v14 }
 0x2aa   :  { %v1385_v54 = vmax.f32 %v4458_v28, %v4478_v53  ;;  %v1386_v60 = vmax.f32 %v4463_v62, %v4483_v49  ;;  %v1340_v19 = vadd.f32 %v1339_v47, %v1325_v9 }
 0x2ab   :  { %v1387_v37 = vmax.f32 %v1383_v44, %v4488_v50  ;;  %v1388_v21 = vmax.f32 %v1384_v41, %v4493_v56 }
 0x2ac   :  { %v1389_v24 = vmax.f32 %v1385_v54, %v4498_v27  ;;  %v1390_v11 = vmax.f32 %v1386_v60, %v4503_v39  ;;  %v1341_v40 = vadd.f32 %v1340_v19, %v1326_v6 }
 0x2ad   :  { %v1391_v25 = vmax.f32 %v1387_v37, %v4508_v52  ;;  %v1392_v1 = vmax.f32 %v1388_v21, %v4513_v35 }
 0x2ae   :  { %v1393_v13 = vmax.f32 %v1389_v24, %v4518_v63  ;;  %v1394_v42 = vmax.f32 %v1390_v11, %v4523_v61  ;;  %v1342_v23 = vadd.f32 %v1341_v40, %v1327_v0  ;;  %v6225_v40 = vld [vmem:[#allocation67_spill] sm:$0xff] }
 0x2af   :  { %v1395_v22 = vmax.f32 %v1391_v25, %v1392_v1 }
 0x2b0   :  { %v1396_v9 = vmax.f32 %v1393_v13, %v1394_v42  ;;  %v1343_v47 = vadd.f32 %v1342_v23, %v1328_v36 }
 0x2b2   :  { %v1397_v44 = vmax.f32 %v1395_v22, %v1396_v9  ;;  %v1344_v51 = vadd.f32 %v1343_v47, %v1329_v10 }
 0x2b4   :  { %v1398_v41 = vrot.slane %v1397_v44, 4  ;;  %v1345_v3 = vadd.f32 %v1344_v51, %v1330_v58 }
 0x2b6   :  { %v1399_v54 = vmax.f32 %v1397_v44, %v1398_v41  ;;  %v1346_v59 = vadd.f32 %v1345_v3, %v1331_v31 }
 0x2b8   :  { %v1400_v60 = vrot.slane %v1399_v54, 2  ;;  %v1347_v6 = vadd.f32 %v1346_v59, %v1332_v48 }
 0x2ba   :  { %v1401_v19 = vmax.f32 %v1399_v54, %v1400_v60  ;;  %v1348_v37 = vadd.f32 %v1347_v6, %v1333_v16  ;;  %v6224_v16 = vld [vmem:[#allocation66_spill] sm:$0xff] }
 0x2bc   :  { %v1402_v55 = vrot.slane %v1401_v19, 1  ;;  %v1349_v21 = vadd.f32 %v1348_v37, %v1334_v17 }
 0x2be   :  { %v1403_v15 = vmax.f32 %v1401_v19, %v1402_v55  ;;  %v1350_v24 = vadd.f32 %v1349_v21, %v1335_v57 }
 0x2c0   :  { %vm1404_vm5 = vcmp.eq.f32.partialorder %v4448_v8, %v1403_v15  ;;  %vm1405_vm0 = vcmp.eq.f32.partialorder %v4453_v18, %v1403_v15  ;;  %v1351_v22 = vadd.f32 %v1350_v24, %v1336_v46  ;;  %vm1410_vm8 = vcmp.eq.f32.partialorder %v4478_v53, %v1403_v15 }
 0x2c1   :  { %vm1411_vm11 = vcmp.eq.f32.partialorder %v4483_v49, %v1403_v15  ;;  %vm1412_vm4 = vcmp.eq.f32.partialorder %v4488_v50, %v1403_v15  ;;  %vm1413_vm2 = vcmp.eq.f32.partialorder %v4493_v56, %v1403_v15  ;;  %vm1414_vm10 = vcmp.eq.f32.partialorder %v4498_v27, %v1403_v15 }
 0x2c2   :  { %v1352_v55 = vrot.slane %v1351_v22, 4  ;;  %vm1416_vm14 = vcmp.eq.f32.partialorder %v4508_v52, %v1403_v15  ;;  %vm1418_vm7 = vcmp.eq.f32.partialorder %v4518_v63, %v1403_v15  ;;  %v1420_v59 = vsel %vm1404_vm5, %v6118_v5, 128 }
 0x2c3   :  { %v1421_v3 = vsel %vm1405_vm0, %v6120_v34, 128  ;;  %vm6218_vm3 = vcmp.eq.f32.partialorder %v4458_v28, %v1403_v15  ;;  %vm6219_vm15 = vcmp.eq.f32.partialorder %v4463_v62, %v1403_v15  ;;  %vm6220_vm1 = vcmp.eq.f32.partialorder %v4468_v30, %v1403_v15 }
 0x2c4   :  { %v1353_v51 = vadd.f32 %v1352_v55, %v1351_v22  ;;  %v1422_v23 = vsel %vm6218_vm3, %v6122_v4, 128  ;;  %v1423_v42 = vsel %vm6219_vm15, %v6123_v7, 128  ;;  %v1424_v13 = vsel %vm6220_vm1, %v6125_v43, 128  ;;  %v6227_v22 = vld [vmem:[#allocation52_spill] sm:$0xff] }
 0x2c5   :  { %vm6221_vm5 = vcmp.eq.f32.partialorder %v4473_v14, %v1403_v15  ;;  %v1426_v25 = vsel %vm1410_vm8, %v6129_v2, 128  ;;  %v1427_v0 = vsel %vm1411_vm11, %v6131_v20, 128  ;;  %v1428_v36 = vsel %vm1412_vm4, %v6133_v32, 128 }
 0x2c6   :  { %v1425_v1 = vsel %vm6221_vm5, %v6127_v38, 128  ;;  %v1354_v10 = vrot.slane %v1353_v51, 2  ;;  %v1429_v57 = vsel %vm1413_vm2, %v6134_v33, 128  ;;  %v1430_v58 = vsel %vm1414_vm10, %v6136_v45, 128 }
 0x2c7   :  { %vm6222_vm0 = vcmp.eq.f32.partialorder %v4503_v39, %v1403_v15  ;;  %v1432_v31 = vsel %vm1416_vm14, %v6138_v26, 128  ;;  %vm6223_vm15 = vcmp.eq.f32.partialorder %v4513_v35, %v1403_v15  ;;  %v1434_v17 = vsel %vm1418_vm7, %v6224_v16, 128 }
 0x2c8   :  { %v1431_v46 = vsel %vm6222_vm0, %v6137_v12, 128  ;;  %v1433_v48 = vsel %vm6223_vm15, %v6140_v29, 128  ;;  %vm6226_vm1 = vcmp.eq.f32.partialorder %v4523_v61, %v1403_v15  ;;  %v1355_v9 = vadd.f32 %v1354_v10, %v1353_v51 }
 0x2c9   :  { %v1435_v11 = vsel %vm6226_vm1, %v6225_v40, 128  ;;  %vm1436_vm8 = vcmp.lt.s32.totalorder %v1420_v59, %v1424_v13  ;;  %vm1438_vm11 = vcmp.lt.s32.totalorder %v1421_v3, %v1425_v1  ;;  %vm1440_vm4 = vcmp.lt.s32.totalorder %v1422_v23, %v1426_v25 }
 0x2ca   :  { %v1437_v47 = vsel %vm1436_vm8, %v1420_v59, %v1424_v13  ;;  %v1439_v44 = vsel %vm1438_vm11, %v1421_v3, %v1425_v1  ;;  %v1441_v41 = vsel %vm1440_vm4, %v1422_v23, %v1426_v25  ;;  %vm1442_vm14 = vcmp.lt.s32.totalorder %v1423_v42, %v1427_v0 }
 0x2cb   :  { %v1356_v54 = vrot.slane %v1355_v9, 1  ;;  %v1443_v60 = vsel %vm1442_vm14, %v1423_v42, %v1427_v0  ;;  %vm1444_vm2 = vcmp.lt.s32.totalorder %v1437_v47, %v1428_v36  ;;  %vm1446_vm10 = vcmp.lt.s32.totalorder %v1439_v44, %v1429_v57 }
 0x2cc   :  { %v1445_v6 = vsel %vm1444_vm2, %v1437_v47, %v1428_v36  ;;  %v1447_v19 = vsel %vm1446_vm10, %v1439_v44, %v1429_v57  ;;  %vm1448_vm3 = vcmp.lt.s32.totalorder %v1441_v41, %v1430_v58  ;;  %vm1450_vm7 = vcmp.lt.s32.totalorder %v1443_v60, %v1431_v46 }
 0x2cd   :  { %v1357_v37 = vadd.f32 %v1356_v54, %v1355_v9  ;;  %v1449_v21 = vsel %vm1448_vm3, %v1441_v41, %v1430_v58  ;;  %v1451_v15 = vsel %vm1450_vm7, %v1443_v60, %v1431_v46  ;;  %vm1452_vm5 = vcmp.lt.s32.totalorder %v1445_v6, %v1432_v31  ;;  %v6231_v41 = vld [vmem:[#allocation10_spill] sm:$0xff] }
 0x2ce   :  { %v1453_v24 = vsel %vm1452_vm5, %v1445_v6, %v1432_v31  ;;  %vm1454_vm0 = vcmp.lt.s32.totalorder %v1447_v19, %v1433_v48  ;;  %vm1456_vm15 = vcmp.lt.s32.totalorder %v1449_v21, %v1434_v17  ;;  %vm1458_vm1 = vcmp.lt.s32.totalorder %v1451_v15, %v1435_v11  ;;  %v6232_v60 = vld [vmem:[#allocation6_spill] sm:$0xff] }
 0x2cf   :  { %v4606_v55 = vmax.f32 %v6227_v22, %v1357_v37  ;;  %v1455_v59 = vsel %vm1454_vm0, %v1447_v19, %v1433_v48  ;;  %v1457_v3 = vsel %vm1456_vm15, %v1449_v21, %v1434_v17  ;;  %v1459_v51 = vsel %vm1458_vm1, %v1451_v15, %v1435_v11  ;;  %v6229_v11 = vld [vmem:[#allocation53_spill] sm:$0xff]  ;;  %v6234_v21 = vld [vmem:[#allocation14_spill] sm:$0xff] }
 0x2d0   :  { %vm1460_vm8 = vcmp.lt.s32.totalorder %v1453_v24, %v1455_v59  ;;  %vm1462_vm11 = vcmp.lt.s32.totalorder %v1457_v3, %v1459_v51  ;;  %v6233_v19 = vld [vmem:[#allocation17_spill] sm:$0xff] }
 0x2d1   :  { %6228 = vst [vmem:[#allocation54_spill] sm:$0xff] %v4606_v55  ;;  %v1359_v23 = vsub.f32 %v6227_v22, %v4606_v55  ;;  %v1363_v42 = vsub.f32 %v1357_v37, %v4606_v55  ;;  %v1461_v13 = vsel %vm1460_vm8, %v1453_v24, %v1455_v59  ;;  %v1463_v1 = vsel %vm1462_vm11, %v1457_v3, %v1459_v51  ;;  %v6236_v24 = vld [vmem:[#allocation32_spill] sm:$0xff]  ;;  %v6238_v59 = vld [vmem:[#allocation27_spill] sm:$0xff]  ;;  %v6240_v51 = vld [vmem:[#allocation41_spill] sm:$0xff] }
 0x2d2   :  { %vm1464_vm4 = vcmp.lt.s32.totalorder %v1461_v13, %v1463_v1 }
 0x2d3   :  { %v1360_v25 = vmul.f32 1.442695, %v1359_v23  ;;  %v1364_v0 = vmul.f32 1.442695, %v1363_v42  ;;  %v1465_v36 = vsel %vm1464_vm4, %v1461_v13, %v1463_v1  ;;  %v6242_v42 = vld [vmem:[#allocation38_spill] sm:$0xff]  ;;  %v6243_v1 = vld [vmem:[#allocation11_spill] sm:$0xff] }
 0x2d4   :  { %v1466_v10 = vrot.slane %v1465_v36, 4 }
 0x2d5   :  { %2520 = vpow2.f32 %v1360_v25 }
 0x2d6   :  { %vm1467_vm14 = vcmp.lt.s32.totalorder %v1465_v36, %v1466_v10  ;;  %2522 = vpow2.f32 %v1364_v0  ;;  %v6244_v0 = vld [vmem:[#allocation7_spill] sm:$0xff] }
 0x2d7   :  { %v1468_v57 = vsel %vm1467_vm14, %v1465_v36, %v1466_v10  ;;  %v6245_v10 = vld [vmem:[#allocation18_spill] sm:$0xff] }
 0x2d8   :  { %v1469_v58 = vrot.slane %v1468_v57, 2 }
 0x2da   :  { %vm1470_vm2 = vcmp.lt.s32.totalorder %v1468_v57, %v1469_v58 }
 0x2db   :  { %v1471_v46 = vsel %vm1470_vm2, %v1468_v57, %v1469_v58  ;;  %v6246_v58 = vld [vmem:[#allocation15_spill] sm:$0xff] }
 0x2dc   :  { %v1472_v31 = vrot.slane %v1471_v46, 1 }
 0x2de   :  { %vm1473_vm10 = vcmp.lt.s32.totalorder %v1471_v46, %v1472_v31 }
 0x2df   :  { %v2521_v48 = vpop.eup %2520  ;;  %v1474_v17 = vsel %vm1473_vm10, %v1471_v46, %v1472_v31  ;;  %v6247_v31 = vld [vmem:[#allocation33_spill] sm:$0xff] }
 0x2e0   :  { %v1362_v9 = vmul.f32 %v2521_v48, %v6229_v11  ;;  %vm5852_vm3 = vcmp.eq.s32.totalorder %v6118_v5, %v1474_v17  ;;  %vm1476_vm7 = vcmp.eq.s32.totalorder %v6120_v34, %v1474_v17  ;;  %vm1477_vm5 = vcmp.eq.s32.totalorder %v6122_v4, %v1474_v17  ;;  %v2523_v47 = vpop.eup %2522  ;;  %v6249_v11 = vld [vmem:[#allocation28_spill] sm:$0xff] }
 0x2e1   :  { %vm1482_vm11 = vcmp.eq.s32.totalorder %v6131_v20, %v1474_v17  ;;  %vm1483_vm4 = vcmp.eq.s32.totalorder %v6133_v32, %v1474_v17  ;;  %vm1484_vm14 = vcmp.eq.s32.totalorder %v6134_v33, %v1474_v17  ;;  %vm1485_vm2 = vcmp.eq.s32.totalorder %v6136_v45, %v1474_v17 }
 0x2e2   :  { %v4619_v44 = vadd.f32 %v2523_v47, %v1362_v9  ;;  %vm1486_vm10 = vcmp.eq.s32.totalorder %v6137_v12, %v1474_v17  ;;  %vm1488_vm15 = vcmp.eq.s32.totalorder %v6140_v29, %v1474_v17  ;;  %v1491_v54 = vsel %vm5852_vm3, %v6231_v41, 0.0  ;;  %v6250_v47 = vld [vmem:[#allocation43_spill] sm:$0xff] }
 0x2e3   :  { %v1492_v6 = vsel %vm1476_vm7, %v6232_v60, 0.0  ;;  %v1493_v37 = vsel %vm1477_vm5, %v6233_v19, 0.0  ;;  %vm6235_vm0 = vcmp.eq.s32.totalorder %v6123_v7, %v1474_v17  ;;  %vm6237_vm1 = vcmp.eq.s32.totalorder %v6125_v43, %v1474_v17 }
 0x2e4   :  { %6230 = vst [vmem:[#allocation55_spill] sm:$0xff] %v4619_v44  ;;  %v1494_v15 = vsel %vm6235_vm0, %v6234_v21, 0.0  ;;  %v1495_v22 = vsel %vm6237_vm1, %v6236_v24, 0.0  ;;  %vm6239_vm8 = vcmp.eq.s32.totalorder %v6127_v38, %v1474_v17  ;;  %vm6241_vm3 = vcmp.eq.s32.totalorder %v6129_v2, %v1474_v17 }
 0x2e5   :  { %v1496_v3 = vsel %vm6239_vm8, %v6238_v59, 0.0  ;;  %v1497_v23 = vsel %vm6241_vm3, %v6240_v51, 0.0  ;;  %v1498_v13 = vsel %vm1482_vm11, %v6242_v42, 0.0  ;;  %v1499_v25 = vsel %vm1483_vm4, %v6243_v1, 0.0  ;;  %v6252_v1 = vld [vmem:[#allocation39_spill] sm:$0xff] }
 0x2e6   :  { %v1500_v36 = vsel %vm1484_vm14, %v6244_v0, 0.0  ;;  %v1501_v57 = vsel %vm1485_vm2, %v6245_v10, 0.0  ;;  %v1502_v46 = vsel %vm1486_vm10, %v6246_v58, 0.0  ;;  %vm6248_vm3 = vcmp.eq.s32.totalorder %v6138_v26, %v1474_v17 }
 0x2e7   :  { %v1503_v48 = vsel %vm6248_vm3, %v6247_v31, 0.0  ;;  %v1504_v9 = vsel %vm1488_vm15, %v6249_v11, 0.0  ;;  %vm6251_vm0 = vcmp.eq.s32.totalorder %v6224_v16, %v1474_v17  ;;  %vm6253_vm1 = vcmp.eq.s32.totalorder %v6225_v40, %v1474_v17 }
 0x2e8   :  { %v1505_v0 = vsel %vm6251_vm0, %v6250_v47, 0.0  ;;  %v1506_v10 = vsel %vm6253_vm1, %v6252_v1, 0.0  ;;  %v1507_v42 = vadd.f32 %v1492_v6, %v1491_v54  ;;  %vm6254_vm8 = vcmp.eq.s32.totalorder %v6118_v5, %v1474_v17 }
 0x2e9   :  { %v4681_v58 = vsel %vm6254_vm8, -inf, %v4448_v8  ;;  %v4686_v31 = vsel %vm1476_vm7, -inf, %v4453_v18  ;;  %v4691_v11 = vsel %vm1477_vm5, -inf, %v4458_v28  ;;  %vm6255_vm3 = vcmp.eq.s32.totalorder %v6123_v7, %v1474_v17 }
 0x2ea   :  { %v4696_v1 = vsel %vm6255_vm3, -inf, %v4463_v62  ;;  %vm6256_vm0 = vcmp.eq.s32.totalorder %v6125_v43, %v1474_v17  ;;  %v1508_v54 = vadd.f32 %v1507_v42, %v1493_v37  ;;  %vm6257_vm7 = vcmp.eq.s32.totalorder %v6127_v38, %v1474_v17 }
 0x2eb   :  { %v4701_v8 = vsel %vm6256_vm0, -inf, %v4468_v30  ;;  %v4706_v18 = vsel %vm6257_vm7, -inf, %v4473_v14  ;;  %vm6258_vm5 = vcmp.eq.s32.totalorder %v6129_v2, %v1474_v17  ;;  %v4716_v62 = vsel %vm1482_vm11, -inf, %v4483_v49 }
 0x2ec   :  { %v4711_v28 = vsel %vm6258_vm5, -inf, %v4478_v53  ;;  %v4721_v30 = vsel %vm1483_vm4, -inf, %v4488_v50  ;;  %v4726_v14 = vsel %vm1484_vm14, -inf, %v4493_v56  ;;  %v4731_v53 = vsel %vm1485_vm2, -inf, %v4498_v27  ;;  %vm6261_vm14 = vmmov %vm6253_vm1 }
 0x2ed   :  { %v4736_v49 = vsel %vm1486_vm10, -inf, %v4503_v39  ;;  %v1509_v6 = vadd.f32 %v1508_v54, %v1494_v15  ;;  %vm6259_vm11 = vcmp.eq.s32.totalorder %v6138_v26, %v1474_v17  ;;  %v4746_v56 = vsel %vm1488_vm15, -inf, %v4513_v35 }
 0x2ee   :  { %v4741_v50 = vsel %vm6259_vm11, -inf, %v4508_v52  ;;  %vm6260_vm4 = vcmp.eq.s32.totalorder %v6224_v16, %v1474_v17  ;;  %v4756_v39 = vsel %vm6261_vm14, -inf, %v4523_v61  ;;  %v1553_v37 = vmax.f32 %v4681_v58, %v4701_v8 }
 0x2ef   :  { %v4751_v27 = vsel %vm6260_vm4, -inf, %v4518_v63  ;;  %v1554_v52 = vmax.f32 %v4686_v31, %v4706_v18  ;;  %v1555_v35 = vmax.f32 %v4691_v11, %v4711_v28  ;;  %v1510_v15 = vadd.f32 %v1509_v6, %v1495_v22 }
 0x2f0   :  { %v1556_v42 = vmax.f32 %v4696_v1, %v4716_v62  ;;  %v1557_v63 = vmax.f32 %v1553_v37, %v4721_v30 }
 0x2f1   :  { %v1558_v54 = vmax.f32 %v1554_v52, %v4726_v14  ;;  %v1559_v61 = vmax.f32 %v1555_v35, %v4731_v53  ;;  %v1511_v17 = vadd.f32 %v1510_v15, %v1496_v3 }
 0x2f2   :  { %v1560_v47 = vmax.f32 %v1556_v42, %v4736_v49  ;;  %v1561_v51 = vmax.f32 %v1557_v63, %v4741_v50 }
 0x2f3   :  { %v1562_v59 = vmax.f32 %v1558_v54, %v4746_v56  ;;  %v1563_v24 = vmax.f32 %v1559_v61, %v4751_v27  ;;  %v1512_v21 = vadd.f32 %v1511_v17, %v1497_v23 }
 0x2f4   :  { %v1564_v22 = vmax.f32 %v1560_v47, %v4756_v39  ;;  %v6269_v47 = vld [vmem:[#allocation67_spill] sm:$0xff] }
 0x2f5   :  { %v1565_v6 = vmax.f32 %v1561_v51, %v1562_v59  ;;  %v1513_v19 = vadd.f32 %v1512_v21, %v1498_v13 }
 0x2f6   :  { %v1566_v60 = vmax.f32 %v1563_v24, %v1564_v22 }
 0x2f7   :  { %v1514_v37 = vadd.f32 %v1513_v19, %v1499_v25 }
 0x2f8   :  { %v1567_v41 = vmax.f32 %v1565_v6, %v1566_v60 }
 0x2f9   :  { %v1515_v52 = vadd.f32 %v1514_v37, %v1500_v36 }
 0x2fa   :  { %v1568_v44 = vrot.slane %v1567_v41, 4 }
 0x2fb   :  { %v1516_v35 = vadd.f32 %v1515_v52, %v1501_v57 }
 0x2fc   :  { %v1569_v3 = vmax.f32 %v1567_v41, %v1568_v44 }
 0x2fd   :  { %v1517_v15 = vadd.f32 %v1516_v35, %v1502_v46 }
 0x2fe   :  { %v1570_v42 = vrot.slane %v1569_v3, 2 }
 0x2ff   :  { %v1518_v55 = vadd.f32 %v1517_v15, %v1503_v48  ;;  %v6268_v48 = vld [vmem:[#allocation66_spill] sm:$0xff] }
 0x300   :  { %v1571_v63 = vmax.f32 %v1569_v3, %v1570_v42 }
 0x301   :  { %v1519_v40 = vadd.f32 %v1518_v55, %v1504_v9 }
 0x302   :  { %v1572_v54 = vrot.slane %v1571_v63, 1 }
 0x303   :  { %v1520_v16 = vadd.f32 %v1519_v40, %v1505_v0 }
 0x304   :  { %v1573_v61 = vmax.f32 %v1571_v63, %v1572_v54  ;;  %v6270_v54 = vld [vmem:[#allocation54_spill] sm:$0xff] }
 0x305   :  { %v1521_v23 = vadd.f32 %v1520_v16, %v1506_v10 }
 0x306   :  { %vm1574_vm15 = vcmp.eq.f32.partialorder %v4681_v58, %v1573_v61  ;;  %vm1575_vm2 = vcmp.eq.f32.partialorder %v4686_v31, %v1573_v61  ;;  %vm1578_vm8 = vcmp.eq.f32.partialorder %v4701_v8, %v1573_v61  ;;  %vm1581_vm7 = vcmp.eq.f32.partialorder %v4716_v62, %v1573_v61 }
 0x307   :  { %v1522_v44 = vrot.slane %v1521_v23, 4  ;;  %vm1582_vm5 = vcmp.eq.f32.partialorder %v4721_v30, %v1573_v61  ;;  %vm1583_vm11 = vcmp.eq.f32.partialorder %v4726_v14, %v1573_v61  ;;  %vm1584_vm4 = vcmp.eq.f32.partialorder %v4731_v53, %v1573_v61 }
 0x308   :  { %vm1586_vm10 = vcmp.eq.f32.partialorder %v4741_v50, %v1573_v61  ;;  %vm1588_vm3 = vcmp.eq.f32.partialorder %v4751_v27, %v1573_v61  ;;  %vm1589_vm0 = vcmp.eq.f32.partialorder %v4756_v39, %v1573_v61  ;;  %v1590_v40 = vsel %vm1574_vm15, %v6118_v5, 128 }
 0x309   :  { %v1523_v16 = vadd.f32 %v1522_v44, %v1521_v23  ;;  %v1591_v55 = vsel %vm1575_vm2, %v6120_v34, 128  ;;  %vm6262_vm14 = vcmp.eq.f32.partialorder %v4691_v11, %v1573_v61  ;;  %vm6263_vm1 = vcmp.eq.f32.partialorder %v4696_v1, %v1573_v61 }
 0x30a   :  { %v1592_v41 = vsel %vm6262_vm14, %v6122_v4, 128  ;;  %v1593_v60 = vsel %vm6263_vm1, %v6123_v7, 128  ;;  %v1594_v19 = vsel %vm1578_vm8, %v6125_v43, 128  ;;  %vm6264_vm15 = vcmp.eq.f32.partialorder %v4706_v18, %v1573_v61 }
 0x30b   :  { %v1524_v21 = vrot.slane %v1523_v16, 2  ;;  %v1595_v24 = vsel %vm6264_vm15, %v6127_v38, 128  ;;  %vm6265_vm2 = vcmp.eq.f32.partialorder %v4711_v28, %v1573_v61  ;;  %v1597_v51 = vsel %vm1581_vm7, %v6131_v20, 128 }
 0x30c   :  { %v1596_v59 = vsel %vm6265_vm2, %v6129_v2, 128  ;;  %v1598_v13 = vsel %vm1582_vm5, %v6133_v32, 128  ;;  %v1599_v25 = vsel %vm1583_vm11, %v6134_v33, 128  ;;  %v1600_v0 = vsel %vm1584_vm4, %v6136_v45, 128 }
 0x30d   :  { %vm6266_vm1 = vcmp.eq.f32.partialorder %v4736_v49, %v1573_v61  ;;  %v1525_v10 = vadd.f32 %v1524_v21, %v1523_v16  ;;  %v1602_v57 = vsel %vm1586_vm10, %v6138_v26, 128  ;;  %vm6267_vm8 = vcmp.eq.f32.partialorder %v4746_v56, %v1573_v61 }
 0x30e   :  { %v1601_v36 = vsel %vm6266_vm1, %v6137_v12, 128  ;;  %v1603_v46 = vsel %vm6267_vm8, %v6140_v29, 128  ;;  %v1604_v9 = vsel %vm1588_vm3, %v6268_v48, 128  ;;  %v1605_v17 = vsel %vm1589_vm0, %v6269_v47, 128 }
 0x30f   :  { %vm1606_vm7 = vcmp.lt.s32.totalorder %v1590_v40, %v1594_v19  ;;  %vm1608_vm5 = vcmp.lt.s32.totalorder %v1591_v55, %v1595_v24  ;;  %vm1610_vm11 = vcmp.lt.s32.totalorder %v1592_v41, %v1596_v59  ;;  %v1526_v22 = vrot.slane %v1525_v10, 1 }
 0x310   :  { %v1607_v6 = vsel %vm1606_vm7, %v1590_v40, %v1594_v19  ;;  %v1609_v37 = vsel %vm1608_vm5, %v1591_v55, %v1595_v24  ;;  %v1611_v52 = vsel %vm1610_vm11, %v1592_v41, %v1596_v59  ;;  %vm1612_vm10 = vcmp.lt.s32.totalorder %v1593_v60, %v1597_v51 }
 0x311   :  { %vm1614_vm4 = vcmp.lt.s32.totalorder %v1607_v6, %v1598_v13  ;;  %vm1616_vm14 = vcmp.lt.s32.totalorder %v1609_v37, %v1599_v25  ;;  %vm1618_vm15 = vcmp.lt.s32.totalorder %v1611_v52, %v1600_v0  ;;  %v1527_v35 = vadd.f32 %v1526_v22, %v1525_v10 }
 0x312   :  { %v1613_v3 = vsel %vm1612_vm10, %v1593_v60, %v1597_v51  ;;  %v1615_v15 = vsel %vm1614_vm4, %v1607_v6, %v1598_v13  ;;  %v1617_v42 = vsel %vm1616_vm14, %v1609_v37, %v1599_v25  ;;  %v1619_v63 = vsel %vm1618_vm15, %v1611_v52, %v1600_v0  ;;  %v6274_v37 = vld [vmem:[#allocation10_spill] sm:$0xff] }
 0x313   :  { %vm1620_vm3 = vcmp.lt.s32.totalorder %v1613_v3, %v1601_v36  ;;  %vm1622_vm2 = vcmp.lt.s32.totalorder %v1615_v15, %v1602_v57  ;;  %vm1624_vm1 = vcmp.lt.s32.totalorder %v1617_v42, %v1603_v46  ;;  %v4839_v61 = vmax.f32 %v6270_v54, %v1527_v35 }
 0x314   :  { %v1621_v23 = vsel %vm1620_vm3, %v1613_v3, %v1601_v36  ;;  %v1623_v44 = vsel %vm1622_vm2, %v1615_v15, %v1602_v57  ;;  %v1625_v16 = vsel %vm1624_vm1, %v1617_v42, %v1603_v46  ;;  %vm1626_vm0 = vcmp.lt.s32.totalorder %v1619_v63, %v1604_v9  ;;  %v6272_v46 = vld [vmem:[#allocation55_spill] sm:$0xff]  ;;  %v6276_v15 = vld [vmem:[#allocation17_spill] sm:$0xff] }
 0x315   :  { %6271 = vst [vmem:[#allocation56_spill] sm:$0xff] %v4839_v61  ;;  %vm1628_vm8 = vcmp.lt.s32.totalorder %v1621_v23, %v1605_v17  ;;  %vm1630_vm7 = vcmp.lt.s32.totalorder %v1623_v44, %v1625_v16  ;;  %v1529_v40 = vsub.f32 %v6270_v54, %v4839_v61  ;;  %v1533_v55 = vsub.f32 %v1527_v35, %v4839_v61  ;;  %v6275_v35 = vld [vmem:[#allocation6_spill] sm:$0xff] }
 0x316   :  { %v1627_v41 = vsel %vm1626_vm0, %v1619_v63, %v1604_v9  ;;  %v1629_v60 = vsel %vm1628_vm8, %v1621_v23, %v1605_v17  ;;  %v1631_v19 = vsel %vm1630_vm7, %v1623_v44, %v1625_v16  ;;  %v6278_v63 = vld [vmem:[#allocation14_spill] sm:$0xff]  ;;  %v6280_v23 = vld [vmem:[#allocation32_spill] sm:$0xff]  ;;  %v6282_v16 = vld [vmem:[#allocation27_spill] sm:$0xff] }
 0x317   :  { %vm1632_vm5 = vcmp.lt.s32.totalorder %v1627_v41, %v1629_v60  ;;  %v1530_v21 = vmul.f32 1.442695, %v1529_v40  ;;  %v1534_v24 = vmul.f32 1.442695, %v1533_v55  ;;  %v6284_v55 = vld [vmem:[#allocation41_spill] sm:$0xff] }
 0x318   :  { %v1633_v59 = vsel %vm1632_vm5, %v1627_v41, %v1629_v60  ;;  %v6285_v60 = vld [vmem:[#allocation38_spill] sm:$0xff] }
 0x319   :  { %vm1634_vm11 = vcmp.lt.s32.totalorder %v1631_v19, %v1633_v59  ;;  %2524 = vpow2.f32 %v1530_v21  ;;  %v6286_v21 = vld [vmem:[#allocation11_spill] sm:$0xff] }
 0x31a   :  { %v1635_v51 = vsel %vm1634_vm11, %v1631_v19, %v1633_v59  ;;  %2526 = vpow2.f32 %v1534_v24  ;;  %v6287_v59 = vld [vmem:[#allocation7_spill] sm:$0xff] }
 0x31b   :  { %v1636_v13 = vrot.slane %v1635_v51, 4 }
 0x31d   :  { %vm1637_vm10 = vcmp.lt.s32.totalorder %v1635_v51, %v1636_v13 }
 0x31e   :  { %v1638_v25 = vsel %vm1637_vm10, %v1635_v51, %v1636_v13  ;;  %v6288_v13 = vld [vmem:[#allocation18_spill] sm:$0xff] }
 0x31f   :  { %v1639_v0 = vrot.slane %v1638_v25, 2 }
 0x321   :  { %vm1640_vm4 = vcmp.lt.s32.totalorder %v1638_v25, %v1639_v0 }
 0x322   :  { %v1641_v36 = vsel %vm1640_vm4, %v1638_v25, %v1639_v0  ;;  %v6290_v0 = vld [vmem:[#allocation15_spill] sm:$0xff] }
 0x323   :  { %v1642_v10 = vrot.slane %v1641_v36, 1  ;;  %v2525_v57 = vpop.eup %2524 }
 0x324   :  { %v1532_v9 = vmul.f32 %v2525_v57, %v6272_v46  ;;  %v2527_v17 = vpop.eup %2526  ;;  %v6293_v46 = vld [vmem:[#allocation28_spill] sm:$0xff] }
 0x325   :  { %vm1643_vm14 = vcmp.lt.s32.totalorder %v1641_v36, %v1642_v10 }
 0x326   :  { %v1644_v22 = vsel %vm1643_vm14, %v1641_v36, %v1642_v10  ;;  %v4845_v6 = vadd.f32 %v2527_v17, %v1532_v9  ;;  %v6291_v10 = vld [vmem:[#allocation33_spill] sm:$0xff]  ;;  %v6294_v17 = vld [vmem:[#allocation43_spill] sm:$0xff] }
 0x327   :  { %vm1645_vm15 = vcmp.eq.s32.totalorder %v6118_v5, %v1644_v22  ;;  %vm1646_vm3 = vcmp.eq.s32.totalorder %v6120_v34, %v1644_v22  ;;  %vm1651_vm7 = vcmp.eq.s32.totalorder %v6129_v2, %v1644_v22  ;;  %vm1652_vm5 = vcmp.eq.s32.totalorder %v6131_v20, %v1644_v22 }
 0x328   :  { %6273 = vst [vmem:[#allocation57_spill] sm:$0xff] %v4845_v6  ;;  %vm1653_vm11 = vcmp.eq.s32.totalorder %v6133_v32, %v1644_v22  ;;  %vm1654_vm10 = vcmp.eq.s32.totalorder %v6134_v33, %v1644_v22  ;;  %vm1656_vm14 = vcmp.eq.s32.totalorder %v6137_v12, %v1644_v22  ;;  %vm1658_vm1 = vcmp.eq.s32.totalorder %v6140_v29, %v1644_v22 }
 0x329   :  { %v1661_v52 = vsel %vm1645_vm15, %v6274_v37, 0.0  ;;  %v1662_v3 = vsel %vm1646_vm3, %v6275_v35, 0.0  ;;  %vm6277_vm4 = vcmp.eq.s32.totalorder %v6122_v4, %v1644_v22  ;;  %vm6279_vm2 = vcmp.eq.s32.totalorder %v6123_v7, %v1644_v22 }
 0x32a   :  { %v1663_v42 = vsel %vm6277_vm4, %v6276_v15, 0.0  ;;  %v1664_v54 = vsel %vm6279_vm2, %v6278_v63, 0.0  ;;  %vm6281_vm0 = vcmp.eq.s32.totalorder %v6125_v43, %v1644_v22  ;;  %vm6283_vm8 = vcmp.eq.s32.totalorder %v6127_v38, %v1644_v22 }
 0x32b   :  { %v1665_v44 = vsel %vm6281_vm0, %v6280_v23, 0.0  ;;  %v1666_v40 = vsel %vm6283_vm8, %v6282_v16, 0.0  ;;  %v1667_v41 = vsel %vm1651_vm7, %v6284_v55, 0.0  ;;  %v1668_v19 = vsel %vm1652_vm5, %v6285_v60, 0.0 }
 0x32c   :  { %v1669_v24 = vsel %vm1653_vm11, %v6286_v21, 0.0  ;;  %v1670_v51 = vsel %vm1654_vm10, %v6287_v59, 0.0  ;;  %vm6289_vm2 = vcmp.eq.s32.totalorder %v6136_v45, %v1644_v22  ;;  %v1672_v36 = vsel %vm1656_vm14, %v6290_v0, 0.0  ;;  %v6296_v21 = vld [vmem:[#allocation39_spill] sm:$0xff] }
 0x32d   :  { %v1671_v25 = vsel %vm6289_vm2, %v6288_v13, 0.0  ;;  %vm6292_vm0 = vcmp.eq.s32.totalorder %v6138_v26, %v1644_v22  ;;  %v1674_v9 = vsel %vm1658_vm1, %v6293_v46, 0.0  ;;  %vm6295_vm8 = vcmp.eq.s32.totalorder %v6268_v48, %v1644_v22 }
 0x32e   :  { %v1673_v57 = vsel %vm6292_vm0, %v6291_v10, 0.0  ;;  %v1675_v59 = vsel %vm6295_vm8, %v6294_v17, 0.0  ;;  %vm6297_vm4 = vcmp.eq.s32.totalorder %v6269_v47, %v1644_v22  ;;  %v1677_v60 = vadd.f32 %v1662_v3, %v1661_v52 }
 0x32f   :  { %v1676_v13 = vsel %vm6297_vm4, %v6296_v21, 0.0  ;;  %v4914_v0 = vsel %vm1645_vm15, -inf, %v4681_v58  ;;  %v4919_v10 = vsel %vm1646_vm3, -inf, %v4686_v31  ;;  %vm6298_vm2 = vcmp.eq.s32.totalorder %v6122_v4, %v1644_v22 }
 0x330   :  { %v4924_v46 = vsel %vm6298_vm2, -inf, %v4691_v11  ;;  %vm6299_vm0 = vcmp.eq.s32.totalorder %v6123_v7, %v1644_v22  ;;  %vm6300_vm8 = vcmp.eq.s32.totalorder %v6125_v43, %v1644_v22  ;;  %vm6301_vm15 = vcmp.eq.s32.totalorder %v6127_v38, %v1644_v22 }
 0x331   :  { %v4929_v21 = vsel %vm6299_vm0, -inf, %v4696_v1  ;;  %v4934_v58 = vsel %vm6300_vm8, -inf, %v4701_v8  ;;  %v4939_v31 = vsel %vm6301_vm15, -inf, %v4706_v18  ;;  %v1678_v52 = vadd.f32 %v1677_v60, %v1663_v42 }
 0x332   :  { %v4944_v11 = vsel %vm1651_vm7, -inf, %v4711_v28  ;;  %v4949_v1 = vsel %vm1652_vm5, -inf, %v4716_v62  ;;  %v4954_v8 = vsel %vm1653_vm11, -inf, %v4721_v30  ;;  %v4959_v18 = vsel %vm1654_vm10, -inf, %v4726_v14  ;;  %vm6305_vm11 = vmmov %vm6297_vm4 }
 0x333   :  { %vm6302_vm3 = vcmp.eq.s32.totalorder %v6136_v45, %v1644_v22  ;;  %v4969_v62 = vsel %vm1656_vm14, -inf, %v4736_v49  ;;  %vm6303_vm7 = vcmp.eq.s32.totalorder %v6138_v26, %v1644_v22  ;;  %v1679_v3 = vadd.f32 %v1678_v52, %v1664_v54 }
 0x334   :  { %v4964_v28 = vsel %vm6302_vm3, -inf, %v4731_v53  ;;  %v4974_v30 = vsel %vm6303_vm7, -inf, %v4741_v50  ;;  %v4979_v14 = vsel %vm1658_vm1, -inf, %v4746_v56  ;;  %vm6304_vm5 = vcmp.eq.s32.totalorder %v6268_v48, %v1644_v22 }
 0x335   :  { %v4984_v53 = vsel %vm6304_vm5, -inf, %v4751_v27  ;;  %v4989_v49 = vsel %vm6305_vm11, -inf, %v4756_v39  ;;  %v1723_v50 = vmax.f32 %v4914_v0, %v4934_v58  ;;  %v1724_v42 = vmax.f32 %v4919_v10, %v4939_v31 }
 0x336   :  { %v1725_v56 = vmax.f32 %v4924_v46, %v4944_v11  ;;  %v1726_v54 = vmax.f32 %v4929_v21, %v4949_v1  ;;  %v1680_v60 = vadd.f32 %v1679_v3, %v1665_v44 }
 0x337   :  { %v1727_v27 = vmax.f32 %v1723_v50, %v4954_v8  ;;  %v1728_v52 = vmax.f32 %v1724_v42, %v4959_v18 }
 0x338   :  { %v1729_v39 = vmax.f32 %v1725_v56, %v4964_v28  ;;  %v1730_v22 = vmax.f32 %v1726_v54, %v4969_v62  ;;  %v1681_v17 = vadd.f32 %v1680_v60, %v1666_v40 }
 0x339   :  { %v1731_v55 = vmax.f32 %v1727_v27, %v4974_v30  ;;  %v1732_v16 = vmax.f32 %v1728_v52, %v4979_v14 }
 0x33a   :  { %v1733_v23 = vmax.f32 %v1729_v39, %v4984_v53  ;;  %v1734_v63 = vmax.f32 %v1730_v22, %v4989_v49  ;;  %v1682_v15 = vadd.f32 %v1681_v17, %v1667_v41  ;;  %v6313_v17 = vld [vmem:[#allocation67_spill] sm:$0xff] }
 0x33b   :  { %v1735_v35 = vmax.f32 %v1731_v55, %v1732_v16 }
 0x33c   :  { %v1736_v44 = vmax.f32 %v1733_v23, %v1734_v63  ;;  %v1683_v3 = vadd.f32 %v1682_v15, %v1668_v19 }
 0x33e   :  { %v1737_v50 = vmax.f32 %v1735_v35, %v1736_v44  ;;  %v1684_v37 = vadd.f32 %v1683_v3, %v1669_v24 }
 0x340   :  { %v1738_v42 = vrot.slane %v1737_v50, 4  ;;  %v1685_v6 = vadd.f32 %v1684_v37, %v1670_v51 }
 0x342   :  { %v1739_v56 = vmax.f32 %v1737_v50, %v1738_v42  ;;  %v1686_v61 = vadd.f32 %v1685_v6, %v1671_v25 }
 0x344   :  { %v1740_v54 = vrot.slane %v1739_v56, 2  ;;  %v1687_v40 = vadd.f32 %v1686_v61, %v1672_v36 }
 0x346   :  { %v1741_v60 = vmax.f32 %v1739_v56, %v1740_v54  ;;  %v1688_v27 = vadd.f32 %v1687_v40, %v1673_v57  ;;  %v6312_v57 = vld [vmem:[#allocation66_spill] sm:$0xff] }
 0x348   :  { %v1742_v47 = vrot.slane %v1741_v60, 1  ;;  %v1689_v52 = vadd.f32 %v1688_v27, %v1674_v9 }
 0x34a   :  { %v1743_v48 = vmax.f32 %v1741_v60, %v1742_v47  ;;  %v1690_v39 = vadd.f32 %v1689_v52, %v1675_v59 }
 0x34c   :  { %vm1744_vm1 = vcmp.eq.f32.partialorder %v4914_v0, %v1743_v48  ;;  %vm1745_vm10 = vcmp.eq.f32.partialorder %v4919_v10, %v1743_v48  ;;  %v1691_v35 = vadd.f32 %v1690_v39, %v1676_v13  ;;  %vm1750_vm8 = vcmp.eq.f32.partialorder %v4944_v11, %v1743_v48 }
 0x34d   :  { %vm1751_vm15 = vcmp.eq.f32.partialorder %v4949_v1, %v1743_v48  ;;  %vm1752_vm3 = vcmp.eq.f32.partialorder %v4954_v8, %v1743_v48  ;;  %vm1753_vm7 = vcmp.eq.f32.partialorder %v4959_v18, %v1743_v48  ;;  %vm1754_vm5 = vcmp.eq.f32.partialorder %v4964_v28, %v1743_v48 }
 0x34e   :  { %v1692_v47 = vrot.slane %v1691_v35, 4  ;;  %vm1756_vm4 = vcmp.eq.f32.partialorder %v4974_v30, %v1743_v48  ;;  %vm1758_vm2 = vcmp.eq.f32.partialorder %v4984_v53, %v1743_v48  ;;  %v1760_v61 = vsel %vm1744_vm1, %v6118_v5, 128 }
 0x34f   :  { %v1761_v6 = vsel %vm1745_vm10, %v6120_v34, 128  ;;  %vm6306_vm11 = vcmp.eq.f32.partialorder %v4924_v46, %v1743_v48  ;;  %vm6307_vm14 = vcmp.eq.f32.partialorder %v4929_v21, %v1743_v48  ;;  %vm6308_vm0 = vcmp.eq.f32.partialorder %v4934_v58, %v1743_v48 }
 0x350   :  { %v1693_v37 = vadd.f32 %v1692_v47, %v1691_v35  ;;  %v1762_v15 = vsel %vm6306_vm11, %v6122_v4, 128  ;;  %v1763_v63 = vsel %vm6307_vm14, %v6123_v7, 128  ;;  %v1764_v23 = vsel %vm6308_vm0, %v6125_v43, 128  ;;  %v6315_v35 = vld [vmem:[#allocation56_spill] sm:$0xff] }
 0x351   :  { %vm6309_vm1 = vcmp.eq.f32.partialorder %v4939_v31, %v1743_v48  ;;  %v1766_v55 = vsel %vm1750_vm8, %v6129_v2, 128  ;;  %v1767_v41 = vsel %vm1751_vm15, %v6131_v20, 128  ;;  %v1768_v19 = vsel %vm1752_vm3, %v6133_v32, 128 }
 0x352   :  { %v1765_v16 = vsel %vm6309_vm1, %v6127_v38, 128  ;;  %v1694_v24 = vrot.slane %v1693_v37, 2  ;;  %v1769_v59 = vsel %vm1753_vm7, %v6134_v33, 128  ;;  %v1770_v51 = vsel %vm1754_vm5, %v6136_v45, 128 }
 0x353   :  { %vm6310_vm10 = vcmp.eq.f32.partialorder %v4969_v62, %v1743_v48  ;;  %v1772_v25 = vsel %vm1756_vm4, %v6138_v26, 128  ;;  %vm6311_vm14 = vcmp.eq.f32.partialorder %v4979_v14, %v1743_v48  ;;  %v1774_v9 = vsel %vm1758_vm2, %v6312_v57, 128 }
 0x354   :  { %v1771_v13 = vsel %vm6310_vm10, %v6137_v12, 128  ;;  %v1773_v36 = vsel %vm6311_vm14, %v6140_v29, 128  ;;  %vm6314_vm0 = vcmp.eq.f32.partialorder %v4989_v49, %v1743_v48  ;;  %v1695_v44 = vadd.f32 %v1694_v24, %v1693_v37 }
 0x355   :  { %v1775_v22 = vsel %vm6314_vm0, %v6313_v17, 128  ;;  %vm1776_vm8 = vcmp.lt.s32.totalorder %v1760_v61, %v1764_v23  ;;  %vm1778_vm15 = vcmp.lt.s32.totalorder %v1761_v6, %v1765_v16  ;;  %vm1780_vm3 = vcmp.lt.s32.totalorder %v1762_v15, %v1766_v55 }
 0x356   :  { %v1777_v3 = vsel %vm1776_vm8, %v1760_v61, %v1764_v23  ;;  %v1779_v50 = vsel %vm1778_vm15, %v1761_v6, %v1765_v16  ;;  %v1781_v42 = vsel %vm1780_vm3, %v1762_v15, %v1766_v55  ;;  %vm1782_vm4 = vcmp.lt.s32.totalorder %v1763_v63, %v1767_v41 }
 0x357   :  { %v1696_v56 = vrot.slane %v1695_v44, 1  ;;  %v1783_v54 = vsel %vm1782_vm4, %v1763_v63, %v1767_v41  ;;  %vm1784_vm7 = vcmp.lt.s32.totalorder %v1777_v3, %v1768_v19  ;;  %vm1786_vm5 = vcmp.lt.s32.totalorder %v1779_v50, %v1769_v59 }
 0x358   :  { %v1785_v40 = vsel %vm1784_vm7, %v1777_v3, %v1768_v19  ;;  %v1787_v60 = vsel %vm1786_vm5, %v1779_v50, %v1769_v59  ;;  %vm1788_vm11 = vcmp.lt.s32.totalorder %v1781_v42, %v1770_v51  ;;  %vm1790_vm2 = vcmp.lt.s32.totalorder %v1783_v54, %v1771_v13 }
 0x359   :  { %v1697_v27 = vadd.f32 %v1696_v56, %v1695_v44  ;;  %v1789_v52 = vsel %vm1788_vm11, %v1781_v42, %v1770_v51  ;;  %v1791_v48 = vsel %vm1790_vm2, %v1783_v54, %v1771_v13  ;;  %vm1792_vm1 = vcmp.lt.s32.totalorder %v1785_v40, %v1772_v25  ;;  %v6319_v42 = vld [vmem:[#allocation10_spill] sm:$0xff] }
 0x35a   :  { %v1793_v39 = vsel %vm1792_vm1, %v1785_v40, %v1772_v25  ;;  %vm1794_vm10 = vcmp.lt.s32.totalorder %v1787_v60, %v1773_v36  ;;  %vm1796_vm14 = vcmp.lt.s32.totalorder %v1789_v52, %v1774_v9  ;;  %vm1798_vm0 = vcmp.lt.s32.totalorder %v1791_v48, %v1775_v22  ;;  %v6320_v54 = vld [vmem:[#allocation6_spill] sm:$0xff] }
 0x35b   :  { %v5072_v47 = vmax.f32 %v6315_v35, %v1697_v27  ;;  %v1795_v61 = vsel %vm1794_vm10, %v1787_v60, %v1773_v36  ;;  %v1797_v6 = vsel %vm1796_vm14, %v1789_v52, %v1774_v9  ;;  %v1799_v37 = vsel %vm1798_vm0, %v1791_v48, %v1775_v22  ;;  %v6317_v22 = vld [vmem:[#allocation57_spill] sm:$0xff]  ;;  %v6322_v52 = vld [vmem:[#allocation14_spill] sm:$0xff] }
 0x35c   :  { %vm1800_vm8 = vcmp.lt.s32.totalorder %v1793_v39, %v1795_v61  ;;  %vm1802_vm15 = vcmp.lt.s32.totalorder %v1797_v6, %v1799_v37  ;;  %v6321_v60 = vld [vmem:[#allocation17_spill] sm:$0xff] }
 0x35d   :  { %6316 = vst [vmem:[#allocation58_spill] sm:$0xff] %v5072_v47  ;;  %v1699_v15 = vsub.f32 %v6315_v35, %v5072_v47  ;;  %v1703_v63 = vsub.f32 %v1697_v27, %v5072_v47  ;;  %v1801_v23 = vsel %vm1800_vm8, %v1793_v39, %v1795_v61  ;;  %v1803_v16 = vsel %vm1802_vm15, %v1797_v6, %v1799_v37  ;;  %v6324_v39 = vld [vmem:[#allocation32_spill] sm:$0xff]  ;;  %v6326_v61 = vld [vmem:[#allocation27_spill] sm:$0xff]  ;;  %v6328_v37 = vld [vmem:[#allocation41_spill] sm:$0xff] }
 0x35e   :  { %vm1804_vm3 = vcmp.lt.s32.totalorder %v1801_v23, %v1803_v16 }
 0x35f   :  { %v1700_v55 = vmul.f32 1.442695, %v1699_v15  ;;  %v1704_v41 = vmul.f32 1.442695, %v1703_v63  ;;  %v1805_v19 = vsel %vm1804_vm3, %v1801_v23, %v1803_v16  ;;  %v6330_v63 = vld [vmem:[#allocation38_spill] sm:$0xff]  ;;  %v6331_v16 = vld [vmem:[#allocation11_spill] sm:$0xff] }
 0x360   :  { %v1806_v24 = vrot.slane %v1805_v19, 4 }
 0x361   :  { %2528 = vpow2.f32 %v1700_v55 }
 0x362   :  { %vm1807_vm4 = vcmp.lt.s32.totalorder %v1805_v19, %v1806_v24  ;;  %2530 = vpow2.f32 %v1704_v41  ;;  %v6332_v41 = vld [vmem:[#allocation7_spill] sm:$0xff] }
 0x363   :  { %v1808_v59 = vsel %vm1807_vm4, %v1805_v19, %v1806_v24  ;;  %v6333_v24 = vld [vmem:[#allocation18_spill] sm:$0xff] }
 0x364   :  { %v1809_v51 = vrot.slane %v1808_v59, 2 }
 0x366   :  { %vm1810_vm7 = vcmp.lt.s32.totalorder %v1808_v59, %v1809_v51 }
 0x367   :  { %v1811_v13 = vsel %vm1810_vm7, %v1808_v59, %v1809_v51  ;;  %v6334_v51 = vld [vmem:[#allocation15_spill] sm:$0xff] }
 0x368   :  { %v1812_v25 = vrot.slane %v1811_v13, 1 }
 0x36a   :  { %vm1813_vm5 = vcmp.lt.s32.totalorder %v1811_v13, %v1812_v25 }
 0x36b   :  { %v2529_v36 = vpop.eup %2528  ;;  %v1814_v9 = vsel %vm1813_vm5, %v1811_v13, %v1812_v25  ;;  %v6335_v25 = vld [vmem:[#allocation33_spill] sm:$0xff] }
 0x36c   :  { %v1702_v44 = vmul.f32 %v2529_v36, %v6317_v22  ;;  %vm5861_vm11 = vcmp.eq.s32.totalorder %v6118_v5, %v1814_v9  ;;  %vm1816_vm2 = vcmp.eq.s32.totalorder %v6120_v34, %v1814_v9  ;;  %vm1817_vm1 = vcmp.eq.s32.totalorder %v6122_v4, %v1814_v9  ;;  %v2531_v3 = vpop.eup %2530  ;;  %v6337_v22 = vld [vmem:[#allocation28_spill] sm:$0xff] }
 0x36d   :  { %vm1822_vm15 = vcmp.eq.s32.totalorder %v6131_v20, %v1814_v9  ;;  %vm1823_vm3 = vcmp.eq.s32.totalorder %v6133_v32, %v1814_v9  ;;  %vm1824_vm4 = vcmp.eq.s32.totalorder %v6134_v33, %v1814_v9  ;;  %vm1825_vm7 = vcmp.eq.s32.totalorder %v6136_v45, %v1814_v9 }
 0x36e   :  { %v5085_v50 = vadd.f32 %v2531_v3, %v1702_v44  ;;  %vm1826_vm5 = vcmp.eq.s32.totalorder %v6137_v12, %v1814_v9  ;;  %vm1828_vm14 = vcmp.eq.s32.totalorder %v6140_v29, %v1814_v9  ;;  %v1831_v56 = vsel %vm5861_vm11, %v6319_v42, 0.0  ;;  %v6338_v3 = vld [vmem:[#allocation43_spill] sm:$0xff] }
 0x36f   :  { %v1832_v40 = vsel %vm1816_vm2, %v6320_v54, 0.0  ;;  %v1833_v27 = vsel %vm1817_vm1, %v6321_v60, 0.0  ;;  %vm6323_vm10 = vcmp.eq.s32.totalorder %v6123_v7, %v1814_v9  ;;  %vm6325_vm0 = vcmp.eq.s32.totalorder %v6125_v43, %v1814_v9 }
 0x370   :  { %6318 = vst [vmem:[#allocation59_spill] sm:$0xff] %v5085_v50  ;;  %v1834_v48 = vsel %vm6323_vm10, %v6322_v52, 0.0  ;;  %v1835_v35 = vsel %vm6325_vm0, %v6324_v39, 0.0  ;;  %vm6327_vm8 = vcmp.eq.s32.totalorder %v6127_v38, %v1814_v9  ;;  %vm6329_vm11 = vcmp.eq.s32.totalorder %v6129_v2, %v1814_v9 }
 0x371   :  { %v1836_v6 = vsel %vm6327_vm8, %v6326_v61, 0.0  ;;  %v1837_v15 = vsel %vm6329_vm11, %v6328_v37, 0.0  ;;  %v1838_v23 = vsel %vm1822_vm15, %v6330_v63, 0.0  ;;  %v1839_v55 = vsel %vm1823_vm3, %v6331_v16, 0.0  ;;  %v6340_v16 = vld [vmem:[#allocation39_spill] sm:$0xff] }
 0x372   :  { %v1840_v19 = vsel %vm1824_vm4, %v6332_v41, 0.0  ;;  %v1841_v59 = vsel %vm1825_vm7, %v6333_v24, 0.0  ;;  %v1842_v13 = vsel %vm1826_vm5, %v6334_v51, 0.0  ;;  %vm6336_vm11 = vcmp.eq.s32.totalorder %v6138_v26, %v1814_v9 }
 0x373   :  { %v1843_v36 = vsel %vm6336_vm11, %v6335_v25, 0.0  ;;  %v1844_v44 = vsel %vm1828_vm14, %v6337_v22, 0.0  ;;  %vm6339_vm10 = vcmp.eq.s32.totalorder %v6312_v57, %v1814_v9  ;;  %vm6341_vm0 = vcmp.eq.s32.totalorder %v6313_v17, %v1814_v9 }
 0x374   :  { %v1845_v41 = vsel %vm6339_vm10, %v6338_v3, 0.0  ;;  %v1846_v24 = vsel %vm6341_vm0, %v6340_v16, 0.0  ;;  %v1847_v63 = vadd.f32 %v1832_v40, %v1831_v56  ;;  %vm6342_vm8 = vcmp.eq.s32.totalorder %v6118_v5, %v1814_v9 }
 0x375   :  { %v5147_v51 = vsel %vm6342_vm8, -inf, %v4914_v0  ;;  %v5152_v25 = vsel %vm1816_vm2, -inf, %v4919_v10  ;;  %v5157_v22 = vsel %vm1817_vm1, -inf, %v4924_v46  ;;  %vm6343_vm11 = vcmp.eq.s32.totalorder %v6123_v7, %v1814_v9 }
 0x376   :  { %v5162_v16 = vsel %vm6343_vm11, -inf, %v4929_v21  ;;  %vm6344_vm10 = vcmp.eq.s32.totalorder %v6125_v43, %v1814_v9  ;;  %v1848_v56 = vadd.f32 %v1847_v63, %v1833_v27  ;;  %vm6345_vm2 = vcmp.eq.s32.totalorder %v6127_v38, %v1814_v9 }
 0x377   :  { %v5167_v0 = vsel %vm6344_vm10, -inf, %v4934_v58  ;;  %v5172_v10 = vsel %vm6345_vm2, -inf, %v4939_v31  ;;  %vm6346_vm1 = vcmp.eq.s32.totalorder %v6129_v2, %v1814_v9  ;;  %v5182_v21 = vsel %vm1822_vm15, -inf, %v4949_v1 }
 0x378   :  { %v5177_v46 = vsel %vm6346_vm1, -inf, %v4944_v11  ;;  %v5187_v58 = vsel %vm1823_vm3, -inf, %v4954_v8  ;;  %v5192_v31 = vsel %vm1824_vm4, -inf, %v4959_v18  ;;  %v5197_v11 = vsel %vm1825_vm7, -inf, %v4964_v28  ;;  %vm6349_vm4 = vmmov %vm6341_vm0 }
 0x379   :  { %v5202_v1 = vsel %vm1826_vm5, -inf, %v4969_v62  ;;  %v1849_v40 = vadd.f32 %v1848_v56, %v1834_v48  ;;  %vm6347_vm15 = vcmp.eq.s32.totalorder %v6138_v26, %v1814_v9  ;;  %v5212_v18 = vsel %vm1828_vm14, -inf, %v4979_v14 }
 0x37a   :  { %v5207_v8 = vsel %vm6347_vm15, -inf, %v4974_v30  ;;  %vm6348_vm3 = vcmp.eq.s32.totalorder %v6312_v57, %v1814_v9  ;;  %v5222_v62 = vsel %vm6349_vm4, -inf, %v4989_v49  ;;  %v1893_v27 = vmax.f32 %v5147_v51, %v5167_v0 }
 0x37b   :  { %v5217_v28 = vsel %vm6348_vm3, -inf, %v4984_v53  ;;  %v1894_v30 = vmax.f32 %v5152_v25, %v5172_v10  ;;  %v1895_v14 = vmax.f32 %v5157_v22, %v5177_v46  ;;  %v1850_v48 = vadd.f32 %v1849_v40, %v1835_v35 }
 0x37c   :  { %v1896_v63 = vmax.f32 %v5162_v16, %v5182_v21  ;;  %v1897_v53 = vmax.f32 %v1893_v27, %v5187_v58 }
 0x37d   :  { %v1898_v56 = vmax.f32 %v1894_v30, %v5192_v31  ;;  %v1899_v49 = vmax.f32 %v1895_v14, %v5197_v11  ;;  %v1851_v9 = vadd.f32 %v1850_v48, %v1836_v6 }
 0x37e   :  { %v1900_v3 = vmax.f32 %v1896_v63, %v5202_v1  ;;  %v1901_v37 = vmax.f32 %v1897_v53, %v5207_v8 }
 0x37f   :  { %v1902_v61 = vmax.f32 %v1898_v56, %v5212_v18  ;;  %v1903_v39 = vmax.f32 %v1899_v49, %v5217_v28  ;;  %v1852_v52 = vadd.f32 %v1851_v9, %v1837_v15 }
 0x380   :  { %v1904_v35 = vmax.f32 %v1900_v3, %v5222_v62  ;;  %v6357_v3 = vld [vmem:[#allocation67_spill] sm:$0xff] }
 0x381   :  { %v1905_v40 = vmax.f32 %v1901_v37, %v1902_v61  ;;  %v1853_v60 = vadd.f32 %v1852_v52, %v1838_v23 }
 0x382   :  { %v1906_v54 = vmax.f32 %v1903_v39, %v1904_v35 }
 0x383   :  { %v1854_v27 = vadd.f32 %v1853_v60, %v1839_v55 }
 0x384   :  { %v1907_v42 = vmax.f32 %v1905_v40, %v1906_v54 }
 0x385   :  { %v1855_v30 = vadd.f32 %v1854_v27, %v1840_v19 }
 0x386   :  { %v1908_v50 = vrot.slane %v1907_v42, 4 }
 0x387   :  { %v1856_v14 = vadd.f32 %v1855_v30, %v1841_v59 }
 0x388   :  { %v1909_v6 = vmax.f32 %v1907_v42, %v1908_v50 }
 0x389   :  { %v1857_v48 = vadd.f32 %v1856_v14, %v1842_v13 }
 0x38a   :  { %v1910_v63 = vrot.slane %v1909_v6, 2 }
 0x38b   :  { %v1858_v47 = vadd.f32 %v1857_v48, %v1843_v36  ;;  %v6356_v36 = vld [vmem:[#allocation66_spill] sm:$0xff] }
 0x38c   :  { %v1911_v53 = vmax.f32 %v1909_v6, %v1910_v63 }
 0x38d   :  { %v1859_v17 = vadd.f32 %v1858_v47, %v1844_v44 }
 0x38e   :  { %v1912_v56 = vrot.slane %v1911_v53, 1 }
 0x38f   :  { %v1860_v57 = vadd.f32 %v1859_v17, %v1845_v41 }
 0x390   :  { %v1913_v49 = vmax.f32 %v1911_v53, %v1912_v56  ;;  %v6358_v56 = vld [vmem:[#allocation58_spill] sm:$0xff] }
 0x391   :  { %v1861_v15 = vadd.f32 %v1860_v57, %v1846_v24 }
 0x392   :  { %vm1914_vm14 = vcmp.eq.f32.partialorder %v5147_v51, %v1913_v49  ;;  %vm1915_vm7 = vcmp.eq.f32.partialorder %v5152_v25, %v1913_v49  ;;  %vm1918_vm8 = vcmp.eq.f32.partialorder %v5167_v0, %v1913_v49  ;;  %vm1921_vm2 = vcmp.eq.f32.partialorder %v5182_v21, %v1913_v49 }
 0x393   :  { %v1862_v50 = vrot.slane %v1861_v15, 4  ;;  %vm1922_vm1 = vcmp.eq.f32.partialorder %v5187_v58, %v1913_v49  ;;  %vm1923_vm15 = vcmp.eq.f32.partialorder %v5192_v31, %v1913_v49  ;;  %vm1924_vm3 = vcmp.eq.f32.partialorder %v5197_v11, %v1913_v49 }
 0x394   :  { %vm1926_vm5 = vcmp.eq.f32.partialorder %v5207_v8, %v1913_v49  ;;  %vm1928_vm11 = vcmp.eq.f32.partialorder %v5217_v28, %v1913_v49  ;;  %vm1929_vm10 = vcmp.eq.f32.partialorder %v5222_v62, %v1913_v49  ;;  %v1930_v17 = vsel %vm1914_vm14, %v6118_v5, 128 }
 0x395   :  { %v1863_v57 = vadd.f32 %v1862_v50, %v1861_v15  ;;  %v1931_v47 = vsel %vm1915_vm7, %v6120_v34, 128  ;;  %vm6350_vm4 = vcmp.eq.f32.partialorder %v5157_v22, %v1913_v49  ;;  %vm6351_vm0 = vcmp.eq.f32.partialorder %v5162_v16, %v1913_v49 }
 0x396   :  { %v1932_v42 = vsel %vm6350_vm4, %v6122_v4, 128  ;;  %v1933_v54 = vsel %vm6351_vm0, %v6123_v7, 128  ;;  %v1934_v60 = vsel %vm1918_vm8, %v6125_v43, 128  ;;  %vm6352_vm14 = vcmp.eq.f32.partialorder %v5172_v10, %v1913_v49 }
 0x397   :  { %v1864_v52 = vrot.slane %v1863_v57, 2  ;;  %v1935_v39 = vsel %vm6352_vm14, %v6127_v38, 128  ;;  %vm6353_vm7 = vcmp.eq.f32.partialorder %v5177_v46, %v1913_v49  ;;  %v1937_v37 = vsel %vm1921_vm2, %v6131_v20, 128 }
 0x398   :  { %v1936_v61 = vsel %vm6353_vm7, %v6129_v2, 128  ;;  %v1938_v23 = vsel %vm1922_vm1, %v6133_v32, 128  ;;  %v1939_v55 = vsel %vm1923_vm15, %v6134_v33, 128  ;;  %v1940_v41 = vsel %vm1924_vm3, %v6136_v45, 128 }
 0x399   :  { %vm6354_vm0 = vcmp.eq.f32.partialorder %v5202_v1, %v1913_v49  ;;  %v1865_v24 = vadd.f32 %v1864_v52, %v1863_v57  ;;  %v1942_v59 = vsel %vm1926_vm5, %v6138_v26, 128  ;;  %vm6355_vm8 = vcmp.eq.f32.partialorder %v5212_v18, %v1913_v49 }
 0x39a   :  { %v1941_v19 = vsel %vm6354_vm0, %v6137_v12, 128  ;;  %v1943_v13 = vsel %vm6355_vm8, %v6140_v29, 128  ;;  %v1944_v44 = vsel %vm1928_vm11, %v6356_v36, 128  ;;  %v1945_v9 = vsel %vm1929_vm10, %v6357_v3, 128 }
 0x39b   :  { %vm1946_vm2 = vcmp.lt.s32.totalorder %v1930_v17, %v1934_v60  ;;  %vm1948_vm1 = vcmp.lt.s32.totalorder %v1931_v47, %v1935_v39  ;;  %vm1950_vm15 = vcmp.lt.s32.totalorder %v1932_v42, %v1936_v61  ;;  %v1866_v35 = vrot.slane %v1865_v24, 1 }
 0x39c   :  { %v1947_v40 = vsel %vm1946_vm2, %v1930_v17, %v1934_v60  ;;  %v1949_v27 = vsel %vm1948_vm1, %v1931_v47, %v1935_v39  ;;  %v1951_v30 = vsel %vm1950_vm15, %v1932_v42, %v1936_v61  ;;  %vm1952_vm5 = vcmp.lt.s32.totalorder %v1933_v54, %v1937_v37 }
 0x39d   :  { %vm1954_vm3 = vcmp.lt.s32.totalorder %v1947_v40, %v1938_v23  ;;  %vm1956_vm4 = vcmp.lt.s32.totalorder %v1949_v27, %v1939_v55  ;;  %vm1958_vm14 = vcmp.lt.s32.totalorder %v1951_v30, %v1940_v41  ;;  %v1867_v14 = vadd.f32 %v1866_v35, %v1865_v24 }
 0x39e   :  { %v1953_v6 = vsel %vm1952_vm5, %v1933_v54, %v1937_v37  ;;  %v1955_v48 = vsel %vm1954_vm3, %v1947_v40, %v1938_v23  ;;  %v1957_v63 = vsel %vm1956_vm4, %v1949_v27, %v1939_v55  ;;  %v1959_v53 = vsel %vm1958_vm14, %v1951_v30, %v1940_v41  ;;  %v6362_v27 = vld [vmem:[#allocation10_spill] sm:$0xff] }
 0x39f   :  { %vm1960_vm11 = vcmp.lt.s32.totalorder %v1953_v6, %v1941_v19  ;;  %vm1962_vm7 = vcmp.lt.s32.totalorder %v1955_v48, %v1942_v59  ;;  %vm1964_vm0 = vcmp.lt.s32.totalorder %v1957_v63, %v1943_v13  ;;  %v5305_v49 = vmax.f32 %v6358_v56, %v1867_v14 }
 0x3a0   :  { %v1961_v15 = vsel %vm1960_vm11, %v1953_v6, %v1941_v19  ;;  %v1963_v50 = vsel %vm1962_vm7, %v1955_v48, %v1942_v59  ;;  %v1965_v57 = vsel %vm1964_vm0, %v1957_v63, %v1943_v13  ;;  %vm1966_vm10 = vcmp.lt.s32.totalorder %v1959_v53, %v1944_v44  ;;  %v6360_v13 = vld [vmem:[#allocation59_spill] sm:$0xff]  ;;  %v6364_v48 = vld [vmem:[#allocation17_spill] sm:$0xff] }
 0x3a1   :  { %6359 = vst [vmem:[#allocation60_spill] sm:$0xff] %v5305_v49  ;;  %vm1968_vm8 = vcmp.lt.s32.totalorder %v1961_v15, %v1945_v9  ;;  %vm1970_vm2 = vcmp.lt.s32.totalorder %v1963_v50, %v1965_v57  ;;  %v1869_v17 = vsub.f32 %v6358_v56, %v5305_v49  ;;  %v1873_v47 = vsub.f32 %v1867_v14, %v5305_v49  ;;  %v6363_v14 = vld [vmem:[#allocation6_spill] sm:$0xff] }
 0x3a2   :  { %v1967_v42 = vsel %vm1966_vm10, %v1959_v53, %v1944_v44  ;;  %v1969_v54 = vsel %vm1968_vm8, %v1961_v15, %v1945_v9  ;;  %v1971_v60 = vsel %vm1970_vm2, %v1963_v50, %v1965_v57  ;;  %v6366_v53 = vld [vmem:[#allocation14_spill] sm:$0xff]  ;;  %v6368_v15 = vld [vmem:[#allocation32_spill] sm:$0xff]  ;;  %v6370_v57 = vld [vmem:[#allocation27_spill] sm:$0xff] }
 0x3a3   :  { %vm1972_vm1 = vcmp.lt.s32.totalorder %v1967_v42, %v1969_v54  ;;  %v1870_v52 = vmul.f32 1.442695, %v1869_v17  ;;  %v1874_v39 = vmul.f32 1.442695, %v1873_v47  ;;  %v6372_v47 = vld [vmem:[#allocation41_spill] sm:$0xff] }
 0x3a4   :  { %v1973_v61 = vsel %vm1972_vm1, %v1967_v42, %v1969_v54  ;;  %v6373_v54 = vld [vmem:[#allocation38_spill] sm:$0xff] }
 0x3a5   :  { %vm1974_vm15 = vcmp.lt.s32.totalorder %v1971_v60, %v1973_v61  ;;  %2532 = vpow2.f32 %v1870_v52  ;;  %v6374_v52 = vld [vmem:[#allocation11_spill] sm:$0xff] }
 0x3a6   :  { %v1975_v37 = vsel %vm1974_vm15, %v1971_v60, %v1973_v61  ;;  %2534 = vpow2.f32 %v1874_v39  ;;  %v6375_v61 = vld [vmem:[#allocation7_spill] sm:$0xff] }
 0x3a7   :  { %v1976_v23 = vrot.slane %v1975_v37, 4 }
 0x3a9   :  { %vm1977_vm5 = vcmp.lt.s32.totalorder %v1975_v37, %v1976_v23 }
 0x3aa   :  { %v1978_v55 = vsel %vm1977_vm5, %v1975_v37, %v1976_v23  ;;  %v6376_v23 = vld [vmem:[#allocation18_spill] sm:$0xff] }
 0x3ab   :  { %v1979_v41 = vrot.slane %v1978_v55, 2 }
 0x3ad   :  { %vm1980_vm3 = vcmp.lt.s32.totalorder %v1978_v55, %v1979_v41 }
 0x3ae   :  { %v1981_v19 = vsel %vm1980_vm3, %v1978_v55, %v1979_v41  ;;  %v6378_v41 = vld [vmem:[#allocation15_spill] sm:$0xff] }
 0x3af   :  { %v1982_v24 = vrot.slane %v1981_v19, 1  ;;  %v2533_v59 = vpop.eup %2532 }
 0x3b0   :  { %v1872_v44 = vmul.f32 %v2533_v59, %v6360_v13  ;;  %v2535_v9 = vpop.eup %2534  ;;  %v6381_v13 = vld [vmem:[#allocation28_spill] sm:$0xff] }
 0x3b1   :  { %vm1983_vm4 = vcmp.lt.s32.totalorder %v1981_v19, %v1982_v24 }
 0x3b2   :  { %v1984_v35 = vsel %vm1983_vm4, %v1981_v19, %v1982_v24  ;;  %v5311_v40 = vadd.f32 %v2535_v9, %v1872_v44  ;;  %v6379_v24 = vld [vmem:[#allocation33_spill] sm:$0xff]  ;;  %v6382_v9 = vld [vmem:[#allocation43_spill] sm:$0xff] }
 0x3b3   :  { %vm1985_vm14 = vcmp.eq.s32.totalorder %v6118_v5, %v1984_v35  ;;  %vm1986_vm11 = vcmp.eq.s32.totalorder %v6120_v34, %v1984_v35  ;;  %vm1991_vm2 = vcmp.eq.s32.totalorder %v6129_v2, %v1984_v35  ;;  %vm1992_vm1 = vcmp.eq.s32.totalorder %v6131_v20, %v1984_v35 }
 0x3b4   :  { %6361 = vst [vmem:[#allocation61_spill] sm:$0xff] %v5311_v40  ;;  %vm1993_vm15 = vcmp.eq.s32.totalorder %v6133_v32, %v1984_v35  ;;  %vm1994_vm5 = vcmp.eq.s32.totalorder %v6134_v33, %v1984_v35  ;;  %vm1996_vm4 = vcmp.eq.s32.totalorder %v6137_v12, %v1984_v35  ;;  %vm1998_vm0 = vcmp.eq.s32.totalorder %v6140_v29, %v1984_v35 }
 0x3b5   :  { %v2001_v30 = vsel %vm1985_vm14, %v6362_v27, 0.0  ;;  %v2002_v6 = vsel %vm1986_vm11, %v6363_v14, 0.0  ;;  %vm6365_vm3 = vcmp.eq.s32.totalorder %v6122_v4, %v1984_v35  ;;  %vm6367_vm7 = vcmp.eq.s32.totalorder %v6123_v7, %v1984_v35 }
 0x3b6   :  { %v2003_v63 = vsel %vm6365_vm3, %v6364_v48, 0.0  ;;  %v2004_v56 = vsel %vm6367_vm7, %v6366_v53, 0.0  ;;  %vm6369_vm10 = vcmp.eq.s32.totalorder %v6125_v43, %v1984_v35  ;;  %vm6371_vm8 = vcmp.eq.s32.totalorder %v6127_v38, %v1984_v35 }
 0x3b7   :  { %v2005_v50 = vsel %vm6369_vm10, %v6368_v15, 0.0  ;;  %v2006_v17 = vsel %vm6371_vm8, %v6370_v57, 0.0  ;;  %v2007_v42 = vsel %vm1991_vm2, %v6372_v47, 0.0  ;;  %v2008_v60 = vsel %vm1992_vm1, %v6373_v54, 0.0 }
 0x3b8   :  { %v2009_v39 = vsel %vm1993_vm15, %v6374_v52, 0.0  ;;  %v2010_v37 = vsel %vm1994_vm5, %v6375_v61, 0.0  ;;  %vm6377_vm7 = vcmp.eq.s32.totalorder %v6136_v45, %v1984_v35  ;;  %v2012_v19 = vsel %vm1996_vm4, %v6378_v41, 0.0  ;;  %v6384_v52 = vld [vmem:[#allocation39_spill] sm:$0xff] }
 0x3b9   :  { %v2011_v55 = vsel %vm6377_vm7, %v6376_v23, 0.0  ;;  %vm6380_vm10 = vcmp.eq.s32.totalorder %v6138_v26, %v1984_v35  ;;  %v2014_v44 = vsel %vm1998_vm0, %v6381_v13, 0.0  ;;  %vm6383_vm8 = vcmp.eq.s32.totalorder %v6356_v36, %v1984_v35 }
 0x3ba   :  { %v2013_v59 = vsel %vm6380_vm10, %v6379_v24, 0.0  ;;  %v2015_v61 = vsel %vm6383_vm8, %v6382_v9, 0.0  ;;  %vm6385_vm3 = vcmp.eq.s32.totalorder %v6357_v3, %v1984_v35  ;;  %v2017_v54 = vadd.f32 %v2002_v6, %v2001_v30 }
 0x3bb   :  { %v2016_v23 = vsel %vm6385_vm3, %v6384_v52, 0.0  ;;  %v5380_v41 = vsel %vm1985_vm14, -inf, %v5147_v51  ;;  %v5385_v24 = vsel %vm1986_vm11, -inf, %v5152_v25  ;;  %vm6386_vm7 = vcmp.eq.s32.totalorder %v6122_v4, %v1984_v35 }
 0x3bc   :  { %v5390_v13 = vsel %vm6386_vm7, -inf, %v5157_v22  ;;  %vm6387_vm10 = vcmp.eq.s32.totalorder %v6123_v7, %v1984_v35  ;;  %vm6388_vm8 = vcmp.eq.s32.totalorder %v6125_v43, %v1984_v35  ;;  %vm6389_vm14 = vcmp.eq.s32.totalorder %v6127_v38, %v1984_v35 }
 0x3bd   :  { %v5395_v52 = vsel %vm6387_vm10, -inf, %v5162_v16  ;;  %v5400_v51 = vsel %vm6388_vm8, -inf, %v5167_v0  ;;  %v5405_v25 = vsel %vm6389_vm14, -inf, %v5172_v10  ;;  %v2018_v30 = vadd.f32 %v2017_v54, %v2003_v63 }
 0x3be   :  { %v5410_v22 = vsel %vm1991_vm2, -inf, %v5177_v46  ;;  %v5415_v16 = vsel %vm1992_vm1, -inf, %v5182_v21  ;;  %v5420_v0 = vsel %vm1993_vm15, -inf, %v5187_v58  ;;  %v5425_v10 = vsel %vm1994_vm5, -inf, %v5192_v31  ;;  %vm6393_vm15 = vmmov %vm6385_vm3 }
 0x3bf   :  { %vm6390_vm11 = vcmp.eq.s32.totalorder %v6136_v45, %v1984_v35  ;;  %v5435_v21 = vsel %vm1996_vm4, -inf, %v5202_v1  ;;  %vm6391_vm2 = vcmp.eq.s32.totalorder %v6138_v26, %v1984_v35  ;;  %v2019_v6 = vadd.f32 %v2018_v30, %v2004_v56 }
 0x3c0   :  { %v5430_v46 = vsel %vm6390_vm11, -inf, %v5197_v11  ;;  %v5440_v58 = vsel %vm6391_vm2, -inf, %v5207_v8  ;;  %v5445_v31 = vsel %vm1998_vm0, -inf, %v5212_v18  ;;  %vm6392_vm1 = vcmp.eq.s32.totalorder %v6356_v36, %v1984_v35 }
 0x3c1   :  { %v5450_v11 = vsel %vm6392_vm1, -inf, %v5217_v28  ;;  %v5455_v1 = vsel %vm6393_vm15, -inf, %v5222_v62  ;;  %v2063_v8 = vmax.f32 %v5380_v41, %v5400_v51  ;;  %v2064_v63 = vmax.f32 %v5385_v24, %v5405_v25 }
 0x3c2   :  { %v2065_v18 = vmax.f32 %v5390_v13, %v5410_v22  ;;  %v2066_v56 = vmax.f32 %v5395_v52, %v5415_v16  ;;  %v2020_v54 = vadd.f32 %v2019_v6, %v2005_v50 }
 0x3c3   :  { %v2067_v28 = vmax.f32 %v2063_v8, %v5420_v0  ;;  %v2068_v30 = vmax.f32 %v2064_v63, %v5425_v10 }
 0x3c4   :  { %v2069_v62 = vmax.f32 %v2065_v18, %v5430_v46  ;;  %v2070_v35 = vmax.f32 %v2066_v56, %v5435_v21  ;;  %v2021_v9 = vadd.f32 %v2020_v54, %v2006_v17  ;;  %v2573_v56 = vmov 0.0  }
 0x3c5   :  { %v2071_v47 = vmax.f32 %v2067_v28, %v5440_v58  ;;  %v2072_v57 = vmax.f32 %v2068_v30, %v5445_v31  ;;  %v628_v54 = vsel %vm3084_vm6, 1.0, %v2573_v56  ;;  %v629_v30 = vsel %vm3102_vm9, 1.0, %v2573_v56 }
 0x3c6   :  { %v2073_v15 = vmax.f32 %v2069_v62, %v5450_v11  ;;  %v2074_v53 = vmax.f32 %v2070_v35, %v5455_v1  ;;  %v2022_v48 = vadd.f32 %v2021_v9, %v2007_v42 }
 0x3c7   :  { %v2075_v14 = vmax.f32 %v2071_v47, %v2072_v57 }
 0x3c8   :  { %v2076_v50 = vmax.f32 %v2073_v15, %v2074_v53  ;;  %v2023_v6 = vadd.f32 %v2022_v48, %v2008_v60  ;;  %v644_v53 = vadd.f32 %v629_v30, %v628_v54  ;;  %v6398_v54 = vld [vmem:[#allocation60_spill] sm:$0xff] }
 0x3ca   :  { %v2077_v8 = vmax.f32 %v2075_v14, %v2076_v50  ;;  %v2024_v27 = vadd.f32 %v2023_v6, %v2009_v39 }
 0x3cc   :  { %v2078_v63 = vrot.slane %v2077_v8, 4  ;;  %v2025_v40 = vadd.f32 %v2024_v27, %v2010_v37  ;;  %v630_v27 = vsel %vm3117_vm12, 1.0, %v2573_v56 }
 0x3cd   :  { %v5482_v60 = vadd.f32 %v644_v53, %v630_v27  ;;  %v631_v53 = vsel %vm6027_vm13, 1.0, %v2573_v56 }
 0x3ce   :  { %v2079_v18 = vmax.f32 %v2077_v8, %v2078_v63  ;;  %v2026_v49 = vadd.f32 %v2025_v40, %v2011_v55 }
 0x3d0   :  { %v2080_v62 = vrot.slane %v2079_v18, 2  ;;  %v2027_v42 = vadd.f32 %v2026_v49, %v2012_v19 }
 0x3d2   :  { %v2081_v57 = vmax.f32 %v2079_v18, %v2080_v62  ;;  %v2028_v48 = vadd.f32 %v2027_v42, %v2013_v59 }
 0x3d4   :  { %v2082_v15 = vrot.slane %v2081_v57, 1  ;;  %v2029_v40 = vadd.f32 %v2028_v48, %v2014_v44 }
 0x3d6   :  { %v2083_v47 = vmax.f32 %v2081_v57, %v2082_v15  ;;  %v2030_v39 = vadd.f32 %v2029_v40, %v2015_v61  ;;  %v646_v40 = vadd.f32 %v5482_v60, %v631_v53  ;;  %v6418_v57 = vld [vmem:[#allocation7_spill] sm:$0xff]  ;;  %v6419_v53 = vld [vmem:[#allocation18_spill] sm:$0xff] }
 0x3d8   :  { %vm2084_vm6 = vcmp.eq.f32.partialorder %v5380_v41, %v2083_v47  ;;  %vm2085_vm0 = vcmp.eq.f32.partialorder %v5385_v24, %v2083_v47  ;;  %vm2086_vm9 = vcmp.eq.f32.partialorder %v5390_v13, %v2083_v47  ;;  %vm2087_vm5 = vcmp.eq.f32.partialorder %v5395_v52, %v2083_v47 }
 0x3d9   :  { %v2031_v49 = vadd.f32 %v2030_v39, %v2016_v23  ;;  %vm2088_vm4 = vcmp.eq.f32.partialorder %v5400_v51, %v2083_v47  ;;  %vm2090_vm12 = vcmp.eq.f32.partialorder %v5410_v22, %v2083_v47  ;;  %vm2091_vm7 = vcmp.eq.f32.partialorder %v5415_v16, %v2083_v47 }
 0x3da   :  { %vm2092_vm10 = vcmp.eq.f32.partialorder %v5420_v0, %v2083_v47  ;;  %vm2093_vm8 = vcmp.eq.f32.partialorder %v5425_v10, %v2083_v47  ;;  %vm2094_vm14 = vcmp.eq.f32.partialorder %v5430_v46, %v2083_v47  ;;  %vm2095_vm11 = vcmp.eq.f32.partialorder %v5435_v21, %v2083_v47 }
 0x3db   :  { %v2032_v61 = vrot.slane %v2031_v49, 4  ;;  %vm2096_vm2 = vcmp.eq.f32.partialorder %v5440_v58, %v2083_v47  ;;  %vm2097_vm1 = vcmp.eq.f32.partialorder %v5445_v31, %v2083_v47  ;;  %vm2098_vm15 = vcmp.eq.f32.partialorder %v5450_v11, %v2083_v47 }
 0x3dc   :  { %vm2099_vm3 = vcmp.eq.f32.partialorder %v5455_v1, %v2083_v47  ;;  %v2100_v37 = vsel %vm2084_vm6, %v6118_v5, 128  ;;  %v2101_v23 = vsel %vm2085_vm0, %v6120_v34, 128  ;;  %v2102_v19 = vsel %vm2086_vm9, %v6122_v4, 128 }
 0x3dd   :  { %v2033_v55 = vadd.f32 %v2032_v61, %v2031_v49  ;;  %v2103_v59 = vsel %vm2087_vm5, %v6123_v7, 128  ;;  %v2104_v44 = vsel %vm2088_vm4, %v6125_v43, 128  ;;  %vm6397_vm6 = vcmp.eq.f32.partialorder %v5405_v25, %v2083_v47  ;;  %v6400_v61 = vld [vmem:[#allocation16_spill] sm:$0xff] }
 0x3de   :  { %v2105_v41 = vsel %vm6397_vm6, %v6127_v38, 128  ;;  %v2106_v24 = vsel %vm2090_vm12, %v6129_v2, 128  ;;  %v2107_v13 = vsel %vm2091_vm7, %v6131_v20, 128  ;;  %v2108_v52 = vsel %vm2092_vm10, %v6133_v32, 128 }
 0x3df   :  { %v2034_v9 = vrot.slane %v2033_v55, 2  ;;  %v2109_v51 = vsel %vm2093_vm8, %v6134_v33, 128  ;;  %v2110_v25 = vsel %vm2094_vm14, %v6136_v45, 128  ;;  %v2111_v22 = vsel %vm2095_vm11, %v6137_v12, 128 }
 0x3e0   :  { %v2112_v16 = vsel %vm2096_vm2, %v6138_v26, 128  ;;  %v2113_v0 = vsel %vm2097_vm1, %v6140_v29, 128  ;;  %v2114_v10 = vsel %vm2098_vm15, %v6356_v36, 128  ;;  %v2115_v46 = vsel %vm2099_vm3, %v6357_v3, 128 }
 0x3e1   :  { %v2035_v35 = vadd.f32 %v2034_v9, %v2033_v55  ;;  %vm2116_vm0 = vcmp.lt.s32.totalorder %v2100_v37, %v2104_v44  ;;  %vm2118_vm9 = vcmp.lt.s32.totalorder %v2101_v23, %v2105_v41  ;;  %vm2120_vm5 = vcmp.lt.s32.totalorder %v2102_v19, %v2106_v24 }
 0x3e2   :  { %v2117_v21 = vsel %vm2116_vm0, %v2100_v37, %v2104_v44  ;;  %v2119_v50 = vsel %vm2118_vm9, %v2101_v23, %v2105_v41  ;;  %v2121_v58 = vsel %vm2120_vm5, %v2102_v19, %v2106_v24  ;;  %vm2122_vm4 = vcmp.lt.s32.totalorder %v2103_v59, %v2107_v13 }
 0x3e3   :  { %v2036_v6 = vrot.slane %v2035_v35, 1  ;;  %v2123_v8 = vsel %vm2122_vm4, %v2103_v59, %v2107_v13  ;;  %vm2124_vm12 = vcmp.lt.s32.totalorder %v2117_v21, %v2108_v52  ;;  %vm2126_vm7 = vcmp.lt.s32.totalorder %v2119_v50, %v2109_v51  ;;  %v6402_v59 = vld [vmem:[#allocation24_spill] sm:$0xff] }
 0x3e4   :  { %v2125_v31 = vsel %vm2124_vm12, %v2117_v21, %v2108_v52  ;;  %v2127_v63 = vsel %vm2126_vm7, %v2119_v50, %v2109_v51  ;;  %vm2128_vm10 = vcmp.lt.s32.totalorder %v2121_v58, %v2110_v25  ;;  %vm2130_vm8 = vcmp.lt.s32.totalorder %v2123_v8, %v2111_v22  ;;  %v6404_v13 = vld [vmem:[#allocation44_spill] sm:$0xff]  ;;  %v6409_v50 = vld [vmem:[#allocation10_spill] sm:$0xff] }
 0x3e5   :  { %v2037_v11 = vadd.f32 %v2036_v6, %v2035_v35  ;;  %v2129_v18 = vsel %vm2128_vm10, %v2121_v58, %v2110_v25  ;;  %v2131_v1 = vsel %vm2130_vm8, %v2123_v8, %v2111_v22  ;;  %vm2132_vm3 = vcmp.lt.s32.totalorder %v2125_v31, %v2112_v16  ;;  %v6406_v22 = vld [vmem:[#allocation36_spill] sm:$0xff]  ;;  %v6410_v6 = vld [vmem:[#allocation6_spill] sm:$0xff] }
 0x3e6   :  { %v2133_v17 = vsel %vm2132_vm3, %v2125_v31, %v2112_v16  ;;  %vm2134_vm14 = vcmp.lt.s32.totalorder %v2127_v63, %v2113_v0  ;;  %vm2136_vm11 = vcmp.lt.s32.totalorder %v2129_v18, %v2114_v10  ;;  %vm2138_vm2 = vcmp.lt.s32.totalorder %v2131_v1, %v2115_v46  ;;  %v6411_v31 = vld [vmem:[#allocation17_spill] sm:$0xff] }
 0x3e7   :  { %v5549_v28 = vmax.f32 %v6398_v54, %v2037_v11  ;;  %v2135_v30 = vsel %vm2134_vm14, %v2127_v63, %v2113_v0  ;;  %v2137_v62 = vsel %vm2136_vm11, %v2129_v18, %v2114_v10  ;;  %v2139_v42 = vsel %vm2138_vm2, %v2131_v1, %v2115_v46  ;;  %v6408_v10 = vld [vmem:[#allocation61_spill] sm:$0xff]  ;;  %v6413_v1 = vld [vmem:[#allocation32_spill] sm:$0xff] }
 0x3e8   :  { %vm2140_vm1 = vcmp.lt.s32.totalorder %v2133_v17, %v2135_v30  ;;  %vm2142_vm15 = vcmp.lt.s32.totalorder %v2137_v62, %v2139_v42  ;;  %vm6401_vm0 = vnez %v6400_v61  ;;  %vm6403_vm9 = vnez %v6402_v59  ;;  %v6429_v59 = vld [vmem:[#allocation29_spill] sm:$0xff] }
 0x3e9   :  { %v2039_v48 = vsub.f32 %v6398_v54, %v5549_v28  ;;  %v2043_v14 = vsub.f32 %v2037_v11, %v5549_v28  ;;  %v2141_v27 = vsel %vm2140_vm1, %v2133_v17, %v2135_v30  ;;  %v2143_v15 = vsel %vm2142_vm15, %v2137_v62, %v2139_v42  ;;  %v6412_v11 = vld [vmem:[#allocation14_spill] sm:$0xff]  ;;  %v6414_v54 = vld [vmem:[#allocation27_spill] sm:$0xff]  ;;  %v6415_v30 = vld [vmem:[#allocation41_spill] sm:$0xff] }
 0x3ea   :  { %vm2144_vm6 = vcmp.lt.s32.totalorder %v2141_v27, %v2143_v15  ;;  %v632_v37 = vsel %vm6401_vm0, 1.0, %v2573_v56  ;;  %v633_v44 = vsel %vm6403_vm9, 1.0, %v2573_v56  ;;  %vm6405_vm4 = vnez %v6404_v13  ;;  %v6416_v62 = vld [vmem:[#allocation38_spill] sm:$0xff]  ;;  %v6417_v42 = vld [vmem:[#allocation11_spill] sm:$0xff] }
 0x3eb   :  { %v2040_v47 = vmul.f32 1.442695, %v2039_v48  ;;  %v2044_v39 = vmul.f32 1.442695, %v2043_v14  ;;  %v2145_v49 = vsel %vm2144_vm6, %v2141_v27, %v2143_v15  ;;  %v647_v55 = vadd.f32 %v646_v40, %v632_v37  ;;  %v6420_v48 = vld [vmem:[#allocation15_spill] sm:$0xff]  ;;  %v6421_v14 = vld [vmem:[#allocation33_spill] sm:$0xff] }
 0x3ec   :  { %v2146_v23 = vrot.slane %v2145_v49, 4  ;;  %v634_v52 = vsel %vm6405_vm4, 1.0, %v2573_v56  ;;  %vm6407_vm7 = vnez %v6406_v22  ;;  %v6422_v27 = vld [vmem:[#allocation28_spill] sm:$0xff]  ;;  %v6423_v15 = vld [vmem:[#allocation43_spill] sm:$0xff] }
 0x3ed   :  { %2536 = vpow2.f32 %v2040_v47  ;;  %v648_v60 = vadd.f32 %v647_v55, %v633_v44  ;;  %v635_v16 = vsel %vm6407_vm7, 1.0, %v2573_v56  ;;  %v6424_v40 = vld [vmem:[#allocation39_spill] sm:$0xff] }
 0x3ee   :  { %vm2147_vm13 = vcmp.lt.s32.totalorder %v2145_v49, %v2146_v23  ;;  %2538 = vpow2.f32 %v2044_v39 }
 0x3ef   :  { %v2148_v19 = vsel %vm2147_vm13, %v2145_v49, %v2146_v23  ;;  %v649_v25 = vadd.f32 %v648_v60, %v634_v52 }
 0x3f0   :  { %v2149_v41 = vrot.slane %v2148_v19, 2 }
 0x3f1   :  { %v650_v39 = vadd.f32 %v649_v25, %v635_v16  ;;  %v6433_v25 = vld [vmem:[#allocation42_spill] sm:$0xff] }
 0x3f2   :  { %vm2150_vm5 = vcmp.lt.s32.totalorder %v2148_v19, %v2149_v41 }
 0x3f3   :  { %v2151_v24 = vsel %vm2150_vm5, %v2148_v19, %v2149_v41 }
 0x3f4   :  { %v2152_v9 = vrot.slane %v2151_v24, 1 }
 0x3f6   :  { %vm2153_vm12 = vcmp.lt.s32.totalorder %v2151_v24, %v2152_v9 }
 0x3f7   :  { %v2537_v51 = vpop.eup %2536  ;;  %v2154_v0 = vsel %vm2153_vm12, %v2151_v24, %v2152_v9  ;;  %v6431_v24 = vld [vmem:[#allocation22_spill] sm:$0xff] }
 0x3f8   :  { %v2042_v46 = vmul.f32 %v2537_v51, %v6408_v10  ;;  %vm2155_vm10 = vcmp.eq.s32.totalorder %v6118_v5, %v2154_v0  ;;  %vm2156_vm8 = vcmp.eq.s32.totalorder %v6120_v34, %v2154_v0  ;;  %vm2157_vm3 = vcmp.eq.s32.totalorder %v6122_v4, %v2154_v0  ;;  %v2539_v35 = vpop.eup %2538 }
 0x3f9   :  { %vm2158_vm14 = vcmp.eq.s32.totalorder %v6123_v7, %v2154_v0  ;;  %vm2159_vm11 = vcmp.eq.s32.totalorder %v6125_v43, %v2154_v0  ;;  %vm2160_vm2 = vcmp.eq.s32.totalorder %v6127_v38, %v2154_v0  ;;  %vm2161_vm1 = vcmp.eq.s32.totalorder %v6129_v2, %v2154_v0 }
 0x3fa   :  { %v5578_v21 = vadd.f32 %v2539_v35, %v2042_v46  ;;  %vm2162_vm15 = vcmp.eq.s32.totalorder %v6131_v20, %v2154_v0  ;;  %vm2163_vm6 = vcmp.eq.s32.totalorder %v6133_v32, %v2154_v0  ;;  %vm2164_vm0 = vcmp.eq.s32.totalorder %v6134_v33, %v2154_v0  ;;  %v6435_v46 = vld [vmem:[#allocation30_spill] sm:$0xff] }
 0x3fb   :  { %vm2165_vm13 = vcmp.eq.s32.totalorder %v6136_v45, %v2154_v0  ;;  %vm2166_vm9 = vcmp.eq.s32.totalorder %v6137_v12, %v2154_v0  ;;  %vm2167_vm5 = vcmp.eq.s32.totalorder %v6138_v26, %v2154_v0  ;;  %vm2168_vm4 = vcmp.eq.s32.totalorder %v6140_v29, %v2154_v0  ;;  %v6425_v12 = vld [vmem:[#allocation19_spill] sm:$0xff]  ;;  %v6427_v29 = vld [vmem:[#allocation13_spill] sm:$0xff] }
 0x3fc   :  { %vm2169_vm12 = vcmp.eq.s32.totalorder %v6356_v36, %v2154_v0  ;;  %vm2170_vm7 = vcmp.eq.s32.totalorder %v6357_v3, %v2154_v0  ;;  %v2171_v58 = vsel %vm2155_vm10, %v6409_v50, 0.0  ;;  %v2172_v8 = vsel %vm2156_vm8, %v6410_v6, 0.0 }
 0x3fd   :  { %v2173_v63 = vsel %vm2157_vm3, %v6411_v31, 0.0  ;;  %v2174_v18 = vsel %vm2158_vm14, %v6412_v11, 0.0  ;;  %v2175_v17 = vsel %vm2159_vm11, %v6413_v1, 0.0  ;;  %v2176_v5 = vsel %vm2160_vm2, %v6414_v54, 0.0  ;;  %v6439_v1 = vld [vmem:[#allocation46_spill] sm:$0xff] }
 0x3fe   :  { %v2177_v34 = vsel %vm2161_vm1, %v6415_v30, 0.0  ;;  %v2178_v4 = vsel %vm2162_vm15, %v6416_v62, 0.0  ;;  %v2179_v7 = vsel %vm2163_vm6, %v6417_v42, 0.0  ;;  %v2180_v43 = vsel %vm2164_vm0, %v6418_v57, 0.0 }
 0x3ff   :  { %v2181_v38 = vsel %vm2165_vm13, %v6419_v53, 0.0  ;;  %v2182_v2 = vsel %vm2166_vm9, %v6420_v48, 0.0  ;;  %v2183_v20 = vsel %vm2167_vm5, %v6421_v14, 0.0  ;;  %v2184_v32 = vsel %vm2168_vm4, %v6422_v27, 0.0 }
 0x400   :  { %v2185_v33 = vsel %vm2169_vm12, %v6423_v15, 0.0  ;;  %v2186_v45 = vsel %vm2170_vm7, %v6424_v40, 0.0  ;;  %v2187_v47 = vadd.f32 %v2172_v8, %v2171_v58  ;;  %vm6426_vm10 = vnez %v6425_v12  ;;  %v6437_v8 = vld [vmem:[#allocation49_spill] sm:$0xff] }
 0x401   :  { %v636_v49 = vsel %vm6426_vm10, 1.0, %v2573_v56  ;;  %vm6428_vm8 = vnez %v6427_v29  ;;  %vm6430_vm3 = vnez %v6429_v59  ;;  %vm6432_vm14 = vnez %v6431_v24 }
 0x402   :  { %v2188_v26 = vadd.f32 %v2187_v47, %v2173_v63  ;;  %v651_v37 = vadd.f32 %v650_v39, %v636_v49  ;;  %v637_v23 = vsel %vm6428_vm8, 1.0, %v2573_v56  ;;  %v638_v3 = vsel %vm6430_vm3, 1.0, %v2573_v56 }
 0x403   :  { %v639_v13 = vsel %vm6432_vm14, 1.0, %v2573_v56  ;;  %vm6434_vm11 = vnez %v6433_v25  ;;  %vm6436_vm2 = vnez %v6435_v46  ;;  %vm6438_vm1 = vnez %v6437_v8 }
 0x404   :  { %v2189_v61 = vadd.f32 %v2188_v26, %v2174_v18  ;;  %v652_v19 = vadd.f32 %v651_v37, %v637_v23  ;;  %v640_v22 = vsel %vm6434_vm11, 1.0, %v2573_v56  ;;  %v641_v35 = vsel %vm6436_vm2, 1.0, %v2573_v56 }
 0x405   :  { %v642_v31 = vsel %vm6438_vm1, 1.0, %v2573_v56  ;;  %vm6440_vm15 = vnez %v6439_v1 }
 0x406   :  { %v2190_v55 = vadd.f32 %v2189_v61, %v2175_v17  ;;  %v653_v60 = vadd.f32 %v652_v19, %v638_v3  ;;  %v643_v17 = vsel %vm6440_vm15, 1.0, %v2573_v56  ;;  %v6441_v56 = vld [vmem:[#allocation68_spill] sm:$0xff] }
 0x407   :  { %v696_v27 = vrot.slane %v6441_v56, 4 }
 0x408   :  { %v2191_v36 = vadd.f32 %v2190_v55, %v2176_v5  ;;  %v654_v51 = vadd.f32 %v653_v60, %v639_v13 }
 0x409   :  { %v697_v15 = vadd.f32 %v696_v27, %v6441_v56 }
 0x40a   :  { %v2192_v44 = vadd.f32 %v2191_v36, %v2177_v34  ;;  %v655_v10 = vadd.f32 %v654_v51, %v640_v22 }
 0x40b   :  { %v698_v39 = vrot.slane %v697_v15, 2 }
 0x40c   :  { %v2193_v41 = vadd.f32 %v2192_v44, %v2178_v4  ;;  %v656_v6 = vadd.f32 %v655_v10, %v641_v35 }
 0x40d   :  { %v699_v49 = vadd.f32 %v698_v39, %v697_v15 }
 0x40e   :  { %v2194_v52 = vadd.f32 %v2193_v41, %v2179_v7  ;;  %v657_v18 = vadd.f32 %v656_v6, %v642_v31 }
 0x40f   :  { %v700_v26 = vrot.slane %v699_v49, 1 }
 0x410   :  { %v2195_v9 = vadd.f32 %v2194_v52, %v2180_v43  ;;  %v658_v30 = vadd.f32 %v657_v18, %v643_v17 }
 0x411   :  { %v701_v61 = vadd.f32 %v700_v26, %v699_v49 }
 0x412   :  { %v2196_v16 = vadd.f32 %v2195_v9, %v2181_v38  ;;  %v659_v4 = vrot.slane %v658_v30, 4 }
 0x414   :  { %v2197_v0 = vadd.f32 %v2196_v16, %v2182_v2  ;;  %v660_v57 = vadd.f32 %v659_v4, %v658_v30 }
 0x416   :  { %v2198_v50 = vadd.f32 %v2197_v0, %v2183_v20  ;;  %v661_v48 = vrot.slane %v660_v57, 2 }
 0x418   :  { %v2199_v58 = vadd.f32 %v2198_v50, %v2184_v32  ;;  %v662_v20 = vadd.f32 %v661_v48, %v660_v57 }
 0x41a   :  { %v2200_v63 = vadd.f32 %v2199_v58, %v2185_v33  ;;  %v663_v32 = vrot.slane %v662_v20, 1 }
 0x41c   :  { %v2201_v11 = vadd.f32 %v2200_v63, %v2186_v45  ;;  %v664_v33 = vadd.f32 %v663_v32, %v662_v20 }
 0x41e   :  { %v2202_v54 = vrot.slane %v2201_v11, 4  ;;  %vm2223_vm6 = vcmp.gt.f32.partialorder %v664_v33, 0.0 }
 0x420   :  { %v2203_v5 = vadd.f32 %v2202_v54, %v2201_v11 }
 0x422   :  { %v2204_v34 = vrot.slane %v2203_v5, 2 }
 0x424   :  { %v2205_v62 = vadd.f32 %v2204_v34, %v2203_v5 }
 0x426   :  { %v2206_v42 = vrot.slane %v2205_v62, 1 }
 0x428   :  { %v2207_v7 = vadd.f32 %v2206_v42, %v2205_v62 }
 0x42a   :  { %v2208_v43 = vmax.f32 %v5549_v28, %v2207_v7 }
 0x42c   :  { %v2209_v53 = vsub.f32 %v5549_v28, %v2208_v43  ;;  %v2213_v38 = vsub.f32 %v2207_v7, %v2208_v43  ;;  %v2220_v28 = vmax.f32 %v664_v33, 1.0 }
 0x42e   :  { %v2210_v2 = vmul.f32 1.442695, %v2209_v53  ;;  %v2214_v14 = vmul.f32 1.442695, %v2213_v38 }
 0x430   :  { %2540 = vpow2.f32 %v2210_v2 }
 0x431   :  { %2542 = vpow2.f32 %v2214_v14 }
 0x43a   :  { %v2541_v40 = vpop.eup %2540 }
 0x43b   :  { %v2212_v45 = vmul.f32 %v2541_v40, %v5578_v21  ;;  %v2543_v47 = vpop.eup %2542 }
 0x43d   :  { %v2216_v12 = vadd.f32 %v2543_v47, %v2212_v45 }
 0x43f   :  { %2544 = vlog2.f32 %v2216_v12 }
 0x440   :  { %2546 = vrcp.f32 %v2220_v28 }
 0x449   :  { %v2545_v37 = vpop.eup %2544 }
 0x44a   :  { %v2218_v29 = vmul.f32 0.6931472, %v2545_v37  ;;  %v2547_v23 = vpop.eup %2546 }
 0x44b   :  { %v2222_v36 = vmul.f32 %v2547_v23, %v701_v61 }
 0x44c   :  { %v2219_v55 = vadd.f32 %v2218_v29, %v2208_v43 }
 0x44e   :  { %v2224_v19 = vsub.f32 %v2219_v55, %v2222_v36 }
 0x450   :  { %v2225_v21 = vsel %vm2223_vm6, %v2224_v19, 0.0 }
 0x451   :  { %2226 = vst [vmem:[#allocation2] sm:$0x1] %v2225_v21 }
 0x452   :  { %2559 = shalt.err (!%p2556_p4)
}
 0x453   :  { %s2560_s26 = scalar_lea.hbm %s5684_s6, 16 }
 0x454   :  { %p2561_p5 = scmp.ne.s32.totalorder %s5684_s6, %s2560_s26  ;;  %p2564_p6 = scmp.lt.u32.totalorder %s2560_s26, %s5684_s6 }
 0x456   :  { %p2566_p7 = pnand %p2564_p6, %p2561_p5 }
 0x458   :  { %2569 = shalt.err (!%p2566_p7)
}
 0x459   :  { %2236 = dma.vmem_to_hbm [thread:$0]  %s2234_s22, 16, %s5684_s6, [#allocation3]  }
 0x45a   :  { %2570 = dma.done.wait [#allocation3], 16  }
 0x45b   :  { %2571 = vsyncadd [#allocation3], 4294967280 }
 0x45c   :  { %2240 = vsyncpa [#allocation3], 1 }

// kernel: tpu_custom_call.1
= control target key start
LH: loop header
LB: loop body
LE: loop exit
PB: predicated region body
PF: predicated region fallthrough
CT: control target
= control target key end

     0   :  { %vm56_vm0 = vcmask 261120   ;;  %s5678_s0 = inlined_call_operand.vmem [shape: f32[128,32], index: 0, kind: input, shape index: {}]   ;;  %s5679_s1 = inlined_call_operand.vmem [shape: f32[128,32], index: 1, kind: input, shape index: {}]   ;;  %s5680_s2 = inlined_call_operand.vmem [shape: s32[128,1], index: 2, kind: input, shape index: {}]   ;;  %s5681_s3 = inlined_call_operand.vmem [shape: s32[128,1], index: 3, kind: input, shape index: {}]   ;;  %s5682_s4 = inlined_call_operand.vmem [shape: s32[1,128], index: 4, kind: input, shape index: {}]   ;;  %s5683_s5 = inlined_call_operand.vmem [shape: s32[1,128], index: 5, kind: input, shape index: {}]   ;;  %s5684_s6 = inlined_call_operand.hbm [shape: f32[1,128], index: 6, kind: output, shape index: {}]  }
   0x1   :  { %v2613_v0 = vld [vmem:[%s5678_s0] sm:$0xff]  ;;  %v2618_v1 = vld [vmem:[%s5678_s0 + $0x10] sm:$0xff]  ;;  %v2623_v2 = vld [vmem:[%s5678_s0 + $0x8] sm:$0xff] }
   0x2   :  { %v40_v3 = vmul.f32 %v2613_v0, %v2613_v0  ;;  %v42_v4 = vmul.f32 %v2618_v1, %v2618_v1  ;;  %v41_v5 = vmul.f32 %v2623_v2, %v2623_v2  ;;  %v2634_v6 = vld [vmem:[%s5678_s0 + $0x18] sm:$0xff]  ;;  %v2641_v8 = vld [vmem:[%s5678_s0 + $0x28] sm:$0xff]  ;;  %v2646_v9 = vld [vmem:[%s5678_s0 + $0x20] sm:$0xff] }
   0x3   :  { %v43_v7 = vmul.f32 %v2634_v6, %v2634_v6  ;;  %v45_v14 = vmul.f32 %v2641_v8, %v2641_v8  ;;  %v44_v15 = vmul.f32 %v2646_v9, %v2646_v9 }
   0x4   :  { %v57_v10 = vsel %vm56_vm0, %v40_v3, 0.0  ;;  %v63_v11 = vsel %vm56_vm0, %v42_v4, 0.0  ;;  %v60_v12 = vsel %vm56_vm0, %v41_v5, 0.0 }
   0x5   :  { %58 = vadd.xlane.f32.xlu0 %v57_v10  ;;  %64 = vadd.xlane.f32.xlu1 %v63_v11  ;;  %v66_v13 = vsel %vm56_vm0, %v43_v7, 0.0 }
   0x6   :  { %11 = vsyncpa [#allocation3], 0  ;;  %v2659_v16 = vld [vmem:[%s5678_s0 + $0x38] sm:$0xff]  ;;  %v2664_v17 = vld [vmem:[%s5678_s0 + $0x30] sm:$0xff]  ;;  %v72_v18 = vsel %vm56_vm0, %v45_v14, 0.0  ;;  %v69_v19 = vsel %vm56_vm0, %v44_v15, 0.0 }
   0x7   :  { %v47_v20 = vmul.f32 %v2659_v16, %v2659_v16  ;;  %v46_v21 = vmul.f32 %v2664_v17, %v2664_v17  ;;  %v2675_v22 = vld [vmem:[%s5678_s0 + $0x48] sm:$0xff]  ;;  %v2680_v23 = vld [vmem:[%s5678_s0 + $0x40] sm:$0xff]  ;;  %v2691_v28 = vld [vmem:[%s5678_s0 + $0x58] sm:$0xff]  ;;  %v2572_v49 = vmov 0  }
   0x8   :  { %v49_v26 = vmul.f32 %v2675_v22, %v2675_v22  ;;  %v48_v27 = vmul.f32 %v2680_v23, %v2680_v23  ;;  %v2696_v29 = vld [vmem:[%s5678_s0 + $0x50] sm:$0xff]  ;;  %v51_v32 = vmul.f32 %v2691_v28, %v2691_v28  ;;  %v2707_v34 = vld [vmem:[%s5678_s0 + $0x68] sm:$0xff]  ;;  %v2712_v35 = vld [vmem:[%s5678_s0 + $0x60] sm:$0xff]  ;;  %2447 = vset.pattern.permute.xlu1 %v2572_v49  ;;  %2446 = vset.pattern.permute.xlu0 %v2572_v49 }
   0x9   :  { %61 = vadd.xlane.f32.xlu0 %v60_v12  ;;  %67 = vadd.xlane.f32.xlu1 %v66_v13  ;;  %v78_v24 = vsel %vm56_vm0, %v47_v20, 0.0  ;;  %v75_v25 = vsel %vm56_vm0, %v46_v21, 0.0  ;;  %v50_v33 = vmul.f32 %v2696_v29, %v2696_v29  ;;  %v53_v38 = vmul.f32 %v2707_v34, %v2707_v34  ;;  %v2723_v40 = vld [vmem:[%s5678_s0 + $0x78] sm:$0xff]  ;;  %v2728_v41 = vld [vmem:[%s5678_s0 + $0x70] sm:$0xff]  ;;  %v429_v48 = vld [vmem:[%s5680_s2 + $0x8] sm:$0xff] }
   0xa   :  { %v84_v30 = vsel %vm56_vm0, %v49_v26, 0.0  ;;  %v81_v31 = vsel %vm56_vm0, %v48_v27, 0.0  ;;  %v90_v36 = vsel %vm56_vm0, %v51_v32, 0.0  ;;  %v52_v39 = vmul.f32 %v2712_v35, %v2712_v35  ;;  %v430_v50 = vld [vmem:[%s5680_s2 + $0x10] sm:$0xff]  ;;  %v431_v51 = vld [vmem:[%s5680_s2 + $0x18] sm:$0xff]  ;;  %v432_v52 = vld [vmem:[%s5680_s2 + $0x20] sm:$0xff] }
   0xb   :  { %v87_v37 = vsel %vm56_vm0, %v50_v33, 0.0  ;;  %v96_v42 = vsel %vm56_vm0, %v53_v38, 0.0  ;;  %v55_v44 = vmul.f32 %v2723_v40, %v2723_v40  ;;  %v54_v45 = vmul.f32 %v2728_v41, %v2728_v41  ;;  %v169_v53 = vld [vmem:[%s5679_s1] sm:$0xff]  ;;  %v433_v55 = vld [vmem:[%s5680_s2 + $0x28] sm:$0xff]  ;;  %v434_v56 = vld [vmem:[%s5680_s2 + $0x30] sm:$0xff] }
   0xc   :  { %v93_v43 = vsel %vm56_vm0, %v52_v39, 0.0  ;;  %v177_v54 = vld [vmem:[%s5679_s1 + $0x40] sm:$0xff]  ;;  %2355 = vmatprep.mubr.msk.f32.mxu0 %vm56_vm0, %v169_v53  ;;  %v435_v57 = vld [vmem:[%s5680_s2 + $0x38] sm:$0xff]  ;;  %v437_v60 = vld [vmem:[%s5680_s2 + $0x48] sm:$0xff] }
   0xd   :  { %73 = vadd.xlane.f32.xlu1 %v72_v18  ;;  %70 = vadd.xlane.f32.xlu0 %v69_v19  ;;  %v102_v46 = vsel %vm56_vm0, %v55_v44, 0.0  ;;  %v99_v47 = vsel %vm56_vm0, %v54_v45, 0.0  ;;  %v428_v58 = vld [vmem:[%s5680_s2] sm:$0xff]  ;;  %v438_v61 = vld [vmem:[%s5680_s2 + $0x50] sm:$0xff]  ;;  %v439_v62 = vld [vmem:[%s5680_s2 + $0x58] sm:$0xff] }
   0xe   :  { %2367 = vmatprep.mubr.msk.f32.mxu1 %vm56_vm0, %v177_v54  ;;  %v436_v59 = vld [vmem:[%s5680_s2 + $0x40] sm:$0xff]  ;;  %v441_v3 = vld [vmem:[%s5680_s2 + $0x68] sm:$0xff]  ;;  %v442_v4 = vld [vmem:[%s5680_s2 + $0x70] sm:$0xff] }
   0xf   :  { %v440_v63 = vld [vmem:[%s5680_s2 + $0x60] sm:$0xff]  ;;  %v443_v5 = vld [vmem:[%s5680_s2 + $0x78] sm:$0xff]  ;;  %v445_v10 = vld [vmem:[%s5681_s3 + $0x8] sm:$0xff] }
  0x10   :  { %v444_v7 = vld [vmem:[%s5681_s3] sm:$0xff]  ;;  %v446_v11 = vld [vmem:[%s5681_s3 + $0x10] sm:$0xff]  ;;  %v447_v12 = vld [vmem:[%s5681_s3 + $0x18] sm:$0xff] }
  0x11   :  { %79 = vadd.xlane.f32.xlu1 %v78_v24  ;;  %76 = vadd.xlane.f32.xlu0 %v75_v25  ;;  %v448_v13 = vld [vmem:[%s5681_s3 + $0x20] sm:$0xff]  ;;  %v449_v14 = vld [vmem:[%s5681_s3 + $0x28] sm:$0xff]  ;;  %v450_v15 = vld [vmem:[%s5681_s3 + $0x30] sm:$0xff] }
  0x12   :  { %v451_v18 = vld [vmem:[%s5681_s3 + $0x38] sm:$0xff]  ;;  %v452_v19 = vld [vmem:[%s5681_s3 + $0x40] sm:$0xff]  ;;  %v453_v26 = vld [vmem:[%s5681_s3 + $0x48] sm:$0xff] }
  0x13   :  { %v454_v27 = vld [vmem:[%s5681_s3 + $0x50] sm:$0xff]  ;;  %v457_v44 = vld [vmem:[%s5681_s3 + $0x68] sm:$0xff]  ;;  %vm2848_vm1 = vmpackc.low %vm56_vm0, %vm56_vm0 }
  0x14   :  { %v458_v45 = vld [vmem:[%s5681_s3 + $0x70] sm:$0xff] }
  0x15   :  { %85 = vadd.xlane.f32.xlu1 %v84_v30  ;;  %82 = vadd.xlane.f32.xlu0 %v81_v31 }
  0x19   :  { %91 = vadd.xlane.f32.xlu1 %v90_v36  ;;  %88 = vadd.xlane.f32.xlu0 %v87_v37  ;;  %v455_v36 = vld [vmem:[%s5681_s3 + $0x58] sm:$0xff]  ;;  %v456_v37 = vld [vmem:[%s5681_s3 + $0x60] sm:$0xff] }
  0x1d   :  { %97 = vadd.xlane.f32.xlu1 %v96_v42  ;;  %94 = vadd.xlane.f32.xlu0 %v93_v43 }
  0x21   :  { %103 = vadd.xlane.f32.xlu1 %v102_v46  ;;  %100 = vadd.xlane.f32.xlu0 %v99_v47 }
  0x32   :  { %464 = vperm.xlu1 %2447, %v429_v48  }
  0x36   :  { %467 = vperm.xlu1 %2447, %v430_v50  }
  0x37   :  { %461 = vperm.xlu0 %2446, %v428_v58  }
  0x3a   :  { %470 = vperm.xlu1 %2447, %v431_v51  }
  0x3b   :  { %488 = vperm.xlu0 %2446, %v437_v60  }
  0x3e   :  { %473 = vperm.xlu1 %2447, %v432_v52   ;;  %v459_v52 = vld [vmem:[%s5681_s3 + $0x78] sm:$0xff] }
  0x3f   :  { %494 = vperm.xlu0 %2446, %v439_v62  }
  0x42   :  { %476 = vperm.xlu1 %2447, %v433_v55  }
  0x43   :  { %500 = vperm.xlu0 %2446, %v441_v3  }
  0x46   :  { %479 = vperm.xlu1 %2447, %v434_v56  }
  0x47   :  { %506 = vperm.xlu0 %2446, %v443_v5  }
  0x4a   :  { %482 = vperm.xlu1 %2447, %v435_v57  }
  0x4b   :  { %532 = vperm.xlu0 %2446, %v445_v10  }
  0x4e   :  { %485 = vperm.xlu1 %2447, %v436_v59  }
  0x4f   :  { %538 = vperm.xlu0 %2446, %v447_v12  }
  0x52   :  { %491 = vperm.xlu1 %2447, %v438_v61  }
  0x53   :  { %544 = vperm.xlu0 %2446, %v449_v14  }
  0x56   :  { %497 = vperm.xlu1 %2447, %v440_v63  }
  0x57   :  { %550 = vperm.xlu0 %2446, %v451_v18  }
  0x5a   :  { %503 = vperm.xlu1 %2447, %v442_v4  }
  0x5b   :  { %556 = vperm.xlu0 %2446, %v453_v26  }
  0x5e   :  { %529 = vperm.xlu1 %2447, %v444_v7   ;;  %v171_v7 = vld [vmem:[%s5679_s1 + $0x10] sm:$0xff] }
  0x5f   :  { %562 = vperm.xlu0 %2446, %v455_v36  }
  0x62   :  { %535 = vperm.xlu1 %2447, %v446_v11  }
  0x63   :  { %568 = vperm.xlu0 %2446, %v457_v44  }
  0x66   :  { %541 = vperm.xlu1 %2447, %v448_v13  }
  0x67   :  { %574 = vperm.xlu0 %2446, %v459_v52  }
  0x6a   :  { %547 = vperm.xlu1 %2447, %v450_v15  }
  0x6e   :  { %553 = vperm.xlu1 %2447, %v452_v19  }
  0x72   :  { %559 = vperm.xlu1 %2447, %v454_v27  }
  0x76   :  { %565 = vperm.xlu1 %2447, %v456_v37  }
  0x7a   :  { %571 = vperm.xlu1 %2447, %v458_v45  }
  0x92   :  { %v59_v20 = vpop.xlane.xlu0 %58  ;;  %v65_v21 = vpop.xlane.xlu1 %64 }
  0x93   :  { %v105_v24 = vmax.f32 %v59_v20, 1e-24  ;;  %v107_v25 = vmax.f32 %v65_v21, 1e-24 }
  0x95   :  { %2448 = vrsqrt.f32 %v105_v24 }
  0x96   :  { %2450 = vrsqrt.f32 %v107_v25  ;;  %v62_v30 = vpop.xlane.xlu0 %61  ;;  %v68_v31 = vpop.xlane.xlu1 %67 }
  0x97   :  { %v106_v32 = vmax.f32 %v62_v30, 1e-24  ;;  %v108_v33 = vmax.f32 %v68_v31, 1e-24 }
  0x99   :  { %2452 = vrsqrt.f32 %v106_v32 }
  0x9a   :  { %2454 = vrsqrt.f32 %v108_v33  ;;  %v74_v38 = vpop.xlane.xlu1 %73  ;;  %v71_v39 = vpop.xlane.xlu0 %70 }
  0x9b   :  { %v110_v42 = vmax.f32 %v74_v38, 1e-24  ;;  %v109_v43 = vmax.f32 %v71_v39, 1e-24 }
  0x9d   :  { %2456 = vrsqrt.f32 %v110_v42 }
  0x9e   :  { %2458 = vrsqrt.f32 %v109_v43  ;;  %v80_v46 = vpop.xlane.xlu1 %79  ;;  %v77_v47 = vpop.xlane.xlu0 %76 }
  0x9f   :  { %v2449_v48 = vpop.eup %2448  ;;  %v112_v49 = vmax.f32 %v80_v46, 1e-24  ;;  %v111_v50 = vmax.f32 %v77_v47, 1e-24 }
  0xa0   :  { %v2451_v51 = vpop.eup %2450  ;;  %v137_v54 = vmul.f32 14.285714, %v2449_v48 }
  0xa1   :  { %v139_v53 = vmul.f32 14.285714, %v2451_v51  ;;  %2460 = vrsqrt.f32 %v112_v49 }
  0xa2   :  { %2462 = vrsqrt.f32 %v111_v50  ;;  %v86_v56 = vpop.xlane.xlu1 %85  ;;  %v83_v59 = vpop.xlane.xlu0 %82  ;;  %v153_v62 = vmul.f32 %v137_v54, %v2613_v0 }
  0xa3   :  { %v2453_v55 = vpop.eup %2452  ;;  %v155_v60 = vmul.f32 %v139_v53, %v2618_v1  ;;  %v114_v3 = vmax.f32 %v86_v56, 1e-24  ;;  %v113_v10 = vmax.f32 %v83_v59, 1e-24 }
  0xa4   :  { %v2455_v57 = vpop.eup %2454  ;;  %v138_v58 = vmul.f32 14.285714, %v2453_v55 }
  0xa5   :  { %v140_v61 = vmul.f32 14.285714, %v2455_v57  ;;  %2464 = vrsqrt.f32 %v114_v3 }
  0xa6   :  { %v154_v63 = vmul.f32 %v138_v58, %v2623_v2  ;;  %2466 = vrsqrt.f32 %v113_v10  ;;  %v92_v0 = vpop.xlane.xlu1 %91  ;;  %v89_v18 = vpop.xlane.xlu0 %88 }
  0xa7   :  { %v2457_v4 = vpop.eup %2456  ;;  %v156_v5 = vmul.f32 %v140_v61, %v2634_v6  ;;  %v116_v20 = vmax.f32 %v92_v0, 1e-24  ;;  %v115_v21 = vmax.f32 %v89_v18, 1e-24  ;;  %v2909_v61 = vld [vmem:[%s5682_s4] ss:$0 sm:$0xff] }
  0xa8   :  { %v2459_v11 = vpop.eup %2458  ;;  %v142_v12 = vmul.f32 14.285714, %v2457_v4  ;;  %v2379_v13 = vpack.c.bf16 %v154_v63, %v153_v62  ;;  %v170_v4 = vld [vmem:[%s5679_s1 + $0x8] sm:$0xff]  ;;  %v181_v0 = vld [vmem:[%s5679_s1 + $0x60] sm:$0xff]  ;;  %v175_v18 = vld [vmem:[%s5679_s1 + $0x30] sm:$0xff] }
  0xa9   :  { %v141_v1 = vmul.f32 14.285714, %v2459_v11  ;;  %v2385_v14 = vpack.c.bf16 %v156_v5, %v155_v60  ;;  %2468 = vrsqrt.f32 %v116_v20  ;;  %v178_v5 = vld [vmem:[%s5679_s1 + $0x48] sm:$0xff]  ;;  %v179_v11 = vld [vmem:[%s5679_s1 + $0x50] sm:$0xff] }
  0xaa   :  { %2381 = vmatprep.subr.msk.bf16.mxu0 %vm2848_vm1, %v2379_v13  ;;  %2427 = vmatprep.subr.msk.bf16.mxu1 %vm2848_vm1, %v2379_v13  ;;  %v158_v6 = vmul.f32 %v142_v12, %v2641_v8  ;;  %2470 = vrsqrt.f32 %v115_v21  ;;  %v98_v8 = vpop.xlane.xlu1 %97  ;;  %v95_v31 = vpop.xlane.xlu0 %94  ;;  %v172_v12 = vld [vmem:[%s5679_s1 + $0x18] sm:$0xff] }
  0xab   :  { %2384 = vmatpush3.bf16.xpose.msk.msra.mxu0 %vm2848_vm1, %v2379_v13  ;;  %2435 = vmatpush3.bf16.xpose.msk.msra.mxu1 %vm2848_vm1, %v2379_v13  ;;  %v2461_v2 = vpop.eup %2460  ;;  %v157_v15 = vmul.f32 %v141_v1, %v2646_v9  ;;  %v118_v33 = vmax.f32 %v98_v8, 1e-24  ;;  %v117_v36 = vmax.f32 %v95_v31, 1e-24  ;;  %v180_v13 = vld [vmem:[%s5679_s1 + $0x58] sm:$0xff] }
  0xac   :  { %2387 = vmatprep.subr.msk.bf16.mxu0 %vm2848_vm1, %v2385_v14  ;;  %2428 = vmatprep.subr.msk.bf16.mxu1 %vm2848_vm1, %v2385_v14  ;;  %v2463_v19 = vpop.eup %2462  ;;  %v144_v24 = vmul.f32 14.285714, %v2461_v2  ;;  %v174_v2 = vld [vmem:[%s5679_s1 + $0x28] sm:$0xff]  ;;  %v176_v21 = vld [vmem:[%s5679_s1 + $0x38] sm:$0xff] }
  0xad   :  { %v143_v25 = vmul.f32 14.285714, %v2463_v19  ;;  %v2391_v26 = vpack.c.bf16 %v158_v6, %v157_v15  ;;  %2472 = vrsqrt.f32 %v118_v33  ;;  %v182_v6 = vld [vmem:[%s5679_s1 + $0x68] sm:$0xff]  ;;  %v183_v19 = vld [vmem:[%s5679_s1 + $0x70] sm:$0xff] }
  0xae   :  { %v160_v27 = vmul.f32 %v144_v24, %v2659_v16  ;;  %2474 = vrsqrt.f32 %v117_v36  ;;  %v104_v16 = vpop.xlane.xlu1 %103  ;;  %v101_v44 = vpop.xlane.xlu0 %100  ;;  %v184_v24 = vld [vmem:[%s5679_s1 + $0x78] sm:$0xff] }
  0xaf   :  { %v2465_v9 = vpop.eup %2464  ;;  %v159_v30 = vmul.f32 %v143_v25, %v2664_v17  ;;  %v120_v46 = vmax.f32 %v104_v16, 1e-24  ;;  %v119_v47 = vmax.f32 %v101_v44, 1e-24 }
  0xb0   :  { %v2467_v32 = vpop.eup %2466  ;;  %v146_v37 = vmul.f32 14.285714, %v2465_v9 }
  0xb1   :  { %v145_v38 = vmul.f32 14.285714, %v2467_v32  ;;  %v2397_v39 = vpack.c.bf16 %v160_v27, %v159_v30  ;;  %2476 = vrsqrt.f32 %v120_v46 }
  0xb2   :  { %v162_v42 = vmul.f32 %v146_v37, %v2675_v22  ;;  %2478 = vrsqrt.f32 %v119_v47  ;;  %v2921_v62 = vpop.permute.xlu1 %464  ;;  %v3064_v47 = vld [vmem:[%s5683_s5] ss:$0 sm:$0xff]  ;;  %s2574_s5 = smov [#allocation2]  }
  0xb3   :  { %2390 = vmatpush3.bf16.xpose.msk.msra.mxu0 %vm2848_vm1, %v2385_v14  ;;  %2436 = vmatpush3.bf16.xpose.msk.msra.mxu1 %vm2848_vm1, %v2385_v14  ;;  %v2469_v17 = vpop.eup %2468  ;;  %v161_v43 = vmul.f32 %v145_v38, %v2680_v23  ;;  %vm513_vm2 = vcmp.eq.s32.totalorder %v2921_v62, %v2909_v61  ;;  %v173_v14 = vld [vmem:[%s5679_s1 + $0x20] sm:$0xff]  ;;  %s2233_s22 = sshll.u32 %s2574_s5, 4  ;;  %s2234_s22 = int_to_ptr.vmem [resolvable:$true] %s2233_s22 }
  0xb4   :  { %2393 = vmatprep.subr.msk.bf16.mxu0 %vm2848_vm1, %v2391_v26  ;;  %2429 = vmatprep.subr.msk.bf16.mxu1 %vm2848_vm1, %v2391_v26  ;;  %v2471_v45 = vpop.eup %2470  ;;  %v148_v48 = vmul.f32 14.285714, %v2469_v17  ;;  %s2548_s2 = scalar_lea.vmem %s2234_s22, 16  ;;  %s2552_s23 = scalar_lea.vmem %s2234_s22, 32 }
  0xb5   :  { %v147_v49 = vmul.f32 14.285714, %v2471_v45  ;;  %v2403_v50 = vpack.c.bf16 %v162_v42, %v161_v43  ;;  %p2549_p0 = scmp.ne.s32.totalorder %s2234_s22, %s2548_s2  ;;  %p2553_p1 = scmp.lt.s32.totalorder %s2234_s22, %s2234_s22 }
  0xb6   :  { %v164_v23 = vmul.f32 %v148_v48, %v2691_v28  ;;  %v3007_v20 = vpop.permute.xlu0 %461  ;;  %p2554_p2 = scmp.lt.s32.totalorder %s2552_s23, %s2548_s2 }
  0xb7   :  { %v2473_v22 = vpop.eup %2472  ;;  %v163_v51 = vmul.f32 %v147_v49, %v2696_v29  ;;  %vm512_vm9 = vcmp.eq.s32.totalorder %v3007_v20, %v2909_v61 }
  0xb8   :  { %v2475_v52 = vpop.eup %2474  ;;  %v150_v53 = vmul.f32 14.285714, %v2473_v22  ;;  %p2555_p3 = por %p2554_p2, %p2553_p1 }
  0xb9   :  { %v149_v54 = vmul.f32 14.285714, %v2475_v52  ;;  %v2409_v55 = vpack.c.bf16 %v164_v23, %v163_v51  ;;  %v5875_v51 = vmov 0 }
  0xba   :  { %v166_v28 = vmul.f32 %v150_v53, %v2707_v34  ;;  %v5878_v53 = vmov 0  ;;  %p2556_p4 = pnand %p2555_p3, %p2549_p0 }
  0xbb   :  { %2396 = vmatpush3.bf16.xpose.msk.msra.mxu0 %vm2848_vm1, %v2391_v26  ;;  %2437 = vmatpush3.bf16.xpose.msk.msra.mxu1 %vm2848_vm1, %v2391_v26  ;;  %v2477_v56 = vpop.eup %2476  ;;  %v165_v29 = vmul.f32 %v149_v54, %v2712_v35  ;;  %v3025_v26 = vpop.permute.xlu0 %488 }
  0xbc   :  { %2399 = vmatprep.subr.msk.bf16.mxu0 %vm2848_vm1, %v2397_v39  ;;  %2430 = vmatprep.subr.msk.bf16.mxu1 %vm2848_vm1, %v2397_v39  ;;  %v2479_v57 = vpop.eup %2478  ;;  %v152_v58 = vmul.f32 14.285714, %v2477_v56  ;;  %vm521_vm11 = vcmp.eq.s32.totalorder %v3025_v26, %v2909_v61 }
  0xbd   :  { %v151_v59 = vmul.f32 14.285714, %v2479_v57  ;;  %v2415_v60 = vpack.c.bf16 %v166_v28, %v165_v29  ;;  %v5883_v29 = vmov 0 }
  0xbe   :  { %v168_v34 = vmul.f32 %v152_v58, %v2723_v40  ;;  %v2929_v40 = vpop.permute.xlu1 %467  ;;  %v5886_v58 = vmov 0 }
  0xbf   :  { %v167_v35 = vmul.f32 %v151_v59, %v2728_v41  ;;  %vm514_vm3 = vcmp.eq.s32.totalorder %v2929_v40, %v2909_v61  ;;  %v3033_v9 = vpop.permute.xlu0 %494 }
  0xc1   :  { %v2421_v63 = vpack.c.bf16 %v168_v34, %v167_v35 }
  0xc2   :  { %v2937_v41 = vpop.permute.xlu1 %470 }
  0xc3   :  { %2402 = vmatpush3.bf16.xpose.msk.msra.mxu0 %vm2848_vm1, %v2397_v39  ;;  %2438 = vmatpush3.bf16.xpose.msk.msra.mxu1 %vm2848_vm1, %v2397_v39  ;;  %vm515_vm4 = vcmp.eq.s32.totalorder %v2937_v41, %v2909_v61  ;;  %v3041_v30 = vpop.permute.xlu0 %500 }
  0xc4   :  { %2405 = vmatprep.subr.msk.bf16.mxu0 %vm2848_vm1, %v2403_v50  ;;  %2431 = vmatprep.subr.msk.bf16.mxu1 %vm2848_vm1, %v2403_v50 }
  0xc6   :  { %v2945_v3 = vpop.permute.xlu1 %473 }
  0xc7   :  { %vm516_vm5 = vcmp.eq.s32.totalorder %v2945_v3, %v2909_v61  ;;  %v3049_v32 = vpop.permute.xlu0 %506 }
  0xca   :  { %v2955_v10 = vpop.permute.xlu1 %476 }
  0xcb   :  { %2408 = vmatpush3.bf16.xpose.msk.msra.mxu0 %vm2848_vm1, %v2403_v50  ;;  %2439 = vmatpush3.bf16.xpose.msk.msra.mxu1 %vm2848_vm1, %v2403_v50  ;;  %v533_v33 = vpop.permute.xlu0 %532  ;;  %v5870_v50 = vmov 0 }
  0xcc   :  { %2411 = vmatprep.subr.msk.bf16.mxu0 %vm2848_vm1, %v2409_v55  ;;  %2432 = vmatprep.subr.msk.bf16.mxu1 %vm2848_vm1, %v2409_v55 }
  0xce   :  { %v2975_v1 = vpop.permute.xlu1 %479 }
  0xcf   :  { %v539_v37 = vpop.permute.xlu0 %538 }
  0xd0   :  { %vm583_vm13 = vcmp.ne.s32.totalorder %v539_v37, %v3064_v47 }
  0xd2   :  { %v2995_v15 = vpop.permute.xlu1 %482 }
  0xd3   :  { %2414 = vmatpush3.bf16.xpose.msk.msra.mxu0 %vm2848_vm1, %v2409_v55  ;;  %2440 = vmatpush3.bf16.xpose.msk.msra.mxu1 %vm2848_vm1, %v2409_v55  ;;  %v3053_v39 = vpop.permute.xlu0 %544 }
  0xd4   :  { %2417 = vmatprep.subr.msk.bf16.mxu0 %vm2848_vm1, %v2415_v60  ;;  %2433 = vmatprep.subr.msk.bf16.mxu1 %vm2848_vm1, %v2415_v60 }
  0xd6   :  { %v3019_v25 = vpop.permute.xlu1 %485 }
  0xd7   :  { %vm520_vm10 = vcmp.eq.s32.totalorder %v3019_v25, %v2909_v61  ;;  %v3055_v17 = vpop.permute.xlu0 %550 }
  0xda   :  { %v3029_v8 = vpop.permute.xlu1 %491 }
  0xdb   :  { %2420 = vmatpush3.bf16.xpose.msk.msra.mxu0 %vm2848_vm1, %v2415_v60  ;;  %2441 = vmatpush3.bf16.xpose.msk.msra.mxu1 %vm2848_vm1, %v2415_v60  ;;  %v557_v43 = vpop.permute.xlu0 %556 }
  0xdc   :  { %2423 = vmatprep.subr.msk.bf16.mxu0 %vm2848_vm1, %v2421_v63  ;;  %2434 = vmatprep.subr.msk.bf16.mxu1 %vm2848_vm1, %v2421_v63  ;;  %vm589_vm7 = vcmp.ne.s32.totalorder %v557_v43, %v3064_v47 }
  0xde   :  { %v3037_v27 = vpop.permute.xlu1 %497 }
  0xdf   :  { %v563_v45 = vpop.permute.xlu0 %562 }
  0xe2   :  { %v3045_v31 = vpop.permute.xlu1 %503 }
  0xe3   :  { %2426 = vmatpush3.bf16.xpose.msk.msra.mxu0 %vm2848_vm1, %v2421_v63  ;;  %2442 = vmatpush3.bf16.xpose.msk.msra.mxu1 %vm2848_vm1, %v2421_v63  ;;  %v3066_v48 = vpop.permute.xlu0 %568  ;;  %vm581_vm1 = vcmp.ne.s32.totalorder %v533_v33, %v3064_v47  ;;  %v5891_v63 = vmov 0 }
  0xe4   :  { %vm593_vm8 = vcmp.ne.s32.totalorder %v3066_v48, %v3064_v47 }
  0xe6   :  { %v530_v36 = vpop.permute.xlu1 %529 }
  0xe7   :  { %v3108_v52 = vpop.permute.xlu0 %574 }
  0xea   :  { %2356 = vmatmul.mubr.msk.f32.vlgmr.msra.gmra.mrb[0].mxu0 %vm56_vm0, %v170_v4  ;;  %2368 = vmatmul.mubr.msk.f32.vlgmr.msra.gmra.mrb[0].mxu1 %vm56_vm0, %v178_v5  ;;  %v536_v38 = vpop.permute.xlu1 %535 }
  0xeb   :  { %2358 = vmatprep.mubr.msk.f32.mxu0 %vm56_vm0, %v171_v7  ;;  %2370 = vmatprep.mubr.msk.f32.mxu1 %vm56_vm0, %v179_v11  ;;  %vm582_vm14 = vcmp.ne.s32.totalorder %v536_v38, %v3064_v47 }
  0xec   :  { %vm3117_vm12 = vmand %vm514_vm3, %vm582_vm14  ;;  %vm5929_vm3 = vcmp.ne.s32.totalorder %v3033_v9, %v2909_v61 }
  0xed   :  { %v5879_v53 = vsel %vm3117_vm12, 4294967295, %v5878_v53  ;;  %vm3138_vm14 = vmand %vm515_vm4, %vm583_vm13 }
  0xee   :  { %2359 = vmatmul.mubr.msk.f32.gmra.mrb[2].mxu0 %vm56_vm0, %v172_v12  ;;  %2371 = vmatmul.mubr.msk.f32.gmra.mrb[2].mxu1 %vm56_vm0, %v180_v13  ;;  %v542_v16 = vpop.permute.xlu1 %541  ;;  %5880 = vst [vmem:[#allocation9_spill] sm:$0xff] %v5879_v53  ;;  %v5884_v29 = vsel %vm3138_vm14, 4294967295, %v5883_v29  ;;  %vm3156_vm4 = vmand %vm521_vm11, %vm589_vm7  ;;  %v5896_v13 = vmov 0  ;;  %vm5899_vm11 = vcmp.ne.s32.totalorder %v2921_v62, %v2909_v61 }
  0xef   :  { %2361 = vmatprep.mubr.msk.f32.mxu0 %vm56_vm0, %v173_v14  ;;  %2373 = vmatprep.mubr.msk.f32.mxu1 %vm56_vm0, %v181_v0  ;;  %5885 = vst [vmem:[#allocation12_spill] sm:$0xff] %v5884_v29  ;;  %v5887_v58 = vsel %vm3156_vm4, 4294967295, %v5886_v58 }
  0xf0   :  { %5888 = vst [vmem:[#allocation13_spill] sm:$0xff] %v5887_v58 }
  0xf2   :  { %2362 = vmatmul.mubr.msk.f32.gmra.mrb[4].mxu0 %vm56_vm0, %v174_v2  ;;  %2374 = vmatmul.mubr.msk.f32.gmra.mrb[4].mxu1 %vm56_vm0, %v182_v6  ;;  %v3057_v42 = vpop.permute.xlu1 %547 }
  0xf3   :  { %2364 = vmatprep.mubr.msk.f32.mxu0 %vm56_vm0, %v175_v18  ;;  %2376 = vmatprep.mubr.msk.f32.mxu1 %vm56_vm0, %v183_v19  ;;  %v5904_v19 = vmov 0 }
  0xf6   :  { %2365 = vmatmul.mubr.msk.f32.gmra.mrb[6].mxu0 %vm56_vm0, %v176_v21  ;;  %2377 = vmatmul.mubr.msk.f32.gmra.mrb[6].mxu1 %vm56_vm0, %v184_v24  ;;  %v554_v44 = vpop.permute.xlu1 %553  ;;  %vm580_vm0 = vcmp.ne.s32.totalorder %v530_v36, %v3064_v47 }
  0xf7   :  { %vm3084_vm6 = vmand %vm512_vm9, %vm580_vm0  ;;  %vm584_vm0 = vcmp.ne.s32.totalorder %v542_v16, %v3064_v47 }
  0xf8   :  { %v5871_v50 = vsel %vm3084_vm6, 4294967295, %v5870_v50  ;;  %vm3102_vm9 = vmand %vm513_vm2, %vm581_vm1  ;;  %vm588_vm1 = vcmp.ne.s32.totalorder %v554_v44, %v3064_v47  ;;  %vm591_vm2 = vcmp.ne.s32.totalorder %v563_v45, %v3064_v47 }
  0xf9   :  { %5872 = vst [vmem:[#allocation5_spill] sm:$0xff] %v5871_v50  ;;  %v5876_v51 = vsel %vm3102_vm9, 4294967295, %v5875_v51  ;;  %vm3177_vm7 = vmand %vm516_vm5, %vm584_vm0  ;;  %vm5901_vm5 = vcmp.ne.s32.totalorder %v3025_v26, %v2909_v61 }
  0xfa   :  { %v3059_v46 = vpop.permute.xlu1 %559  ;;  %5877 = vst [vmem:[#allocation8_spill] sm:$0xff] %v5876_v51  ;;  %v5892_v63 = vsel %vm3177_vm7, 4294967295, %v5891_v63  ;;  %vm3201_vm0 = vmand %vm520_vm10, %vm588_vm1  ;;  %vm5903_vm10 = vcmp.eq.s32.totalorder %v3033_v9, %v2909_v61 }
  0xfb   :  { %5893 = vst [vmem:[#allocation16_spill] sm:$0xff] %v5892_v63  ;;  %v5897_v13 = vsel %vm3201_vm0, 4294967295, %v5896_v13  ;;  %vm3226_vm1 = vmand %vm5903_vm10, %vm591_vm2  ;;  %vm5910_vm10 = vcmp.eq.s32.totalorder %v2955_v10, %v2909_v61  ;;  %vm5916_vm2 = vcmp.ne.s32.totalorder %v2937_v41, %v2909_v61  ;;  %v5922_v41 = vmov 0 }
  0xfc   :  { %5898 = vst [vmem:[#allocation19_spill] sm:$0xff] %v5897_v13  ;;  %v5905_v19 = vsel %vm3226_vm1, 4294967295, %v5904_v19 }
  0xfd   :  { %5906 = vst [vmem:[#allocation22_spill] sm:$0xff] %v5905_v19 }
  0xfe   :  { %v3073_v49 = vpop.permute.xlu1 %565 }
 0x102   :  { %v3205_v14 = vpop.permute.xlu1 %571 }
 0x1bd   :  { %v3089_v22 = vpop.f32.mrb[0].mxu0  ;;  %v3091_v23 = vpop.f32.mrb[0].mxu1 }
 0x1be   :  { %5873 = vst [vmem:[#allocation6_spill] sm:$0xff] %v3089_v22  ;;  %5874 = vst [vmem:[#allocation7_spill] sm:$0xff] %v3091_v23  ;;  %v2276_v54 = vadd.f32 -9999999.0, %v3089_v22  ;;  %v2284_v55 = vadd.f32 -9999999.0, %v3091_v23 }
 0x1bf   :  { %v3127_v56 = vpop.f32.mrb[1].mxu0  ;;  %v3129_v28 = vpop.f32.mrb[1].mxu1  ;;  %v703_v59 = vsel %vm3102_vm9, %v3089_v22, -inf  ;;  %v711_v4 = vsel %vm3156_vm4, %v3091_v23, -inf  ;;  %v674_v13 = vsel %vm3156_vm4, %v3091_v23, 0.0 }
 0x1c0   :  { %5881 = vst [vmem:[#allocation10_spill] sm:$0xff] %v3127_v56  ;;  %5882 = vst [vmem:[#allocation11_spill] sm:$0xff] %v3129_v28  ;;  %v2275_v57 = vadd.f32 -9999999.0, %v3127_v56  ;;  %v2283_v60 = vadd.f32 -9999999.0, %v3129_v28  ;;  %v3211_v0 = vsel %vm5899_vm11, %v3089_v22, %v2276_v54  ;;  %v3217_v2 = vsel %vm5901_vm5, %v3091_v23, %v2284_v55 }
 0x1c1   :  { %v3168_v34 = vpop.f32.mrb[2].mxu0  ;;  %v3170_v35 = vpop.f32.mrb[2].mxu1  ;;  %5900 = vst [vmem:[#allocation20_spill] sm:$0xff] %v3211_v0  ;;  %5902 = vst [vmem:[#allocation21_spill] sm:$0xff] %v3217_v2  ;;  %v702_v62 = vsel %vm3084_vm6, %v3127_v56, -inf  ;;  %vm5907_vm11 = vcmp.ne.s32.totalorder %v3007_v20, %v2909_v61  ;;  %v710_v24 = vsel %vm3201_vm0, %v3129_v28, -inf  ;;  %vm5909_vm5 = vcmp.ne.s32.totalorder %v3053_v39, %v3064_v47 }
 0x1c2   :  { %5889 = vst [vmem:[#allocation14_spill] sm:$0xff] %v3168_v34  ;;  %5890 = vst [vmem:[#allocation15_spill] sm:$0xff] %v3170_v35  ;;  %v2278_v5 = vadd.f32 -9999999.0, %v3168_v34  ;;  %v3187_v7 = vpop.f32.mrb[3].mxu0  ;;  %v3189_v11 = vpop.f32.mrb[3].mxu1  ;;  %v3237_v21 = vsel %vm5907_vm11, %v3127_v56, %v2275_v57  ;;  %vm5914_vm11 = vcmp.ne.s32.totalorder %v3019_v25, %v2909_v61 }
 0x1c3   :  { %5894 = vst [vmem:[#allocation17_spill] sm:$0xff] %v3187_v7  ;;  %5895 = vst [vmem:[#allocation18_spill] sm:$0xff] %v3189_v11  ;;  %v2286_v6 = vadd.f32 -9999999.0, %v3170_v35  ;;  %v2277_v18 = vadd.f32 -9999999.0, %v3187_v7  ;;  %v3261_v33 = vsel %vm5914_vm11, %v3129_v28, %v2283_v60 }
 0x1c4   :  { %5908 = vst [vmem:[#allocation23_spill] sm:$0xff] %v3237_v21  ;;  %v705_v26 = vsel %vm3138_vm14, %v3168_v34, -inf  ;;  %vm3253_vm15 = vmand %vm5910_vm10, %vm5909_vm5  ;;  %v5911_v20 = vmov 0  ;;  %v3267_v36 = vsel %vm5916_vm2, %v3168_v34, %v2278_v5  ;;  %v713_v37 = vsel %vm3226_vm1, %v3170_v35, -inf }
 0x1c5   :  { %v5912_v20 = vsel %vm3253_vm15, 4294967295, %v5911_v20  ;;  %5915 = vst [vmem:[#allocation25_spill] sm:$0xff] %v3261_v33  ;;  %5917 = vst [vmem:[#allocation26_spill] sm:$0xff] %v3267_v36  ;;  %v3273_v38 = vadd.f32 -9999999.0, %v3189_v11  ;;  %v3275_v39 = vpop.f32.mrb[4].mxu0  ;;  %vm5920_vm5 = vcmp.ne.s32.totalorder %v3059_v46, %v3064_v47  ;;  %vm5921_vm10 = vcmp.eq.s32.totalorder %v3029_v8, %v2909_v61 }
 0x1c6   :  { %5913 = vst [vmem:[#allocation24_spill] sm:$0xff] %v5912_v20  ;;  %5918 = vst [vmem:[#allocation27_spill] sm:$0xff] %v3275_v39  ;;  %v3277_v16 = vpop.f32.mrb[4].mxu1  ;;  %v707_v25 = vsel %vm3253_vm15, %v3275_v39, -inf  ;;  %v2280_v43 = vadd.f32 -9999999.0, %v3275_v39  ;;  %vm5925_vm2 = vcmp.eq.s32.totalorder %v3041_v30, %v2909_v61  ;;  %v3317_v54 = vsel %vm5929_vm3, %v3170_v35, %v2286_v6 }
 0x1c7   :  { %5919 = vst [vmem:[#allocation28_spill] sm:$0xff] %v3277_v16  ;;  %vm3285_vm11 = vmand %vm5921_vm10, %vm5920_vm5  ;;  %v2288_v44 = vadd.f32 -9999999.0, %v3277_v16  ;;  %v704_v45 = vsel %vm3117_vm12, %v3187_v7, -inf  ;;  %v5926_v46 = vmov 0  ;;  %v719_v55 = vmax.f32 %v703_v59, %v707_v25  ;;  %v3319_v57 = vpop.f32.mrb[5].mxu0 }
 0x1c8   :  { %v5923_v41 = vsel %vm3285_vm11, 4294967295, %v5922_v41  ;;  %vm3309_vm13 = vmand %vm5925_vm2, %vm593_vm8  ;;  %5930 = vst [vmem:[#allocation31_spill] sm:$0xff] %v3317_v54  ;;  %v3321_v60 = vpop.f32.mrb[5].mxu1  ;;  %vm5933_vm10 = vcmp.ne.s32.totalorder %v2929_v40, %v2909_v61  ;;  %v712_v5 = vsel %vm3285_vm11, %v3189_v11, -inf  ;;  %vm5935_vm8 = vcmp.ne.s32.totalorder %v2955_v10, %v2909_v61  ;;  %v6055_v51 = vld [vmem:[#allocation20_spill] sm:$0xff] }
 0x1c9   :  { %5924 = vst [vmem:[#allocation29_spill] sm:$0xff] %v5923_v41  ;;  %v5927_v46 = vsel %vm3309_vm13, 4294967295, %v5926_v46  ;;  %5931 = vst [vmem:[#allocation32_spill] sm:$0xff] %v3319_v57  ;;  %v3327_v48 = vsel %vm5933_vm10, %v3187_v7, %v2277_v18  ;;  %v3336_v9 = vsel %vm5935_vm8, %v3275_v39, %v2280_v43  ;;  %v715_v59 = vsel %vm3309_vm13, %v3277_v16, -inf }
 0x1ca   :  { %5928 = vst [vmem:[#allocation30_spill] sm:$0xff] %v5927_v46  ;;  %5932 = vst [vmem:[#allocation33_spill] sm:$0xff] %v3321_v60  ;;  %v706_v40 = vsel %vm3177_vm7, %v3319_v57, -inf  ;;  %v2279_v6 = vadd.f32 -9999999.0, %v3319_v57  ;;  %vm5937_vm2 = vcmp.ne.s32.totalorder %v3055_v17, %v3064_v47  ;;  %vm5938_vm10 = vcmp.eq.s32.totalorder %v2995_v15, %v2909_v61  ;;  %v3365_v46 = vpop.f32.mrb[6].mxu0 }
 0x1cb   :  { %5934 = vst [vmem:[#allocation34_spill] sm:$0xff] %v3327_v48  ;;  %5936 = vst [vmem:[#allocation35_spill] sm:$0xff] %v3336_v9  ;;  %v5939_v10 = vmov 0  ;;  %v874_v18 = vmax.f32 %v3211_v0, %v3336_v9  ;;  %v723_v25 = vmax.f32 %v719_v55, %v711_v4  ;;  %vm5942_vm5 = vcmp.ne.s32.totalorder %v3041_v30, %v2909_v61  ;;  %v3367_v17 = vpop.f32.mrb[6].mxu1 }
 0x1cc   :  { %vm3353_vm8 = vmand %vm5938_vm10, %vm5937_vm2  ;;  %v3363_v43 = vsel %vm5942_vm5, %v3277_v16, %v2288_v44  ;;  %v718_v12 = vmax.f32 %v702_v62, %v706_v40  ;;  %5944 = vst [vmem:[#allocation38_spill] sm:$0xff] %v3365_v46  ;;  %vm5946_vm2 = vcmp.ne.s32.totalorder %v2945_v3, %v2909_v61  ;;  %v2287_v35 = vadd.f32 -9999999.0, %v3321_v60  ;;  %v3380_v44 = vpop.f32.mrb[7].mxu0  ;;  %v3395_v16 = vpop.f32.mrb[7].mxu1 }
 0x1cd   :  { %v5940_v10 = vsel %vm3353_vm8, 4294967295, %v5939_v10  ;;  %5943 = vst [vmem:[#allocation37_spill] sm:$0xff] %v3363_v43  ;;  %5945 = vst [vmem:[#allocation39_spill] sm:$0xff] %v3367_v17  ;;  %v3373_v19 = vsel %vm5946_vm2, %v3319_v57, %v2279_v6  ;;  %v709_v4 = vsel %vm3353_vm8, %v3365_v46, -inf  ;;  %v2282_v30 = vadd.f32 -9999999.0, %v3365_v46 }
 0x1ce   :  { %5941 = vst [vmem:[#allocation36_spill] sm:$0xff] %v5940_v10  ;;  %5947 = vst [vmem:[#allocation40_spill] sm:$0xff] %v3373_v19  ;;  %vm5949_vm5 = vcmp.ne.s32.totalorder %v3073_v49, %v3064_v47  ;;  %vm5950_vm10 = vcmp.eq.s32.totalorder %v3037_v27, %v2909_v61  ;;  %v5951_v3 = vmov 0  ;;  %v727_v62 = vmax.f32 %v723_v25, %v715_v59 }
 0x1cf   :  { %5948 = vst [vmem:[#allocation41_spill] sm:$0xff] %v3380_v44  ;;  %vm3388_vm3 = vmand %vm5950_vm10, %vm5949_vm5  ;;  %v878_v55 = vmax.f32 %v874_v18, %v3217_v2  ;;  %v873_v40 = vmax.f32 %v3237_v21, %v3373_v19  ;;  %v722_v6 = vmax.f32 %v718_v12, %v710_v24  ;;  %vm5955_vm2 = vcmp.ne.s32.totalorder %v3057_v42, %v3064_v47 }
 0x1d0   :  { %v5952_v3 = vsel %vm3388_vm3, 4294967295, %v5951_v3  ;;  %5954 = vst [vmem:[#allocation43_spill] sm:$0xff] %v3395_v16  ;;  %vm5956_vm13 = vcmp.eq.s32.totalorder %v2975_v1, %v2909_v61  ;;  %v5957_v49 = vmov 0  ;;  %v714_v59 = vsel %vm3388_vm3, %v3321_v60, -inf }
 0x1d1   :  { %5953 = vst [vmem:[#allocation42_spill] sm:$0xff] %v5952_v3  ;;  %vm3403_vm1 = vmand %vm5956_vm13, %vm5955_vm2  ;;  %v721_v18 = vmax.f32 %v705_v26, %v709_v4  ;;  %vm5960_vm5 = vcmp.ne.s32.totalorder %v2995_v15, %v2909_v61  ;;  %v2290_v42 = vadd.f32 -9999999.0, %v3367_v17  ;;  %vm5962_vm10 = vcmp.ne.s32.totalorder %v3108_v52, %v3064_v47 }
 0x1d2   :  { %v5958_v49 = vsel %vm3403_vm1, 4294967295, %v5957_v49  ;;  %v3414_v12 = vsel %vm5960_vm5, %v3365_v46, %v2282_v30  ;;  %vm5963_vm13 = vcmp.eq.s32.totalorder %v3049_v32, %v2909_v61  ;;  %v5964_v24 = vmov 0 }
 0x1d3   :  { %5959 = vst [vmem:[#allocation44_spill] sm:$0xff] %v5958_v49  ;;  %5961 = vst [vmem:[#allocation45_spill] sm:$0xff] %v3414_v12  ;;  %v882_v26 = vmax.f32 %v878_v55, %v3363_v43  ;;  %v726_v25 = vmax.f32 %v722_v6, %v714_v59  ;;  %v877_v4 = vmax.f32 %v873_v40, %v3261_v33  ;;  %v708_v30 = vsel %vm3403_vm1, %v3380_v44, -inf }
 0x1d4   :  { %vm3423_vm2 = vmand %vm5963_vm13, %vm5962_vm10  ;;  %v876_v15 = vmax.f32 %v3267_v36, %v3414_v12  ;;  %vm5967_vm5 = vcmp.ne.s32.totalorder %v3037_v27, %v2909_v61  ;;  %v2281_v3 = vadd.f32 -9999999.0, %v3380_v44  ;;  %v720_v6 = vmax.f32 %v704_v45, %v708_v30  ;;  %v6003_v49 = vld [vmem:[#allocation37_spill] sm:$0xff] }
 0x1d5   :  { %v5965_v24 = vsel %vm3423_vm2, 4294967295, %v5964_v24  ;;  %v3435_v52 = vsel %vm5967_vm5, %v3321_v60, %v2287_v35  ;;  %v717_v55 = vsel %vm3423_vm2, %v3367_v17, -inf  ;;  %v725_v59 = vmax.f32 %v721_v18, %v713_v37 }
 0x1d6   :  { %5966 = vst [vmem:[#allocation46_spill] sm:$0xff] %v5965_v24  ;;  %5968 = vst [vmem:[#allocation47_spill] sm:$0xff] %v3435_v52  ;;  %v881_v40 = vmax.f32 %v877_v4, %v3435_v52  ;;  %v730_v43 = vmax.f32 %v726_v25, %v727_v62  ;;  %vm5969_vm10 = vcmp.ne.s32.totalorder %v2975_v1, %v2909_v61  ;;  %v2289_v35 = vadd.f32 -9999999.0, %v3395_v16 }
 0x1d7   :  { %v3449_v27 = vsel %vm5969_vm10, %v3380_v44, %v2281_v3  ;;  %vm5971_vm13 = vcmp.ne.s32.totalorder %v3049_v32, %v2909_v61  ;;  %v880_v24 = vmax.f32 %v876_v15, %v3317_v54  ;;  %vm5972_vm5 = vcmp.ne.s32.totalorder %v3205_v14, %v3064_v47 }
 0x1d8   :  { %5970 = vst [vmem:[#allocation48_spill] sm:$0xff] %v3449_v27  ;;  %v3456_v60 = vsel %vm5971_vm13, %v3367_v17, %v2290_v42  ;;  %vm5973_vm2 = vcmp.eq.s32.totalorder %v3045_v31, %v2909_v61  ;;  %v5974_v1 = vmov 0  ;;  %v885_v37 = vmax.f32 %v881_v40, %v882_v26  ;;  %v6001_v58 = vld [vmem:[#allocation42_spill] sm:$0xff] }
 0x1d9   :  { %vm3465_vm3 = vmand %vm5973_vm2, %vm5972_vm5  ;;  %v875_v45 = vmax.f32 %v3327_v48, %v3449_v27  ;;  %v724_v3 = vmax.f32 %v720_v6, %v712_v5  ;;  %v729_v32 = vmax.f32 %v725_v59, %v717_v55  ;;  %vm5977_vm10 = vcmp.ne.s32.totalorder %v3029_v8, %v2909_v61 }
 0x1da   :  { %v5975_v1 = vsel %vm3465_vm3, 4294967295, %v5974_v1  ;;  %v716_v62 = vsel %vm3465_vm3, %v3395_v16, -inf  ;;  %v3479_v47 = vsel %vm5977_vm10, %v3189_v11, %v3273_v38  ;;  %v884_v14 = vmax.f32 %v880_v24, %v3456_v60 }
 0x1db   :  { %5976 = vst [vmem:[#allocation49_spill] sm:$0xff] %v5975_v1  ;;  %5978 = vst [vmem:[#allocation50_spill] sm:$0xff] %v3479_v47  ;;  %v665_v18 = vsel %vm3084_vm6, %v3127_v56, 0.0  ;;  %vm626_vm2 = vcmp.ne.s32.totalorder %v3045_v31, %v2909_v61  ;;  %v728_v5 = vmax.f32 %v724_v3, %v716_v62  ;;  %v879_v42 = vmax.f32 %v875_v45, %v3479_v47 }
 0x1dc   :  { %v3489_v26 = vsel %vm626_vm2, %v3395_v16, %v2289_v35  ;;  %v667_v8 = vsel %vm3117_vm12, %v3187_v7, 0.0  ;;  %v5980_v25 = vsel %vm3102_vm9, %v3089_v22, 0.0  ;;  %v856_v15 = vlaneseq }
 0x1dd   :  { %5979 = vst [vmem:[#allocation51_spill] sm:$0xff] %v3489_v26  ;;  %v731_v38 = vmax.f32 %v728_v5, %v729_v32  ;;  %v883_v24 = vmax.f32 %v879_v42, %v3489_v26  ;;  %v681_v4 = vadd.f32 %v5980_v25, %v665_v18  ;;  %v668_v55 = vsel %vm3138_vm14, %v3168_v34, 0.0 }
 0x1de   :  { %v669_v40 = vsel %vm3177_vm7, %v3319_v57, 0.0  ;;  %v3505_v45 = vshrl.u32 %v856_v15, 7 }
 0x1df   :  { %v732_v61 = vmax.f32 %v730_v43, %v731_v38  ;;  %v886_v31 = vmax.f32 %v883_v24, %v884_v14  ;;  %v682_v30 = vadd.f32 %v681_v4, %v667_v8  ;;  %v670_v43 = vsel %vm3253_vm15, %v3275_v39, 0.0 }
 0x1e0   :  { %5981 = vst [vmem:[#allocation52_spill] sm:$0xff] %v3505_v45  ;;  %v671_v14 = vsel %vm3403_vm1, %v3380_v44, 0.0  ;;  %v3514_v8 = vadd.s32 8, %v3505_v45  ;;  %v3520_v38 = vadd.s32 24, %v3505_v45  ;;  %v3523_v25 = vadd.s32 32, %v3505_v45 }
 0x1e1   :  { %v733_v6 = vrot.slane %v732_v61, 4  ;;  %v887_v59 = vmax.f32 %v885_v37, %v886_v31  ;;  %v683_v35 = vadd.f32 %v682_v30, %v668_v55  ;;  %v3517_v37 = vadd.s32 16, %v3505_v45 }
 0x1e2   :  { %5982 = vst [vmem:[#allocation53_spill] sm:$0xff] %v3514_v8  ;;  %5984 = vst [vmem:[#allocation55_spill] sm:$0xff] %v3520_v38  ;;  %v3529_v31 = vadd.s32 48, %v3505_v45  ;;  %v3532_v30 = vadd.s32 56, %v3505_v45  ;;  %v672_v55 = vsel %vm3353_vm8, %v3365_v46, 0.0 }
 0x1e3   :  { %v734_v3 = vmax.f32 %v732_v61, %v733_v6  ;;  %v888_v32 = vrot.slane %v887_v59, 4  ;;  %v684_v62 = vadd.f32 %v683_v35, %v669_v40  ;;  %5983 = vst [vmem:[#allocation54_spill] sm:$0xff] %v3517_v37  ;;  %5985 = vst [vmem:[#allocation56_spill] sm:$0xff] %v3523_v25  ;;  %v3526_v61 = vadd.s32 40, %v3505_v45 }
 0x1e4   :  { %5987 = vst [vmem:[#allocation58_spill] sm:$0xff] %v3529_v31  ;;  %5988 = vst [vmem:[#allocation59_spill] sm:$0xff] %v3532_v30  ;;  %v3538_v6 = vadd.s32 64, %v3505_v45 }
 0x1e5   :  { %v735_v18 = vrot.slane %v734_v3, 2  ;;  %v889_v5 = vmax.f32 %v887_v59, %v888_v32  ;;  %v685_v42 = vadd.f32 %v684_v62, %v670_v43  ;;  %5986 = vst [vmem:[#allocation57_spill] sm:$0xff] %v3526_v61  ;;  %v3544_v32 = vadd.s32 80, %v3505_v45 }
 0x1e6   :  { %5989 = vst [vmem:[#allocation60_spill] sm:$0xff] %v3538_v6  ;;  %v3547_v62 = vadd.s32 88, %v3505_v45  ;;  %v673_v43 = vsel %vm3201_vm0, %v3129_v28, 0.0  ;;  %vm6002_vm0 = vnez %v6001_v58 }
 0x1e7   :  { %v736_v24 = vmax.f32 %v734_v3, %v735_v18  ;;  %v890_v4 = vrot.slane %v889_v5, 2  ;;  %v686_v15 = vadd.f32 %v685_v42, %v671_v14  ;;  %v3541_v3 = vadd.s32 72, %v3505_v45  ;;  %5991 = vst [vmem:[#allocation62_spill] sm:$0xff] %v3544_v32 }
 0x1e8   :  { %5992 = vst [vmem:[#allocation63_spill] sm:$0xff] %v3547_v62  ;;  %v3555_v18 = vadd.s32 96, %v3505_v45 }
 0x1e9   :  { %v737_v40 = vrot.slane %v736_v24, 1  ;;  %v891_v59 = vmax.f32 %v889_v5, %v890_v4  ;;  %v687_v35 = vadd.f32 %v686_v15, %v672_v55  ;;  %5990 = vst [vmem:[#allocation61_spill] sm:$0xff] %v3541_v3  ;;  %v3558_v4 = vadd.s32 104, %v3505_v45 }
 0x1ea   :  { %5993 = vst [vmem:[#allocation64_spill] sm:$0xff] %v3555_v18  ;;  %v3561_v15 = vadd.s32 112, %v3505_v45  ;;  %v3564_v55 = vadd.s32 120, %v3505_v45 }
 0x1eb   :  { %v3552_v14 = vmax.f32 %v736_v24, %v737_v40  ;;  %v892_v5 = vrot.slane %v891_v59, 1  ;;  %v688_v42 = vadd.f32 %v687_v35, %v673_v43  ;;  %5994 = vst [vmem:[#allocation65_spill] sm:$0xff] %v3558_v4  ;;  %v6000_v24 = vld [vmem:[#allocation33_spill] sm:$0xff] }
 0x1ec   :  { %5995 = vst [vmem:[#allocation66_spill] sm:$0xff] %v3561_v15  ;;  %5996 = vst [vmem:[#allocation67_spill] sm:$0xff] %v3564_v55  ;;  %v677_v20 = vsel %vm6002_vm0, %v6000_v24, 0.0 }
 0x1ed   :  { %v893_v40 = vmax.f32 %v891_v59, %v892_v5  ;;  %v3571_v10 = vadd.f32 %v688_v42, %v674_v13  ;;  %v675_v13 = vsel %vm3285_vm11, %v3189_v11, 0.0  ;;  %v5997_v59 = vld [vmem:[#allocation15_spill] sm:$0xff]  ;;  %v5998_v5 = vld [vmem:[#allocation22_spill] sm:$0xff] }
 0x1ee   :  { %vm5999_vm8 = vnez %v5998_v5 }
 0x1ef   :  { %v676_v42 = vsel %vm5999_vm8, %v5997_v59, 0.0  ;;  %vm903_vm1 = vcmp.eq.f32.partialorder %v3217_v2, %v893_v40  ;;  %vm907_vm8 = vcmp.eq.f32.partialorder %v6003_v49, %v893_v40  ;;  %vm6004_vm10 = vcmp.eq.f32.partialorder %v3237_v21, %v893_v40 }
 0x1f0   :  { %v910_v43 = vsel %vm6004_vm10, %v3505_v45, 128  ;;  %vm6005_vm11 = vcmp.eq.f32.partialorder %v3211_v0, %v893_v40  ;;  %vm6006_vm4 = vcmp.eq.f32.partialorder %v3327_v48, %v893_v40  ;;  %vm6007_vm2 = vcmp.eq.f32.partialorder %v3267_v36, %v893_v40 }
 0x1f1   :  { %v911_v35 = vsel %vm6005_vm11, %v3514_v8, 128  ;;  %v912_v5 = vsel %vm6006_vm4, %v3517_v37, 128  ;;  %v913_v58 = vsel %vm6007_vm2, %v3520_v38, 128  ;;  %vm6008_vm13 = vcmp.eq.f32.partialorder %v3373_v19, %v893_v40 }
 0x1f2   :  { %v914_v41 = vsel %vm6008_vm13, %v3523_v25, 128  ;;  %vm6009_vm5 = vcmp.eq.f32.partialorder %v3336_v9, %v893_v40  ;;  %vm6010_vm10 = vcmp.eq.f32.partialorder %v3449_v27, %v893_v40  ;;  %vm6011_vm11 = vcmp.eq.f32.partialorder %v3414_v12, %v893_v40 }
 0x1f3   :  { %v915_v21 = vsel %vm6009_vm5, %v3526_v61, 128  ;;  %v916_v0 = vsel %vm6010_vm10, %v3529_v31, 128  ;;  %v917_v48 = vsel %vm6011_vm11, %v3532_v30, 128  ;;  %vm6012_vm4 = vcmp.eq.f32.partialorder %v3261_v33, %v893_v40 }
 0x1f4   :  { %v918_v36 = vsel %vm6012_vm4, %v3538_v6, 128  ;;  %v919_v19 = vsel %vm903_vm1, %v3541_v3, 128  ;;  %vm6013_vm13 = vcmp.eq.f32.partialorder %v3479_v47, %v893_v40  ;;  %vm6014_vm5 = vcmp.eq.f32.partialorder %v3317_v54, %v893_v40 }
 0x1f5   :  { %v920_v9 = vsel %vm6013_vm13, %v3544_v32, 128  ;;  %v921_v27 = vsel %vm6014_vm5, %v3547_v62, 128  ;;  %vm6015_vm2 = vcmp.eq.f32.partialorder %v3435_v52, %v893_v40  ;;  %v923_v33 = vsel %vm907_vm8, %v3558_v4, 128 }
 0x1f6   :  { %v922_v12 = vsel %vm6015_vm2, %v3555_v18, 128  ;;  %vm6016_vm10 = vcmp.eq.f32.partialorder %v3489_v26, %v893_v40  ;;  %vm6017_vm1 = vcmp.eq.f32.partialorder %v3456_v60, %v893_v40  ;;  %vm926_vm11 = vcmp.lt.s32.totalorder %v910_v43, %v914_v41 }
 0x1f7   :  { %v924_v2 = vsel %vm6016_vm10, %v3561_v15, 128  ;;  %v925_v47 = vsel %vm6017_vm1, %v3564_v55, 128  ;;  %v927_v32 = vsel %vm926_vm11, %v910_v43, %v914_v41  ;;  %vm928_vm4 = vcmp.lt.s32.totalorder %v911_v35, %v915_v21 }
 0x1f8   :  { %vm930_vm13 = vcmp.lt.s32.totalorder %v912_v5, %v916_v0  ;;  %vm932_vm5 = vcmp.lt.s32.totalorder %v913_v58, %v917_v48  ;;  %v929_v54 = vsel %vm928_vm4, %v911_v35, %v915_v21  ;;  %vm934_vm2 = vcmp.lt.s32.totalorder %v927_v32, %v918_v36 }
 0x1f9   :  { %v931_v52 = vsel %vm930_vm13, %v912_v5, %v916_v0  ;;  %v933_v18 = vsel %vm932_vm5, %v913_v58, %v917_v48  ;;  %v935_v62 = vsel %vm934_vm2, %v927_v32, %v918_v36  ;;  %vm936_vm0 = vcmp.lt.s32.totalorder %v929_v54, %v919_v19 }
 0x1fa   :  { %vm938_vm8 = vcmp.lt.s32.totalorder %v931_v52, %v920_v9  ;;  %vm940_vm15 = vcmp.lt.s32.totalorder %v933_v18, %v921_v27  ;;  %v937_v49 = vsel %vm936_vm0, %v929_v54, %v919_v19  ;;  %vm942_vm10 = vcmp.lt.s32.totalorder %v935_v62, %v922_v12 }
 0x1fb   :  { %v939_v26 = vsel %vm938_vm8, %v931_v52, %v920_v9  ;;  %v941_v15 = vsel %vm940_vm15, %v933_v18, %v921_v27  ;;  %v943_v4 = vsel %vm942_vm10, %v935_v62, %v922_v12  ;;  %vm944_vm7 = vcmp.lt.s32.totalorder %v937_v49, %v923_v33  ;;  %v6031_v62 = vld [vmem:[#allocation24_spill] sm:$0xff] }
 0x1fc   :  { %vm946_vm1 = vcmp.lt.s32.totalorder %v939_v26, %v924_v2  ;;  %vm948_vm14 = vcmp.lt.s32.totalorder %v941_v15, %v925_v47  ;;  %v945_v41 = vsel %vm944_vm7, %v937_v49, %v923_v33  ;;  %v690_v21 = vadd.f32 %v3571_v10, %v675_v13 }
 0x1fd   :  { %v947_v40 = vsel %vm946_vm1, %v939_v26, %v924_v2  ;;  %v949_v43 = vsel %vm948_vm14, %v941_v15, %v925_v47  ;;  %vm950_vm11 = vcmp.lt.s32.totalorder %v943_v4, %v945_v41  ;;  %v744_v58 = vsub.f32 %v3275_v39, %v3552_v14  ;;  %v6018_v47 = vld [vmem:[#allocation28_spill] sm:$0xff]  ;;  %v6019_v26 = vld [vmem:[#allocation30_spill] sm:$0xff] }
 0x1fe   :  { %vm952_vm4 = vcmp.lt.s32.totalorder %v947_v40, %v949_v43  ;;  %v745_v0 = vsub.f32 %v3380_v44, %v3552_v14  ;;  %v951_v19 = vsel %vm950_vm11, %v943_v4, %v945_v41  ;;  %v691_v54 = vadd.f32 %v690_v21, %v676_v42 }
 0x1ff   :  { %v953_v36 = vsel %vm952_vm4, %v947_v40, %v949_v43  ;;  %vm6020_vm14 = vnez %v6019_v26  ;;  %v6021_v15 = vsub.f32 %v3127_v56, %v3552_v14  ;;  %v6022_v42 = vsub.f32 %v3089_v22, %v3552_v14  ;;  %v6138_v26 = vld [vmem:[#allocation64_spill] sm:$0xff] }
 0x200   :  { %vm954_vm15 = vcmp.lt.s32.totalorder %v951_v19, %v953_v36  ;;  %v692_v49 = vadd.f32 %v691_v54, %v677_v20  ;;  %v678_v32 = vsel %vm6020_vm14, %v6018_v47, 0.0  ;;  %v679_v20 = vsel %vm3465_vm3, %v3395_v16, 0.0 }
 0x201   :  { %v955_v10 = vsel %vm954_vm15, %v951_v19, %v953_v36  ;;  %v755_v35 = vsel %vm3084_vm6, %v6021_v15, -inf  ;;  %v756_v41 = vsel %vm3102_vm9, %v6022_v42, -inf  ;;  %v6023_v40 = vsub.f32 %v3187_v7, %v3552_v14  ;;  %v6024_v19 = vld [vmem:[#allocation46_spill] sm:$0xff] }
 0x202   :  { %v956_v27 = vrot.slane %v955_v10, 4  ;;  %v693_v4 = vadd.f32 %v692_v49, %v678_v32  ;;  %vm6025_vm0 = vnez %v6024_v19  ;;  %v6026_v54 = vsub.f32 %v3168_v34, %v3552_v14 }
 0x203   :  { %v757_v43 = vsel %vm3117_vm12, %v6023_v40, -inf  ;;  %v680_v36 = vsel %vm6025_vm0, %v3367_v17, 0.0  ;;  %vm6027_vm13 = vnez %v5884_v29  ;;  %v773_v32 = vmul.f32 1.442695, %v756_v41  ;;  %v6053_v29 = vld [vmem:[#allocation23_spill] sm:$0xff] }
 0x204   :  { %vm957_vm7 = vcmp.lt.s32.totalorder %v955_v10, %v956_v27  ;;  %v694_v5 = vadd.f32 %v693_v4, %v679_v20  ;;  %v775_v4 = vmul.f32 1.442695, %v757_v43  ;;  %v6029_v40 = vsub.f32 %v3319_v57, %v3552_v14 }
 0x205   :  { %v958_v13 = vsel %vm957_vm7, %v955_v10, %v956_v27  ;;  %v758_v10 = vsel %vm6027_vm13, %v6026_v54, -inf  ;;  %v771_v27 = vmul.f32 1.442695, %v755_v35  ;;  %vm6030_vm2 = vnez %v5892_v63 }
 0x206   :  { %v959_v21 = vrot.slane %v958_v13, 2  ;;  %v3706_v49 = vadd.f32 %v694_v5, %v680_v36  ;;  %v777_v15 = vmul.f32 1.442695, %v758_v10  ;;  %v759_v18 = vsel %vm6030_vm2, %v6029_v40, -inf  ;;  %v6033_v5 = vld [vmem:[#allocation44_spill] sm:$0xff] }
 0x207   :  { %vm6032_vm8 = vnez %v6031_v62  ;;  %2480 = vpow2.f32 %v771_v27  ;;  %vm6034_vm1 = vnez %v6033_v5  ;;  %v3721_v41 = vmul.f32 1.442695, %v759_v18  ;;  %v6038_v18 = vld [vmem:[#allocation65_spill] sm:$0xff] }
 0x208   :  { %6028 = vst [vmem:[#allocation68_spill] sm:$0xff] %v3706_v49  ;;  %vm960_vm5 = vcmp.lt.s32.totalorder %v958_v13, %v959_v21  ;;  %v760_v52 = vsel %vm6032_vm8, %v744_v58, -inf  ;;  %2482 = vpow2.f32 %v773_v32  ;;  %v3717_v35 = vsel %vm6034_vm1, %v745_v0, -inf  ;;  %v6035_v58 = vld [vmem:[#allocation62_spill] sm:$0xff]  ;;  %v6036_v0 = vld [vmem:[#allocation63_spill] sm:$0xff] }
 0x209   :  { %v961_v20 = vsel %vm960_vm5, %v958_v13, %v959_v21  ;;  %2484 = vpow2.f32 %v775_v4  ;;  %v3723_v43 = vmul.f32 1.442695, %v760_v52  ;;  %v6037_v52 = vld [vmem:[#allocation64_spill] sm:$0xff]  ;;  %v6039_v21 = vld [vmem:[#allocation66_spill] sm:$0xff] }
 0x20a   :  { %v962_v42 = vrot.slane %v961_v20, 1  ;;  %2486 = vpow2.f32 %v777_v15 }
 0x20b   :  { %2488 = vpow2.f32 %v3721_v41 }
 0x20c   :  { %vm963_vm10 = vcmp.lt.s32.totalorder %v961_v20, %v962_v42  ;;  %2490 = vpow2.f32 %v3723_v43  ;;  %v6103_v43 = vsub.f32 %v3395_v16, %v3552_v14 }
 0x20d   :  { %v3719_v13 = vsel %vm963_vm10, %v961_v20, %v962_v42 }
 0x20e   :  { %vm975_vm7 = vcmp.eq.s32.totalorder %v6035_v58, %v3719_v13  ;;  %vm977_vm10 = vcmp.eq.s32.totalorder %v6037_v52, %v3719_v13  ;;  %vm6040_vm15 = vcmp.eq.s32.totalorder %v3505_v45, %v3719_v13  ;;  %vm6041_vm5 = vcmp.eq.s32.totalorder %v3514_v8, %v3719_v13  ;;  %v6097_v52 = vld [vmem:[#allocation36_spill] sm:$0xff] }
 0x20f   :  { %v981_v36 = vsel %vm6040_vm15, %v3127_v56, 0.0  ;;  %v982_v54 = vsel %vm6041_vm5, %v3089_v22, 0.0  ;;  %vm6042_vm1 = vcmp.eq.s32.totalorder %v3517_v37, %v3719_v13  ;;  %vm6043_vm11 = vcmp.eq.s32.totalorder %v3520_v38, %v3719_v13  ;;  %v6069_v22 = vld [vmem:[#allocation48_spill] sm:$0xff]  ;;  %v6072_v56 = vld [vmem:[#allocation45_spill] sm:$0xff] }
 0x210   :  { %v983_v10 = vsel %vm6042_vm1, %v3187_v7, 0.0  ;;  %v984_v27 = vsel %vm6043_vm11, %v3168_v34, 0.0  ;;  %vm6044_vm4 = vcmp.eq.s32.totalorder %v3523_v25, %v3719_v13  ;;  %vm6045_vm15 = vcmp.eq.s32.totalorder %v3526_v61, %v3719_v13  ;;  %v6063_v34 = vld [vmem:[#allocation40_spill] sm:$0xff]  ;;  %v6066_v7 = vld [vmem:[#allocation35_spill] sm:$0xff] }
 0x211   :  { %v985_v32 = vsel %vm6044_vm4, %v3319_v57, 0.0  ;;  %v986_v4 = vsel %vm6045_vm15, %v3275_v39, 0.0  ;;  %vm6046_vm5 = vcmp.eq.s32.totalorder %v3529_v31, %v3719_v13  ;;  %vm6047_vm1 = vcmp.eq.s32.totalorder %v3532_v30, %v3719_v13  ;;  %v2481_v42 = vpop.eup %2480 }
 0x212   :  { %v987_v20 = vsel %vm6046_vm5, %v3380_v44, 0.0  ;;  %v988_v15 = vsel %vm6047_vm1, %v3365_v46, 0.0  ;;  %vm6048_vm11 = vcmp.eq.s32.totalorder %v3538_v6, %v3719_v13  ;;  %vm6049_vm4 = vcmp.eq.s32.totalorder %v3541_v3, %v3719_v13  ;;  %v2483_v2 = vpop.eup %2482  ;;  %v6057_v44 = vld [vmem:[#allocation34_spill] sm:$0xff] }
 0x213   :  { %v989_v40 = vsel %vm6048_vm11, %v3129_v28, 0.0  ;;  %v3797_v12 = vsel %vm6049_vm4, %v3091_v23, 0.0  ;;  %v3803_v9 = vsel %vm975_vm7, %v3189_v11, 0.0  ;;  %vm6050_vm15 = vcmp.eq.s32.totalorder %v6036_v0, %v3719_v13  ;;  %v2485_v63 = vpop.eup %2484 }
 0x214   :  { %v3809_v33 = vsel %vm6050_vm15, %v5997_v59, 0.0  ;;  %v3815_v48 = vsel %vm977_vm10, %v6000_v24, 0.0  ;;  %vm6051_vm5 = vcmp.eq.s32.totalorder %v6038_v18, %v3719_v13  ;;  %vm6052_vm1 = vcmp.eq.s32.totalorder %v6039_v21, %v3719_v13 }
 0x215   :  { %v3821_v49 = vsel %vm6051_vm5, %v6018_v47, 0.0  ;;  %v3827_v5 = vsel %vm6052_vm1, %v3395_v16, 0.0  ;;  %v997_v62 = vadd.f32 %v982_v54, %v981_v36  ;;  %vm6054_vm11 = vcmp.eq.s32.totalorder %v3505_v45, %v3719_v13  ;;  %v6060_v36 = vld [vmem:[#allocation26_spill] sm:$0xff] }
 0x216   :  { %v3833_v53 = vsel %vm6054_vm11, -inf, %v6053_v29  ;;  %vm6056_vm4 = vcmp.eq.s32.totalorder %v3514_v8, %v3719_v13  ;;  %vm6058_vm15 = vcmp.eq.s32.totalorder %v3517_v37, %v3719_v13  ;;  %vm6061_vm5 = vcmp.eq.s32.totalorder %v3520_v38, %v3719_v13  ;;  %v2487_v29 = vpop.eup %2486 }
 0x217   :  { %v3839_v50 = vsel %vm6056_vm4, -inf, %v6055_v51  ;;  %v3845_v39 = vsel %vm6058_vm15, -inf, %v6057_v44  ;;  %v3851_v54 = vsel %vm6061_vm5, -inf, %v6060_v36  ;;  %v998_v57 = vadd.f32 %v997_v62, %v983_v10 }
 0x218   :  { %6059 = vst [vmem:[#allocation23_spill] sm:$0xff] %v3845_v39  ;;  %6062 = vst [vmem:[#allocation20_spill] sm:$0xff] %v3851_v54  ;;  %vm6064_vm1 = vcmp.eq.s32.totalorder %v3523_v25, %v3719_v13  ;;  %vm6067_vm11 = vcmp.eq.s32.totalorder %v3526_v61, %v3719_v13  ;;  %vm6070_vm4 = vcmp.eq.s32.totalorder %v3529_v31, %v3719_v13 }
 0x219   :  { %v3857_v51 = vsel %vm6064_vm1, -inf, %v6063_v34  ;;  %v3863_v44 = vsel %vm6067_vm11, -inf, %v6066_v7  ;;  %v3869_v36 = vsel %vm6070_vm4, -inf, %v6069_v22  ;;  %vm6073_vm15 = vcmp.eq.s32.totalorder %v3532_v30, %v3719_v13  ;;  %v6075_v34 = vld [vmem:[#allocation25_spill] sm:$0xff]  ;;  %v6081_v22 = vld [vmem:[#allocation50_spill] sm:$0xff]  ;;  %v6083_v30 = vld [vmem:[#allocation31_spill] sm:$0xff] }
 0x21a   :  { %6065 = vst [vmem:[#allocation34_spill] sm:$0xff] %v3857_v51  ;;  %6068 = vst [vmem:[#allocation26_spill] sm:$0xff] %v3863_v44  ;;  %v3875_v62 = vsel %vm6073_vm15, -inf, %v6072_v56  ;;  %vm6076_vm5 = vcmp.eq.s32.totalorder %v3538_v6, %v3719_v13  ;;  %v6078_v7 = vld [vmem:[#allocation21_spill] sm:$0xff]  ;;  %vm6079_vm1 = vcmp.eq.s32.totalorder %v3541_v3, %v3719_v13  ;;  %v3893_v31 = vsel %vm975_vm7, -inf, %v6081_v22  ;;  %v6091_v22 = vld [vmem:[#allocation51_spill] sm:$0xff] }
 0x21b   :  { %6071 = vst [vmem:[#allocation40_spill] sm:$0xff] %v3869_v36  ;;  %6074 = vst [vmem:[#allocation35_spill] sm:$0xff] %v3875_v62  ;;  %v3881_v10 = vsel %vm6076_vm5, -inf, %v6075_v34  ;;  %v3887_v61 = vsel %vm6079_vm1, -inf, %v6078_v7  ;;  %v999_v56 = vadd.f32 %v998_v57, %v984_v27  ;;  %vm6084_vm11 = vcmp.eq.s32.totalorder %v6036_v0, %v3719_v13  ;;  %v6086_v34 = vld [vmem:[#allocation47_spill] sm:$0xff]  ;;  %v6088_v7 = vld [vmem:[#allocation37_spill] sm:$0xff] }
 0x21c   :  { %6077 = vst [vmem:[#allocation48_spill] sm:$0xff] %v3881_v10  ;;  %6080 = vst [vmem:[#allocation45_spill] sm:$0xff] %v3887_v61  ;;  %v3899_v6 = vsel %vm6084_vm11, -inf, %v6083_v30  ;;  %v3905_v3 = vsel %vm977_vm10, -inf, %v6086_v34  ;;  %vm6089_vm4 = vcmp.eq.s32.totalorder %v6038_v18, %v3719_v13  ;;  %vm6092_vm7 = vcmp.eq.s32.totalorder %v6039_v21, %v3719_v13 }
 0x21d   :  { %6082 = vst [vmem:[#allocation25_spill] sm:$0xff] %v3893_v31  ;;  %6085 = vst [vmem:[#allocation21_spill] sm:$0xff] %v3899_v6  ;;  %v3911_v58 = vsel %vm6089_vm4, -inf, %v6088_v7  ;;  %v3917_v57 = vsel %vm6092_vm7, -inf, %v6091_v22  ;;  %vm6094_vm15 = vcmp.eq.s32.totalorder %v3564_v55, %v3719_v13  ;;  %v1043_v27 = vmax.f32 %v3833_v53, %v3857_v51 }
 0x21e   :  { %6087 = vst [vmem:[#allocation50_spill] sm:$0xff] %v3905_v3  ;;  %6090 = vst [vmem:[#allocation31_spill] sm:$0xff] %v3911_v58  ;;  %v3923_v30 = vsel %vm6094_vm15, -inf, %v3456_v60  ;;  %v1044_v34 = vmax.f32 %v3839_v50, %v3863_v44  ;;  %v1000_v7 = vadd.f32 %v999_v56, %v985_v32  ;;  %v1045_v18 = vmax.f32 %v3845_v39, %v3869_v36 }
 0x21f   :  { %6093 = vst [vmem:[#allocation47_spill] sm:$0xff] %v3917_v57  ;;  %6095 = vst [vmem:[#allocation37_spill] sm:$0xff] %v3923_v30  ;;  %v1046_v22 = vmax.f32 %v3851_v54, %v3875_v62  ;;  %v6096_v21 = vsub.f32 %v3365_v46, %v3552_v14  ;;  %vm6098_vm10 = vnez %v6097_v52  ;;  %v1047_v0 = vmax.f32 %v1043_v27, %v3881_v10  ;;  %v6100_v46 = vld [vmem:[#allocation19_spill] sm:$0xff] }
 0x220   :  { %v1048_v25 = vmax.f32 %v1044_v34, %v3887_v61  ;;  %v783_v32 = vmul.f32 1.442695, %v3717_v35  ;;  %v1001_v56 = vadd.f32 %v1000_v7, %v986_v4  ;;  %v1049_v38 = vmax.f32 %v1045_v18, %v3893_v31  ;;  %vm6102_vm1 = vmmov %vm6094_vm15 }
 0x221   :  { %v762_v60 = vsel %vm6098_vm10, %v6096_v21, -inf  ;;  %v1050_v37 = vmax.f32 %v1046_v22, %v3899_v6  ;;  %v6099_v8 = vsub.f32 %v3129_v28, %v3552_v14  ;;  %vm6101_vm5 = vnez %v6100_v46 }
 0x222   :  { %v1051_v21 = vmax.f32 %v1047_v0, %v3905_v3  ;;  %v1052_v27 = vmax.f32 %v1048_v25, %v3911_v58  ;;  %v785_v41 = vmul.f32 1.442695, %v762_v60  ;;  %v1002_v34 = vadd.f32 %v1001_v56, %v987_v20  ;;  %v6108_v56 = vld [vmem:[#allocation29_spill] sm:$0xff] }
 0x223   :  { %v763_v52 = vsel %vm6101_vm5, %v6099_v8, -inf  ;;  %v1053_v35 = vmax.f32 %v1049_v38, %v3917_v57  ;;  %v1054_v18 = vmax.f32 %v1050_v37, %v3923_v30  ;;  %2492 = vpow2.f32 %v783_v32 }
 0x224   :  { %v1055_v4 = vmax.f32 %v1051_v21, %v1052_v27  ;;  %v787_v7 = vmul.f32 1.442695, %v763_v52  ;;  %v803_v22 = vadd.f32 %v2483_v2, %v2481_v42  ;;  %v1003_v28 = vadd.f32 %v1002_v34, %v988_v15  ;;  %v6105_v15 = vld [vmem:[#allocation13_spill] sm:$0xff] }
 0x225   :  { %v1056_v45 = vmax.f32 %v1053_v35, %v1054_v18  ;;  %v3958_v8 = vsel %vm6102_vm1, %v3367_v17, 0.0  ;;  %2494 = vpow2.f32 %v785_v41  ;;  %v769_v37 = vsel %vm3465_vm3, %v6103_v43, -inf  ;;  %v6114_v35 = vld [vmem:[#allocation42_spill] sm:$0xff] }
 0x226   :  { %v804_v25 = vadd.f32 %v2485_v63, %v803_v22  ;;  %v1004_v38 = vadd.f32 %v1003_v28, %v989_v40  ;;  %2496 = vpow2.f32 %v787_v7  ;;  %v6104_v13 = vsub.f32 %v3091_v23, %v3552_v14  ;;  %v2489_v63 = vpop.eup %2488 }
 0x227   :  { %v1057_v0 = vmax.f32 %v1055_v4, %v1056_v45  ;;  %vm6106_vm11 = vnez %v6105_v15  ;;  %v799_v60 = vmul.f32 1.442695, %v769_v37  ;;  %v6107_v32 = vsub.f32 %v3189_v11, %v3552_v14  ;;  %v2491_v41 = vpop.eup %2490  ;;  %v6141_v15 = vld [vmem:[#allocation66_spill] sm:$0xff] }
 0x228   :  { %v805_v2 = vadd.f32 %v2487_v29, %v804_v25  ;;  %v1005_v52 = vadd.f32 %v1004_v38, %v3797_v12  ;;  %v764_v42 = vsel %vm6106_vm11, %v6104_v13, -inf  ;;  %vm6109_vm4 = vnez %v6108_v56  ;;  %v6111_v29 = vld [vmem:[#allocation22_spill] sm:$0xff] }
 0x229   :  { %v1058_v20 = vrot.slane %v1057_v0, 4  ;;  %v765_v28 = vsel %vm6109_vm4, %v6107_v32, -inf  ;;  %v6110_v12 = vsub.f32 %v5997_v59, %v3552_v14  ;;  %vm6112_vm7 = vnez %v6111_v29  ;;  %v6140_v29 = vld [vmem:[#allocation65_spill] sm:$0xff] }
 0x22a   :  { %v1006_v45 = vadd.f32 %v1005_v52, %v3803_v9  ;;  %v806_v27 = vadd.f32 %v2489_v63, %v805_v2  ;;  %v6113_v34 = vsub.f32 %v6000_v24, %v3552_v14  ;;  %vm6115_vm15 = vnez %v6114_v35 }
 0x22b   :  { %v1059_v40 = vmax.f32 %v1057_v0, %v1058_v20  ;;  %v766_v21 = vsel %vm6112_vm7, %v6110_v12, -inf  ;;  %v6116_v4 = vsub.f32 %v6018_v47, %v3552_v14  ;;  %v789_v7 = vmul.f32 1.442695, %v764_v42 }
 0x22c   :  { %v767_v18 = vsel %vm6115_vm15, %v6113_v34, -inf  ;;  %v1007_v22 = vadd.f32 %v1006_v45, %v3809_v33  ;;  %v791_v43 = vmul.f32 1.442695, %v765_v28  ;;  %v807_v37 = vadd.f32 %v2491_v41, %v806_v27  ;;  %v6120_v34 = vld [vmem:[#allocation53_spill] sm:$0xff] }
 0x22d   :  { %v768_v9 = vsel %vm6020_vm14, %v6116_v4, -inf  ;;  %v1060_v25 = vrot.slane %v1059_v40, 2  ;;  %v2493_v38 = vpop.eup %2492  ;;  %2498 = vpow2.f32 %v799_v60  ;;  %v793_v0 = vmul.f32 1.442695, %v766_v21  ;;  %v6122_v4 = vld [vmem:[#allocation54_spill] sm:$0xff] }
 0x22e   :  { %v1008_v2 = vadd.f32 %v1007_v22, %v3815_v48  ;;  %v795_v20 = vmul.f32 1.442695, %v767_v18  ;;  %v808_v13 = vadd.f32 %v2493_v38, %v807_v37  ;;  %v6117_v32 = vsub.f32 %v3367_v17, %v3552_v14  ;;  %v6127_v38 = vld [vmem:[#allocation57_spill] sm:$0xff] }
 0x22f   :  { %v1061_v52 = vmax.f32 %v1059_v40, %v1060_v25  ;;  %v2495_v63 = vpop.eup %2494  ;;  %2500 = vpow2.f32 %v789_v7  ;;  %v797_v33 = vmul.f32 1.442695, %v768_v9  ;;  %v6123_v7 = vld [vmem:[#allocation55_spill] sm:$0xff] }
 0x230   :  { %v770_v42 = vsel %vm6025_vm0, %v6117_v32, -inf  ;;  %v1009_v28 = vadd.f32 %v1008_v2, %v3821_v49  ;;  %2502 = vpow2.f32 %v791_v43  ;;  %v809_v60 = vadd.f32 %v2495_v63, %v808_v13  ;;  %v2497_v12 = vpop.eup %2496  ;;  %v6125_v43 = vld [vmem:[#allocation56_spill] sm:$0xff]  ;;  %v6129_v2 = vld [vmem:[#allocation58_spill] sm:$0xff] }
 0x231   :  { %v1062_v45 = vrot.slane %v1061_v52, 1  ;;  %2504 = vpow2.f32 %v793_v0  ;;  %v4005_v27 = vmul.f32 1.442695, %v770_v42  ;;  %v6133_v32 = vld [vmem:[#allocation60_spill] sm:$0xff] }
 0x232   :  { %v4001_v48 = vadd.f32 %v1009_v28, %v3827_v5  ;;  %2506 = vpow2.f32 %v795_v20  ;;  %v4003_v21 = vadd.f32 %v2497_v12, %v809_v60  ;;  %v6118_v5 = vld [vmem:[#allocation52_spill] sm:$0xff]  ;;  %v6131_v20 = vld [vmem:[#allocation59_spill] sm:$0xff] }
 0x233   :  { %v1063_v40 = vmax.f32 %v1061_v52, %v1062_v45  ;;  %2508 = vpow2.f32 %v797_v33  ;;  %v6134_v33 = vld [vmem:[#allocation61_spill] sm:$0xff]  ;;  %v6136_v45 = vld [vmem:[#allocation62_spill] sm:$0xff]  ;;  %v6137_v12 = vld [vmem:[#allocation63_spill] sm:$0xff] }
 0x234   :  { %2510 = vpow2.f32 %v4005_v27 }
 0x235   :  { %vm1066_vm3 = vcmp.eq.f32.partialorder %v3845_v39, %v1063_v40  ;;  %vm1072_vm5 = vcmp.eq.f32.partialorder %v3881_v10, %v1063_v40  ;;  %vm1074_vm1 = vcmp.eq.f32.partialorder %v3893_v31, %v1063_v40  ;;  %vm1075_vm0 = vcmp.eq.f32.partialorder %v3899_v6, %v1063_v40 }
 0x236   :  { %vm1077_vm15 = vcmp.eq.f32.partialorder %v3911_v58, %v1063_v40  ;;  %vm1078_vm7 = vcmp.eq.f32.partialorder %v3917_v57, %v1063_v40  ;;  %vm6119_vm11 = vcmp.eq.f32.partialorder %v3833_v53, %v1063_v40  ;;  %vm6121_vm10 = vcmp.eq.f32.partialorder %v3839_v50, %v1063_v40 }
 0x237   :  { %v4019_v49 = vpop.eup %2498  ;;  %v1080_v41 = vsel %vm6119_vm11, %v6118_v5, 128  ;;  %v1081_v18 = vsel %vm6121_vm10, %v6120_v34, 128  ;;  %v1082_v9 = vsel %vm1066_vm3, %v6122_v4, 128  ;;  %vm6124_vm14 = vcmp.eq.f32.partialorder %v3851_v54, %v1063_v40 }
 0x238   :  { %v1083_v22 = vsel %vm6124_vm14, %v6123_v7, 128  ;;  %vm6126_vm4 = vcmp.eq.f32.partialorder %v3857_v51, %v1063_v40  ;;  %vm6128_vm11 = vcmp.eq.f32.partialorder %v3863_v44, %v1063_v40  ;;  %vm6130_vm10 = vcmp.eq.f32.partialorder %v3869_v36, %v1063_v40 }
 0x239   :  { %v2501_v25 = vpop.eup %2500  ;;  %v1084_v37 = vsel %vm6126_vm4, %v6125_v43, 128  ;;  %v1085_v0 = vsel %vm6128_vm11, %v6127_v38, 128  ;;  %v1086_v52 = vsel %vm6130_vm10, %v6129_v2, 128  ;;  %vm6132_vm3 = vcmp.eq.f32.partialorder %v3875_v62, %v1063_v40 }
 0x23a   :  { %v1087_v13 = vsel %vm6132_vm3, %v6131_v20, 128  ;;  %v2503_v63 = vpop.eup %2502  ;;  %v1088_v42 = vsel %vm1072_vm5, %v6133_v32, 128  ;;  %vm6135_vm14 = vcmp.eq.f32.partialorder %v3887_v61, %v1063_v40  ;;  %v1090_v60 = vsel %vm1074_vm1, %v6136_v45, 128 }
 0x23b   :  { %v1089_v28 = vsel %vm6135_vm14, %v6134_v33, 128  ;;  %v1091_v19 = vsel %vm1075_vm0, %v6137_v12, 128  ;;  %v2505_v1 = vpop.eup %2504  ;;  %vm6139_vm4 = vcmp.eq.f32.partialorder %v3905_v3, %v1063_v40  ;;  %v1093_v56 = vsel %vm1077_vm15, %v6140_v29, 128 }
 0x23c   :  { %v1092_v35 = vsel %vm6139_vm4, %v6138_v26, 128  ;;  %v1094_v46 = vsel %vm1078_vm7, %v6141_v15, 128  ;;  %vm6142_vm5 = vcmp.eq.f32.partialorder %v3923_v30, %v1063_v40  ;;  %v2507_v61 = vpop.eup %2506  ;;  %vm1096_vm1 = vcmp.lt.s32.totalorder %v1080_v41, %v1084_v37 }
 0x23d   :  { %v1095_v31 = vsel %vm6142_vm5, %v3564_v55, 128  ;;  %vm1098_vm0 = vcmp.lt.s32.totalorder %v1081_v18, %v1085_v0  ;;  %vm1100_vm11 = vcmp.lt.s32.totalorder %v1082_v9, %v1086_v52  ;;  %vm1102_vm10 = vcmp.lt.s32.totalorder %v1083_v22, %v1087_v13  ;;  %v2509_v6 = vpop.eup %2508 }
 0x23e   :  { %v1097_v3 = vsel %vm1096_vm1, %v1080_v41, %v1084_v37  ;;  %v1099_v10 = vsel %vm1098_vm0, %v1081_v18, %v1085_v0  ;;  %v1101_v62 = vsel %vm1100_vm11, %v1082_v9, %v1086_v52  ;;  %v1103_v36 = vsel %vm1102_vm10, %v1083_v22, %v1087_v13  ;;  %v6146_v0 = vld [vmem:[#allocation17_spill] sm:$0xff]  ;;  %v6147_v13 = vld [vmem:[#allocation14_spill] sm:$0xff] }
 0x23f   :  { %vm1104_vm3 = vcmp.lt.s32.totalorder %v1097_v3, %v1088_v42  ;;  %vm1106_vm15 = vcmp.lt.s32.totalorder %v1099_v10, %v1089_v28  ;;  %vm1108_vm14 = vcmp.lt.s32.totalorder %v1101_v62, %v1090_v60  ;;  %vm1110_vm4 = vcmp.lt.s32.totalorder %v1103_v36, %v1091_v19 }
 0x240   :  { %v1105_v57 = vsel %vm1104_vm3, %v1097_v3, %v1088_v42  ;;  %v1107_v58 = vsel %vm1106_vm15, %v1099_v10, %v1089_v28  ;;  %v1109_v44 = vsel %vm1108_vm14, %v1101_v62, %v1090_v60  ;;  %v1111_v51 = vsel %vm1110_vm4, %v1103_v36, %v1091_v19  ;;  %v6148_v42 = vld [vmem:[#allocation32_spill] sm:$0xff]  ;;  %v6149_v60 = vld [vmem:[#allocation27_spill] sm:$0xff] }
 0x241   :  { %vm1112_vm7 = vcmp.lt.s32.totalorder %v1105_v57, %v1092_v35  ;;  %vm1114_vm5 = vcmp.lt.s32.totalorder %v1107_v58, %v1093_v56  ;;  %vm1116_vm8 = vcmp.lt.s32.totalorder %v1109_v44, %v1094_v46  ;;  %vm1118_vm2 = vcmp.lt.s32.totalorder %v1111_v51, %v1095_v31 }
 0x242   :  { %v1113_v40 = vsel %vm1112_vm7, %v1105_v57, %v1092_v35  ;;  %v1115_v30 = vsel %vm1114_vm5, %v1107_v58, %v1093_v56  ;;  %v1117_v54 = vsel %vm1116_vm8, %v1109_v44, %v1094_v46  ;;  %v1119_v39 = vsel %vm1118_vm2, %v1111_v51, %v1095_v31 }
 0x243   :  { %vm1120_vm1 = vcmp.lt.s32.totalorder %v1113_v40, %v1115_v30  ;;  %vm1122_vm0 = vcmp.lt.s32.totalorder %v1117_v54, %v1119_v39  ;;  %v811_v41 = vadd.f32 %v2501_v25, %v4003_v21  ;;  %v1011_v18 = vadd.f32 %v4001_v48, %v3958_v8  ;;  %v6145_v25 = vld [vmem:[#allocation6_spill] sm:$0xff] }
 0x244   :  { %v1121_v9 = vsel %vm1120_vm1, %v1113_v40, %v1115_v30  ;;  %v1123_v3 = vsel %vm1122_vm0, %v1117_v54, %v1119_v39  ;;  %v2511_v54 = vpop.eup %2510 }
 0x245   :  { %vm1124_vm11 = vcmp.lt.s32.totalorder %v1121_v9, %v1123_v3  ;;  %v812_v19 = vadd.f32 %v2503_v63, %v811_v41  ;;  %v1012_v36 = vrot.slane %v1011_v18, 4  ;;  %v6151_v41 = vld [vmem:[#allocation41_spill] sm:$0xff] }
 0x246   :  { %v1125_v62 = vsel %vm1124_vm11, %v1121_v9, %v1123_v3  ;;  %v6153_v9 = vld [vmem:[#allocation38_spill] sm:$0xff] }
 0x247   :  { %v1126_v10 = vrot.slane %v1125_v62, 4  ;;  %v813_v57 = vadd.f32 %v2505_v1, %v812_v19  ;;  %v1013_v58 = vadd.f32 %v1012_v36, %v1011_v18  ;;  %v6155_v19 = vld [vmem:[#allocation11_spill] sm:$0xff] }
 0x249   :  { %vm1127_vm8 = vcmp.lt.s32.totalorder %v1125_v62, %v1126_v10  ;;  %v814_v46 = vadd.f32 %v2507_v61, %v813_v57  ;;  %v1014_v31 = vrot.slane %v1013_v58, 2 }
 0x24a   :  { %v1128_v51 = vsel %vm1127_vm8, %v1125_v62, %v1126_v10 }
 0x24b   :  { %v1129_v44 = vrot.slane %v1128_v51, 2  ;;  %v815_v56 = vadd.f32 %v2509_v6, %v814_v46  ;;  %v1015_v35 = vadd.f32 %v1014_v31, %v1013_v58  ;;  %v6144_v6 = vld [vmem:[#allocation10_spill] sm:$0xff] }
 0x24d   :  { %vm1130_vm2 = vcmp.lt.s32.totalorder %v1128_v51, %v1129_v44  ;;  %v816_v30 = vadd.f32 %v4019_v49, %v815_v56  ;;  %v1016_v39 = vrot.slane %v1015_v35, 1 }
 0x24e   :  { %v1131_v8 = vsel %vm1130_vm2, %v1128_v51, %v1129_v44 }
 0x24f   :  { %v1132_v48 = vrot.slane %v1131_v8, 1  ;;  %v817_v21 = vadd.f32 %v2511_v54, %v816_v30  ;;  %v1017_v27 = vadd.f32 %v1016_v39, %v1015_v35 }
 0x251   :  { %vm1133_vm10 = vcmp.lt.s32.totalorder %v1131_v8, %v1132_v48  ;;  %v4079_v1 = vmax.f32 %v3552_v14, %v1017_v27  ;;  %v818_v61 = vrot.slane %v817_v21, 4 }
 0x252   :  { %v4081_v22 = vsel %vm1133_vm10, %v1131_v8, %v1132_v48 }
 0x253   :  { %6143 = vst [vmem:[#allocation51_spill] sm:$0xff] %v4079_v1  ;;  %vm5831_vm3 = vcmp.eq.s32.totalorder %v6118_v5, %v4081_v22  ;;  %vm5832_vm15 = vcmp.eq.s32.totalorder %v6120_v34, %v4081_v22  ;;  %vm5833_vm14 = vcmp.eq.s32.totalorder %v6122_v4, %v4081_v22  ;;  %vm1138_vm4 = vcmp.eq.s32.totalorder %v6123_v7, %v4081_v22 }
 0x254   :  { %vm1139_vm7 = vcmp.eq.s32.totalorder %v6125_v43, %v4081_v22  ;;  %vm1143_vm11 = vcmp.eq.s32.totalorder %v6133_v32, %v4081_v22  ;;  %vm1144_vm8 = vcmp.eq.s32.totalorder %v6134_v33, %v4081_v22  ;;  %vm1145_vm2 = vcmp.eq.s32.totalorder %v6136_v45, %v4081_v22 }
 0x255   :  { %vm1146_vm10 = vcmp.eq.s32.totalorder %v6137_v12, %v4081_v22  ;;  %vm1147_vm5 = vcmp.eq.s32.totalorder %v6138_v26, %v4081_v22  ;;  %vm1148_vm1 = vcmp.eq.s32.totalorder %v6140_v29, %v4081_v22  ;;  %vm1149_vm0 = vcmp.eq.s32.totalorder %v6141_v15, %v4081_v22 }
 0x256   :  { %v1151_v49 = vsel %vm5831_vm3, %v6144_v6, 0.0  ;;  %v1152_v37 = vsel %vm5832_vm15, %v6145_v25, 0.0  ;;  %v1153_v52 = vsel %vm5833_vm14, %v6146_v0, 0.0  ;;  %v1154_v63 = vsel %vm1138_vm4, %v6147_v13, 0.0 }
 0x257   :  { %v1155_v28 = vsel %vm1139_vm7, %v6148_v42, 0.0  ;;  %vm6150_vm3 = vcmp.eq.s32.totalorder %v6127_v38, %v4081_v22  ;;  %vm6152_vm15 = vcmp.eq.s32.totalorder %v6129_v2, %v4081_v22  ;;  %vm6154_vm14 = vcmp.eq.s32.totalorder %v6131_v20, %v4081_v22 }
 0x258   :  { %v1156_v40 = vsel %vm6150_vm3, %v6149_v60, 0.0  ;;  %v1157_v18 = vsel %vm6152_vm15, %v6151_v41, 0.0  ;;  %v1158_v3 = vsel %vm6154_vm14, %v6153_v9, 0.0  ;;  %v1159_v36 = vsel %vm1143_vm11, %v6155_v19, 0.0 }
 0x259   :  { %v1160_v62 = vsel %vm1144_vm8, %v3091_v23, 0.0  ;;  %v1161_v10 = vsel %vm1145_vm2, %v3189_v11, 0.0  ;;  %v4161_v57 = vsel %vm1146_vm10, %v5997_v59, 0.0  ;;  %v4167_v58 = vsel %vm1147_vm5, %v6000_v24, 0.0 }
 0x25a   :  { %v4173_v46 = vsel %vm1148_vm1, %v6018_v47, 0.0  ;;  %v4179_v31 = vsel %vm1149_vm0, %v3395_v16, 0.0  ;;  %v1167_v51 = vadd.f32 %v1152_v37, %v1151_v49  ;;  %v819_v44 = vadd.f32 %v818_v61, %v817_v21  ;;  %v6160_v61 = vld [vmem:[#allocation20_spill] sm:$0xff]  ;;  %v6170_v16 = vld [vmem:[#allocation25_spill] sm:$0xff] }
 0x25b   :  { %v1019_v56 = vsub.f32 %v3552_v14, %v4079_v1  ;;  %v1023_v35 = vsub.f32 %v1017_v27, %v4079_v1  ;;  %vm1150_vm3 = vcmp.eq.s32.totalorder %v3564_v55, %v4081_v22  ;;  %vm6156_vm15 = vcmp.eq.s32.totalorder %v6118_v5, %v4081_v22  ;;  %v6158_v27 = vld [vmem:[#allocation23_spill] sm:$0xff]  ;;  %v6171_v47 = vld [vmem:[#allocation21_spill] sm:$0xff] }
 0x25c   :  { %v4190_v30 = vsel %vm6156_vm15, -inf, %v3833_v53  ;;  %v1168_v39 = vadd.f32 %v1167_v51, %v1153_v52  ;;  %v820_v54 = vrot.slane %v819_v44, 2  ;;  %v1166_v8 = vsel %vm1150_vm3, %v3367_v17, 0.0  ;;  %v6161_v52 = vld [vmem:[#allocation34_spill] sm:$0xff]  ;;  %v6169_v17 = vld [vmem:[#allocation45_spill] sm:$0xff] }
 0x25d   :  { %vm6157_vm14 = vcmp.eq.s32.totalorder %v6120_v34, %v4081_v22  ;;  %v1020_v48 = vmul.f32 1.442695, %v1019_v56  ;;  %v1024_v21 = vmul.f32 1.442695, %v1023_v35  ;;  %vm6159_vm15 = vcmp.eq.s32.totalorder %v6122_v4, %v4081_v22  ;;  %v6162_v51 = vld [vmem:[#allocation26_spill] sm:$0xff]  ;;  %v6164_v35 = vld [vmem:[#allocation40_spill] sm:$0xff] }
 0x25e   :  { %v4200_v14 = vsel %vm6157_vm14, -inf, %v3839_v50  ;;  %v4206_v53 = vsel %vm6159_vm15, -inf, %v6158_v27  ;;  %v4212_v49 = vsel %vm1138_vm4, -inf, %v6160_v61  ;;  %v1169_v37 = vadd.f32 %v1168_v39, %v1154_v63  ;;  %v6166_v63 = vld [vmem:[#allocation35_spill] sm:$0xff]  ;;  %v6168_v61 = vld [vmem:[#allocation48_spill] sm:$0xff] }
 0x25f   :  { %v4218_v50 = vsel %vm1139_vm7, -inf, %v6161_v52  ;;  %vm6163_vm14 = vcmp.eq.s32.totalorder %v6127_v38, %v4081_v22  ;;  %2512 = vpow2.f32 %v1020_v48  ;;  %vm6165_vm15 = vcmp.eq.s32.totalorder %v6129_v2, %v4081_v22 }
 0x260   :  { %v4224_v56 = vsel %vm6163_vm14, -inf, %v6162_v51  ;;  %v4230_v27 = vsel %vm6165_vm15, -inf, %v6164_v35  ;;  %vm6167_vm4 = vcmp.eq.s32.totalorder %v6131_v20, %v4081_v22  ;;  %v4242_v52 = vsel %vm1143_vm11, -inf, %v6168_v61 }
 0x261   :  { %v4236_v39 = vsel %vm6167_vm4, -inf, %v6166_v63  ;;  %v1170_v51 = vadd.f32 %v1169_v37, %v1155_v28  ;;  %v821_v48 = vadd.f32 %v820_v54, %v819_v44  ;;  %2514 = vpow2.f32 %v1024_v21  ;;  %v6172_v28 = vld [vmem:[#allocation50_spill] sm:$0xff]  ;;  %v6174_v21 = vld [vmem:[#allocation47_spill] sm:$0xff] }
 0x262   :  { %v4248_v35 = vsel %vm1144_vm8, -inf, %v6169_v17  ;;  %v4254_v63 = vsel %vm1145_vm2, -inf, %v6170_v16  ;;  %v4260_v61 = vsel %vm1146_vm10, -inf, %v6171_v47  ;;  %v4266_v44 = vsel %vm1147_vm5, -inf, %v6172_v28  ;;  %v6173_v17 = vld [vmem:[#allocation31_spill] sm:$0xff]  ;;  %v6175_v47 = vld [vmem:[#allocation37_spill] sm:$0xff] }
 0x263   :  { %v4272_v54 = vsel %vm1148_vm1, -inf, %v6173_v17  ;;  %v1171_v16 = vadd.f32 %v1170_v51, %v1156_v40  ;;  %v4278_v37 = vsel %vm1149_vm0, -inf, %v6174_v21  ;;  %v4284_v24 = vsel %vm1150_vm3, -inf, %v6175_v47 }
 0x264   :  { %v1213_v28 = vmax.f32 %v4190_v30, %v4218_v50  ;;  %v1214_v17 = vmax.f32 %v4200_v14, %v4224_v56  ;;  %v1215_v40 = vmax.f32 %v4206_v53, %v4230_v27  ;;  %v1216_v51 = vmax.f32 %v4212_v49, %v4236_v39 }
 0x265   :  { %v1172_v21 = vadd.f32 %v1171_v16, %v1157_v18  ;;  %v822_v59 = vrot.slane %v821_v48, 1 }
 0x266   :  { %v1217_v11 = vmax.f32 %v1213_v28, %v4242_v52  ;;  %v1218_v22 = vmax.f32 %v1214_v17, %v4248_v35  ;;  %v1219_v47 = vmax.f32 %v1215_v40, %v4254_v63  ;;  %v1220_v23 = vmax.f32 %v1216_v51, %v4260_v61 }
 0x267   :  { %v1173_v19 = vadd.f32 %v1172_v21, %v1158_v3  ;;  %v823_v18 = vadd.f32 %v822_v59, %v821_v48 }
 0x268   :  { %v1221_v9 = vmax.f32 %v1217_v11, %v4266_v44  ;;  %v1222_v41 = vmax.f32 %v1218_v22, %v4272_v54  ;;  %v1223_v60 = vmax.f32 %v1219_v47, %v4278_v37  ;;  %v1224_v42 = vmax.f32 %v1220_v23, %v4284_v24 }
 0x269   :  { %v1174_v13 = vadd.f32 %v1173_v19, %v1159_v36  ;;  %v2513_v16 = vpop.eup %2512 }
 0x26a   :  { %v1225_v0 = vmax.f32 %v1221_v9, %v1222_v41  ;;  %v1226_v28 = vmax.f32 %v1223_v60, %v1224_v42  ;;  %v1022_v6 = vmul.f32 %v2513_v16, %v823_v18 }
 0x26b   :  { %v2515_v25 = vpop.eup %2514  ;;  %v1175_v17 = vadd.f32 %v1174_v13, %v1160_v62 }
 0x26c   :  { %v1227_v40 = vmax.f32 %v1225_v0, %v1226_v28  ;;  %v4302_v51 = vadd.f32 %v2515_v25, %v1022_v6 }
 0x26d   :  { %v1176_v1 = vadd.f32 %v1175_v17, %v1161_v10 }
 0x26e   :  { %v1228_v3 = vrot.slane %v1227_v40, 4 }
 0x26f   :  { %v1177_v11 = vadd.f32 %v1176_v1, %v4161_v57 }
 0x270   :  { %v1229_v21 = vmax.f32 %v1227_v40, %v1228_v3 }
 0x271   :  { %v1178_v22 = vadd.f32 %v1177_v11, %v4167_v58 }
 0x272   :  { %v1230_v47 = vrot.slane %v1229_v21, 2 }
 0x273   :  { %v1179_v23 = vadd.f32 %v1178_v22, %v4173_v46 }
 0x274   :  { %v1231_v59 = vmax.f32 %v1229_v21, %v1230_v47 }
 0x275   :  { %v1180_v41 = vadd.f32 %v1179_v23, %v4179_v31  ;;  %v6183_v23 = vld [vmem:[#allocation51_spill] sm:$0xff] }
 0x276   :  { %v1232_v42 = vrot.slane %v1231_v59, 1 }
 0x277   :  { %v1181_v60 = vadd.f32 %v1180_v41, %v1166_v8 }
 0x278   :  { %v1233_v13 = vmax.f32 %v1231_v59, %v1232_v42 }
 0x279   :  { %v1182_v9 = vrot.slane %v1181_v60, 4 }
 0x27a   :  { %vm1234_vm7 = vcmp.eq.f32.partialorder %v4190_v30, %v1233_v13  ;;  %vm1235_vm5 = vcmp.eq.f32.partialorder %v4200_v14, %v1233_v13  ;;  %vm1240_vm2 = vcmp.eq.f32.partialorder %v4230_v27, %v1233_v13  ;;  %vm1241_vm10 = vcmp.eq.f32.partialorder %v4236_v39, %v1233_v13 }
 0x27b   :  { %v1183_v1 = vadd.f32 %v1182_v9, %v1181_v60  ;;  %vm1242_vm3 = vcmp.eq.f32.partialorder %v4242_v52, %v1233_v13  ;;  %vm1243_vm14 = vcmp.eq.f32.partialorder %v4248_v35, %v1233_v13  ;;  %vm1244_vm15 = vcmp.eq.f32.partialorder %v4254_v63, %v1233_v13 }
 0x27c   :  { %vm1246_vm0 = vcmp.eq.f32.partialorder %v4266_v44, %v1233_v13  ;;  %vm1248_vm11 = vcmp.eq.f32.partialorder %v4278_v37, %v1233_v13  ;;  %v1250_v25 = vsel %vm1234_vm7, %v6118_v5, 128  ;;  %v1251_v0 = vsel %vm1235_vm5, %v6120_v34, 128 }
 0x27d   :  { %v1184_v6 = vrot.slane %v1183_v1, 2  ;;  %vm6176_vm4 = vcmp.eq.f32.partialorder %v4206_v53, %v1233_v13  ;;  %vm6177_vm1 = vcmp.eq.f32.partialorder %v4212_v49, %v1233_v13  ;;  %vm6178_vm8 = vcmp.eq.f32.partialorder %v4218_v50, %v1233_v13 }
 0x27e   :  { %v1252_v36 = vsel %vm6176_vm4, %v6122_v4, 128  ;;  %v1253_v62 = vsel %vm6177_vm1, %v6123_v7, 128  ;;  %v1254_v10 = vsel %vm6178_vm8, %v6125_v43, 128  ;;  %vm6179_vm7 = vcmp.eq.f32.partialorder %v4224_v56, %v1233_v13 }
 0x27f   :  { %v1185_v19 = vadd.f32 %v1184_v6, %v1183_v1  ;;  %v1255_v57 = vsel %vm6179_vm7, %v6127_v38, 128  ;;  %v1256_v58 = vsel %vm1240_vm2, %v6129_v2, 128  ;;  %v1257_v46 = vsel %vm1241_vm10, %v6131_v20, 128 }
 0x280   :  { %v1258_v31 = vsel %vm1242_vm3, %v6133_v32, 128  ;;  %v1259_v48 = vsel %vm1243_vm14, %v6134_v33, 128  ;;  %v1260_v18 = vsel %vm1244_vm15, %v6136_v45, 128  ;;  %vm6180_vm5 = vcmp.eq.f32.partialorder %v4260_v61, %v1233_v13 }
 0x281   :  { %v1186_v8 = vrot.slane %v1185_v19, 1  ;;  %v1261_v16 = vsel %vm6180_vm5, %v6137_v12, 128  ;;  %v1262_v28 = vsel %vm1246_vm0, %v6138_v26, 128  ;;  %vm6181_vm1 = vcmp.eq.f32.partialorder %v4272_v54, %v1233_v13 }
 0x282   :  { %v1263_v17 = vsel %vm6181_vm1, %v6140_v29, 128  ;;  %v1264_v40 = vsel %vm1248_vm11, %v6141_v15, 128  ;;  %vm6182_vm8 = vcmp.eq.f32.partialorder %v4284_v24, %v1233_v13  ;;  %vm1266_vm2 = vcmp.lt.s32.totalorder %v1250_v25, %v1254_v10 }
 0x283   :  { %v1265_v3 = vsel %vm6182_vm8, %v3564_v55, 128  ;;  %v1187_v11 = vadd.f32 %v1186_v8, %v1185_v19  ;;  %vm1268_vm10 = vcmp.lt.s32.totalorder %v1251_v0, %v1255_v57  ;;  %vm1270_vm3 = vcmp.lt.s32.totalorder %v1252_v36, %v1256_v58 }
 0x284   :  { %v1267_v21 = vsel %vm1266_vm2, %v1250_v25, %v1254_v10  ;;  %v1269_v22 = vsel %vm1268_vm10, %v1251_v0, %v1255_v57  ;;  %v1271_v47 = vsel %vm1270_vm3, %v1252_v36, %v1256_v58  ;;  %vm1272_vm0 = vcmp.lt.s32.totalorder %v1253_v62, %v1257_v46 }
 0x285   :  { %v4373_v59 = vmax.f32 %v6183_v23, %v1187_v11  ;;  %v1273_v41 = vsel %vm1272_vm0, %v1253_v62, %v1257_v46  ;;  %vm1274_vm14 = vcmp.lt.s32.totalorder %v1267_v21, %v1258_v31  ;;  %vm1276_vm15 = vcmp.lt.s32.totalorder %v1269_v22, %v1259_v48 }
 0x286   :  { %v1275_v42 = vsel %vm1274_vm14, %v1267_v21, %v1258_v31  ;;  %v1277_v60 = vsel %vm1276_vm15, %v1269_v22, %v1259_v48  ;;  %vm1278_vm11 = vcmp.lt.s32.totalorder %v1271_v47, %v1260_v18  ;;  %vm1280_vm4 = vcmp.lt.s32.totalorder %v1273_v41, %v1261_v16  ;;  %v6187_v22 = vld [vmem:[#allocation6_spill] sm:$0xff] }
 0x287   :  { %6184 = vst [vmem:[#allocation52_spill] sm:$0xff] %v4373_v59  ;;  %v1189_v13 = vsub.f32 %v6183_v23, %v4373_v59  ;;  %v1193_v9 = vsub.f32 %v1187_v11, %v4373_v59  ;;  %v1279_v1 = vsel %vm1278_vm11, %v1271_v47, %v1260_v18  ;;  %v1281_v6 = vsel %vm1280_vm4, %v1273_v41, %v1261_v16  ;;  %v6188_v23 = vld [vmem:[#allocation17_spill] sm:$0xff] }
 0x288   :  { %vm1282_vm7 = vcmp.lt.s32.totalorder %v1275_v42, %v1262_v28  ;;  %vm1284_vm5 = vcmp.lt.s32.totalorder %v1277_v60, %v1263_v17  ;;  %vm1286_vm1 = vcmp.lt.s32.totalorder %v1279_v1, %v1264_v40  ;;  %vm1288_vm8 = vcmp.lt.s32.totalorder %v1281_v6, %v1265_v3 }
 0x289   :  { %v1190_v25 = vmul.f32 1.442695, %v1189_v13  ;;  %v1194_v0 = vmul.f32 1.442695, %v1193_v9  ;;  %v1283_v19 = vsel %vm1282_vm7, %v1275_v42, %v1262_v28  ;;  %v1285_v36 = vsel %vm1284_vm5, %v1277_v60, %v1263_v17  ;;  %v6190_v42 = vld [vmem:[#allocation14_spill] sm:$0xff]  ;;  %v6192_v13 = vld [vmem:[#allocation32_spill] sm:$0xff] }
 0x28a   :  { %v1287_v62 = vsel %vm1286_vm1, %v1279_v1, %v1264_v40  ;;  %v1289_v10 = vsel %vm1288_vm8, %v1281_v6, %v1265_v3  ;;  %vm1290_vm2 = vcmp.lt.s32.totalorder %v1283_v19, %v1285_v36  ;;  %v6194_v1 = vld [vmem:[#allocation27_spill] sm:$0xff] }
 0x28b   :  { %2516 = vpow2.f32 %v1190_v25  ;;  %v1291_v57 = vsel %vm1290_vm2, %v1283_v19, %v1285_v36  ;;  %vm1292_vm10 = vcmp.lt.s32.totalorder %v1287_v62, %v1289_v10  ;;  %v6196_v25 = vld [vmem:[#allocation41_spill] sm:$0xff]  ;;  %v6197_v19 = vld [vmem:[#allocation38_spill] sm:$0xff] }
 0x28c   :  { %v1293_v58 = vsel %vm1292_vm10, %v1287_v62, %v1289_v10  ;;  %2518 = vpow2.f32 %v1194_v0  ;;  %v6198_v62 = vld [vmem:[#allocation11_spill] sm:$0xff] }
 0x28d   :  { %vm1294_vm3 = vcmp.lt.s32.totalorder %v1291_v57, %v1293_v58 }
 0x28e   :  { %v1295_v46 = vsel %vm1294_vm3, %v1291_v57, %v1293_v58  ;;  %v6199_v57 = vld [vmem:[#allocation7_spill] sm:$0xff] }
 0x28f   :  { %v1296_v31 = vrot.slane %v1295_v46, 4 }
 0x291   :  { %vm1297_vm0 = vcmp.lt.s32.totalorder %v1295_v46, %v1296_v31 }
 0x292   :  { %v1298_v8 = vsel %vm1297_vm0, %v1295_v46, %v1296_v31  ;;  %v6200_v46 = vld [vmem:[#allocation18_spill] sm:$0xff] }
 0x293   :  { %v1299_v48 = vrot.slane %v1298_v8, 2 }
 0x295   :  { %v2517_v18 = vpop.eup %2516  ;;  %vm1300_vm14 = vcmp.lt.s32.totalorder %v1298_v8, %v1299_v48 }
 0x296   :  { %v1192_v16 = vmul.f32 %v2517_v18, %v4302_v51  ;;  %v1301_v28 = vsel %vm1300_vm14, %v1298_v8, %v1299_v48  ;;  %v2519_v17 = vpop.eup %2518  ;;  %v6186_v51 = vld [vmem:[#allocation10_spill] sm:$0xff]  ;;  %v6202_v8 = vld [vmem:[#allocation15_spill] sm:$0xff]  ;;  %v6203_v18 = vld [vmem:[#allocation33_spill] sm:$0xff] }
 0x297   :  { %v1302_v40 = vrot.slane %v1301_v28, 1 }
 0x298   :  { %v4379_v3 = vadd.f32 %v2519_v17, %v1192_v16 }
 0x299   :  { %vm1303_vm15 = vcmp.lt.s32.totalorder %v1301_v28, %v1302_v40 }
 0x29a   :  { %6185 = vst [vmem:[#allocation53_spill] sm:$0xff] %v4379_v3  ;;  %v1304_v11 = vsel %vm1303_vm15, %v1301_v28, %v1302_v40  ;;  %v6205_v28 = vld [vmem:[#allocation28_spill] sm:$0xff]  ;;  %v6206_v40 = vld [vmem:[#allocation43_spill] sm:$0xff] }
 0x29b   :  { %vm1305_vm11 = vcmp.eq.s32.totalorder %v6118_v5, %v1304_v11  ;;  %vm1306_vm4 = vcmp.eq.s32.totalorder %v6120_v34, %v1304_v11  ;;  %vm1311_vm2 = vcmp.eq.s32.totalorder %v6129_v2, %v1304_v11  ;;  %vm1312_vm10 = vcmp.eq.s32.totalorder %v6131_v20, %v1304_v11 }
 0x29c   :  { %vm1313_vm3 = vcmp.eq.s32.totalorder %v6133_v32, %v1304_v11  ;;  %vm1314_vm0 = vcmp.eq.s32.totalorder %v6134_v33, %v1304_v11  ;;  %vm1316_vm15 = vcmp.eq.s32.totalorder %v6137_v12, %v1304_v11  ;;  %vm1318_vm5 = vcmp.eq.s32.totalorder %v6140_v29, %v1304_v11 }
 0x29d   :  { %v1321_v21 = vsel %vm1305_vm11, %v6186_v51, 0.0  ;;  %v1322_v47 = vsel %vm1306_vm4, %v6187_v22, 0.0  ;;  %vm6189_vm14 = vcmp.eq.s32.totalorder %v6122_v4, %v1304_v11  ;;  %vm6191_vm7 = vcmp.eq.s32.totalorder %v6123_v7, %v1304_v11 }
 0x29e   :  { %v1323_v41 = vsel %vm6189_vm14, %v6188_v23, 0.0  ;;  %v1324_v60 = vsel %vm6191_vm7, %v6190_v42, 0.0  ;;  %vm6193_vm1 = vcmp.eq.s32.totalorder %v6125_v43, %v1304_v11  ;;  %vm6195_vm8 = vcmp.eq.s32.totalorder %v6127_v38, %v1304_v11 }
 0x29f   :  { %v1325_v9 = vsel %vm6193_vm1, %v6192_v13, 0.0  ;;  %v1326_v6 = vsel %vm6195_vm8, %v6194_v1, 0.0  ;;  %v1327_v0 = vsel %vm1311_vm2, %v6196_v25, 0.0  ;;  %v1328_v36 = vsel %vm1312_vm10, %v6197_v19, 0.0 }
 0x2a0   :  { %v1329_v10 = vsel %vm1313_vm3, %v6198_v62, 0.0  ;;  %v1330_v58 = vsel %vm1314_vm0, %v6199_v57, 0.0  ;;  %vm6201_vm7 = vcmp.eq.s32.totalorder %v6136_v45, %v1304_v11  ;;  %v1332_v48 = vsel %vm1316_vm15, %v6202_v8, 0.0  ;;  %v6208_v62 = vld [vmem:[#allocation39_spill] sm:$0xff] }
 0x2a1   :  { %v1331_v31 = vsel %vm6201_vm7, %v6200_v46, 0.0  ;;  %vm6204_vm1 = vcmp.eq.s32.totalorder %v6138_v26, %v1304_v11  ;;  %v1334_v17 = vsel %vm1318_vm5, %v6205_v28, 0.0  ;;  %vm6207_vm8 = vcmp.eq.s32.totalorder %v6141_v15, %v1304_v11 }
 0x2a2   :  { %v1333_v16 = vsel %vm6204_vm1, %v6203_v18, 0.0  ;;  %v1335_v57 = vsel %vm6207_vm8, %v6206_v40, 0.0  ;;  %vm6209_vm14 = vcmp.eq.s32.totalorder %v3564_v55, %v1304_v11  ;;  %v1337_v19 = vadd.f32 %v1322_v47, %v1321_v21 }
 0x2a3   :  { %v1336_v46 = vsel %vm6209_vm14, %v6208_v62, 0.0  ;;  %v4448_v8 = vsel %vm1305_vm11, -inf, %v4190_v30  ;;  %v4453_v18 = vsel %vm1306_vm4, -inf, %v4200_v14  ;;  %vm6210_vm7 = vcmp.eq.s32.totalorder %v6122_v4, %v1304_v11 }
 0x2a4   :  { %v4458_v28 = vsel %vm6210_vm7, -inf, %v4206_v53  ;;  %vm6211_vm1 = vcmp.eq.s32.totalorder %v6123_v7, %v1304_v11  ;;  %vm6212_vm8 = vcmp.eq.s32.totalorder %v6125_v43, %v1304_v11  ;;  %vm6213_vm11 = vcmp.eq.s32.totalorder %v6127_v38, %v1304_v11 }
 0x2a5   :  { %v4463_v62 = vsel %vm6211_vm1, -inf, %v4212_v49  ;;  %v4468_v30 = vsel %vm6212_vm8, -inf, %v4218_v50  ;;  %v4473_v14 = vsel %vm6213_vm11, -inf, %v4224_v56  ;;  %v4478_v53 = vsel %vm1311_vm2, -inf, %v4230_v27 }
 0x2a6   :  { %v1338_v21 = vadd.f32 %v1337_v19, %v1323_v41  ;;  %v4483_v49 = vsel %vm1312_vm10, -inf, %v4236_v39  ;;  %v4488_v50 = vsel %vm1313_vm3, -inf, %v4242_v52  ;;  %v4493_v56 = vsel %vm1314_vm0, -inf, %v4248_v35  ;;  %vm6217_vm3 = vmmov %vm6209_vm14 }
 0x2a7   :  { %vm6214_vm4 = vcmp.eq.s32.totalorder %v6136_v45, %v1304_v11  ;;  %v4503_v39 = vsel %vm1316_vm15, -inf, %v4260_v61  ;;  %vm6215_vm2 = vcmp.eq.s32.totalorder %v6138_v26, %v1304_v11  ;;  %v4513_v35 = vsel %vm1318_vm5, -inf, %v4272_v54 }
 0x2a8   :  { %v4498_v27 = vsel %vm6214_vm4, -inf, %v4254_v63  ;;  %v4508_v52 = vsel %vm6215_vm2, -inf, %v4266_v44  ;;  %v1339_v47 = vadd.f32 %v1338_v21, %v1324_v60  ;;  %vm6216_vm10 = vcmp.eq.s32.totalorder %v6141_v15, %v1304_v11 }
 0x2a9   :  { %v4518_v63 = vsel %vm6216_vm10, -inf, %v4278_v37  ;;  %v4523_v61 = vsel %vm6217_vm3, -inf, %v4284_v24  ;;  %v1383_v44 = vmax.f32 %v4448_v8, %v4468_v30  ;;  %v1384_v41 = vmax.f32 %v4453_v18, %v4473_v14 }
 0x2aa   :  { %v1385_v54 = vmax.f32 %v4458_v28, %v4478_v53  ;;  %v1386_v60 = vmax.f32 %v4463_v62, %v4483_v49  ;;  %v1340_v19 = vadd.f32 %v1339_v47, %v1325_v9 }
 0x2ab   :  { %v1387_v37 = vmax.f32 %v1383_v44, %v4488_v50  ;;  %v1388_v21 = vmax.f32 %v1384_v41, %v4493_v56 }
 0x2ac   :  { %v1389_v24 = vmax.f32 %v1385_v54, %v4498_v27  ;;  %v1390_v11 = vmax.f32 %v1386_v60, %v4503_v39  ;;  %v1341_v40 = vadd.f32 %v1340_v19, %v1326_v6 }
 0x2ad   :  { %v1391_v25 = vmax.f32 %v1387_v37, %v4508_v52  ;;  %v1392_v1 = vmax.f32 %v1388_v21, %v4513_v35 }
 0x2ae   :  { %v1393_v13 = vmax.f32 %v1389_v24, %v4518_v63  ;;  %v1394_v42 = vmax.f32 %v1390_v11, %v4523_v61  ;;  %v1342_v23 = vadd.f32 %v1341_v40, %v1327_v0  ;;  %v6225_v40 = vld [vmem:[#allocation67_spill] sm:$0xff] }
 0x2af   :  { %v1395_v22 = vmax.f32 %v1391_v25, %v1392_v1 }
 0x2b0   :  { %v1396_v9 = vmax.f32 %v1393_v13, %v1394_v42  ;;  %v1343_v47 = vadd.f32 %v1342_v23, %v1328_v36 }
 0x2b2   :  { %v1397_v44 = vmax.f32 %v1395_v22, %v1396_v9  ;;  %v1344_v51 = vadd.f32 %v1343_v47, %v1329_v10 }
 0x2b4   :  { %v1398_v41 = vrot.slane %v1397_v44, 4  ;;  %v1345_v3 = vadd.f32 %v1344_v51, %v1330_v58 }
 0x2b6   :  { %v1399_v54 = vmax.f32 %v1397_v44, %v1398_v41  ;;  %v1346_v59 = vadd.f32 %v1345_v3, %v1331_v31 }
 0x2b8   :  { %v1400_v60 = vrot.slane %v1399_v54, 2  ;;  %v1347_v6 = vadd.f32 %v1346_v59, %v1332_v48 }
 0x2ba   :  { %v1401_v19 = vmax.f32 %v1399_v54, %v1400_v60  ;;  %v1348_v37 = vadd.f32 %v1347_v6, %v1333_v16  ;;  %v6224_v16 = vld [vmem:[#allocation66_spill] sm:$0xff] }
 0x2bc   :  { %v1402_v55 = vrot.slane %v1401_v19, 1  ;;  %v1349_v21 = vadd.f32 %v1348_v37, %v1334_v17 }
 0x2be   :  { %v1403_v15 = vmax.f32 %v1401_v19, %v1402_v55  ;;  %v1350_v24 = vadd.f32 %v1349_v21, %v1335_v57 }
 0x2c0   :  { %vm1404_vm5 = vcmp.eq.f32.partialorder %v4448_v8, %v1403_v15  ;;  %vm1405_vm0 = vcmp.eq.f32.partialorder %v4453_v18, %v1403_v15  ;;  %v1351_v22 = vadd.f32 %v1350_v24, %v1336_v46  ;;  %vm1410_vm8 = vcmp.eq.f32.partialorder %v4478_v53, %v1403_v15 }
 0x2c1   :  { %vm1411_vm11 = vcmp.eq.f32.partialorder %v4483_v49, %v1403_v15  ;;  %vm1412_vm4 = vcmp.eq.f32.partialorder %v4488_v50, %v1403_v15  ;;  %vm1413_vm2 = vcmp.eq.f32.partialorder %v4493_v56, %v1403_v15  ;;  %vm1414_vm10 = vcmp.eq.f32.partialorder %v4498_v27, %v1403_v15 }
 0x2c2   :  { %v1352_v55 = vrot.slane %v1351_v22, 4  ;;  %vm1416_vm14 = vcmp.eq.f32.partialorder %v4508_v52, %v1403_v15  ;;  %vm1418_vm7 = vcmp.eq.f32.partialorder %v4518_v63, %v1403_v15  ;;  %v1420_v59 = vsel %vm1404_vm5, %v6118_v5, 128 }
 0x2c3   :  { %v1421_v3 = vsel %vm1405_vm0, %v6120_v34, 128  ;;  %vm6218_vm3 = vcmp.eq.f32.partialorder %v4458_v28, %v1403_v15  ;;  %vm6219_vm15 = vcmp.eq.f32.partialorder %v4463_v62, %v1403_v15  ;;  %vm6220_vm1 = vcmp.eq.f32.partialorder %v4468_v30, %v1403_v15 }
 0x2c4   :  { %v1353_v51 = vadd.f32 %v1352_v55, %v1351_v22  ;;  %v1422_v23 = vsel %vm6218_vm3, %v6122_v4, 128  ;;  %v1423_v42 = vsel %vm6219_vm15, %v6123_v7, 128  ;;  %v1424_v13 = vsel %vm6220_vm1, %v6125_v43, 128  ;;  %v6227_v22 = vld [vmem:[#allocation52_spill] sm:$0xff] }
 0x2c5   :  { %vm6221_vm5 = vcmp.eq.f32.partialorder %v4473_v14, %v1403_v15  ;;  %v1426_v25 = vsel %vm1410_vm8, %v6129_v2, 128  ;;  %v1427_v0 = vsel %vm1411_vm11, %v6131_v20, 128  ;;  %v1428_v36 = vsel %vm1412_vm4, %v6133_v32, 128 }
 0x2c6   :  { %v1425_v1 = vsel %vm6221_vm5, %v6127_v38, 128  ;;  %v1354_v10 = vrot.slane %v1353_v51, 2  ;;  %v1429_v57 = vsel %vm1413_vm2, %v6134_v33, 128  ;;  %v1430_v58 = vsel %vm1414_vm10, %v6136_v45, 128 }
 0x2c7   :  { %vm6222_vm0 = vcmp.eq.f32.partialorder %v4503_v39, %v1403_v15  ;;  %v1432_v31 = vsel %vm1416_vm14, %v6138_v26, 128  ;;  %vm6223_vm15 = vcmp.eq.f32.partialorder %v4513_v35, %v1403_v15  ;;  %v1434_v17 = vsel %vm1418_vm7, %v6224_v16, 128 }
 0x2c8   :  { %v1431_v46 = vsel %vm6222_vm0, %v6137_v12, 128  ;;  %v1433_v48 = vsel %vm6223_vm15, %v6140_v29, 128  ;;  %vm6226_vm1 = vcmp.eq.f32.partialorder %v4523_v61, %v1403_v15  ;;  %v1355_v9 = vadd.f32 %v1354_v10, %v1353_v51 }
 0x2c9   :  { %v1435_v11 = vsel %vm6226_vm1, %v6225_v40, 128  ;;  %vm1436_vm8 = vcmp.lt.s32.totalorder %v1420_v59, %v1424_v13  ;;  %vm1438_vm11 = vcmp.lt.s32.totalorder %v1421_v3, %v1425_v1  ;;  %vm1440_vm4 = vcmp.lt.s32.totalorder %v1422_v23, %v1426_v25 }
 0x2ca   :  { %v1437_v47 = vsel %vm1436_vm8, %v1420_v59, %v1424_v13  ;;  %v1439_v44 = vsel %vm1438_vm11, %v1421_v3, %v1425_v1  ;;  %v1441_v41 = vsel %vm1440_vm4, %v1422_v23, %v1426_v25  ;;  %vm1442_vm14 = vcmp.lt.s32.totalorder %v1423_v42, %v1427_v0 }
 0x2cb   :  { %v1356_v54 = vrot.slane %v1355_v9, 1  ;;  %v1443_v60 = vsel %vm1442_vm14, %v1423_v42, %v1427_v0  ;;  %vm1444_vm2 = vcmp.lt.s32.totalorder %v1437_v47, %v1428_v36  ;;  %vm1446_vm10 = vcmp.lt.s32.totalorder %v1439_v44, %v1429_v57 }
 0x2cc   :  { %v1445_v6 = vsel %vm1444_vm2, %v1437_v47, %v1428_v36  ;;  %v1447_v19 = vsel %vm1446_vm10, %v1439_v44, %v1429_v57  ;;  %vm1448_vm3 = vcmp.lt.s32.totalorder %v1441_v41, %v1430_v58  ;;  %vm1450_vm7 = vcmp.lt.s32.totalorder %v1443_v60, %v1431_v46 }
 0x2cd   :  { %v1357_v37 = vadd.f32 %v1356_v54, %v1355_v9  ;;  %v1449_v21 = vsel %vm1448_vm3, %v1441_v41, %v1430_v58  ;;  %v1451_v15 = vsel %vm1450_vm7, %v1443_v60, %v1431_v46  ;;  %vm1452_vm5 = vcmp.lt.s32.totalorder %v1445_v6, %v1432_v31  ;;  %v6231_v41 = vld [vmem:[#allocation10_spill] sm:$0xff] }
 0x2ce   :  { %v1453_v24 = vsel %vm1452_vm5, %v1445_v6, %v1432_v31  ;;  %vm1454_vm0 = vcmp.lt.s32.totalorder %v1447_v19, %v1433_v48  ;;  %vm1456_vm15 = vcmp.lt.s32.totalorder %v1449_v21, %v1434_v17  ;;  %vm1458_vm1 = vcmp.lt.s32.totalorder %v1451_v15, %v1435_v11  ;;  %v6232_v60 = vld [vmem:[#allocation6_spill] sm:$0xff] }
 0x2cf   :  { %v4606_v55 = vmax.f32 %v6227_v22, %v1357_v37  ;;  %v1455_v59 = vsel %vm1454_vm0, %v1447_v19, %v1433_v48  ;;  %v1457_v3 = vsel %vm1456_vm15, %v1449_v21, %v1434_v17  ;;  %v1459_v51 = vsel %vm1458_vm1, %v1451_v15, %v1435_v11  ;;  %v6229_v11 = vld [vmem:[#allocation53_spill] sm:$0xff]  ;;  %v6234_v21 = vld [vmem:[#allocation14_spill] sm:$0xff] }
 0x2d0   :  { %vm1460_vm8 = vcmp.lt.s32.totalorder %v1453_v24, %v1455_v59  ;;  %vm1462_vm11 = vcmp.lt.s32.totalorder %v1457_v3, %v1459_v51  ;;  %v6233_v19 = vld [vmem:[#allocation17_spill] sm:$0xff] }
 0x2d1   :  { %6228 = vst [vmem:[#allocation54_spill] sm:$0xff] %v4606_v55  ;;  %v1359_v23 = vsub.f32 %v6227_v22, %v4606_v55  ;;  %v1363_v42 = vsub.f32 %v1357_v37, %v4606_v55  ;;  %v1461_v13 = vsel %vm1460_vm8, %v1453_v24, %v1455_v59  ;;  %v1463_v1 = vsel %vm1462_vm11, %v1457_v3, %v1459_v51  ;;  %v6236_v24 = vld [vmem:[#allocation32_spill] sm:$0xff]  ;;  %v6238_v59 = vld [vmem:[#allocation27_spill] sm:$0xff]  ;;  %v6240_v51 = vld [vmem:[#allocation41_spill] sm:$0xff] }
 0x2d2   :  { %vm1464_vm4 = vcmp.lt.s32.totalorder %v1461_v13, %v1463_v1 }
 0x2d3   :  { %v1360_v25 = vmul.f32 1.442695, %v1359_v23  ;;  %v1364_v0 = vmul.f32 1.442695, %v1363_v42  ;;  %v1465_v36 = vsel %vm1464_vm4, %v1461_v13, %v1463_v1  ;;  %v6242_v42 = vld [vmem:[#allocation38_spill] sm:$0xff]  ;;  %v6243_v1 = vld [vmem:[#allocation11_spill] sm:$0xff] }
 0x2d4   :  { %v1466_v10 = vrot.slane %v1465_v36, 4 }
 0x2d5   :  { %2520 = vpow2.f32 %v1360_v25 }
 0x2d6   :  { %vm1467_vm14 = vcmp.lt.s32.totalorder %v1465_v36, %v1466_v10  ;;  %2522 = vpow2.f32 %v1364_v0  ;;  %v6244_v0 = vld [vmem:[#allocation7_spill] sm:$0xff] }
 0x2d7   :  { %v1468_v57 = vsel %vm1467_vm14, %v1465_v36, %v1466_v10  ;;  %v6245_v10 = vld [vmem:[#allocation18_spill] sm:$0xff] }
 0x2d8   :  { %v1469_v58 = vrot.slane %v1468_v57, 2 }
 0x2da   :  { %vm1470_vm2 = vcmp.lt.s32.totalorder %v1468_v57, %v1469_v58 }
 0x2db   :  { %v1471_v46 = vsel %vm1470_vm2, %v1468_v57, %v1469_v58  ;;  %v6246_v58 = vld [vmem:[#allocation15_spill] sm:$0xff] }
 0x2dc   :  { %v1472_v31 = vrot.slane %v1471_v46, 1 }
 0x2de   :  { %vm1473_vm10 = vcmp.lt.s32.totalorder %v1471_v46, %v1472_v31 }
 0x2df   :  { %v2521_v48 = vpop.eup %2520  ;;  %v1474_v17 = vsel %vm1473_vm10, %v1471_v46, %v1472_v31  ;;  %v6247_v31 = vld [vmem:[#allocation33_spill] sm:$0xff] }
 0x2e0   :  { %v1362_v9 = vmul.f32 %v2521_v48, %v6229_v11  ;;  %vm5852_vm3 = vcmp.eq.s32.totalorder %v6118_v5, %v1474_v17  ;;  %vm1476_vm7 = vcmp.eq.s32.totalorder %v6120_v34, %v1474_v17  ;;  %vm1477_vm5 = vcmp.eq.s32.totalorder %v6122_v4, %v1474_v17  ;;  %v2523_v47 = vpop.eup %2522  ;;  %v6249_v11 = vld [vmem:[#allocation28_spill] sm:$0xff] }
 0x2e1   :  { %vm1482_vm11 = vcmp.eq.s32.totalorder %v6131_v20, %v1474_v17  ;;  %vm1483_vm4 = vcmp.eq.s32.totalorder %v6133_v32, %v1474_v17  ;;  %vm1484_vm14 = vcmp.eq.s32.totalorder %v6134_v33, %v1474_v17  ;;  %vm1485_vm2 = vcmp.eq.s32.totalorder %v6136_v45, %v1474_v17 }
 0x2e2   :  { %v4619_v44 = vadd.f32 %v2523_v47, %v1362_v9  ;;  %vm1486_vm10 = vcmp.eq.s32.totalorder %v6137_v12, %v1474_v17  ;;  %vm1488_vm15 = vcmp.eq.s32.totalorder %v6140_v29, %v1474_v17  ;;  %v1491_v54 = vsel %vm5852_vm3, %v6231_v41, 0.0  ;;  %v6250_v47 = vld [vmem:[#allocation43_spill] sm:$0xff] }
 0x2e3   :  { %v1492_v6 = vsel %vm1476_vm7, %v6232_v60, 0.0  ;;  %v1493_v37 = vsel %vm1477_vm5, %v6233_v19, 0.0  ;;  %vm6235_vm0 = vcmp.eq.s32.totalorder %v6123_v7, %v1474_v17  ;;  %vm6237_vm1 = vcmp.eq.s32.totalorder %v6125_v43, %v1474_v17 }
 0x2e4   :  { %6230 = vst [vmem:[#allocation55_spill] sm:$0xff] %v4619_v44  ;;  %v1494_v15 = vsel %vm6235_vm0, %v6234_v21, 0.0  ;;  %v1495_v22 = vsel %vm6237_vm1, %v6236_v24, 0.0  ;;  %vm6239_vm8 = vcmp.eq.s32.totalorder %v6127_v38, %v1474_v17  ;;  %vm6241_vm3 = vcmp.eq.s32.totalorder %v6129_v2, %v1474_v17 }
 0x2e5   :  { %v1496_v3 = vsel %vm6239_vm8, %v6238_v59, 0.0  ;;  %v1497_v23 = vsel %vm6241_vm3, %v6240_v51, 0.0  ;;  %v1498_v13 = vsel %vm1482_vm11, %v6242_v42, 0.0  ;;  %v1499_v25 = vsel %vm1483_vm4, %v6243_v1, 0.0  ;;  %v6252_v1 = vld [vmem:[#allocation39_spill] sm:$0xff] }
 0x2e6   :  { %v1500_v36 = vsel %vm1484_vm14, %v6244_v0, 0.0  ;;  %v1501_v57 = vsel %vm1485_vm2, %v6245_v10, 0.0  ;;  %v1502_v46 = vsel %vm1486_vm10, %v6246_v58, 0.0  ;;  %vm6248_vm3 = vcmp.eq.s32.totalorder %v6138_v26, %v1474_v17 }
 0x2e7   :  { %v1503_v48 = vsel %vm6248_vm3, %v6247_v31, 0.0  ;;  %v1504_v9 = vsel %vm1488_vm15, %v6249_v11, 0.0  ;;  %vm6251_vm0 = vcmp.eq.s32.totalorder %v6224_v16, %v1474_v17  ;;  %vm6253_vm1 = vcmp.eq.s32.totalorder %v6225_v40, %v1474_v17 }
 0x2e8   :  { %v1505_v0 = vsel %vm6251_vm0, %v6250_v47, 0.0  ;;  %v1506_v10 = vsel %vm6253_vm1, %v6252_v1, 0.0  ;;  %v1507_v42 = vadd.f32 %v1492_v6, %v1491_v54  ;;  %vm6254_vm8 = vcmp.eq.s32.totalorder %v6118_v5, %v1474_v17 }
 0x2e9   :  { %v4681_v58 = vsel %vm6254_vm8, -inf, %v4448_v8  ;;  %v4686_v31 = vsel %vm1476_vm7, -inf, %v4453_v18  ;;  %v4691_v11 = vsel %vm1477_vm5, -inf, %v4458_v28  ;;  %vm6255_vm3 = vcmp.eq.s32.totalorder %v6123_v7, %v1474_v17 }
 0x2ea   :  { %v4696_v1 = vsel %vm6255_vm3, -inf, %v4463_v62  ;;  %vm6256_vm0 = vcmp.eq.s32.totalorder %v6125_v43, %v1474_v17  ;;  %v1508_v54 = vadd.f32 %v1507_v42, %v1493_v37  ;;  %vm6257_vm7 = vcmp.eq.s32.totalorder %v6127_v38, %v1474_v17 }
 0x2eb   :  { %v4701_v8 = vsel %vm6256_vm0, -inf, %v4468_v30  ;;  %v4706_v18 = vsel %vm6257_vm7, -inf, %v4473_v14  ;;  %vm6258_vm5 = vcmp.eq.s32.totalorder %v6129_v2, %v1474_v17  ;;  %v4716_v62 = vsel %vm1482_vm11, -inf, %v4483_v49 }
 0x2ec   :  { %v4711_v28 = vsel %vm6258_vm5, -inf, %v4478_v53  ;;  %v4721_v30 = vsel %vm1483_vm4, -inf, %v4488_v50  ;;  %v4726_v14 = vsel %vm1484_vm14, -inf, %v4493_v56  ;;  %v4731_v53 = vsel %vm1485_vm2, -inf, %v4498_v27  ;;  %vm6261_vm14 = vmmov %vm6253_vm1 }
 0x2ed   :  { %v4736_v49 = vsel %vm1486_vm10, -inf, %v4503_v39  ;;  %v1509_v6 = vadd.f32 %v1508_v54, %v1494_v15  ;;  %vm6259_vm11 = vcmp.eq.s32.totalorder %v6138_v26, %v1474_v17  ;;  %v4746_v56 = vsel %vm1488_vm15, -inf, %v4513_v35 }
 0x2ee   :  { %v4741_v50 = vsel %vm6259_vm11, -inf, %v4508_v52  ;;  %vm6260_vm4 = vcmp.eq.s32.totalorder %v6224_v16, %v1474_v17  ;;  %v4756_v39 = vsel %vm6261_vm14, -inf, %v4523_v61  ;;  %v1553_v37 = vmax.f32 %v4681_v58, %v4701_v8 }
 0x2ef   :  { %v4751_v27 = vsel %vm6260_vm4, -inf, %v4518_v63  ;;  %v1554_v52 = vmax.f32 %v4686_v31, %v4706_v18  ;;  %v1555_v35 = vmax.f32 %v4691_v11, %v4711_v28  ;;  %v1510_v15 = vadd.f32 %v1509_v6, %v1495_v22 }
 0x2f0   :  { %v1556_v42 = vmax.f32 %v4696_v1, %v4716_v62  ;;  %v1557_v63 = vmax.f32 %v1553_v37, %v4721_v30 }
 0x2f1   :  { %v1558_v54 = vmax.f32 %v1554_v52, %v4726_v14  ;;  %v1559_v61 = vmax.f32 %v1555_v35, %v4731_v53  ;;  %v1511_v17 = vadd.f32 %v1510_v15, %v1496_v3 }
 0x2f2   :  { %v1560_v47 = vmax.f32 %v1556_v42, %v4736_v49  ;;  %v1561_v51 = vmax.f32 %v1557_v63, %v4741_v50 }
 0x2f3   :  { %v1562_v59 = vmax.f32 %v1558_v54, %v4746_v56  ;;  %v1563_v24 = vmax.f32 %v1559_v61, %v4751_v27  ;;  %v1512_v21 = vadd.f32 %v1511_v17, %v1497_v23 }
 0x2f4   :  { %v1564_v22 = vmax.f32 %v1560_v47, %v4756_v39  ;;  %v6269_v47 = vld [vmem:[#allocation67_spill] sm:$0xff] }
 0x2f5   :  { %v1565_v6 = vmax.f32 %v1561_v51, %v1562_v59  ;;  %v1513_v19 = vadd.f32 %v1512_v21, %v1498_v13 }
 0x2f6   :  { %v1566_v60 = vmax.f32 %v1563_v24, %v1564_v22 }
 0x2f7   :  { %v1514_v37 = vadd.f32 %v1513_v19, %v1499_v25 }
 0x2f8   :  { %v1567_v41 = vmax.f32 %v1565_v6, %v1566_v60 }
 0x2f9   :  { %v1515_v52 = vadd.f32 %v1514_v37, %v1500_v36 }
 0x2fa   :  { %v1568_v44 = vrot.slane %v1567_v41, 4 }
 0x2fb   :  { %v1516_v35 = vadd.f32 %v1515_v52, %v1501_v57 }
 0x2fc   :  { %v1569_v3 = vmax.f32 %v1567_v41, %v1568_v44 }
 0x2fd   :  { %v1517_v15 = vadd.f32 %v1516_v35, %v1502_v46 }
 0x2fe   :  { %v1570_v42 = vrot.slane %v1569_v3, 2 }
 0x2ff   :  { %v1518_v55 = vadd.f32 %v1517_v15, %v1503_v48  ;;  %v6268_v48 = vld [vmem:[#allocation66_spill] sm:$0xff] }
 0x300   :  { %v1571_v63 = vmax.f32 %v1569_v3, %v1570_v42 }
 0x301   :  { %v1519_v40 = vadd.f32 %v1518_v55, %v1504_v9 }
 0x302   :  { %v1572_v54 = vrot.slane %v1571_v63, 1 }
 0x303   :  { %v1520_v16 = vadd.f32 %v1519_v40, %v1505_v0 }
 0x304   :  { %v1573_v61 = vmax.f32 %v1571_v63, %v1572_v54  ;;  %v6270_v54 = vld [vmem:[#allocation54_spill] sm:$0xff] }
 0x305   :  { %v1521_v23 = vadd.f32 %v1520_v16, %v1506_v10 }
 0x306   :  { %vm1574_vm15 = vcmp.eq.f32.partialorder %v4681_v58, %v1573_v61  ;;  %vm1575_vm2 = vcmp.eq.f32.partialorder %v4686_v31, %v1573_v61  ;;  %vm1578_vm8 = vcmp.eq.f32.partialorder %v4701_v8, %v1573_v61  ;;  %vm1581_vm7 = vcmp.eq.f32.partialorder %v4716_v62, %v1573_v61 }
 0x307   :  { %v1522_v44 = vrot.slane %v1521_v23, 4  ;;  %vm1582_vm5 = vcmp.eq.f32.partialorder %v4721_v30, %v1573_v61  ;;  %vm1583_vm11 = vcmp.eq.f32.partialorder %v4726_v14, %v1573_v61  ;;  %vm1584_vm4 = vcmp.eq.f32.partialorder %v4731_v53, %v1573_v61 }
 0x308   :  { %vm1586_vm10 = vcmp.eq.f32.partialorder %v4741_v50, %v1573_v61  ;;  %vm1588_vm3 = vcmp.eq.f32.partialorder %v4751_v27, %v1573_v61  ;;  %vm1589_vm0 = vcmp.eq.f32.partialorder %v4756_v39, %v1573_v61  ;;  %v1590_v40 = vsel %vm1574_vm15, %v6118_v5, 128 }
 0x309   :  { %v1523_v16 = vadd.f32 %v1522_v44, %v1521_v23  ;;  %v1591_v55 = vsel %vm1575_vm2, %v6120_v34, 128  ;;  %vm6262_vm14 = vcmp.eq.f32.partialorder %v4691_v11, %v1573_v61  ;;  %vm6263_vm1 = vcmp.eq.f32.partialorder %v4696_v1, %v1573_v61 }
 0x30a   :  { %v1592_v41 = vsel %vm6262_vm14, %v6122_v4, 128  ;;  %v1593_v60 = vsel %vm6263_vm1, %v6123_v7, 128  ;;  %v1594_v19 = vsel %vm1578_vm8, %v6125_v43, 128  ;;  %vm6264_vm15 = vcmp.eq.f32.partialorder %v4706_v18, %v1573_v61 }
 0x30b   :  { %v1524_v21 = vrot.slane %v1523_v16, 2  ;;  %v1595_v24 = vsel %vm6264_vm15, %v6127_v38, 128  ;;  %vm6265_vm2 = vcmp.eq.f32.partialorder %v4711_v28, %v1573_v61  ;;  %v1597_v51 = vsel %vm1581_vm7, %v6131_v20, 128 }
 0x30c   :  { %v1596_v59 = vsel %vm6265_vm2, %v6129_v2, 128  ;;  %v1598_v13 = vsel %vm1582_vm5, %v6133_v32, 128  ;;  %v1599_v25 = vsel %vm1583_vm11, %v6134_v33, 128  ;;  %v1600_v0 = vsel %vm1584_vm4, %v6136_v45, 128 }
 0x30d   :  { %vm6266_vm1 = vcmp.eq.f32.partialorder %v4736_v49, %v1573_v61  ;;  %v1525_v10 = vadd.f32 %v1524_v21, %v1523_v16  ;;  %v1602_v57 = vsel %vm1586_vm10, %v6138_v26, 128  ;;  %vm6267_vm8 = vcmp.eq.f32.partialorder %v4746_v56, %v1573_v61 }
 0x30e   :  { %v1601_v36 = vsel %vm6266_vm1, %v6137_v12, 128  ;;  %v1603_v46 = vsel %vm6267_vm8, %v6140_v29, 128  ;;  %v1604_v9 = vsel %vm1588_vm3, %v6268_v48, 128  ;;  %v1605_v17 = vsel %vm1589_vm0, %v6269_v47, 128 }
 0x30f   :  { %vm1606_vm7 = vcmp.lt.s32.totalorder %v1590_v40, %v1594_v19  ;;  %vm1608_vm5 = vcmp.lt.s32.totalorder %v1591_v55, %v1595_v24  ;;  %vm1610_vm11 = vcmp.lt.s32.totalorder %v1592_v41, %v1596_v59  ;;  %v1526_v22 = vrot.slane %v1525_v10, 1 }
 0x310   :  { %v1607_v6 = vsel %vm1606_vm7, %v1590_v40, %v1594_v19  ;;  %v1609_v37 = vsel %vm1608_vm5, %v1591_v55, %v1595_v24  ;;  %v1611_v52 = vsel %vm1610_vm11, %v1592_v41, %v1596_v59  ;;  %vm1612_vm10 = vcmp.lt.s32.totalorder %v1593_v60, %v1597_v51 }
 0x311   :  { %vm1614_vm4 = vcmp.lt.s32.totalorder %v1607_v6, %v1598_v13  ;;  %vm1616_vm14 = vcmp.lt.s32.totalorder %v1609_v37, %v1599_v25  ;;  %vm1618_vm15 = vcmp.lt.s32.totalorder %v1611_v52, %v1600_v0  ;;  %v1527_v35 = vadd.f32 %v1526_v22, %v1525_v10 }
 0x312   :  { %v1613_v3 = vsel %vm1612_vm10, %v1593_v60, %v1597_v51  ;;  %v1615_v15 = vsel %vm1614_vm4, %v1607_v6, %v1598_v13  ;;  %v1617_v42 = vsel %vm1616_vm14, %v1609_v37, %v1599_v25  ;;  %v1619_v63 = vsel %vm1618_vm15, %v1611_v52, %v1600_v0  ;;  %v6274_v37 = vld [vmem:[#allocation10_spill] sm:$0xff] }
 0x313   :  { %vm1620_vm3 = vcmp.lt.s32.totalorder %v1613_v3, %v1601_v36  ;;  %vm1622_vm2 = vcmp.lt.s32.totalorder %v1615_v15, %v1602_v57  ;;  %vm1624_vm1 = vcmp.lt.s32.totalorder %v1617_v42, %v1603_v46  ;;  %v4839_v61 = vmax.f32 %v6270_v54, %v1527_v35 }
 0x314   :  { %v1621_v23 = vsel %vm1620_vm3, %v1613_v3, %v1601_v36  ;;  %v1623_v44 = vsel %vm1622_vm2, %v1615_v15, %v1602_v57  ;;  %v1625_v16 = vsel %vm1624_vm1, %v1617_v42, %v1603_v46  ;;  %vm1626_vm0 = vcmp.lt.s32.totalorder %v1619_v63, %v1604_v9  ;;  %v6272_v46 = vld [vmem:[#allocation55_spill] sm:$0xff]  ;;  %v6276_v15 = vld [vmem:[#allocation17_spill] sm:$0xff] }
 0x315   :  { %6271 = vst [vmem:[#allocation56_spill] sm:$0xff] %v4839_v61  ;;  %vm1628_vm8 = vcmp.lt.s32.totalorder %v1621_v23, %v1605_v17  ;;  %vm1630_vm7 = vcmp.lt.s32.totalorder %v1623_v44, %v1625_v16  ;;  %v1529_v40 = vsub.f32 %v6270_v54, %v4839_v61  ;;  %v1533_v55 = vsub.f32 %v1527_v35, %v4839_v61  ;;  %v6275_v35 = vld [vmem:[#allocation6_spill] sm:$0xff] }
 0x316   :  { %v1627_v41 = vsel %vm1626_vm0, %v1619_v63, %v1604_v9  ;;  %v1629_v60 = vsel %vm1628_vm8, %v1621_v23, %v1605_v17  ;;  %v1631_v19 = vsel %vm1630_vm7, %v1623_v44, %v1625_v16  ;;  %v6278_v63 = vld [vmem:[#allocation14_spill] sm:$0xff]  ;;  %v6280_v23 = vld [vmem:[#allocation32_spill] sm:$0xff]  ;;  %v6282_v16 = vld [vmem:[#allocation27_spill] sm:$0xff] }
 0x317   :  { %vm1632_vm5 = vcmp.lt.s32.totalorder %v1627_v41, %v1629_v60  ;;  %v1530_v21 = vmul.f32 1.442695, %v1529_v40  ;;  %v1534_v24 = vmul.f32 1.442695, %v1533_v55  ;;  %v6284_v55 = vld [vmem:[#allocation41_spill] sm:$0xff] }
 0x318   :  { %v1633_v59 = vsel %vm1632_vm5, %v1627_v41, %v1629_v60  ;;  %v6285_v60 = vld [vmem:[#allocation38_spill] sm:$0xff] }
 0x319   :  { %vm1634_vm11 = vcmp.lt.s32.totalorder %v1631_v19, %v1633_v59  ;;  %2524 = vpow2.f32 %v1530_v21  ;;  %v6286_v21 = vld [vmem:[#allocation11_spill] sm:$0xff] }
 0x31a   :  { %v1635_v51 = vsel %vm1634_vm11, %v1631_v19, %v1633_v59  ;;  %2526 = vpow2.f32 %v1534_v24  ;;  %v6287_v59 = vld [vmem:[#allocation7_spill] sm:$0xff] }
 0x31b   :  { %v1636_v13 = vrot.slane %v1635_v51, 4 }
 0x31d   :  { %vm1637_vm10 = vcmp.lt.s32.totalorder %v1635_v51, %v1636_v13 }
 0x31e   :  { %v1638_v25 = vsel %vm1637_vm10, %v1635_v51, %v1636_v13  ;;  %v6288_v13 = vld [vmem:[#allocation18_spill] sm:$0xff] }
 0x31f   :  { %v1639_v0 = vrot.slane %v1638_v25, 2 }
 0x321   :  { %vm1640_vm4 = vcmp.lt.s32.totalorder %v1638_v25, %v1639_v0 }
 0x322   :  { %v1641_v36 = vsel %vm1640_vm4, %v1638_v25, %v1639_v0  ;;  %v6290_v0 = vld [vmem:[#allocation15_spill] sm:$0xff] }
 0x323   :  { %v1642_v10 = vrot.slane %v1641_v36, 1  ;;  %v2525_v57 = vpop.eup %2524 }
 0x324   :  { %v1532_v9 = vmul.f32 %v2525_v57, %v6272_v46  ;;  %v2527_v17 = vpop.eup %2526  ;;  %v6293_v46 = vld [vmem:[#allocation28_spill] sm:$0xff] }
 0x325   :  { %vm1643_vm14 = vcmp.lt.s32.totalorder %v1641_v36, %v1642_v10 }
 0x326   :  { %v1644_v22 = vsel %vm1643_vm14, %v1641_v36, %v1642_v10  ;;  %v4845_v6 = vadd.f32 %v2527_v17, %v1532_v9  ;;  %v6291_v10 = vld [vmem:[#allocation33_spill] sm:$0xff]  ;;  %v6294_v17 = vld [vmem:[#allocation43_spill] sm:$0xff] }
 0x327   :  { %vm1645_vm15 = vcmp.eq.s32.totalorder %v6118_v5, %v1644_v22  ;;  %vm1646_vm3 = vcmp.eq.s32.totalorder %v6120_v34, %v1644_v22  ;;  %vm1651_vm7 = vcmp.eq.s32.totalorder %v6129_v2, %v1644_v22  ;;  %vm1652_vm5 = vcmp.eq.s32.totalorder %v6131_v20, %v1644_v22 }
 0x328   :  { %6273 = vst [vmem:[#allocation57_spill] sm:$0xff] %v4845_v6  ;;  %vm1653_vm11 = vcmp.eq.s32.totalorder %v6133_v32, %v1644_v22  ;;  %vm1654_vm10 = vcmp.eq.s32.totalorder %v6134_v33, %v1644_v22  ;;  %vm1656_vm14 = vcmp.eq.s32.totalorder %v6137_v12, %v1644_v22  ;;  %vm1658_vm1 = vcmp.eq.s32.totalorder %v6140_v29, %v1644_v22 }
 0x329   :  { %v1661_v52 = vsel %vm1645_vm15, %v6274_v37, 0.0  ;;  %v1662_v3 = vsel %vm1646_vm3, %v6275_v35, 0.0  ;;  %vm6277_vm4 = vcmp.eq.s32.totalorder %v6122_v4, %v1644_v22  ;;  %vm6279_vm2 = vcmp.eq.s32.totalorder %v6123_v7, %v1644_v22 }
 0x32a   :  { %v1663_v42 = vsel %vm6277_vm4, %v6276_v15, 0.0  ;;  %v1664_v54 = vsel %vm6279_vm2, %v6278_v63, 0.0  ;;  %vm6281_vm0 = vcmp.eq.s32.totalorder %v6125_v43, %v1644_v22  ;;  %vm6283_vm8 = vcmp.eq.s32.totalorder %v6127_v38, %v1644_v22 }
 0x32b   :  { %v1665_v44 = vsel %vm6281_vm0, %v6280_v23, 0.0  ;;  %v1666_v40 = vsel %vm6283_vm8, %v6282_v16, 0.0  ;;  %v1667_v41 = vsel %vm1651_vm7, %v6284_v55, 0.0  ;;  %v1668_v19 = vsel %vm1652_vm5, %v6285_v60, 0.0 }
 0x32c   :  { %v1669_v24 = vsel %vm1653_vm11, %v6286_v21, 0.0  ;;  %v1670_v51 = vsel %vm1654_vm10, %v6287_v59, 0.0  ;;  %vm6289_vm2 = vcmp.eq.s32.totalorder %v6136_v45, %v1644_v22  ;;  %v1672_v36 = vsel %vm1656_vm14, %v6290_v0, 0.0  ;;  %v6296_v21 = vld [vmem:[#allocation39_spill] sm:$0xff] }
 0x32d   :  { %v1671_v25 = vsel %vm6289_vm2, %v6288_v13, 0.0  ;;  %vm6292_vm0 = vcmp.eq.s32.totalorder %v6138_v26, %v1644_v22  ;;  %v1674_v9 = vsel %vm1658_vm1, %v6293_v46, 0.0  ;;  %vm6295_vm8 = vcmp.eq.s32.totalorder %v6268_v48, %v1644_v22 }
 0x32e   :  { %v1673_v57 = vsel %vm6292_vm0, %v6291_v10, 0.0  ;;  %v1675_v59 = vsel %vm6295_vm8, %v6294_v17, 0.0  ;;  %vm6297_vm4 = vcmp.eq.s32.totalorder %v6269_v47, %v1644_v22  ;;  %v1677_v60 = vadd.f32 %v1662_v3, %v1661_v52 }
 0x32f   :  { %v1676_v13 = vsel %vm6297_vm4, %v6296_v21, 0.0  ;;  %v4914_v0 = vsel %vm1645_vm15, -inf, %v4681_v58  ;;  %v4919_v10 = vsel %vm1646_vm3, -inf, %v4686_v31  ;;  %vm6298_vm2 = vcmp.eq.s32.totalorder %v6122_v4, %v1644_v22 }
 0x330   :  { %v4924_v46 = vsel %vm6298_vm2, -inf, %v4691_v11  ;;  %vm6299_vm0 = vcmp.eq.s32.totalorder %v6123_v7, %v1644_v22  ;;  %vm6300_vm8 = vcmp.eq.s32.totalorder %v6125_v43, %v1644_v22  ;;  %vm6301_vm15 = vcmp.eq.s32.totalorder %v6127_v38, %v1644_v22 }
 0x331   :  { %v4929_v21 = vsel %vm6299_vm0, -inf, %v4696_v1  ;;  %v4934_v58 = vsel %vm6300_vm8, -inf, %v4701_v8  ;;  %v4939_v31 = vsel %vm6301_vm15, -inf, %v4706_v18  ;;  %v1678_v52 = vadd.f32 %v1677_v60, %v1663_v42 }
 0x332   :  { %v4944_v11 = vsel %vm1651_vm7, -inf, %v4711_v28  ;;  %v4949_v1 = vsel %vm1652_vm5, -inf, %v4716_v62  ;;  %v4954_v8 = vsel %vm1653_vm11, -inf, %v4721_v30  ;;  %v4959_v18 = vsel %vm1654_vm10, -inf, %v4726_v14  ;;  %vm6305_vm11 = vmmov %vm6297_vm4 }
 0x333   :  { %vm6302_vm3 = vcmp.eq.s32.totalorder %v6136_v45, %v1644_v22  ;;  %v4969_v62 = vsel %vm1656_vm14, -inf, %v4736_v49  ;;  %vm6303_vm7 = vcmp.eq.s32.totalorder %v6138_v26, %v1644_v22  ;;  %v1679_v3 = vadd.f32 %v1678_v52, %v1664_v54 }
 0x334   :  { %v4964_v28 = vsel %vm6302_vm3, -inf, %v4731_v53  ;;  %v4974_v30 = vsel %vm6303_vm7, -inf, %v4741_v50  ;;  %v4979_v14 = vsel %vm1658_vm1, -inf, %v4746_v56  ;;  %vm6304_vm5 = vcmp.eq.s32.totalorder %v6268_v48, %v1644_v22 }
 0x335   :  { %v4984_v53 = vsel %vm6304_vm5, -inf, %v4751_v27  ;;  %v4989_v49 = vsel %vm6305_vm11, -inf, %v4756_v39  ;;  %v1723_v50 = vmax.f32 %v4914_v0, %v4934_v58  ;;  %v1724_v42 = vmax.f32 %v4919_v10, %v4939_v31 }
 0x336   :  { %v1725_v56 = vmax.f32 %v4924_v46, %v4944_v11  ;;  %v1726_v54 = vmax.f32 %v4929_v21, %v4949_v1  ;;  %v1680_v60 = vadd.f32 %v1679_v3, %v1665_v44 }
 0x337   :  { %v1727_v27 = vmax.f32 %v1723_v50, %v4954_v8  ;;  %v1728_v52 = vmax.f32 %v1724_v42, %v4959_v18 }
 0x338   :  { %v1729_v39 = vmax.f32 %v1725_v56, %v4964_v28  ;;  %v1730_v22 = vmax.f32 %v1726_v54, %v4969_v62  ;;  %v1681_v17 = vadd.f32 %v1680_v60, %v1666_v40 }
 0x339   :  { %v1731_v55 = vmax.f32 %v1727_v27, %v4974_v30  ;;  %v1732_v16 = vmax.f32 %v1728_v52, %v4979_v14 }
 0x33a   :  { %v1733_v23 = vmax.f32 %v1729_v39, %v4984_v53  ;;  %v1734_v63 = vmax.f32 %v1730_v22, %v4989_v49  ;;  %v1682_v15 = vadd.f32 %v1681_v17, %v1667_v41  ;;  %v6313_v17 = vld [vmem:[#allocation67_spill] sm:$0xff] }
 0x33b   :  { %v1735_v35 = vmax.f32 %v1731_v55, %v1732_v16 }
 0x33c   :  { %v1736_v44 = vmax.f32 %v1733_v23, %v1734_v63  ;;  %v1683_v3 = vadd.f32 %v1682_v15, %v1668_v19 }
 0x33e   :  { %v1737_v50 = vmax.f32 %v1735_v35, %v1736_v44  ;;  %v1684_v37 = vadd.f32 %v1683_v3, %v1669_v24 }
 0x340   :  { %v1738_v42 = vrot.slane %v1737_v50, 4  ;;  %v1685_v6 = vadd.f32 %v1684_v37, %v1670_v51 }
 0x342   :  { %v1739_v56 = vmax.f32 %v1737_v50, %v1738_v42  ;;  %v1686_v61 = vadd.f32 %v1685_v6, %v1671_v25 }
 0x344   :  { %v1740_v54 = vrot.slane %v1739_v56, 2  ;;  %v1687_v40 = vadd.f32 %v1686_v61, %v1672_v36 }
 0x346   :  { %v1741_v60 = vmax.f32 %v1739_v56, %v1740_v54  ;;  %v1688_v27 = vadd.f32 %v1687_v40, %v1673_v57  ;;  %v6312_v57 = vld [vmem:[#allocation66_spill] sm:$0xff] }
 0x348   :  { %v1742_v47 = vrot.slane %v1741_v60, 1  ;;  %v1689_v52 = vadd.f32 %v1688_v27, %v1674_v9 }
 0x34a   :  { %v1743_v48 = vmax.f32 %v1741_v60, %v1742_v47  ;;  %v1690_v39 = vadd.f32 %v1689_v52, %v1675_v59 }
 0x34c   :  { %vm1744_vm1 = vcmp.eq.f32.partialorder %v4914_v0, %v1743_v48  ;;  %vm1745_vm10 = vcmp.eq.f32.partialorder %v4919_v10, %v1743_v48  ;;  %v1691_v35 = vadd.f32 %v1690_v39, %v1676_v13  ;;  %vm1750_vm8 = vcmp.eq.f32.partialorder %v4944_v11, %v1743_v48 }
 0x34d   :  { %vm1751_vm15 = vcmp.eq.f32.partialorder %v4949_v1, %v1743_v48  ;;  %vm1752_vm3 = vcmp.eq.f32.partialorder %v4954_v8, %v1743_v48  ;;  %vm1753_vm7 = vcmp.eq.f32.partialorder %v4959_v18, %v1743_v48  ;;  %vm1754_vm5 = vcmp.eq.f32.partialorder %v4964_v28, %v1743_v48 }
 0x34e   :  { %v1692_v47 = vrot.slane %v1691_v35, 4  ;;  %vm1756_vm4 = vcmp.eq.f32.partialorder %v4974_v30, %v1743_v48  ;;  %vm1758_vm2 = vcmp.eq.f32.partialorder %v4984_v53, %v1743_v48  ;;  %v1760_v61 = vsel %vm1744_vm1, %v6118_v5, 128 }
 0x34f   :  { %v1761_v6 = vsel %vm1745_vm10, %v6120_v34, 128  ;;  %vm6306_vm11 = vcmp.eq.f32.partialorder %v4924_v46, %v1743_v48  ;;  %vm6307_vm14 = vcmp.eq.f32.partialorder %v4929_v21, %v1743_v48  ;;  %vm6308_vm0 = vcmp.eq.f32.partialorder %v4934_v58, %v1743_v48 }
 0x350   :  { %v1693_v37 = vadd.f32 %v1692_v47, %v1691_v35  ;;  %v1762_v15 = vsel %vm6306_vm11, %v6122_v4, 128  ;;  %v1763_v63 = vsel %vm6307_vm14, %v6123_v7, 128  ;;  %v1764_v23 = vsel %vm6308_vm0, %v6125_v43, 128  ;;  %v6315_v35 = vld [vmem:[#allocation56_spill] sm:$0xff] }
 0x351   :  { %vm6309_vm1 = vcmp.eq.f32.partialorder %v4939_v31, %v1743_v48  ;;  %v1766_v55 = vsel %vm1750_vm8, %v6129_v2, 128  ;;  %v1767_v41 = vsel %vm1751_vm15, %v6131_v20, 128  ;;  %v1768_v19 = vsel %vm1752_vm3, %v6133_v32, 128 }
 0x352   :  { %v1765_v16 = vsel %vm6309_vm1, %v6127_v38, 128  ;;  %v1694_v24 = vrot.slane %v1693_v37, 2  ;;  %v1769_v59 = vsel %vm1753_vm7, %v6134_v33, 128  ;;  %v1770_v51 = vsel %vm1754_vm5, %v6136_v45, 128 }
 0x353   :  { %vm6310_vm10 = vcmp.eq.f32.partialorder %v4969_v62, %v1743_v48  ;;  %v1772_v25 = vsel %vm1756_vm4, %v6138_v26, 128  ;;  %vm6311_vm14 = vcmp.eq.f32.partialorder %v4979_v14, %v1743_v48  ;;  %v1774_v9 = vsel %vm1758_vm2, %v6312_v57, 128 }
 0x354   :  { %v1771_v13 = vsel %vm6310_vm10, %v6137_v12, 128  ;;  %v1773_v36 = vsel %vm6311_vm14, %v6140_v29, 128  ;;  %vm6314_vm0 = vcmp.eq.f32.partialorder %v4989_v49, %v1743_v48  ;;  %v1695_v44 = vadd.f32 %v1694_v24, %v1693_v37 }
 0x355   :  { %v1775_v22 = vsel %vm6314_vm0, %v6313_v17, 128  ;;  %vm1776_vm8 = vcmp.lt.s32.totalorder %v1760_v61, %v1764_v23  ;;  %vm1778_vm15 = vcmp.lt.s32.totalorder %v1761_v6, %v1765_v16  ;;  %vm1780_vm3 = vcmp.lt.s32.totalorder %v1762_v15, %v1766_v55 }
 0x356   :  { %v1777_v3 = vsel %vm1776_vm8, %v1760_v61, %v1764_v23  ;;  %v1779_v50 = vsel %vm1778_vm15, %v1761_v6, %v1765_v16  ;;  %v1781_v42 = vsel %vm1780_vm3, %v1762_v15, %v1766_v55  ;;  %vm1782_vm4 = vcmp.lt.s32.totalorder %v1763_v63, %v1767_v41 }
 0x357   :  { %v1696_v56 = vrot.slane %v1695_v44, 1  ;;  %v1783_v54 = vsel %vm1782_vm4, %v1763_v63, %v1767_v41  ;;  %vm1784_vm7 = vcmp.lt.s32.totalorder %v1777_v3, %v1768_v19  ;;  %vm1786_vm5 = vcmp.lt.s32.totalorder %v1779_v50, %v1769_v59 }
 0x358   :  { %v1785_v40 = vsel %vm1784_vm7, %v1777_v3, %v1768_v19  ;;  %v1787_v60 = vsel %vm1786_vm5, %v1779_v50, %v1769_v59  ;;  %vm1788_vm11 = vcmp.lt.s32.totalorder %v1781_v42, %v1770_v51  ;;  %vm1790_vm2 = vcmp.lt.s32.totalorder %v1783_v54, %v1771_v13 }
 0x359   :  { %v1697_v27 = vadd.f32 %v1696_v56, %v1695_v44  ;;  %v1789_v52 = vsel %vm1788_vm11, %v1781_v42, %v1770_v51  ;;  %v1791_v48 = vsel %vm1790_vm2, %v1783_v54, %v1771_v13  ;;  %vm1792_vm1 = vcmp.lt.s32.totalorder %v1785_v40, %v1772_v25  ;;  %v6319_v42 = vld [vmem:[#allocation10_spill] sm:$0xff] }
 0x35a   :  { %v1793_v39 = vsel %vm1792_vm1, %v1785_v40, %v1772_v25  ;;  %vm1794_vm10 = vcmp.lt.s32.totalorder %v1787_v60, %v1773_v36  ;;  %vm1796_vm14 = vcmp.lt.s32.totalorder %v1789_v52, %v1774_v9  ;;  %vm1798_vm0 = vcmp.lt.s32.totalorder %v1791_v48, %v1775_v22  ;;  %v6320_v54 = vld [vmem:[#allocation6_spill] sm:$0xff] }
 0x35b   :  { %v5072_v47 = vmax.f32 %v6315_v35, %v1697_v27  ;;  %v1795_v61 = vsel %vm1794_vm10, %v1787_v60, %v1773_v36  ;;  %v1797_v6 = vsel %vm1796_vm14, %v1789_v52, %v1774_v9  ;;  %v1799_v37 = vsel %vm1798_vm0, %v1791_v48, %v1775_v22  ;;  %v6317_v22 = vld [vmem:[#allocation57_spill] sm:$0xff]  ;;  %v6322_v52 = vld [vmem:[#allocation14_spill] sm:$0xff] }
 0x35c   :  { %vm1800_vm8 = vcmp.lt.s32.totalorder %v1793_v39, %v1795_v61  ;;  %vm1802_vm15 = vcmp.lt.s32.totalorder %v1797_v6, %v1799_v37  ;;  %v6321_v60 = vld [vmem:[#allocation17_spill] sm:$0xff] }
 0x35d   :  { %6316 = vst [vmem:[#allocation58_spill] sm:$0xff] %v5072_v47  ;;  %v1699_v15 = vsub.f32 %v6315_v35, %v5072_v47  ;;  %v1703_v63 = vsub.f32 %v1697_v27, %v5072_v47  ;;  %v1801_v23 = vsel %vm1800_vm8, %v1793_v39, %v1795_v61  ;;  %v1803_v16 = vsel %vm1802_vm15, %v1797_v6, %v1799_v37  ;;  %v6324_v39 = vld [vmem:[#allocation32_spill] sm:$0xff]  ;;  %v6326_v61 = vld [vmem:[#allocation27_spill] sm:$0xff]  ;;  %v6328_v37 = vld [vmem:[#allocation41_spill] sm:$0xff] }
 0x35e   :  { %vm1804_vm3 = vcmp.lt.s32.totalorder %v1801_v23, %v1803_v16 }
 0x35f   :  { %v1700_v55 = vmul.f32 1.442695, %v1699_v15  ;;  %v1704_v41 = vmul.f32 1.442695, %v1703_v63  ;;  %v1805_v19 = vsel %vm1804_vm3, %v1801_v23, %v1803_v16  ;;  %v6330_v63 = vld [vmem:[#allocation38_spill] sm:$0xff]  ;;  %v6331_v16 = vld [vmem:[#allocation11_spill] sm:$0xff] }
 0x360   :  { %v1806_v24 = vrot.slane %v1805_v19, 4 }
 0x361   :  { %2528 = vpow2.f32 %v1700_v55 }
 0x362   :  { %vm1807_vm4 = vcmp.lt.s32.totalorder %v1805_v19, %v1806_v24  ;;  %2530 = vpow2.f32 %v1704_v41  ;;  %v6332_v41 = vld [vmem:[#allocation7_spill] sm:$0xff] }
 0x363   :  { %v1808_v59 = vsel %vm1807_vm4, %v1805_v19, %v1806_v24  ;;  %v6333_v24 = vld [vmem:[#allocation18_spill] sm:$0xff] }
 0x364   :  { %v1809_v51 = vrot.slane %v1808_v59, 2 }
 0x366   :  { %vm1810_vm7 = vcmp.lt.s32.totalorder %v1808_v59, %v1809_v51 }
 0x367   :  { %v1811_v13 = vsel %vm1810_vm7, %v1808_v59, %v1809_v51  ;;  %v6334_v51 = vld [vmem:[#allocation15_spill] sm:$0xff] }
 0x368   :  { %v1812_v25 = vrot.slane %v1811_v13, 1 }
 0x36a   :  { %vm1813_vm5 = vcmp.lt.s32.totalorder %v1811_v13, %v1812_v25 }
 0x36b   :  { %v2529_v36 = vpop.eup %2528  ;;  %v1814_v9 = vsel %vm1813_vm5, %v1811_v13, %v1812_v25  ;;  %v6335_v25 = vld [vmem:[#allocation33_spill] sm:$0xff] }
 0x36c   :  { %v1702_v44 = vmul.f32 %v2529_v36, %v6317_v22  ;;  %vm5861_vm11 = vcmp.eq.s32.totalorder %v6118_v5, %v1814_v9  ;;  %vm1816_vm2 = vcmp.eq.s32.totalorder %v6120_v34, %v1814_v9  ;;  %vm1817_vm1 = vcmp.eq.s32.totalorder %v6122_v4, %v1814_v9  ;;  %v2531_v3 = vpop.eup %2530  ;;  %v6337_v22 = vld [vmem:[#allocation28_spill] sm:$0xff] }
 0x36d   :  { %vm1822_vm15 = vcmp.eq.s32.totalorder %v6131_v20, %v1814_v9  ;;  %vm1823_vm3 = vcmp.eq.s32.totalorder %v6133_v32, %v1814_v9  ;;  %vm1824_vm4 = vcmp.eq.s32.totalorder %v6134_v33, %v1814_v9  ;;  %vm1825_vm7 = vcmp.eq.s32.totalorder %v6136_v45, %v1814_v9 }
 0x36e   :  { %v5085_v50 = vadd.f32 %v2531_v3, %v1702_v44  ;;  %vm1826_vm5 = vcmp.eq.s32.totalorder %v6137_v12, %v1814_v9  ;;  %vm1828_vm14 = vcmp.eq.s32.totalorder %v6140_v29, %v1814_v9  ;;  %v1831_v56 = vsel %vm5861_vm11, %v6319_v42, 0.0  ;;  %v6338_v3 = vld [vmem:[#allocation43_spill] sm:$0xff] }
 0x36f   :  { %v1832_v40 = vsel %vm1816_vm2, %v6320_v54, 0.0  ;;  %v1833_v27 = vsel %vm1817_vm1, %v6321_v60, 0.0  ;;  %vm6323_vm10 = vcmp.eq.s32.totalorder %v6123_v7, %v1814_v9  ;;  %vm6325_vm0 = vcmp.eq.s32.totalorder %v6125_v43, %v1814_v9 }
 0x370   :  { %6318 = vst [vmem:[#allocation59_spill] sm:$0xff] %v5085_v50  ;;  %v1834_v48 = vsel %vm6323_vm10, %v6322_v52, 0.0  ;;  %v1835_v35 = vsel %vm6325_vm0, %v6324_v39, 0.0  ;;  %vm6327_vm8 = vcmp.eq.s32.totalorder %v6127_v38, %v1814_v9  ;;  %vm6329_vm11 = vcmp.eq.s32.totalorder %v6129_v2, %v1814_v9 }
 0x371   :  { %v1836_v6 = vsel %vm6327_vm8, %v6326_v61, 0.0  ;;  %v1837_v15 = vsel %vm6329_vm11, %v6328_v37, 0.0  ;;  %v1838_v23 = vsel %vm1822_vm15, %v6330_v63, 0.0  ;;  %v1839_v55 = vsel %vm1823_vm3, %v6331_v16, 0.0  ;;  %v6340_v16 = vld [vmem:[#allocation39_spill] sm:$0xff] }
 0x372   :  { %v1840_v19 = vsel %vm1824_vm4, %v6332_v41, 0.0  ;;  %v1841_v59 = vsel %vm1825_vm7, %v6333_v24, 0.0  ;;  %v1842_v13 = vsel %vm1826_vm5, %v6334_v51, 0.0  ;;  %vm6336_vm11 = vcmp.eq.s32.totalorder %v6138_v26, %v1814_v9 }
 0x373   :  { %v1843_v36 = vsel %vm6336_vm11, %v6335_v25, 0.0  ;;  %v1844_v44 = vsel %vm1828_vm14, %v6337_v22, 0.0  ;;  %vm6339_vm10 = vcmp.eq.s32.totalorder %v6312_v57, %v1814_v9  ;;  %vm6341_vm0 = vcmp.eq.s32.totalorder %v6313_v17, %v1814_v9 }
 0x374   :  { %v1845_v41 = vsel %vm6339_vm10, %v6338_v3, 0.0  ;;  %v1846_v24 = vsel %vm6341_vm0, %v6340_v16, 0.0  ;;  %v1847_v63 = vadd.f32 %v1832_v40, %v1831_v56  ;;  %vm6342_vm8 = vcmp.eq.s32.totalorder %v6118_v5, %v1814_v9 }
 0x375   :  { %v5147_v51 = vsel %vm6342_vm8, -inf, %v4914_v0  ;;  %v5152_v25 = vsel %vm1816_vm2, -inf, %v4919_v10  ;;  %v5157_v22 = vsel %vm1817_vm1, -inf, %v4924_v46  ;;  %vm6343_vm11 = vcmp.eq.s32.totalorder %v6123_v7, %v1814_v9 }
 0x376   :  { %v5162_v16 = vsel %vm6343_vm11, -inf, %v4929_v21  ;;  %vm6344_vm10 = vcmp.eq.s32.totalorder %v6125_v43, %v1814_v9  ;;  %v1848_v56 = vadd.f32 %v1847_v63, %v1833_v27  ;;  %vm6345_vm2 = vcmp.eq.s32.totalorder %v6127_v38, %v1814_v9 }
 0x377   :  { %v5167_v0 = vsel %vm6344_vm10, -inf, %v4934_v58  ;;  %v5172_v10 = vsel %vm6345_vm2, -inf, %v4939_v31  ;;  %vm6346_vm1 = vcmp.eq.s32.totalorder %v6129_v2, %v1814_v9  ;;  %v5182_v21 = vsel %vm1822_vm15, -inf, %v4949_v1 }
 0x378   :  { %v5177_v46 = vsel %vm6346_vm1, -inf, %v4944_v11  ;;  %v5187_v58 = vsel %vm1823_vm3, -inf, %v4954_v8  ;;  %v5192_v31 = vsel %vm1824_vm4, -inf, %v4959_v18  ;;  %v5197_v11 = vsel %vm1825_vm7, -inf, %v4964_v28  ;;  %vm6349_vm4 = vmmov %vm6341_vm0 }
 0x379   :  { %v5202_v1 = vsel %vm1826_vm5, -inf, %v4969_v62  ;;  %v1849_v40 = vadd.f32 %v1848_v56, %v1834_v48  ;;  %vm6347_vm15 = vcmp.eq.s32.totalorder %v6138_v26, %v1814_v9  ;;  %v5212_v18 = vsel %vm1828_vm14, -inf, %v4979_v14 }
 0x37a   :  { %v5207_v8 = vsel %vm6347_vm15, -inf, %v4974_v30  ;;  %vm6348_vm3 = vcmp.eq.s32.totalorder %v6312_v57, %v1814_v9  ;;  %v5222_v62 = vsel %vm6349_vm4, -inf, %v4989_v49  ;;  %v1893_v27 = vmax.f32 %v5147_v51, %v5167_v0 }
 0x37b   :  { %v5217_v28 = vsel %vm6348_vm3, -inf, %v4984_v53  ;;  %v1894_v30 = vmax.f32 %v5152_v25, %v5172_v10  ;;  %v1895_v14 = vmax.f32 %v5157_v22, %v5177_v46  ;;  %v1850_v48 = vadd.f32 %v1849_v40, %v1835_v35 }
 0x37c   :  { %v1896_v63 = vmax.f32 %v5162_v16, %v5182_v21  ;;  %v1897_v53 = vmax.f32 %v1893_v27, %v5187_v58 }
 0x37d   :  { %v1898_v56 = vmax.f32 %v1894_v30, %v5192_v31  ;;  %v1899_v49 = vmax.f32 %v1895_v14, %v5197_v11  ;;  %v1851_v9 = vadd.f32 %v1850_v48, %v1836_v6 }
 0x37e   :  { %v1900_v3 = vmax.f32 %v1896_v63, %v5202_v1  ;;  %v1901_v37 = vmax.f32 %v1897_v53, %v5207_v8 }
 0x37f   :  { %v1902_v61 = vmax.f32 %v1898_v56, %v5212_v18  ;;  %v1903_v39 = vmax.f32 %v1899_v49, %v5217_v28  ;;  %v1852_v52 = vadd.f32 %v1851_v9, %v1837_v15 }
 0x380   :  { %v1904_v35 = vmax.f32 %v1900_v3, %v5222_v62  ;;  %v6357_v3 = vld [vmem:[#allocation67_spill] sm:$0xff] }
 0x381   :  { %v1905_v40 = vmax.f32 %v1901_v37, %v1902_v61  ;;  %v1853_v60 = vadd.f32 %v1852_v52, %v1838_v23 }
 0x382   :  { %v1906_v54 = vmax.f32 %v1903_v39, %v1904_v35 }
 0x383   :  { %v1854_v27 = vadd.f32 %v1853_v60, %v1839_v55 }
 0x384   :  { %v1907_v42 = vmax.f32 %v1905_v40, %v1906_v54 }
 0x385   :  { %v1855_v30 = vadd.f32 %v1854_v27, %v1840_v19 }
 0x386   :  { %v1908_v50 = vrot.slane %v1907_v42, 4 }
 0x387   :  { %v1856_v14 = vadd.f32 %v1855_v30, %v1841_v59 }
 0x388   :  { %v1909_v6 = vmax.f32 %v1907_v42, %v1908_v50 }
 0x389   :  { %v1857_v48 = vadd.f32 %v1856_v14, %v1842_v13 }
 0x38a   :  { %v1910_v63 = vrot.slane %v1909_v6, 2 }
 0x38b   :  { %v1858_v47 = vadd.f32 %v1857_v48, %v1843_v36  ;;  %v6356_v36 = vld [vmem:[#allocation66_spill] sm:$0xff] }
 0x38c   :  { %v1911_v53 = vmax.f32 %v1909_v6, %v1910_v63 }
 0x38d   :  { %v1859_v17 = vadd.f32 %v1858_v47, %v1844_v44 }
 0x38e   :  { %v1912_v56 = vrot.slane %v1911_v53, 1 }
 0x38f   :  { %v1860_v57 = vadd.f32 %v1859_v17, %v1845_v41 }
 0x390   :  { %v1913_v49 = vmax.f32 %v1911_v53, %v1912_v56  ;;  %v6358_v56 = vld [vmem:[#allocation58_spill] sm:$0xff] }
 0x391   :  { %v1861_v15 = vadd.f32 %v1860_v57, %v1846_v24 }
 0x392   :  { %vm1914_vm14 = vcmp.eq.f32.partialorder %v5147_v51, %v1913_v49  ;;  %vm1915_vm7 = vcmp.eq.f32.partialorder %v5152_v25, %v1913_v49  ;;  %vm1918_vm8 = vcmp.eq.f32.partialorder %v5167_v0, %v1913_v49  ;;  %vm1921_vm2 = vcmp.eq.f32.partialorder %v5182_v21, %v1913_v49 }
 0x393   :  { %v1862_v50 = vrot.slane %v1861_v15, 4  ;;  %vm1922_vm1 = vcmp.eq.f32.partialorder %v5187_v58, %v1913_v49  ;;  %vm1923_vm15 = vcmp.eq.f32.partialorder %v5192_v31, %v1913_v49  ;;  %vm1924_vm3 = vcmp.eq.f32.partialorder %v5197_v11, %v1913_v49 }
 0x394   :  { %vm1926_vm5 = vcmp.eq.f32.partialorder %v5207_v8, %v1913_v49  ;;  %vm1928_vm11 = vcmp.eq.f32.partialorder %v5217_v28, %v1913_v49  ;;  %vm1929_vm10 = vcmp.eq.f32.partialorder %v5222_v62, %v1913_v49  ;;  %v1930_v17 = vsel %vm1914_vm14, %v6118_v5, 128 }
 0x395   :  { %v1863_v57 = vadd.f32 %v1862_v50, %v1861_v15  ;;  %v1931_v47 = vsel %vm1915_vm7, %v6120_v34, 128  ;;  %vm6350_vm4 = vcmp.eq.f32.partialorder %v5157_v22, %v1913_v49  ;;  %vm6351_vm0 = vcmp.eq.f32.partialorder %v5162_v16, %v1913_v49 }
 0x396   :  { %v1932_v42 = vsel %vm6350_vm4, %v6122_v4, 128  ;;  %v1933_v54 = vsel %vm6351_vm0, %v6123_v7, 128  ;;  %v1934_v60 = vsel %vm1918_vm8, %v6125_v43, 128  ;;  %vm6352_vm14 = vcmp.eq.f32.partialorder %v5172_v10, %v1913_v49 }
 0x397   :  { %v1864_v52 = vrot.slane %v1863_v57, 2  ;;  %v1935_v39 = vsel %vm6352_vm14, %v6127_v38, 128  ;;  %vm6353_vm7 = vcmp.eq.f32.partialorder %v5177_v46, %v1913_v49  ;;  %v1937_v37 = vsel %vm1921_vm2, %v6131_v20, 128 }
 0x398   :  { %v1936_v61 = vsel %vm6353_vm7, %v6129_v2, 128  ;;  %v1938_v23 = vsel %vm1922_vm1, %v6133_v32, 128  ;;  %v1939_v55 = vsel %vm1923_vm15, %v6134_v33, 128  ;;  %v1940_v41 = vsel %vm1924_vm3, %v6136_v45, 128 }
 0x399   :  { %vm6354_vm0 = vcmp.eq.f32.partialorder %v5202_v1, %v1913_v49  ;;  %v1865_v24 = vadd.f32 %v1864_v52, %v1863_v57  ;;  %v1942_v59 = vsel %vm1926_vm5, %v6138_v26, 128  ;;  %vm6355_vm8 = vcmp.eq.f32.partialorder %v5212_v18, %v1913_v49 }
 0x39a   :  { %v1941_v19 = vsel %vm6354_vm0, %v6137_v12, 128  ;;  %v1943_v13 = vsel %vm6355_vm8, %v6140_v29, 128  ;;  %v1944_v44 = vsel %vm1928_vm11, %v6356_v36, 128  ;;  %v1945_v9 = vsel %vm1929_vm10, %v6357_v3, 128 }
 0x39b   :  { %vm1946_vm2 = vcmp.lt.s32.totalorder %v1930_v17, %v1934_v60  ;;  %vm1948_vm1 = vcmp.lt.s32.totalorder %v1931_v47, %v1935_v39  ;;  %vm1950_vm15 = vcmp.lt.s32.totalorder %v1932_v42, %v1936_v61  ;;  %v1866_v35 = vrot.slane %v1865_v24, 1 }
 0x39c   :  { %v1947_v40 = vsel %vm1946_vm2, %v1930_v17, %v1934_v60  ;;  %v1949_v27 = vsel %vm1948_vm1, %v1931_v47, %v1935_v39  ;;  %v1951_v30 = vsel %vm1950_vm15, %v1932_v42, %v1936_v61  ;;  %vm1952_vm5 = vcmp.lt.s32.totalorder %v1933_v54, %v1937_v37 }
 0x39d   :  { %vm1954_vm3 = vcmp.lt.s32.totalorder %v1947_v40, %v1938_v23  ;;  %vm1956_vm4 = vcmp.lt.s32.totalorder %v1949_v27, %v1939_v55  ;;  %vm1958_vm14 = vcmp.lt.s32.totalorder %v1951_v30, %v1940_v41  ;;  %v1867_v14 = vadd.f32 %v1866_v35, %v1865_v24 }
 0x39e   :  { %v1953_v6 = vsel %vm1952_vm5, %v1933_v54, %v1937_v37  ;;  %v1955_v48 = vsel %vm1954_vm3, %v1947_v40, %v1938_v23  ;;  %v1957_v63 = vsel %vm1956_vm4, %v1949_v27, %v1939_v55  ;;  %v1959_v53 = vsel %vm1958_vm14, %v1951_v30, %v1940_v41  ;;  %v6362_v27 = vld [vmem:[#allocation10_spill] sm:$0xff] }
 0x39f   :  { %vm1960_vm11 = vcmp.lt.s32.totalorder %v1953_v6, %v1941_v19  ;;  %vm1962_vm7 = vcmp.lt.s32.totalorder %v1955_v48, %v1942_v59  ;;  %vm1964_vm0 = vcmp.lt.s32.totalorder %v1957_v63, %v1943_v13  ;;  %v5305_v49 = vmax.f32 %v6358_v56, %v1867_v14 }
 0x3a0   :  { %v1961_v15 = vsel %vm1960_vm11, %v1953_v6, %v1941_v19  ;;  %v1963_v50 = vsel %vm1962_vm7, %v1955_v48, %v1942_v59  ;;  %v1965_v57 = vsel %vm1964_vm0, %v1957_v63, %v1943_v13  ;;  %vm1966_vm10 = vcmp.lt.s32.totalorder %v1959_v53, %v1944_v44  ;;  %v6360_v13 = vld [vmem:[#allocation59_spill] sm:$0xff]  ;;  %v6364_v48 = vld [vmem:[#allocation17_spill] sm:$0xff] }
 0x3a1   :  { %6359 = vst [vmem:[#allocation60_spill] sm:$0xff] %v5305_v49  ;;  %vm1968_vm8 = vcmp.lt.s32.totalorder %v1961_v15, %v1945_v9  ;;  %vm1970_vm2 = vcmp.lt.s32.totalorder %v1963_v50, %v1965_v57  ;;  %v1869_v17 = vsub.f32 %v6358_v56, %v5305_v49  ;;  %v1873_v47 = vsub.f32 %v1867_v14, %v5305_v49  ;;  %v6363_v14 = vld [vmem:[#allocation6_spill] sm:$0xff] }
 0x3a2   :  { %v1967_v42 = vsel %vm1966_vm10, %v1959_v53, %v1944_v44  ;;  %v1969_v54 = vsel %vm1968_vm8, %v1961_v15, %v1945_v9  ;;  %v1971_v60 = vsel %vm1970_vm2, %v1963_v50, %v1965_v57  ;;  %v6366_v53 = vld [vmem:[#allocation14_spill] sm:$0xff]  ;;  %v6368_v15 = vld [vmem:[#allocation32_spill] sm:$0xff]  ;;  %v6370_v57 = vld [vmem:[#allocation27_spill] sm:$0xff] }
 0x3a3   :  { %vm1972_vm1 = vcmp.lt.s32.totalorder %v1967_v42, %v1969_v54  ;;  %v1870_v52 = vmul.f32 1.442695, %v1869_v17  ;;  %v1874_v39 = vmul.f32 1.442695, %v1873_v47  ;;  %v6372_v47 = vld [vmem:[#allocation41_spill] sm:$0xff] }
 0x3a4   :  { %v1973_v61 = vsel %vm1972_vm1, %v1967_v42, %v1969_v54  ;;  %v6373_v54 = vld [vmem:[#allocation38_spill] sm:$0xff] }
 0x3a5   :  { %vm1974_vm15 = vcmp.lt.s32.totalorder %v1971_v60, %v1973_v61  ;;  %2532 = vpow2.f32 %v1870_v52  ;;  %v6374_v52 = vld [vmem:[#allocation11_spill] sm:$0xff] }
 0x3a6   :  { %v1975_v37 = vsel %vm1974_vm15, %v1971_v60, %v1973_v61  ;;  %2534 = vpow2.f32 %v1874_v39  ;;  %v6375_v61 = vld [vmem:[#allocation7_spill] sm:$0xff] }
 0x3a7   :  { %v1976_v23 = vrot.slane %v1975_v37, 4 }
 0x3a9   :  { %vm1977_vm5 = vcmp.lt.s32.totalorder %v1975_v37, %v1976_v23 }
 0x3aa   :  { %v1978_v55 = vsel %vm1977_vm5, %v1975_v37, %v1976_v23  ;;  %v6376_v23 = vld [vmem:[#allocation18_spill] sm:$0xff] }
 0x3ab   :  { %v1979_v41 = vrot.slane %v1978_v55, 2 }
 0x3ad   :  { %vm1980_vm3 = vcmp.lt.s32.totalorder %v1978_v55, %v1979_v41 }
 0x3ae   :  { %v1981_v19 = vsel %vm1980_vm3, %v1978_v55, %v1979_v41  ;;  %v6378_v41 = vld [vmem:[#allocation15_spill] sm:$0xff] }
 0x3af   :  { %v1982_v24 = vrot.slane %v1981_v19, 1  ;;  %v2533_v59 = vpop.eup %2532 }
 0x3b0   :  { %v1872_v44 = vmul.f32 %v2533_v59, %v6360_v13  ;;  %v2535_v9 = vpop.eup %2534  ;;  %v6381_v13 = vld [vmem:[#allocation28_spill] sm:$0xff] }
 0x3b1   :  { %vm1983_vm4 = vcmp.lt.s32.totalorder %v1981_v19, %v1982_v24 }
 0x3b2   :  { %v1984_v35 = vsel %vm1983_vm4, %v1981_v19, %v1982_v24  ;;  %v5311_v40 = vadd.f32 %v2535_v9, %v1872_v44  ;;  %v6379_v24 = vld [vmem:[#allocation33_spill] sm:$0xff]  ;;  %v6382_v9 = vld [vmem:[#allocation43_spill] sm:$0xff] }
 0x3b3   :  { %vm1985_vm14 = vcmp.eq.s32.totalorder %v6118_v5, %v1984_v35  ;;  %vm1986_vm11 = vcmp.eq.s32.totalorder %v6120_v34, %v1984_v35  ;;  %vm1991_vm2 = vcmp.eq.s32.totalorder %v6129_v2, %v1984_v35  ;;  %vm1992_vm1 = vcmp.eq.s32.totalorder %v6131_v20, %v1984_v35 }
 0x3b4   :  { %6361 = vst [vmem:[#allocation61_spill] sm:$0xff] %v5311_v40  ;;  %vm1993_vm15 = vcmp.eq.s32.totalorder %v6133_v32, %v1984_v35  ;;  %vm1994_vm5 = vcmp.eq.s32.totalorder %v6134_v33, %v1984_v35  ;;  %vm1996_vm4 = vcmp.eq.s32.totalorder %v6137_v12, %v1984_v35  ;;  %vm1998_vm0 = vcmp.eq.s32.totalorder %v6140_v29, %v1984_v35 }
 0x3b5   :  { %v2001_v30 = vsel %vm1985_vm14, %v6362_v27, 0.0  ;;  %v2002_v6 = vsel %vm1986_vm11, %v6363_v14, 0.0  ;;  %vm6365_vm3 = vcmp.eq.s32.totalorder %v6122_v4, %v1984_v35  ;;  %vm6367_vm7 = vcmp.eq.s32.totalorder %v6123_v7, %v1984_v35 }
 0x3b6   :  { %v2003_v63 = vsel %vm6365_vm3, %v6364_v48, 0.0  ;;  %v2004_v56 = vsel %vm6367_vm7, %v6366_v53, 0.0  ;;  %vm6369_vm10 = vcmp.eq.s32.totalorder %v6125_v43, %v1984_v35  ;;  %vm6371_vm8 = vcmp.eq.s32.totalorder %v6127_v38, %v1984_v35 }
 0x3b7   :  { %v2005_v50 = vsel %vm6369_vm10, %v6368_v15, 0.0  ;;  %v2006_v17 = vsel %vm6371_vm8, %v6370_v57, 0.0  ;;  %v2007_v42 = vsel %vm1991_vm2, %v6372_v47, 0.0  ;;  %v2008_v60 = vsel %vm1992_vm1, %v6373_v54, 0.0 }
 0x3b8   :  { %v2009_v39 = vsel %vm1993_vm15, %v6374_v52, 0.0  ;;  %v2010_v37 = vsel %vm1994_vm5, %v6375_v61, 0.0  ;;  %vm6377_vm7 = vcmp.eq.s32.totalorder %v6136_v45, %v1984_v35  ;;  %v2012_v19 = vsel %vm1996_vm4, %v6378_v41, 0.0  ;;  %v6384_v52 = vld [vmem:[#allocation39_spill] sm:$0xff] }
 0x3b9   :  { %v2011_v55 = vsel %vm6377_vm7, %v6376_v23, 0.0  ;;  %vm6380_vm10 = vcmp.eq.s32.totalorder %v6138_v26, %v1984_v35  ;;  %v2014_v44 = vsel %vm1998_vm0, %v6381_v13, 0.0  ;;  %vm6383_vm8 = vcmp.eq.s32.totalorder %v6356_v36, %v1984_v35 }
 0x3ba   :  { %v2013_v59 = vsel %vm6380_vm10, %v6379_v24, 0.0  ;;  %v2015_v61 = vsel %vm6383_vm8, %v6382_v9, 0.0  ;;  %vm6385_vm3 = vcmp.eq.s32.totalorder %v6357_v3, %v1984_v35  ;;  %v2017_v54 = vadd.f32 %v2002_v6, %v2001_v30 }
 0x3bb   :  { %v2016_v23 = vsel %vm6385_vm3, %v6384_v52, 0.0  ;;  %v5380_v41 = vsel %vm1985_vm14, -inf, %v5147_v51  ;;  %v5385_v24 = vsel %vm1986_vm11, -inf, %v5152_v25  ;;  %vm6386_vm7 = vcmp.eq.s32.totalorder %v6122_v4, %v1984_v35 }
 0x3bc   :  { %v5390_v13 = vsel %vm6386_vm7, -inf, %v5157_v22  ;;  %vm6387_vm10 = vcmp.eq.s32.totalorder %v6123_v7, %v1984_v35  ;;  %vm6388_vm8 = vcmp.eq.s32.totalorder %v6125_v43, %v1984_v35  ;;  %vm6389_vm14 = vcmp.eq.s32.totalorder %v6127_v38, %v1984_v35 }
 0x3bd   :  { %v5395_v52 = vsel %vm6387_vm10, -inf, %v5162_v16  ;;  %v5400_v51 = vsel %vm6388_vm8, -inf, %v5167_v0  ;;  %v5405_v25 = vsel %vm6389_vm14, -inf, %v5172_v10  ;;  %v2018_v30 = vadd.f32 %v2017_v54, %v2003_v63 }
 0x3be   :  { %v5410_v22 = vsel %vm1991_vm2, -inf, %v5177_v46  ;;  %v5415_v16 = vsel %vm1992_vm1, -inf, %v5182_v21  ;;  %v5420_v0 = vsel %vm1993_vm15, -inf, %v5187_v58  ;;  %v5425_v10 = vsel %vm1994_vm5, -inf, %v5192_v31  ;;  %vm6393_vm15 = vmmov %vm6385_vm3 }
 0x3bf   :  { %vm6390_vm11 = vcmp.eq.s32.totalorder %v6136_v45, %v1984_v35  ;;  %v5435_v21 = vsel %vm1996_vm4, -inf, %v5202_v1  ;;  %vm6391_vm2 = vcmp.eq.s32.totalorder %v6138_v26, %v1984_v35  ;;  %v2019_v6 = vadd.f32 %v2018_v30, %v2004_v56 }
 0x3c0   :  { %v5430_v46 = vsel %vm6390_vm11, -inf, %v5197_v11  ;;  %v5440_v58 = vsel %vm6391_vm2, -inf, %v5207_v8  ;;  %v5445_v31 = vsel %vm1998_vm0, -inf, %v5212_v18  ;;  %vm6392_vm1 = vcmp.eq.s32.totalorder %v6356_v36, %v1984_v35 }
 0x3c1   :  { %v5450_v11 = vsel %vm6392_vm1, -inf, %v5217_v28  ;;  %v5455_v1 = vsel %vm6393_vm15, -inf, %v5222_v62  ;;  %v2063_v8 = vmax.f32 %v5380_v41, %v5400_v51  ;;  %v2064_v63 = vmax.f32 %v5385_v24, %v5405_v25 }
 0x3c2   :  { %v2065_v18 = vmax.f32 %v5390_v13, %v5410_v22  ;;  %v2066_v56 = vmax.f32 %v5395_v52, %v5415_v16  ;;  %v2020_v54 = vadd.f32 %v2019_v6, %v2005_v50 }
 0x3c3   :  { %v2067_v28 = vmax.f32 %v2063_v8, %v5420_v0  ;;  %v2068_v30 = vmax.f32 %v2064_v63, %v5425_v10 }
 0x3c4   :  { %v2069_v62 = vmax.f32 %v2065_v18, %v5430_v46  ;;  %v2070_v35 = vmax.f32 %v2066_v56, %v5435_v21  ;;  %v2021_v9 = vadd.f32 %v2020_v54, %v2006_v17  ;;  %v2573_v56 = vmov 0.0  }
 0x3c5   :  { %v2071_v47 = vmax.f32 %v2067_v28, %v5440_v58  ;;  %v2072_v57 = vmax.f32 %v2068_v30, %v5445_v31  ;;  %v628_v54 = vsel %vm3084_vm6, 1.0, %v2573_v56  ;;  %v629_v30 = vsel %vm3102_vm9, 1.0, %v2573_v56 }
 0x3c6   :  { %v2073_v15 = vmax.f32 %v2069_v62, %v5450_v11  ;;  %v2074_v53 = vmax.f32 %v2070_v35, %v5455_v1  ;;  %v2022_v48 = vadd.f32 %v2021_v9, %v2007_v42 }
 0x3c7   :  { %v2075_v14 = vmax.f32 %v2071_v47, %v2072_v57 }
 0x3c8   :  { %v2076_v50 = vmax.f32 %v2073_v15, %v2074_v53  ;;  %v2023_v6 = vadd.f32 %v2022_v48, %v2008_v60  ;;  %v644_v53 = vadd.f32 %v629_v30, %v628_v54  ;;  %v6398_v54 = vld [vmem:[#allocation60_spill] sm:$0xff] }
 0x3ca   :  { %v2077_v8 = vmax.f32 %v2075_v14, %v2076_v50  ;;  %v2024_v27 = vadd.f32 %v2023_v6, %v2009_v39 }
 0x3cc   :  { %v2078_v63 = vrot.slane %v2077_v8, 4  ;;  %v2025_v40 = vadd.f32 %v2024_v27, %v2010_v37  ;;  %v630_v27 = vsel %vm3117_vm12, 1.0, %v2573_v56 }
 0x3cd   :  { %v5482_v60 = vadd.f32 %v644_v53, %v630_v27  ;;  %v631_v53 = vsel %vm6027_vm13, 1.0, %v2573_v56 }
 0x3ce   :  { %v2079_v18 = vmax.f32 %v2077_v8, %v2078_v63  ;;  %v2026_v49 = vadd.f32 %v2025_v40, %v2011_v55 }
 0x3d0   :  { %v2080_v62 = vrot.slane %v2079_v18, 2  ;;  %v2027_v42 = vadd.f32 %v2026_v49, %v2012_v19 }
 0x3d2   :  { %v2081_v57 = vmax.f32 %v2079_v18, %v2080_v62  ;;  %v2028_v48 = vadd.f32 %v2027_v42, %v2013_v59 }
 0x3d4   :  { %v2082_v15 = vrot.slane %v2081_v57, 1  ;;  %v2029_v40 = vadd.f32 %v2028_v48, %v2014_v44 }
 0x3d6   :  { %v2083_v47 = vmax.f32 %v2081_v57, %v2082_v15  ;;  %v2030_v39 = vadd.f32 %v2029_v40, %v2015_v61  ;;  %v646_v40 = vadd.f32 %v5482_v60, %v631_v53  ;;  %v6418_v57 = vld [vmem:[#allocation7_spill] sm:$0xff]  ;;  %v6419_v53 = vld [vmem:[#allocation18_spill] sm:$0xff] }
 0x3d8   :  { %vm2084_vm6 = vcmp.eq.f32.partialorder %v5380_v41, %v2083_v47  ;;  %vm2085_vm0 = vcmp.eq.f32.partialorder %v5385_v24, %v2083_v47  ;;  %vm2086_vm9 = vcmp.eq.f32.partialorder %v5390_v13, %v2083_v47  ;;  %vm2087_vm5 = vcmp.eq.f32.partialorder %v5395_v52, %v2083_v47 }
 0x3d9   :  { %v2031_v49 = vadd.f32 %v2030_v39, %v2016_v23  ;;  %vm2088_vm4 = vcmp.eq.f32.partialorder %v5400_v51, %v2083_v47  ;;  %vm2090_vm12 = vcmp.eq.f32.partialorder %v5410_v22, %v2083_v47  ;;  %vm2091_vm7 = vcmp.eq.f32.partialorder %v5415_v16, %v2083_v47 }
 0x3da   :  { %vm2092_vm10 = vcmp.eq.f32.partialorder %v5420_v0, %v2083_v47  ;;  %vm2093_vm8 = vcmp.eq.f32.partialorder %v5425_v10, %v2083_v47  ;;  %vm2094_vm14 = vcmp.eq.f32.partialorder %v5430_v46, %v2083_v47  ;;  %vm2095_vm11 = vcmp.eq.f32.partialorder %v5435_v21, %v2083_v47 }
 0x3db   :  { %v2032_v61 = vrot.slane %v2031_v49, 4  ;;  %vm2096_vm2 = vcmp.eq.f32.partialorder %v5440_v58, %v2083_v47  ;;  %vm2097_vm1 = vcmp.eq.f32.partialorder %v5445_v31, %v2083_v47  ;;  %vm2098_vm15 = vcmp.eq.f32.partialorder %v5450_v11, %v2083_v47 }
 0x3dc   :  { %vm2099_vm3 = vcmp.eq.f32.partialorder %v5455_v1, %v2083_v47  ;;  %v2100_v37 = vsel %vm2084_vm6, %v6118_v5, 128  ;;  %v2101_v23 = vsel %vm2085_vm0, %v6120_v34, 128  ;;  %v2102_v19 = vsel %vm2086_vm9, %v6122_v4, 128 }
 0x3dd   :  { %v2033_v55 = vadd.f32 %v2032_v61, %v2031_v49  ;;  %v2103_v59 = vsel %vm2087_vm5, %v6123_v7, 128  ;;  %v2104_v44 = vsel %vm2088_vm4, %v6125_v43, 128  ;;  %vm6397_vm6 = vcmp.eq.f32.partialorder %v5405_v25, %v2083_v47  ;;  %v6400_v61 = vld [vmem:[#allocation16_spill] sm:$0xff] }
 0x3de   :  { %v2105_v41 = vsel %vm6397_vm6, %v6127_v38, 128  ;;  %v2106_v24 = vsel %vm2090_vm12, %v6129_v2, 128  ;;  %v2107_v13 = vsel %vm2091_vm7, %v6131_v20, 128  ;;  %v2108_v52 = vsel %vm2092_vm10, %v6133_v32, 128 }
 0x3df   :  { %v2034_v9 = vrot.slane %v2033_v55, 2  ;;  %v2109_v51 = vsel %vm2093_vm8, %v6134_v33, 128  ;;  %v2110_v25 = vsel %vm2094_vm14, %v6136_v45, 128  ;;  %v2111_v22 = vsel %vm2095_vm11, %v6137_v12, 128 }
 0x3e0   :  { %v2112_v16 = vsel %vm2096_vm2, %v6138_v26, 128  ;;  %v2113_v0 = vsel %vm2097_vm1, %v6140_v29, 128  ;;  %v2114_v10 = vsel %vm2098_vm15, %v6356_v36, 128  ;;  %v2115_v46 = vsel %vm2099_vm3, %v6357_v3, 128 }
 0x3e1   :  { %v2035_v35 = vadd.f32 %v2034_v9, %v2033_v55  ;;  %vm2116_vm0 = vcmp.lt.s32.totalorder %v2100_v37, %v2104_v44  ;;  %vm2118_vm9 = vcmp.lt.s32.totalorder %v2101_v23, %v2105_v41  ;;  %vm2120_vm5 = vcmp.lt.s32.totalorder %v2102_v19, %v2106_v24 }
 0x3e2   :  { %v2117_v21 = vsel %vm2116_vm0, %v2100_v37, %v2104_v44  ;;  %v2119_v50 = vsel %vm2118_vm9, %v2101_v23, %v2105_v41  ;;  %v2121_v58 = vsel %vm2120_vm5, %v2102_v19, %v2106_v24  ;;  %vm2122_vm4 = vcmp.lt.s32.totalorder %v2103_v59, %v2107_v13 }
 0x3e3   :  { %v2036_v6 = vrot.slane %v2035_v35, 1  ;;  %v2123_v8 = vsel %vm2122_vm4, %v2103_v59, %v2107_v13  ;;  %vm2124_vm12 = vcmp.lt.s32.totalorder %v2117_v21, %v2108_v52  ;;  %vm2126_vm7 = vcmp.lt.s32.totalorder %v2119_v50, %v2109_v51  ;;  %v6402_v59 = vld [vmem:[#allocation24_spill] sm:$0xff] }
 0x3e4   :  { %v2125_v31 = vsel %vm2124_vm12, %v2117_v21, %v2108_v52  ;;  %v2127_v63 = vsel %vm2126_vm7, %v2119_v50, %v2109_v51  ;;  %vm2128_vm10 = vcmp.lt.s32.totalorder %v2121_v58, %v2110_v25  ;;  %vm2130_vm8 = vcmp.lt.s32.totalorder %v2123_v8, %v2111_v22  ;;  %v6404_v13 = vld [vmem:[#allocation44_spill] sm:$0xff]  ;;  %v6409_v50 = vld [vmem:[#allocation10_spill] sm:$0xff] }
 0x3e5   :  { %v2037_v11 = vadd.f32 %v2036_v6, %v2035_v35  ;;  %v2129_v18 = vsel %vm2128_vm10, %v2121_v58, %v2110_v25  ;;  %v2131_v1 = vsel %vm2130_vm8, %v2123_v8, %v2111_v22  ;;  %vm2132_vm3 = vcmp.lt.s32.totalorder %v2125_v31, %v2112_v16  ;;  %v6406_v22 = vld [vmem:[#allocation36_spill] sm:$0xff]  ;;  %v6410_v6 = vld [vmem:[#allocation6_spill] sm:$0xff] }
 0x3e6   :  { %v2133_v17 = vsel %vm2132_vm3, %v2125_v31, %v2112_v16  ;;  %vm2134_vm14 = vcmp.lt.s32.totalorder %v2127_v63, %v2113_v0  ;;  %vm2136_vm11 = vcmp.lt.s32.totalorder %v2129_v18, %v2114_v10  ;;  %vm2138_vm2 = vcmp.lt.s32.totalorder %v2131_v1, %v2115_v46  ;;  %v6411_v31 = vld [vmem:[#allocation17_spill] sm:$0xff] }
 0x3e7   :  { %v5549_v28 = vmax.f32 %v6398_v54, %v2037_v11  ;;  %v2135_v30 = vsel %vm2134_vm14, %v2127_v63, %v2113_v0  ;;  %v2137_v62 = vsel %vm2136_vm11, %v2129_v18, %v2114_v10  ;;  %v2139_v42 = vsel %vm2138_vm2, %v2131_v1, %v2115_v46  ;;  %v6408_v10 = vld [vmem:[#allocation61_spill] sm:$0xff]  ;;  %v6413_v1 = vld [vmem:[#allocation32_spill] sm:$0xff] }
 0x3e8   :  { %vm2140_vm1 = vcmp.lt.s32.totalorder %v2133_v17, %v2135_v30  ;;  %vm2142_vm15 = vcmp.lt.s32.totalorder %v2137_v62, %v2139_v42  ;;  %vm6401_vm0 = vnez %v6400_v61  ;;  %vm6403_vm9 = vnez %v6402_v59  ;;  %v6429_v59 = vld [vmem:[#allocation29_spill] sm:$0xff] }
 0x3e9   :  { %v2039_v48 = vsub.f32 %v6398_v54, %v5549_v28  ;;  %v2043_v14 = vsub.f32 %v2037_v11, %v5549_v28  ;;  %v2141_v27 = vsel %vm2140_vm1, %v2133_v17, %v2135_v30  ;;  %v2143_v15 = vsel %vm2142_vm15, %v2137_v62, %v2139_v42  ;;  %v6412_v11 = vld [vmem:[#allocation14_spill] sm:$0xff]  ;;  %v6414_v54 = vld [vmem:[#allocation27_spill] sm:$0xff]  ;;  %v6415_v30 = vld [vmem:[#allocation41_spill] sm:$0xff] }
 0x3ea   :  { %vm2144_vm6 = vcmp.lt.s32.totalorder %v2141_v27, %v2143_v15  ;;  %v632_v37 = vsel %vm6401_vm0, 1.0, %v2573_v56  ;;  %v633_v44 = vsel %vm6403_vm9, 1.0, %v2573_v56  ;;  %vm6405_vm4 = vnez %v6404_v13  ;;  %v6416_v62 = vld [vmem:[#allocation38_spill] sm:$0xff]  ;;  %v6417_v42 = vld [vmem:[#allocation11_spill] sm:$0xff] }
 0x3eb   :  { %v2040_v47 = vmul.f32 1.442695, %v2039_v48  ;;  %v2044_v39 = vmul.f32 1.442695, %v2043_v14  ;;  %v2145_v49 = vsel %vm2144_vm6, %v2141_v27, %v2143_v15  ;;  %v647_v55 = vadd.f32 %v646_v40, %v632_v37  ;;  %v6420_v48 = vld [vmem:[#allocation15_spill] sm:$0xff]  ;;  %v6421_v14 = vld [vmem:[#allocation33_spill] sm:$0xff] }
 0x3ec   :  { %v2146_v23 = vrot.slane %v2145_v49, 4  ;;  %v634_v52 = vsel %vm6405_vm4, 1.0, %v2573_v56  ;;  %vm6407_vm7 = vnez %v6406_v22  ;;  %v6422_v27 = vld [vmem:[#allocation28_spill] sm:$0xff]  ;;  %v6423_v15 = vld [vmem:[#allocation43_spill] sm:$0xff] }
 0x3ed   :  { %2536 = vpow2.f32 %v2040_v47  ;;  %v648_v60 = vadd.f32 %v647_v55, %v633_v44  ;;  %v635_v16 = vsel %vm6407_vm7, 1.0, %v2573_v56  ;;  %v6424_v40 = vld [vmem:[#allocation39_spill] sm:$0xff] }
 0x3ee   :  { %vm2147_vm13 = vcmp.lt.s32.totalorder %v2145_v49, %v2146_v23  ;;  %2538 = vpow2.f32 %v2044_v39 }
 0x3ef   :  { %v2148_v19 = vsel %vm2147_vm13, %v2145_v49, %v2146_v23  ;;  %v649_v25 = vadd.f32 %v648_v60, %v634_v52 }
 0x3f0   :  { %v2149_v41 = vrot.slane %v2148_v19, 2 }
 0x3f1   :  { %v650_v39 = vadd.f32 %v649_v25, %v635_v16  ;;  %v6433_v25 = vld [vmem:[#allocation42_spill] sm:$0xff] }
 0x3f2   :  { %vm2150_vm5 = vcmp.lt.s32.totalorder %v2148_v19, %v2149_v41 }
 0x3f3   :  { %v2151_v24 = vsel %vm2150_vm5, %v2148_v19, %v2149_v41 }
 0x3f4   :  { %v2152_v9 = vrot.slane %v2151_v24, 1 }
 0x3f6   :  { %vm2153_vm12 = vcmp.lt.s32.totalorder %v2151_v24, %v2152_v9 }
 0x3f7   :  { %v2537_v51 = vpop.eup %2536  ;;  %v2154_v0 = vsel %vm2153_vm12, %v2151_v24, %v2152_v9  ;;  %v6431_v24 = vld [vmem:[#allocation22_spill] sm:$0xff] }
 0x3f8   :  { %v2042_v46 = vmul.f32 %v2537_v51, %v6408_v10  ;;  %vm2155_vm10 = vcmp.eq.s32.totalorder %v6118_v5, %v2154_v0  ;;  %vm2156_vm8 = vcmp.eq.s32.totalorder %v6120_v34, %v2154_v0  ;;  %vm2157_vm3 = vcmp.eq.s32.totalorder %v6122_v4, %v2154_v0  ;;  %v2539_v35 = vpop.eup %2538 }
 0x3f9   :  { %vm2158_vm14 = vcmp.eq.s32.totalorder %v6123_v7, %v2154_v0  ;;  %vm2159_vm11 = vcmp.eq.s32.totalorder %v6125_v43, %v2154_v0  ;;  %vm2160_vm2 = vcmp.eq.s32.totalorder %v6127_v38, %v2154_v0  ;;  %vm2161_vm1 = vcmp.eq.s32.totalorder %v6129_v2, %v2154_v0 }
 0x3fa   :  { %v5578_v21 = vadd.f32 %v2539_v35, %v2042_v46  ;;  %vm2162_vm15 = vcmp.eq.s32.totalorder %v6131_v20, %v2154_v0  ;;  %vm2163_vm6 = vcmp.eq.s32.totalorder %v6133_v32, %v2154_v0  ;;  %vm2164_vm0 = vcmp.eq.s32.totalorder %v6134_v33, %v2154_v0  ;;  %v6435_v46 = vld [vmem:[#allocation30_spill] sm:$0xff] }
 0x3fb   :  { %vm2165_vm13 = vcmp.eq.s32.totalorder %v6136_v45, %v2154_v0  ;;  %vm2166_vm9 = vcmp.eq.s32.totalorder %v6137_v12, %v2154_v0  ;;  %vm2167_vm5 = vcmp.eq.s32.totalorder %v6138_v26, %v2154_v0  ;;  %vm2168_vm4 = vcmp.eq.s32.totalorder %v6140_v29, %v2154_v0  ;;  %v6425_v12 = vld [vmem:[#allocation19_spill] sm:$0xff]  ;;  %v6427_v29 = vld [vmem:[#allocation13_spill] sm:$0xff] }
 0x3fc   :  { %vm2169_vm12 = vcmp.eq.s32.totalorder %v6356_v36, %v2154_v0  ;;  %vm2170_vm7 = vcmp.eq.s32.totalorder %v6357_v3, %v2154_v0  ;;  %v2171_v58 = vsel %vm2155_vm10, %v6409_v50, 0.0  ;;  %v2172_v8 = vsel %vm2156_vm8, %v6410_v6, 0.0 }
 0x3fd   :  { %v2173_v63 = vsel %vm2157_vm3, %v6411_v31, 0.0  ;;  %v2174_v18 = vsel %vm2158_vm14, %v6412_v11, 0.0  ;;  %v2175_v17 = vsel %vm2159_vm11, %v6413_v1, 0.0  ;;  %v2176_v5 = vsel %vm2160_vm2, %v6414_v54, 0.0  ;;  %v6439_v1 = vld [vmem:[#allocation46_spill] sm:$0xff] }
 0x3fe   :  { %v2177_v34 = vsel %vm2161_vm1, %v6415_v30, 0.0  ;;  %v2178_v4 = vsel %vm2162_vm15, %v6416_v62, 0.0  ;;  %v2179_v7 = vsel %vm2163_vm6, %v6417_v42, 0.0  ;;  %v2180_v43 = vsel %vm2164_vm0, %v6418_v57, 0.0 }
 0x3ff   :  { %v2181_v38 = vsel %vm2165_vm13, %v6419_v53, 0.0  ;;  %v2182_v2 = vsel %vm2166_vm9, %v6420_v48, 0.0  ;;  %v2183_v20 = vsel %vm2167_vm5, %v6421_v14, 0.0  ;;  %v2184_v32 = vsel %vm2168_vm4, %v6422_v27, 0.0 }
 0x400   :  { %v2185_v33 = vsel %vm2169_vm12, %v6423_v15, 0.0  ;;  %v2186_v45 = vsel %vm2170_vm7, %v6424_v40, 0.0  ;;  %v2187_v47 = vadd.f32 %v2172_v8, %v2171_v58  ;;  %vm6426_vm10 = vnez %v6425_v12  ;;  %v6437_v8 = vld [vmem:[#allocation49_spill] sm:$0xff] }
 0x401   :  { %v636_v49 = vsel %vm6426_vm10, 1.0, %v2573_v56  ;;  %vm6428_vm8 = vnez %v6427_v29  ;;  %vm6430_vm3 = vnez %v6429_v59  ;;  %vm6432_vm14 = vnez %v6431_v24 }
 0x402   :  { %v2188_v26 = vadd.f32 %v2187_v47, %v2173_v63  ;;  %v651_v37 = vadd.f32 %v650_v39, %v636_v49  ;;  %v637_v23 = vsel %vm6428_vm8, 1.0, %v2573_v56  ;;  %v638_v3 = vsel %vm6430_vm3, 1.0, %v2573_v56 }
 0x403   :  { %v639_v13 = vsel %vm6432_vm14, 1.0, %v2573_v56  ;;  %vm6434_vm11 = vnez %v6433_v25  ;;  %vm6436_vm2 = vnez %v6435_v46  ;;  %vm6438_vm1 = vnez %v6437_v8 }
 0x404   :  { %v2189_v61 = vadd.f32 %v2188_v26, %v2174_v18  ;;  %v652_v19 = vadd.f32 %v651_v37, %v637_v23  ;;  %v640_v22 = vsel %vm6434_vm11, 1.0, %v2573_v56  ;;  %v641_v35 = vsel %vm6436_vm2, 1.0, %v2573_v56 }
 0x405   :  { %v642_v31 = vsel %vm6438_vm1, 1.0, %v2573_v56  ;;  %vm6440_vm15 = vnez %v6439_v1 }
 0x406   :  { %v2190_v55 = vadd.f32 %v2189_v61, %v2175_v17  ;;  %v653_v60 = vadd.f32 %v652_v19, %v638_v3  ;;  %v643_v17 = vsel %vm6440_vm15, 1.0, %v2573_v56  ;;  %v6441_v56 = vld [vmem:[#allocation68_spill] sm:$0xff] }
 0x407   :  { %v696_v27 = vrot.slane %v6441_v56, 4 }
 0x408   :  { %v2191_v36 = vadd.f32 %v2190_v55, %v2176_v5  ;;  %v654_v51 = vadd.f32 %v653_v60, %v639_v13 }
 0x409   :  { %v697_v15 = vadd.f32 %v696_v27, %v6441_v56 }
 0x40a   :  { %v2192_v44 = vadd.f32 %v2191_v36, %v2177_v34  ;;  %v655_v10 = vadd.f32 %v654_v51, %v640_v22 }
 0x40b   :  { %v698_v39 = vrot.slane %v697_v15, 2 }
 0x40c   :  { %v2193_v41 = vadd.f32 %v2192_v44, %v2178_v4  ;;  %v656_v6 = vadd.f32 %v655_v10, %v641_v35 }
 0x40d   :  { %v699_v49 = vadd.f32 %v698_v39, %v697_v15 }
 0x40e   :  { %v2194_v52 = vadd.f32 %v2193_v41, %v2179_v7  ;;  %v657_v18 = vadd.f32 %v656_v6, %v642_v31 }
 0x40f   :  { %v700_v26 = vrot.slane %v699_v49, 1 }
 0x410   :  { %v2195_v9 = vadd.f32 %v2194_v52, %v2180_v43  ;;  %v658_v30 = vadd.f32 %v657_v18, %v643_v17 }
 0x411   :  { %v701_v61 = vadd.f32 %v700_v26, %v699_v49 }
 0x412   :  { %v2196_v16 = vadd.f32 %v2195_v9, %v2181_v38  ;;  %v659_v4 = vrot.slane %v658_v30, 4 }
 0x414   :  { %v2197_v0 = vadd.f32 %v2196_v16, %v2182_v2  ;;  %v660_v57 = vadd.f32 %v659_v4, %v658_v30 }
 0x416   :  { %v2198_v50 = vadd.f32 %v2197_v0, %v2183_v20  ;;  %v661_v48 = vrot.slane %v660_v57, 2 }
 0x418   :  { %v2199_v58 = vadd.f32 %v2198_v50, %v2184_v32  ;;  %v662_v20 = vadd.f32 %v661_v48, %v660_v57 }
 0x41a   :  { %v2200_v63 = vadd.f32 %v2199_v58, %v2185_v33  ;;  %v663_v32 = vrot.slane %v662_v20, 1 }
 0x41c   :  { %v2201_v11 = vadd.f32 %v2200_v63, %v2186_v45  ;;  %v664_v33 = vadd.f32 %v663_v32, %v662_v20 }
 0x41e   :  { %v2202_v54 = vrot.slane %v2201_v11, 4  ;;  %vm2223_vm6 = vcmp.gt.f32.partialorder %v664_v33, 0.0 }
 0x420   :  { %v2203_v5 = vadd.f32 %v2202_v54, %v2201_v11 }
 0x422   :  { %v2204_v34 = vrot.slane %v2203_v5, 2 }
 0x424   :  { %v2205_v62 = vadd.f32 %v2204_v34, %v2203_v5 }
 0x426   :  { %v2206_v42 = vrot.slane %v2205_v62, 1 }
 0x428   :  { %v2207_v7 = vadd.f32 %v2206_v42, %v2205_v62 }
 0x42a   :  { %v2208_v43 = vmax.f32 %v5549_v28, %v2207_v7 }
 0x42c   :  { %v2209_v53 = vsub.f32 %v5549_v28, %v2208_v43  ;;  %v2213_v38 = vsub.f32 %v2207_v7, %v2208_v43  ;;  %v2220_v28 = vmax.f32 %v664_v33, 1.0 }
 0x42e   :  { %v2210_v2 = vmul.f32 1.442695, %v2209_v53  ;;  %v2214_v14 = vmul.f32 1.442695, %v2213_v38 }
 0x430   :  { %2540 = vpow2.f32 %v2210_v2 }
 0x431   :  { %2542 = vpow2.f32 %v2214_v14 }
 0x43a   :  { %v2541_v40 = vpop.eup %2540 }
 0x43b   :  { %v2212_v45 = vmul.f32 %v2541_v40, %v5578_v21  ;;  %v2543_v47 = vpop.eup %2542 }
 0x43d   :  { %v2216_v12 = vadd.f32 %v2543_v47, %v2212_v45 }
 0x43f   :  { %2544 = vlog2.f32 %v2216_v12 }
 0x440   :  { %2546 = vrcp.f32 %v2220_v28 }
 0x449   :  { %v2545_v37 = vpop.eup %2544 }
 0x44a   :  { %v2218_v29 = vmul.f32 0.6931472, %v2545_v37  ;;  %v2547_v23 = vpop.eup %2546 }
 0x44b   :  { %v2222_v36 = vmul.f32 %v2547_v23, %v701_v61 }
 0x44c   :  { %v2219_v55 = vadd.f32 %v2218_v29, %v2208_v43 }
 0x44e   :  { %v2224_v19 = vsub.f32 %v2219_v55, %v2222_v36 }
 0x450   :  { %v2225_v21 = vsel %vm2223_vm6, %v2224_v19, 0.0 }
 0x451   :  { %2226 = vst [vmem:[#allocation2] sm:$0x1] %v2225_v21 }
 0x452   :  { %2559 = shalt.err (!%p2556_p4)
}
 0x453   :  { %s2560_s26 = scalar_lea.hbm %s5684_s6, 16 }
 0x454   :  { %p2561_p5 = scmp.ne.s32.totalorder %s5684_s6, %s2560_s26  ;;  %p2564_p6 = scmp.lt.u32.totalorder %s2560_s26, %s5684_s6 }
 0x456   :  { %p2566_p7 = pnand %p2564_p6, %p2561_p5 }
 0x458   :  { %2569 = shalt.err (!%p2566_p7)
}
 0x459   :  { %2236 = dma.vmem_to_hbm [thread:$0]  %s2234_s22, 16, %s5684_s6, [#allocation3]  }
 0x45a   :  { %2570 = dma.done.wait [#allocation3], 16  }
 0x45b   :  { %2571 = vsyncadd [#allocation3], 4294967280 }
 0x45c   :  { %2240 = vsyncpa [#allocation3], 1 }

</bundles_post_ra>
